<compile_context>
chip_gen: v7x
topology: tpu7x:2x2x1
jax: 0.10.0
libtpu: 0.0.40
codegen_flags: <defaults>
</compile_context>

<pallas_src>
import functools

import jax
import jax.numpy as jnp
from jax import lax
from jax.experimental import pallas as pl
from jax.experimental.pallas import tpu as pltpu


def attention_kernel(x_q_ref, x_kv_ref, w_q_ref, w_kv_ref, o_ref,
                     q_scr, m_scr, l_scr, acc_scr,
                     *, heads, head_dim, scale, compute_dtype):
    """One grid step = (batch b, q tile qi, kv tile ki).

    x_q_ref : (1, tq, dim)  query rows of x for this q tile
    x_kv_ref: (1, tk, dim)  key/value rows of x for this kv tile
    w_q_ref : (dim, dim)    VMEM-resident Q projection weight
    w_kv_ref: (dim, 2*dim)  VMEM-resident K|V projection weight
    o_ref   : (1, tq, dim)  lane-dense output block (heads merged on last axis)
    scratch : q_scr (H,tq,d) compute_dtype; m/l (H,tq,1) f32; acc (H,tq,d) f32
    """
    ki = pl.program_id(2)
    dim = heads * head_dim

    @pl.when(ki == 0)
    def _init():
        # Lane-dense fused Q projection for this q tile: (tq, dim) @ (dim, dim).
        xq = x_q_ref[0].astype(compute_dtype)
        q = jnp.dot(xq, w_q_ref[...].astype(compute_dtype),
                    preferred_element_type=jnp.float32) * scale
        q = q.astype(compute_dtype)
        # Split per head ONCE per q tile (static lane slices), outside the kv loop.
        for h in range(heads):
            q_scr[h] = q[:, h * head_dim:(h + 1) * head_dim]
        m_scr[...] = jnp.full_like(m_scr, -jnp.inf)
        l_scr[...] = jnp.zeros_like(l_scr)
        acc_scr[...] = jnp.zeros_like(acc_scr)

    # Lane-dense fused K/V projection for this kv tile: (tk, dim) @ (dim, 2*dim).
    xkv = x_kv_ref[0].astype(compute_dtype)
    kv = jnp.dot(xkv, w_kv_ref[...].astype(compute_dtype),
                 preferred_element_type=jnp.float32).astype(compute_dtype)

    # Static Python loop over heads: all per-head state lives in VMEM scratch,
    # so vreg live ranges stay bounded.  (A fori_loop would force *dynamic*
    # lane slicing at h*head_dim, which is worse than static slices.)
    for h in range(heads):
        k_h = kv[:, h * head_dim:(h + 1) * head_dim]                  # (tk, d)
        v_h = kv[:, dim + h * head_dim: dim + (h + 1) * head_dim]     # (tk, d)
        q_h = q_scr[h]                                                # (tq, d)

        # Contract last dims directly (no explicit k.T / XLU transpose).
        s = lax.dot_general(q_h, k_h, (((1,), (1,)), ((), ())),
                            preferred_element_type=jnp.float32)       # (tq, tk)

        m_prev = m_scr[h]                                             # (tq, 1)
        m_new = jnp.maximum(m_prev, jnp.max(s, axis=-1, keepdims=True))
        alpha = jnp.exp(m_prev - m_new)                               # EUP
        p = jnp.exp(s - m_new)                                        # f32
        l_scr[h] = alpha * l_scr[h] + jnp.sum(p, axis=-1, keepdims=True)
        acc_scr[h] = alpha * acc_scr[h] + jnp.dot(
            p.astype(compute_dtype), v_h, preferred_element_type=jnp.float32)
        m_scr[h] = m_new

    @pl.when(ki == pl.num_programs(2) - 1)
    def _finalize():
        # Merge heads along lanes and store ONE lane-dense (tq, dim) block.
        outs = []
        for h in range(heads):
            inv_l = pl.reciprocal(l_scr[h], approx=True)              # EUP
            outs.append(acc_scr[h] * inv_l)
        o_ref[0] = jnp.concatenate(outs, axis=-1).astype(o_ref.dtype)


def prepare_qkv_weight(w_qkv, compute_dtype=jnp.bfloat16):
    """Transform the PyTorch nn.Linear(dim, 3*dim, bias=False) weight ONCE at init.

    w_qkv: (3*dim, dim), torch layout (y = x @ w_qkv.T).
    Returns (w_q (dim, dim), w_kv (dim, 2*dim)) in compute_dtype so every
    in-kernel matmul is a plain lane-dense 2-D dot and no per-call weight
    transpose/copy happens in the forward wrapper.
    """
    three_dim, dim = w_qkv.shape
    assert three_dim == 3 * dim
    w = jnp.asarray(w_qkv).T.astype(compute_dtype)          # (dim, 3*dim)
    return w[:, :dim], w[:, dim:]


def attention_forward(x, w_q, w_kv, *, heads, tq=128, tk=128,
                      compute_dtype=jnp.bfloat16):
    """x: (B, N, dim) float32; w_q/w_kv from prepare_qkv_weight."""
    B, N, dim = x.shape
    assert dim % heads == 0
    head_dim = dim // heads
    assert w_q.shape == (dim, dim) and w_kv.shape == (dim, 2 * dim)
    scale = float(head_dim) ** -0.5

    tq = min(tq, N)
    tk = min(tk, N)
    assert N % tq == 0 and N % tk == 0, "N must be divisible by the tile sizes"
    assert tq == N or tq % 8 == 0
    assert tk == N or tk % 8 == 0

    grid = (B, N // tq, N // tk)

    kernel = functools.partial(attention_kernel, heads=heads, head_dim=head_dim,
                               scale=scale, compute_dtype=compute_dtype)

    w_bytes = (w_q.size + w_kv.size) * jnp.dtype(w_q.dtype).itemsize
    cost = pl.CostEstimate(
        flops=2 * B * N * dim * 3 * dim          # fused qkv projection
              + 2 * B * N * N * dim              # q k^T over all heads
              + 2 * B * N * N * dim,             # attn @ v over all heads
        transcendentals=B * heads * N * N,       # exp in softmax
        bytes_accessed=x.size * x.dtype.itemsize + w_bytes
                       + B * N * dim * x.dtype.itemsize,
    )

    return pl.pallas_call(
        kernel,
        out_shape=jax.ShapeDtypeStruct((B, N, dim), x.dtype),
        grid_spec=pltpu.PrefetchScalarGridSpec(
            num_scalar_prefetch=0,
            grid=grid,
            in_specs=[
                pl.BlockSpec((1, tq, dim), lambda b, qi, ki: (b, qi, 0)),   # x (q rows)
                pl.BlockSpec((1, tk, dim), lambda b, qi, ki: (b, ki, 0)),   # x (kv rows)
                # Constant index maps -> weights DMA'd once, VMEM-resident.
                # (Could also use pipeline_mode=pl.Buffered(1) to drop the
                #  second buffer of these never-changing blocks on v7x.)
                pl.BlockSpec((dim, dim), lambda b, qi, ki: (0, 0)),
                pl.BlockSpec((dim, 2 * dim), lambda b, qi, ki: (0, 0)),
            ],
            out_specs=pl.BlockSpec((1, tq, dim), lambda b, qi, ki: (b, qi, 0)),
            scratch_shapes=[
                pltpu.VMEM((heads, tq, head_dim), compute_dtype),   # q per head
                pltpu.VMEM((heads, tq, 1), jnp.float32),            # running max
                pltpu.VMEM((heads, tq, 1), jnp.float32),            # running sum
                pltpu.VMEM((heads, tq, head_dim), jnp.float32),     # running out
            ],
        ),
        compiler_params=pltpu.CompilerParams(
            dimension_semantics=("parallel", "parallel", "arbitrary"),
            vmem_limit_bytes=48 * 1024 * 1024,
        ),
        cost_estimate=cost,
    )(x, x, w_q, w_kv)


def attention_reference(x, w_qkv, heads):
    """Pure-JAX f32 reference matching the PyTorch module."""
    B, N, dim = x.shape
    d = dim // heads
    qkv = x @ w_qkv.T                                        # (B, N, 3*dim)
    q, k, v = jnp.split(qkv, 3, axis=-1)

    def split_heads(t):
        return t.reshape(B, N, heads, d).transpose(0, 2, 1, 3)   # (B, H, N, d)

    q, k, v = map(split_heads, (q, k, v))
    dots = jnp.einsum("bhnd,bhmd->bhnm", q, k) * (float(d) ** -0.5)
    attn = jax.nn.softmax(dots, axis=-1)
    out = jnp.einsum("bhnm,bhmd->bhnd", attn, v)
    return out.transpose(0, 2, 1, 3).reshape(B, N, dim)


if __name__ == "__main__":
    key = jax.random.PRNGKey(0)
    # Small shapes that still exercise the tiling: grid = (2, 2, 2), head_dim = 32.
    B, N, dim, heads = 2, 256, 128, 4

    kx, kw = jax.random.split(key)
    x = jax.random.normal(kx, (B, N, dim), jnp.float32)
    # PyTorch nn.Linear(dim, 3*dim, bias=False) default init: U(-1/sqrt(dim), 1/sqrt(dim))
    bound = 1.0 / (dim ** 0.5)
    w_qkv = jax.random.uniform(kw, (3 * dim, dim), jnp.float32, -bound, bound)

    compute_dtype = jnp.bfloat16                 # bf16 MXU operands, f32 accumulate
    w_q, w_kv = prepare_qkv_weight(w_qkv, compute_dtype)   # once, at "init" time

    out = attention_forward(x, w_q, w_kv, heads=heads, tq=128, tk=128,
                            compute_dtype=compute_dtype)
    out = jax.block_until_ready(out)

    ref = attention_reference(x, w_qkv, heads)
    assert out.shape == (B, N, dim)
    # bf16 MXU operands + approx reciprocal vs an f32 reference -> loosened tolerance.
    max_err = float(jnp.max(jnp.abs(out - ref)))
    assert jnp.allclose(out, ref, atol=2e-2, rtol=2e-2), (
        f"mismatch vs reference, max abs err = {max_err}")

    print("KERNEL_OK")
</pallas_src>

<mosaic_0001>
module attributes {stable_mosaic.version = 11 : i64} {
  func.func @attention_kernel(%arg0: i32, %arg1: i32, %arg2: i32, %arg3: memref<1x128x128xf32, #tpu.memory_space<vmem>>, %arg4: memref<1x128x128xf32, #tpu.memory_space<vmem>>, %arg5: memref<128x128xbf16, #tpu.memory_space<vmem>>, %arg6: memref<128x256xbf16, #tpu.memory_space<vmem>>, %arg7: memref<1x128x128xf32, #tpu.memory_space<vmem>>, %arg8: memref<4x128x32xbf16, #tpu.memory_space<vmem>>, %arg9: memref<4x128x1xf32, #tpu.memory_space<vmem>>, %arg10: memref<4x128x1xf32, #tpu.memory_space<vmem>>, %arg11: memref<4x128x32xf32, #tpu.memory_space<vmem>>) attributes {dimension_semantics = [#tpu.dimension_semantics<parallel>, #tpu.dimension_semantics<parallel>, #tpu.dimension_semantics<arbitrary>], iteration_bounds = array<i64: 2, 2, 2>, scalar_prefetch = 0 : i64, scratch_operands = 4 : i64, tpu.core_type = #tpu.core_type<tc>, window_params = [{transform_indices = @transform_0, window_bounds = array<i64: 1, 128, 128>}, {transform_indices = @transform_1, window_bounds = array<i64: 1, 128, 128>}, {pipeline_mode = #tpu.pipeline_mode<synchronous>, transform_indices = @transform_2, window_bounds = array<i64: 128, 128>}, {pipeline_mode = #tpu.pipeline_mode<synchronous>, transform_indices = @transform_3, window_bounds = array<i64: 128, 256>}, {transform_indices = @transform_4, window_bounds = array<i64: 1, 128, 128>}]} {
    %c0_i32 = arith.constant 0 : i32
    %0 = arith.cmpi eq, %arg2, %c0_i32 : i32
    %1 = arith.extui %0 : i1 to i32
    %c0_i32_0 = arith.constant 0 : i32
    %2 = arith.cmpi ne, %1, %c0_i32_0 : i32
    scf.if %2 {
      %c0_103 = arith.constant 0 : index
      %c0_104 = arith.constant 0 : index
      %c0_105 = arith.constant 0 : index
      %160 = vector.load %arg3[%c0_103, %c0_104, %c0_105] : memref<1x128x128xf32, #tpu.memory_space<vmem>>, vector<1x128x128xf32>
      %161 = vector.shape_cast %160 : vector<1x128x128xf32> to vector<128x128xf32>
      %162 = arith.truncf %161 : vector<128x128xf32> to vector<128x128xbf16>
      %c0_106 = arith.constant 0 : index
      %c0_107 = arith.constant 0 : index
      %163 = vector.load %arg5[%c0_106, %c0_107] : memref<128x128xbf16, #tpu.memory_space<vmem>>, vector<128x128xbf16>
      %cst_108 = arith.constant dense<0.000000e+00> : vector<128x128xf32>
      %164 = tpu.matmul %162, %163, %cst_108 {dimension_numbers = #tpu.dot_dimension_numbers<[1], [0], [0], [1], [0, 0, 1, 1], [], []>} : vector<128x128xbf16>, vector<128x128xbf16>, vector<128x128xf32> -> vector<128x128xf32>
      %cst_109 = arith.constant 0.176776692 : f32
      %165 = vector.broadcast %cst_109 : f32 to vector<128x128xf32>
      %166 = arith.mulf %164, %165 : vector<128x128xf32>
      %167 = arith.truncf %166 : vector<128x128xf32> to vector<128x128xbf16>
      %168 = vector.extract_strided_slice %167 {offsets = [0, 0], sizes = [128, 32], strides = [1, 1]} : vector<128x128xbf16> to vector<128x32xbf16>
      %c0_110 = arith.constant 0 : index
      %c0_111 = arith.constant 0 : index
      %c0_112 = arith.constant 0 : index
      %169 = vector.load %arg8[%c0_110, %c0_111, %c0_112] : memref<4x128x32xbf16, #tpu.memory_space<vmem>>, vector<1x128x32xbf16>
      %170 = vector.shape_cast %169 : vector<1x128x32xbf16> to vector<128x32xbf16>
      %171 = vector.shape_cast %168 : vector<128x32xbf16> to vector<1x128x32xbf16>
      tpu.vector_store %arg8[%c0_110, %c0_111, %c0_112], %171 {strides = array<i32>} : memref<4x128x32xbf16, #tpu.memory_space<vmem>>, vector<1x128x32xbf16>,
      %172 = vector.extract_strided_slice %167 {offsets = [0, 32], sizes = [128, 32], strides = [1, 1]} : vector<128x128xbf16> to vector<128x32xbf16>
      %c1_113 = arith.constant 1 : index
      %c0_114 = arith.constant 0 : index
      %c0_115 = arith.constant 0 : index
      %173 = vector.load %arg8[%c1_113, %c0_114, %c0_115] : memref<4x128x32xbf16, #tpu.memory_space<vmem>>, vector<1x128x32xbf16>
      %174 = vector.shape_cast %173 : vector<1x128x32xbf16> to vector<128x32xbf16>
      %175 = vector.shape_cast %172 : vector<128x32xbf16> to vector<1x128x32xbf16>
      tpu.vector_store %arg8[%c1_113, %c0_114, %c0_115], %175 {strides = array<i32>} : memref<4x128x32xbf16, #tpu.memory_space<vmem>>, vector<1x128x32xbf16>,
      %176 = vector.extract_strided_slice %167 {offsets = [0, 64], sizes = [128, 32], strides = [1, 1]} : vector<128x128xbf16> to vector<128x32xbf16>
      %c2_116 = arith.constant 2 : index
      %c0_117 = arith.constant 0 : index
      %c0_118 = arith.constant 0 : index
      %177 = vector.load %arg8[%c2_116, %c0_117, %c0_118] : memref<4x128x32xbf16, #tpu.memory_space<vmem>>, vector<1x128x32xbf16>
      %178 = vector.shape_cast %177 : vector<1x128x32xbf16> to vector<128x32xbf16>
      %179 = vector.shape_cast %176 : vector<128x32xbf16> to vector<1x128x32xbf16>
      tpu.vector_store %arg8[%c2_116, %c0_117, %c0_118], %179 {strides = array<i32>} : memref<4x128x32xbf16, #tpu.memory_space<vmem>>, vector<1x128x32xbf16>,
      %180 = vector.extract_strided_slice %167 {offsets = [0, 96], sizes = [128, 32], strides = [1, 1]} : vector<128x128xbf16> to vector<128x32xbf16>
      %c3_119 = arith.constant 3 : index
      %c0_120 = arith.constant 0 : index
      %c0_121 = arith.constant 0 : index
      %181 = vector.load %arg8[%c3_119, %c0_120, %c0_121] : memref<4x128x32xbf16, #tpu.memory_space<vmem>>, vector<1x128x32xbf16>
      %182 = vector.shape_cast %181 : vector<1x128x32xbf16> to vector<128x32xbf16>
      %183 = vector.shape_cast %180 : vector<128x32xbf16> to vector<1x128x32xbf16>
      tpu.vector_store %arg8[%c3_119, %c0_120, %c0_121], %183 {strides = array<i32>} : memref<4x128x32xbf16, #tpu.memory_space<vmem>>, vector<1x128x32xbf16>,
      %cst_122 = arith.constant 0xFF800000 : f32
      %184 = vector.broadcast %cst_122 : f32 to vector<4x128x1xf32>
      %c0_123 = arith.constant 0 : index
      %c0_124 = arith.constant 0 : index
      %c0_125 = arith.constant 0 : index
      %185 = vector.load %arg9[%c0_123, %c0_124, %c0_125] : memref<4x128x1xf32, #tpu.memory_space<vmem>>, vector<4x128x1xf32>
      tpu.vector_store %arg9[%c0_123, %c0_124, %c0_125], %184 {strides = array<i32>} : memref<4x128x1xf32, #tpu.memory_space<vmem>>, vector<4x128x1xf32>,
      %cst_126 = arith.constant 0.000000e+00 : f32
      %186 = vector.broadcast %cst_126 : f32 to vector<4x128x1xf32>
      %c0_127 = arith.constant 0 : index
      %c0_128 = arith.constant 0 : index
      %c0_129 = arith.constant 0 : index
      %187 = vector.load %arg10[%c0_127, %c0_128, %c0_129] : memref<4x128x1xf32, #tpu.memory_space<vmem>>, vector<4x128x1xf32>
      tpu.vector_store %arg10[%c0_127, %c0_128, %c0_129], %186 {strides = array<i32>} : memref<4x128x1xf32, #tpu.memory_space<vmem>>, vector<4x128x1xf32>,
      %cst_130 = arith.constant 0.000000e+00 : f32
      %188 = vector.broadcast %cst_130 : f32 to vector<4x128x32xf32>
      %c0_131 = arith.constant 0 : index
      %c0_132 = arith.constant 0 : index
      %c0_133 = arith.constant 0 : index
      %189 = vector.load %arg11[%c0_131, %c0_132, %c0_133] : memref<4x128x32xf32, #tpu.memory_space<vmem>>, vector<4x128x32xf32>
      tpu.vector_store %arg11[%c0_131, %c0_132, %c0_133], %188 {strides = array<i32>} : memref<4x128x32xf32, #tpu.memory_space<vmem>>, vector<4x128x32xf32>,
    } else {
    }
    %c0 = arith.constant 0 : index
    %c0_1 = arith.constant 0 : index
    %c0_2 = arith.constant 0 : index
    %3 = vector.load %arg4[%c0, %c0_1, %c0_2] : memref<1x128x128xf32, #tpu.memory_space<vmem>>, vector<1x128x128xf32>
    %4 = vector.shape_cast %3 : vector<1x128x128xf32> to vector<128x128xf32>
    %5 = arith.truncf %4 : vector<128x128xf32> to vector<128x128xbf16>
    %c0_3 = arith.constant 0 : index
    %c0_4 = arith.constant 0 : index
    %6 = vector.load %arg6[%c0_3, %c0_4] : memref<128x256xbf16, #tpu.memory_space<vmem>>, vector<128x256xbf16>
    %cst = arith.constant dense<0.000000e+00> : vector<128x256xf32>
    %7 = tpu.matmul %5, %6, %cst {dimension_numbers = #tpu.dot_dimension_numbers<[1], [0], [0], [1], [0, 0, 1, 1], [], []>} : vector<128x128xbf16>, vector<128x256xbf16>, vector<128x256xf32> -> vector<128x256xf32>
    %8 = arith.truncf %7 : vector<128x256xf32> to vector<128x256xbf16>
    %9 = vector.extract_strided_slice %8 {offsets = [0, 0], sizes = [128, 32], strides = [1, 1]} : vector<128x256xbf16> to vector<128x32xbf16>
    %10 = vector.extract_strided_slice %8 {offsets = [0, 128], sizes = [128, 32], strides = [1, 1]} : vector<128x256xbf16> to vector<128x32xbf16>
    %c0_5 = arith.constant 0 : index
    %c0_6 = arith.constant 0 : index
    %c0_7 = arith.constant 0 : index
    %11 = vector.load %arg8[%c0_5, %c0_6, %c0_7] : memref<4x128x32xbf16, #tpu.memory_space<vmem>>, vector<1x128x32xbf16>
    %12 = vector.shape_cast %11 : vector<1x128x32xbf16> to vector<128x32xbf16>
    %cst_8 = arith.constant dense<0.000000e+00> : vector<128x128xf32>
    %13 = tpu.matmul %12, %9, %cst_8 {dimension_numbers = #tpu.dot_dimension_numbers<[1], [1], [0], [0], [0, 0, 1, 0], [], []>} : vector<128x32xbf16>, vector<128x32xbf16>, vector<128x128xf32> -> vector<128x128xf32>
    %c0_9 = arith.constant 0 : index
    %c0_10 = arith.constant 0 : index
    %c0_11 = arith.constant 0 : index
    %14 = vector.load %arg9[%c0_9, %c0_10, %c0_11] : memref<4x128x1xf32, #tpu.memory_space<vmem>>, vector<1x128x1xf32>
    %15 = vector.shape_cast %14 : vector<1x128x1xf32> to vector<128x1xf32>
    %cst_12 = arith.constant dense<0xFF800000> : vector<128xf32>
    %16 = vector.multi_reduction <maximumf>, %13, %cst_12 [1] : vector<128x128xf32> to vector<128xf32>
    %17 = vector.shape_cast %16 : vector<128xf32> to vector<128x1xf32>
    %18 = arith.maximumf %15, %17 : vector<128x1xf32>
    %19 = arith.subf %15, %18 : vector<128x1xf32>
    %20 = math.exp %19 : vector<128x1xf32>
    %21 = vector.broadcast %18 : vector<128x1xf32> to vector<128x128xf32>
    %22 = arith.subf %13, %21 : vector<128x128xf32>
    %23 = math.exp %22 : vector<128x128xf32>
    %c0_13 = arith.constant 0 : index
    %c0_14 = arith.constant 0 : index
    %c0_15 = arith.constant 0 : index
    %24 = vector.load %arg10[%c0_13, %c0_14, %c0_15] : memref<4x128x1xf32, #tpu.memory_space<vmem>>, vector<1x128x1xf32>
    %25 = vector.shape_cast %24 : vector<1x128x1xf32> to vector<128x1xf32>
    %26 = arith.mulf %20, %25 : vector<128x1xf32>
    %cst_16 = arith.constant dense<0.000000e+00> : vector<128xf32>
    %27 = vector.multi_reduction <add>, %23, %cst_16 [1] : vector<128x128xf32> to vector<128xf32>
    %28 = vector.shape_cast %27 : vector<128xf32> to vector<128x1xf32>
    %29 = arith.addf %26, %28 : vector<128x1xf32>
    %c0_17 = arith.constant 0 : index
    %c0_18 = arith.constant 0 : index
    %c0_19 = arith.constant 0 : index
    %30 = vector.load %arg10[%c0_17, %c0_18, %c0_19] : memref<4x128x1xf32, #tpu.memory_space<vmem>>, vector<1x128x1xf32>
    %31 = vector.shape_cast %30 : vector<1x128x1xf32> to vector<128x1xf32>
    %32 = vector.shape_cast %29 : vector<128x1xf32> to vector<1x128x1xf32>
    tpu.vector_store %arg10[%c0_17, %c0_18, %c0_19], %32 {strides = array<i32>} : memref<4x128x1xf32, #tpu.memory_space<vmem>>, vector<1x128x1xf32>,
    %c0_20 = arith.constant 0 : index
    %c0_21 = arith.constant 0 : index
    %c0_22 = arith.constant 0 : index
    %33 = vector.load %arg11[%c0_20, %c0_21, %c0_22] : memref<4x128x32xf32, #tpu.memory_space<vmem>>, vector<1x128x32xf32>
    %34 = vector.shape_cast %33 : vector<1x128x32xf32> to vector<128x32xf32>
    %35 = vector.broadcast %20 : vector<128x1xf32> to vector<128x32xf32>
    %36 = arith.mulf %35, %34 : vector<128x32xf32>
    %37 = arith.truncf %23 : vector<128x128xf32> to vector<128x128xbf16>
    %cst_23 = arith.constant dense<0.000000e+00> : vector<128x32xf32>
    %38 = tpu.matmul %37, %10, %cst_23 {dimension_numbers = #tpu.dot_dimension_numbers<[1], [0], [0], [1], [0, 0, 1, 1], [], []>} : vector<128x128xbf16>, vector<128x32xbf16>, vector<128x32xf32> -> vector<128x32xf32>
    %39 = arith.addf %36, %38 : vector<128x32xf32>
    %c0_24 = arith.constant 0 : index
    %c0_25 = arith.constant 0 : index
    %c0_26 = arith.constant 0 : index
    %40 = vector.load %arg11[%c0_24, %c0_25, %c0_26] : memref<4x128x32xf32, #tpu.memory_space<vmem>>, vector<1x128x32xf32>
    %41 = vector.shape_cast %40 : vector<1x128x32xf32> to vector<128x32xf32>
    %42 = vector.shape_cast %39 : vector<128x32xf32> to vector<1x128x32xf32>
    tpu.vector_store %arg11[%c0_24, %c0_25, %c0_26], %42 {strides = array<i32>} : memref<4x128x32xf32, #tpu.memory_space<vmem>>, vector<1x128x32xf32>,
    %c0_27 = arith.constant 0 : index
    %c0_28 = arith.constant 0 : index
    %c0_29 = arith.constant 0 : index
    %43 = vector.load %arg9[%c0_27, %c0_28, %c0_29] : memref<4x128x1xf32, #tpu.memory_space<vmem>>, vector<1x128x1xf32>
    %44 = vector.shape_cast %43 : vector<1x128x1xf32> to vector<128x1xf32>
    %45 = vector.shape_cast %18 : vector<128x1xf32> to vector<1x128x1xf32>
    tpu.vector_store %arg9[%c0_27, %c0_28, %c0_29], %45 {strides = array<i32>} : memref<4x128x1xf32, #tpu.memory_space<vmem>>, vector<1x128x1xf32>,
    %46 = vector.extract_strided_slice %8 {offsets = [0, 32], sizes = [128, 32], strides = [1, 1]} : vector<128x256xbf16> to vector<128x32xbf16>
    %47 = vector.extract_strided_slice %8 {offsets = [0, 160], sizes = [128, 32], strides = [1, 1]} : vector<128x256xbf16> to vector<128x32xbf16>
    %c1 = arith.constant 1 : index
    %c0_30 = arith.constant 0 : index
    %c0_31 = arith.constant 0 : index
    %48 = vector.load %arg8[%c1, %c0_30, %c0_31] : memref<4x128x32xbf16, #tpu.memory_space<vmem>>, vector<1x128x32xbf16>
    %49 = vector.shape_cast %48 : vector<1x128x32xbf16> to vector<128x32xbf16>
    %cst_32 = arith.constant dense<0.000000e+00> : vector<128x128xf32>
    %50 = tpu.matmul %49, %46, %cst_32 {dimension_numbers = #tpu.dot_dimension_numbers<[1], [1], [0], [0], [0, 0, 1, 0], [], []>} : vector<128x32xbf16>, vector<128x32xbf16>, vector<128x128xf32> -> vector<128x128xf32>
    %c1_33 = arith.constant 1 : index
    %c0_34 = arith.constant 0 : index
    %c0_35 = arith.constant 0 : index
    %51 = vector.load %arg9[%c1_33, %c0_34, %c0_35] : memref<4x128x1xf32, #tpu.memory_space<vmem>>, vector<1x128x1xf32>
    %52 = vector.shape_cast %51 : vector<1x128x1xf32> to vector<128x1xf32>
    %cst_36 = arith.constant dense<0xFF800000> : vector<128xf32>
    %53 = vector.multi_reduction <maximumf>, %50, %cst_36 [1] : vector<128x128xf32> to vector<128xf32>
    %54 = vector.shape_cast %53 : vector<128xf32> to vector<128x1xf32>
    %55 = arith.maximumf %52, %54 : vector<128x1xf32>
    %56 = arith.subf %52, %55 : vector<128x1xf32>
    %57 = math.exp %56 : vector<128x1xf32>
    %58 = vector.broadcast %55 : vector<128x1xf32> to vector<128x128xf32>
    %59 = arith.subf %50, %58 : vector<128x128xf32>
    %60 = math.exp %59 : vector<128x128xf32>
    %c1_37 = arith.constant 1 : index
    %c0_38 = arith.constant 0 : index
    %c0_39 = arith.constant 0 : index
    %61 = vector.load %arg10[%c1_37, %c0_38, %c0_39] : memref<4x128x1xf32, #tpu.memory_space<vmem>>, vector<1x128x1xf32>
    %62 = vector.shape_cast %61 : vector<1x128x1xf32> to vector<128x1xf32>
    %63 = arith.mulf %57, %62 : vector<128x1xf32>
    %cst_40 = arith.constant dense<0.000000e+00> : vector<128xf32>
    %64 = vector.multi_reduction <add>, %60, %cst_40 [1] : vector<128x128xf32> to vector<128xf32>
    %65 = vector.shape_cast %64 : vector<128xf32> to vector<128x1xf32>
    %66 = arith.addf %63, %65 : vector<128x1xf32>
    %c1_41 = arith.constant 1 : index
    %c0_42 = arith.constant 0 : index
    %c0_43 = arith.constant 0 : index
    %67 = vector.load %arg10[%c1_41, %c0_42, %c0_43] : memref<4x128x1xf32, #tpu.memory_space<vmem>>, vector<1x128x1xf32>
    %68 = vector.shape_cast %67 : vector<1x128x1xf32> to vector<128x1xf32>
    %69 = vector.shape_cast %66 : vector<128x1xf32> to vector<1x128x1xf32>
    tpu.vector_store %arg10[%c1_41, %c0_42, %c0_43], %69 {strides = array<i32>} : memref<4x128x1xf32, #tpu.memory_space<vmem>>, vector<1x128x1xf32>,
    %c1_44 = arith.constant 1 : index
    %c0_45 = arith.constant 0 : index
    %c0_46 = arith.constant 0 : index
    %70 = vector.load %arg11[%c1_44, %c0_45, %c0_46] : memref<4x128x32xf32, #tpu.memory_space<vmem>>, vector<1x128x32xf32>
    %71 = vector.shape_cast %70 : vector<1x128x32xf32> to vector<128x32xf32>
    %72 = vector.broadcast %57 : vector<128x1xf32> to vector<128x32xf32>
    %73 = arith.mulf %72, %71 : vector<128x32xf32>
    %74 = arith.truncf %60 : vector<128x128xf32> to vector<128x128xbf16>
    %cst_47 = arith.constant dense<0.000000e+00> : vector<128x32xf32>
    %75 = tpu.matmul %74, %47, %cst_47 {dimension_numbers = #tpu.dot_dimension_numbers<[1], [0], [0], [1], [0, 0, 1, 1], [], []>} : vector<128x128xbf16>, vector<128x32xbf16>, vector<128x32xf32> -> vector<128x32xf32>
    %76 = arith.addf %73, %75 : vector<128x32xf32>
    %c1_48 = arith.constant 1 : index
    %c0_49 = arith.constant 0 : index
    %c0_50 = arith.constant 0 : index
    %77 = vector.load %arg11[%c1_48, %c0_49, %c0_50] : memref<4x128x32xf32, #tpu.memory_space<vmem>>, vector<1x128x32xf32>
    %78 = vector.shape_cast %77 : vector<1x128x32xf32> to vector<128x32xf32>
    %79 = vector.shape_cast %76 : vector<128x32xf32> to vector<1x128x32xf32>
    tpu.vector_store %arg11[%c1_48, %c0_49, %c0_50], %79 {strides = array<i32>} : memref<4x128x32xf32, #tpu.memory_space<vmem>>, vector<1x128x32xf32>,
    %c1_51 = arith.constant 1 : index
    %c0_52 = arith.constant 0 : index
    %c0_53 = arith.constant 0 : index
    %80 = vector.load %arg9[%c1_51, %c0_52, %c0_53] : memref<4x128x1xf32, #tpu.memory_space<vmem>>, vector<1x128x1xf32>
    %81 = vector.shape_cast %80 : vector<1x128x1xf32> to vector<128x1xf32>
    %82 = vector.shape_cast %55 : vector<128x1xf32> to vector<1x128x1xf32>
    tpu.vector_store %arg9[%c1_51, %c0_52, %c0_53], %82 {strides = array<i32>} : memref<4x128x1xf32, #tpu.memory_space<vmem>>, vector<1x128x1xf32>,
    %83 = vector.extract_strided_slice %8 {offsets = [0, 64], sizes = [128, 32], strides = [1, 1]} : vector<128x256xbf16> to vector<128x32xbf16>
    %84 = vector.extract_strided_slice %8 {offsets = [0, 192], sizes = [128, 32], strides = [1, 1]} : vector<128x256xbf16> to vector<128x32xbf16>
    %c2 = arith.constant 2 : index
    %c0_54 = arith.constant 0 : index
    %c0_55 = arith.constant 0 : index
    %85 = vector.load %arg8[%c2, %c0_54, %c0_55] : memref<4x128x32xbf16, #tpu.memory_space<vmem>>, vector<1x128x32xbf16>
    %86 = vector.shape_cast %85 : vector<1x128x32xbf16> to vector<128x32xbf16>
    %cst_56 = arith.constant dense<0.000000e+00> : vector<128x128xf32>
    %87 = tpu.matmul %86, %83, %cst_56 {dimension_numbers = #tpu.dot_dimension_numbers<[1], [1], [0], [0], [0, 0, 1, 0], [], []>} : vector<128x32xbf16>, vector<128x32xbf16>, vector<128x128xf32> -> vector<128x128xf32>
    %c2_57 = arith.constant 2 : index
    %c0_58 = arith.constant 0 : index
    %c0_59 = arith.constant 0 : index
    %88 = vector.load %arg9[%c2_57, %c0_58, %c0_59] : memref<4x128x1xf32, #tpu.memory_space<vmem>>, vector<1x128x1xf32>
    %89 = vector.shape_cast %88 : vector<1x128x1xf32> to vector<128x1xf32>
    %cst_60 = arith.constant dense<0xFF800000> : vector<128xf32>
    %90 = vector.multi_reduction <maximumf>, %87, %cst_60 [1] : vector<128x128xf32> to vector<128xf32>
    %91 = vector.shape_cast %90 : vector<128xf32> to vector<128x1xf32>
    %92 = arith.maximumf %89, %91 : vector<128x1xf32>
    %93 = arith.subf %89, %92 : vector<128x1xf32>
    %94 = math.exp %93 : vector<128x1xf32>
    %95 = vector.broadcast %92 : vector<128x1xf32> to vector<128x128xf32>
    %96 = arith.subf %87, %95 : vector<128x128xf32>
    %97 = math.exp %96 : vector<128x128xf32>
    %c2_61 = arith.constant 2 : index
    %c0_62 = arith.constant 0 : index
    %c0_63 = arith.constant 0 : index
    %98 = vector.load %arg10[%c2_61, %c0_62, %c0_63] : memref<4x128x1xf32, #tpu.memory_space<vmem>>, vector<1x128x1xf32>
    %99 = vector.shape_cast %98 : vector<1x128x1xf32> to vector<128x1xf32>
    %100 = arith.mulf %94, %99 : vector<128x1xf32>
    %cst_64 = arith.constant dense<0.000000e+00> : vector<128xf32>
    %101 = vector.multi_reduction <add>, %97, %cst_64 [1] : vector<128x128xf32> to vector<128xf32>
    %102 = vector.shape_cast %101 : vector<128xf32> to vector<128x1xf32>
    %103 = arith.addf %100, %102 : vector<128x1xf32>
    %c2_65 = arith.constant 2 : index
    %c0_66 = arith.constant 0 : index
    %c0_67 = arith.constant 0 : index
    %104 = vector.load %arg10[%c2_65, %c0_66, %c0_67] : memref<4x128x1xf32, #tpu.memory_space<vmem>>, vector<1x128x1xf32>
    %105 = vector.shape_cast %104 : vector<1x128x1xf32> to vector<128x1xf32>
    %106 = vector.shape_cast %103 : vector<128x1xf32> to vector<1x128x1xf32>
    tpu.vector_store %arg10[%c2_65, %c0_66, %c0_67], %106 {strides = array<i32>} : memref<4x128x1xf32, #tpu.memory_space<vmem>>, vector<1x128x1xf32>,
    %c2_68 = arith.constant 2 : index
    %c0_69 = arith.constant 0 : index
    %c0_70 = arith.constant 0 : index
    %107 = vector.load %arg11[%c2_68, %c0_69, %c0_70] : memref<4x128x32xf32, #tpu.memory_space<vmem>>, vector<1x128x32xf32>
    %108 = vector.shape_cast %107 : vector<1x128x32xf32> to vector<128x32xf32>
    %109 = vector.broadcast %94 : vector<128x1xf32> to vector<128x32xf32>
    %110 = arith.mulf %109, %108 : vector<128x32xf32>
    %111 = arith.truncf %97 : vector<128x128xf32> to vector<128x128xbf16>
    %cst_71 = arith.constant dense<0.000000e+00> : vector<128x32xf32>
    %112 = tpu.matmul %111, %84, %cst_71 {dimension_numbers = #tpu.dot_dimension_numbers<[1], [0], [0], [1], [0, 0, 1, 1], [], []>} : vector<128x128xbf16>, vector<128x32xbf16>, vector<128x32xf32> -> vector<128x32xf32>
    %113 = arith.addf %110, %112 : vector<128x32xf32>
    %c2_72 = arith.constant 2 : index
    %c0_73 = arith.constant 0 : index
    %c0_74 = arith.constant 0 : index
    %114 = vector.load %arg11[%c2_72, %c0_73, %c0_74] : memref<4x128x32xf32, #tpu.memory_space<vmem>>, vector<1x128x32xf32>
    %115 = vector.shape_cast %114 : vector<1x128x32xf32> to vector<128x32xf32>
    %116 = vector.shape_cast %113 : vector<128x32xf32> to vector<1x128x32xf32>
    tpu.vector_store %arg11[%c2_72, %c0_73, %c0_74], %116 {strides = array<i32>} : memref<4x128x32xf32, #tpu.memory_space<vmem>>, vector<1x128x32xf32>,
    %c2_75 = arith.constant 2 : index
    %c0_76 = arith.constant 0 : index
    %c0_77 = arith.constant 0 : index
    %117 = vector.load %arg9[%c2_75, %c0_76, %c0_77] : memref<4x128x1xf32, #tpu.memory_space<vmem>>, vector<1x128x1xf32>
    %118 = vector.shape_cast %117 : vector<1x128x1xf32> to vector<128x1xf32>
    %119 = vector.shape_cast %92 : vector<128x1xf32> to vector<1x128x1xf32>
    tpu.vector_store %arg9[%c2_75, %c0_76, %c0_77], %119 {strides = array<i32>} : memref<4x128x1xf32, #tpu.memory_space<vmem>>, vector<1x128x1xf32>,
    %120 = vector.extract_strided_slice %8 {offsets = [0, 96], sizes = [128, 32], strides = [1, 1]} : vector<128x256xbf16> to vector<128x32xbf16>
    %121 = vector.extract_strided_slice %8 {offsets = [0, 224], sizes = [128, 32], strides = [1, 1]} : vector<128x256xbf16> to vector<128x32xbf16>
    %c3 = arith.constant 3 : index
    %c0_78 = arith.constant 0 : index
    %c0_79 = arith.constant 0 : index
    %122 = vector.load %arg8[%c3, %c0_78, %c0_79] : memref<4x128x32xbf16, #tpu.memory_space<vmem>>, vector<1x128x32xbf16>
    %123 = vector.shape_cast %122 : vector<1x128x32xbf16> to vector<128x32xbf16>
    %cst_80 = arith.constant dense<0.000000e+00> : vector<128x128xf32>
    %124 = tpu.matmul %123, %120, %cst_80 {dimension_numbers = #tpu.dot_dimension_numbers<[1], [1], [0], [0], [0, 0, 1, 0], [], []>} : vector<128x32xbf16>, vector<128x32xbf16>, vector<128x128xf32> -> vector<128x128xf32>
    %c3_81 = arith.constant 3 : index
    %c0_82 = arith.constant 0 : index
    %c0_83 = arith.constant 0 : index
    %125 = vector.load %arg9[%c3_81, %c0_82, %c0_83] : memref<4x128x1xf32, #tpu.memory_space<vmem>>, vector<1x128x1xf32>
    %126 = vector.shape_cast %125 : vector<1x128x1xf32> to vector<128x1xf32>
    %cst_84 = arith.constant dense<0xFF800000> : vector<128xf32>
    %127 = vector.multi_reduction <maximumf>, %124, %cst_84 [1] : vector<128x128xf32> to vector<128xf32>
    %128 = vector.shape_cast %127 : vector<128xf32> to vector<128x1xf32>
    %129 = arith.maximumf %126, %128 : vector<128x1xf32>
    %130 = arith.subf %126, %129 : vector<128x1xf32>
    %131 = math.exp %130 : vector<128x1xf32>
    %132 = vector.broadcast %129 : vector<128x1xf32> to vector<128x128xf32>
    %133 = arith.subf %124, %132 : vector<128x128xf32>
    %134 = math.exp %133 : vector<128x128xf32>
    %c3_85 = arith.constant 3 : index
    %c0_86 = arith.constant 0 : index
    %c0_87 = arith.constant 0 : index
    %135 = vector.load %arg10[%c3_85, %c0_86, %c0_87] : memref<4x128x1xf32, #tpu.memory_space<vmem>>, vector<1x128x1xf32>
    %136 = vector.shape_cast %135 : vector<1x128x1xf32> to vector<128x1xf32>
    %137 = arith.mulf %131, %136 : vector<128x1xf32>
    %cst_88 = arith.constant dense<0.000000e+00> : vector<128xf32>
    %138 = vector.multi_reduction <add>, %134, %cst_88 [1] : vector<128x128xf32> to vector<128xf32>
    %139 = vector.shape_cast %138 : vector<128xf32> to vector<128x1xf32>
    %140 = arith.addf %137, %139 : vector<128x1xf32>
    %c3_89 = arith.constant 3 : index
    %c0_90 = arith.constant 0 : index
    %c0_91 = arith.constant 0 : index
    %141 = vector.load %arg10[%c3_89, %c0_90, %c0_91] : memref<4x128x1xf32, #tpu.memory_space<vmem>>, vector<1x128x1xf32>
    %142 = vector.shape_cast %141 : vector<1x128x1xf32> to vector<128x1xf32>
    %143 = vector.shape_cast %140 : vector<128x1xf32> to vector<1x128x1xf32>
    tpu.vector_store %arg10[%c3_89, %c0_90, %c0_91], %143 {strides = array<i32>} : memref<4x128x1xf32, #tpu.memory_space<vmem>>, vector<1x128x1xf32>,
    %c3_92 = arith.constant 3 : index
    %c0_93 = arith.constant 0 : index
    %c0_94 = arith.constant 0 : index
    %144 = vector.load %arg11[%c3_92, %c0_93, %c0_94] : memref<4x128x32xf32, #tpu.memory_space<vmem>>, vector<1x128x32xf32>
    %145 = vector.shape_cast %144 : vector<1x128x32xf32> to vector<128x32xf32>
    %146 = vector.broadcast %131 : vector<128x1xf32> to vector<128x32xf32>
    %147 = arith.mulf %146, %145 : vector<128x32xf32>
    %148 = arith.truncf %134 : vector<128x128xf32> to vector<128x128xbf16>
    %cst_95 = arith.constant dense<0.000000e+00> : vector<128x32xf32>
    %149 = tpu.matmul %148, %121, %cst_95 {dimension_numbers = #tpu.dot_dimension_numbers<[1], [0], [0], [1], [0, 0, 1, 1], [], []>} : vector<128x128xbf16>, vector<128x32xbf16>, vector<128x32xf32> -> vector<128x32xf32>
    %150 = arith.addf %147, %149 : vector<128x32xf32>
    %c3_96 = arith.constant 3 : index
    %c0_97 = arith.constant 0 : index
    %c0_98 = arith.constant 0 : index
    %151 = vector.load %arg11[%c3_96, %c0_97, %c0_98] : memref<4x128x32xf32, #tpu.memory_space<vmem>>, vector<1x128x32xf32>
    %152 = vector.shape_cast %151 : vector<1x128x32xf32> to vector<128x32xf32>
    %153 = vector.shape_cast %150 : vector<128x32xf32> to vector<1x128x32xf32>
    tpu.vector_store %arg11[%c3_96, %c0_97, %c0_98], %153 {strides = array<i32>} : memref<4x128x32xf32, #tpu.memory_space<vmem>>, vector<1x128x32xf32>,
    %c3_99 = arith.constant 3 : index
    %c0_100 = arith.constant 0 : index
    %c0_101 = arith.constant 0 : index
    %154 = vector.load %arg9[%c3_99, %c0_100, %c0_101] : memref<4x128x1xf32, #tpu.memory_space<vmem>>, vector<1x128x1xf32>
    %155 = vector.shape_cast %154 : vector<1x128x1xf32> to vector<128x1xf32>
    %156 = vector.shape_cast %129 : vector<128x1xf32> to vector<1x128x1xf32>
    tpu.vector_store %arg9[%c3_99, %c0_100, %c0_101], %156 {strides = array<i32>} : memref<4x128x1xf32, #tpu.memory_space<vmem>>, vector<1x128x1xf32>,
    %c1_i32 = arith.constant 1 : i32
    %157 = arith.cmpi eq, %arg2, %c1_i32 : i32
    %158 = arith.extui %157 : i1 to i32
    %c0_i32_102 = arith.constant 0 : i32
    %159 = arith.cmpi ne, %158, %c0_i32_102 : i32
    scf.if %159 {
      %c0_103 = arith.constant 0 : index
      %c0_104 = arith.constant 0 : index
      %c0_105 = arith.constant 0 : index
      %160 = vector.load %arg10[%c0_103, %c0_104, %c0_105] : memref<4x128x1xf32, #tpu.memory_space<vmem>>, vector<1x128x1xf32>
      %161 = vector.shape_cast %160 : vector<1x128x1xf32> to vector<128x1xf32>
      %162 = tpu.reciprocal %161 {approx = true} : vector<128x1xf32> -> vector<128x1xf32>
      %c0_106 = arith.constant 0 : index
      %c0_107 = arith.constant 0 : index
      %c0_108 = arith.constant 0 : index
      %163 = vector.load %arg11[%c0_106, %c0_107, %c0_108] : memref<4x128x32xf32, #tpu.memory_space<vmem>>, vector<1x128x32xf32>
      %164 = vector.shape_cast %163 : vector<1x128x32xf32> to vector<128x32xf32>
      %165 = vector.broadcast %162 : vector<128x1xf32> to vector<128x32xf32>
      %166 = arith.mulf %164, %165 : vector<128x32xf32>
      %c1_109 = arith.constant 1 : index
      %c0_110 = arith.constant 0 : index
      %c0_111 = arith.constant 0 : index
      %167 = vector.load %arg10[%c1_109, %c0_110, %c0_111] : memref<4x128x1xf32, #tpu.memory_space<vmem>>, vector<1x128x1xf32>
      %168 = vector.shape_cast %167 : vector<1x128x1xf32> to vector<128x1xf32>
      %169 = tpu.reciprocal %168 {approx = true} : vector<128x1xf32> -> vector<128x1xf32>
      %c1_112 = arith.constant 1 : index
      %c0_113 = arith.constant 0 : index
      %c0_114 = arith.constant 0 : index
      %170 = vector.load %arg11[%c1_112, %c0_113, %c0_114] : memref<4x128x32xf32, #tpu.memory_space<vmem>>, vector<1x128x32xf32>
      %171 = vector.shape_cast %170 : vector<1x128x32xf32> to vector<128x32xf32>
      %172 = vector.broadcast %169 : vector<128x1xf32> to vector<128x32xf32>
      %173 = arith.mulf %171, %172 : vector<128x32xf32>
      %c2_115 = arith.constant 2 : index
      %c0_116 = arith.constant 0 : index
      %c0_117 = arith.constant 0 : index
      %174 = vector.load %arg10[%c2_115, %c0_116, %c0_117] : memref<4x128x1xf32, #tpu.memory_space<vmem>>, vector<1x128x1xf32>
      %175 = vector.shape_cast %174 : vector<1x128x1xf32> to vector<128x1xf32>
      %176 = tpu.reciprocal %175 {approx = true} : vector<128x1xf32> -> vector<128x1xf32>
      %c2_118 = arith.constant 2 : index
      %c0_119 = arith.constant 0 : index
      %c0_120 = arith.constant 0 : index
      %177 = vector.load %arg11[%c2_118, %c0_119, %c0_120] : memref<4x128x32xf32, #tpu.memory_space<vmem>>, vector<1x128x32xf32>
      %178 = vector.shape_cast %177 : vector<1x128x32xf32> to vector<128x32xf32>
      %179 = vector.broadcast %176 : vector<128x1xf32> to vector<128x32xf32>
      %180 = arith.mulf %178, %179 : vector<128x32xf32>
      %c3_121 = arith.constant 3 : index
      %c0_122 = arith.constant 0 : index
      %c0_123 = arith.constant 0 : index
      %181 = vector.load %arg10[%c3_121, %c0_122, %c0_123] : memref<4x128x1xf32, #tpu.memory_space<vmem>>, vector<1x128x1xf32>
      %182 = vector.shape_cast %181 : vector<1x128x1xf32> to vector<128x1xf32>
      %183 = tpu.reciprocal %182 {approx = true} : vector<128x1xf32> -> vector<128x1xf32>
      %c3_124 = arith.constant 3 : index
      %c0_125 = arith.constant 0 : index
      %c0_126 = arith.constant 0 : index
      %184 = vector.load %arg11[%c3_124, %c0_125, %c0_126] : memref<4x128x32xf32, #tpu.memory_space<vmem>>, vector<1x128x32xf32>
      %185 = vector.shape_cast %184 : vector<1x128x32xf32> to vector<128x32xf32>
      %186 = vector.broadcast %183 : vector<128x1xf32> to vector<128x32xf32>
      %187 = arith.mulf %185, %186 : vector<128x32xf32>
      %188 = tpu.concatenate %166, %173, %180, %187 in 1 : vector<128x32xf32>, vector<128x32xf32>, vector<128x32xf32>, vector<128x32xf32> -> vector<128x128xf32>
      %c0_127 = arith.constant 0 : index
      %c0_128 = arith.constant 0 : index
      %c0_129 = arith.constant 0 : index
      %189 = vector.load %arg7[%c0_127, %c0_128, %c0_129] : memref<1x128x128xf32, #tpu.memory_space<vmem>>, vector<1x128x128xf32>
      %190 = vector.shape_cast %189 : vector<1x128x128xf32> to vector<128x128xf32>
      %191 = vector.shape_cast %188 : vector<128x128xf32> to vector<1x128x128xf32>
      tpu.vector_store %arg7[%c0_127, %c0_128, %c0_129], %191 {strides = array<i32>} : memref<1x128x128xf32, #tpu.memory_space<vmem>>, vector<1x128x128xf32>,
    } else {
    }
    return
  }
  func.func @transform_0(%arg0: i32, %arg1: i32, %arg2: i32) -> (i32, i32, i32) {
    %c0_i32 = arith.constant 0 : i32
    %c0_i32_0 = arith.constant 0 : i32
    return %arg0, %arg1, %c0_i32 : i32, i32, i32
  }
  func.func @transform_1(%arg0: i32, %arg1: i32, %arg2: i32) -> (i32, i32, i32) {
    %c0_i32 = arith.constant 0 : i32
    %c0_i32_0 = arith.constant 0 : i32
    return %arg0, %arg2, %c0_i32 : i32, i32, i32
  }
  func.func @transform_2(%arg0: i32, %arg1: i32, %arg2: i32) -> (i32, i32) {
    %c0_i32 = arith.constant 0 : i32
    %c0_i32_0 = arith.constant 0 : i32
    %c0_i32_1 = arith.constant 0 : i32
    return %c0_i32, %c0_i32_0 : i32, i32
  }
  func.func @transform_3(%arg0: i32, %arg1: i32, %arg2: i32) -> (i32, i32) {
    %c0_i32 = arith.constant 0 : i32
    %c0_i32_0 = arith.constant 0 : i32
    %c0_i32_1 = arith.constant 0 : i32
    return %c0_i32, %c0_i32_0 : i32, i32
  }
  func.func @transform_4(%arg0: i32, %arg1: i32, %arg2: i32) -> (i32, i32, i32) {
    %c0_i32 = arith.constant 0 : i32
    %c0_i32_0 = arith.constant 0 : i32
    return %arg0, %arg1, %c0_i32 : i32, i32, i32
  }
}

</mosaic_0001>

<bundles_post_ra>
// kernel: tpu_custom_call.1
= control target key start
LH: loop header
LB: loop body
LE: loop exit
PB: predicated region body
PF: predicated region fallthrough
CT: control target
= control target key end

     0   :  { %s10031_s0 = inlined_call_operand.hbm [shape: f32[2,256,128], index: 0, kind: input, shape index: {}]   ;;  %s10032_s1 = inlined_call_operand.hbm [shape: f32[2,256,128], index: 1, kind: input, shape index: {}]   ;;  %s10033_s2 = inlined_call_operand.hbm [shape: bf16[128,128], index: 2, kind: input, shape index: {}]   ;;  %s10034_s3 = inlined_call_operand.hbm [shape: bf16[128,256], index: 3, kind: input, shape index: {}]   ;;  %s10035_s4 = inlined_call_operand.hbm [shape: f32[2,256,128], index: 4, kind: output, shape index: {}]  }
   0x1   :  { %10183 = sst [smem:[#allocation165_spill]] %s10033_s2 }
   0x2   :  { %10184 = sst [smem:[#allocation166_spill]] %s10034_s3 }
   0x3   :  { %10185 = sst [smem:[#allocation167_spill]] %s10035_s4 }
   0x4   :  { %9 = vsyncpa [#allocation7], 0 }
   0x5   :  { %11 = vsyncpa [#allocation7 + $0x1], 0 }
   0x6   :  { %12 = vsyncpa [#allocation10], 0 }
   0x7   :  { %14 = vsyncpa [#allocation10 + $0x1], 0 }
   0x8   :  { %15 = vsyncpa [#allocation13], 0 }
   0x9   :  { %16 = vsyncpa [#allocation8], 0 }
   0xa   :  { %18 = vsyncpa [#allocation8 + $0x1], 0  ;;  %s6714_s15 = smov 0   ;;  %s6716_s16 = smov 0  }
   0xb   :  { %s6718_s17 = smov 0   ;;  %s6720_s18 = smov 0  }
   0xc   :  { %s6722_s19 = smov 0   ;;  %s6724_s20 = smov 0  }
   0xd   :  { %s6726_s21 = smov 0   ;;  %s6728_s22 = smov 0  }
   0xe   :  { %s6730_s23 = smov 0   ;;  %s6732_s24 = smov 0  }
   0xf   :  { %s6734_s25 = smov 0   ;;  %s6736_s26 = smov 0  }
  0x10   :  { %s6738_s27 = smov 0  }
  0x11 LB: > { %10186 = sst [smem:[#allocation20_spill]] %s6627_s18  ;;  %s6778_s28 = sadd.s32 4294967295, %s6663_s27   ;;  %s6663_s27 = sphi %s6738_s27, %s24_s27   ;;  %s6659_s26 = sphi %s6736_s26, %s10656_s26   ;;  %s6655_s25 = sphi %s6734_s25, %s10655_s25   ;;  %s6651_s24 = sphi %s6732_s24, %s10654_s24   ;;  %s6647_s23 = sphi %s6730_s23, %s10653_s23   ;;  %s6643_s22 = sphi %s6728_s22, %s10642_s22   ;;  %s6639_s21 = sphi %s6726_s21, %s10652_s21   ;;  %s6635_s20 = sphi %s6724_s20, %s10651_s20   ;;  %s6631_s19 = sphi %s6722_s19, %s10650_s19   ;;  %s6627_s18 = sphi %s6720_s18, %s10649_s18   ;;  %s6623_s17 = sphi %s6718_s17, %s10648_s17   ;;  %s6619_s16 = sphi %s6716_s16, %s10647_s16   ;;  %s6615_s15 = sphi %s6714_s15, %s10646_s15  }
  0x12   : > { %10187 = sst [smem:[#allocation21_spill]] %s6639_s21  ;;  %s5251_s29 = sadd.s32 4294967294, %s6663_s27  }
  0x13   : > { %10188 = sst [smem:[#allocation22_spill]] %s6643_s22  ;;  %p65_p0 = scmp.ne.s32.totalorder %s6631_s19, %s6627_s18 }
  0x14   : > { %10189 = sst [smem:[#allocation23_spill]] %s6647_s23  ;;  %p10038_p1 = scmp.eq.s32.totalorder %s6778_s28, 0 }
  0x15   : > { %10190 = sst [smem:[#allocation24_spill]] %s6655_s25  ;;  %p93_p2 = scmp.ne.s32.totalorder %s6619_s16, %s6615_s15 }
  0x16   : > { %10191 = sst [smem:[#allocation25_spill]] %s6778_s28  ;;  %p6787_p3 = por %p10038_p1, %p65_p0 }
  0x17   : > { %p167_p4 = scmp.eq.s32.totalorder %s5251_s29, 7  ;;  %p6793_p5 = por %p93_p2, %p10038_p1 }
  0x18   : > { %s10192_s30 = scalar_select %p6787_p3, 1, 0 }
  0x19   : > { %s10193_s5 = scalar_select %p6793_p5, 1, 0 }
  0x1a   : > { %p5252_p6 = scmp.ge.s32.totalorder %s6663_s27, 1  ;;  %p6798_p7 = por %p167_p4, %p65_p0 }
  0x1b   : > { %10194 = sst [smem:[#allocation26_spill]] %s10193_s5  ;;  %p174_p8 = scmp.lt.s32.totalorder %s6663_s27, 9 }
  0x1c   : > { %s10195_s6 = scalar_select %p6798_p7, 1, 0 }
  0x1d   : > { %p6803_p9 = pnand %p5252_p6, %p174_p8  ;;  %s6665_s8 = smov [#allocation11]  }
  0x1e   : > { %10196 = sst [smem:[#allocation27_spill]] %s10195_s6  ;;  %s186_s9 = sshll.u32 %s6665_s8, 4  ;;  %s187_s9 = int_to_ptr.vmem [resolvable:$true] %s186_s9 }
  0x1f   : > { %s10197_s7 = scalar_select %p6803_p9, 1, 0 }
  0x20   : > { %p5828_p10 = pneg %p6803_p9  ;;  %s6666_s11 = smov [#allocation12]  }
  0x21   : > { %s199_s12 = sshll.u32 %s6666_s11, 4  ;;  %s10199_s2 = sld [smem:[#allocation165_spill]]  ;;  %s6815_s12 = int_to_ptr.vmem [resolvable:$true] %s199_s12 }
  0x22   : > { %p6811_p11 = pnand %p5828_p10, %p10038_p1 }
  0x24   : > { %p6399_p13 = pneg %p6811_p11 }
  0x27   : > { %s6397_s15 = scalar_lea.hbm %s10199_s2, 1024 }
  0x28   : > { %p6398_p12 = scmp.ne.s32.totalorder %s10199_s2, %s6397_s15  ;;  %p6404_p4 = scmp.lt.u32.totalorder %s6397_s15, %s10199_s2 }
  0x2a   : > { %p6400_p0 = pnand %p6399_p13, %p6398_p12 }
  0x2c   : > { %p6401_p2 = pneg %p6400_p0 }
  0x2e   : > { %p6406_p6 = pnand %p6404_p4, %p6401_p2 }
  0x30   : > { %6409 = shalt.err (!%p6406_p6)
}
  0x31   : > { %s6410_s11 = scalar_lea.vmem %s187_s9, 1024  ;;  %p6418_p7 = scmp.lt.s32.totalorder %s187_s9, %s187_s9 }
  0x32   : > { %p6411_p8 = scmp.ne.s32.totalorder %s187_s9, %s6410_s11  ;;  %p6419_p5 = scmp.lt.s32.totalorder %s6410_s11, %s6410_s11 }
  0x34   : > { %p6413_p10 = pnand %p6411_p8, %p6399_p13  ;;  %p6420_p3 = por %p6419_p5, %p6418_p7 }
  0x36   : > { %p6414_p1 = pneg %p6413_p10 }
  0x38   : > { %p6421_p9 = pnand %p6420_p3, %p6414_p1 }
  0x3a   : > { %6424 = shalt.err (!%p6421_p9)
}
  0x3b   : > { %s6667_s13 = smov 64   ;;  %s6668_s14 = smov 4  }
  0x3c   : > { %5831 = dma.hbm_to_vmem [thread:$0]  (!%p6811_p11), %s10199_s2, 1024, %s187_s9, [#allocation10], %s6667_s13, %s6667_s13, %s6668_s14  }
  0x3d   : > { %s10200_s3 = sld [smem:[#allocation166_spill]] }
  0x43   : > { %s6425_s8 = scalar_lea.hbm %s10200_s3, 2048 }
  0x44   : > { %p6426_p12 = scmp.ne.s32.totalorder %s10200_s3, %s6425_s8  ;;  %p6432_p5 = scmp.lt.u32.totalorder %s6425_s8, %s10200_s3 }
  0x46   : > { %p6428_p1 = pnand %p6426_p12, %p6399_p13 }
  0x48   : > { %p6429_p3 = pneg %p6428_p1 }
  0x4a   : > { %p6434_p7 = pnand %p6432_p5, %p6429_p3 }
  0x4c   : > { %6437 = shalt.err (!%p6434_p7)
}
  0x4d   : > { %s6438_s9 = scalar_lea.vmem %s6815_s12, 2048  ;;  %p6446_p4 = scmp.lt.s32.totalorder %s6815_s12, %s6815_s12 }
  0x4e   : > { %p6439_p9 = scmp.ne.s32.totalorder %s6815_s12, %s6438_s9  ;;  %p6447_p6 = scmp.lt.s32.totalorder %s6438_s9, %s6438_s9 }
  0x50   : > { %p6441_p0 = pnand %p6439_p9, %p6399_p13  ;;  %p6448_p8 = por %p6447_p6, %p6446_p4 }
  0x52   : > { %p6442_p2 = pneg %p6441_p0 }
  0x54   : > { %p6449_p10 = pnand %p6448_p8, %p6442_p2 }
  0x56   : > { %6452 = shalt.err (!%p6449_p10)
}
  0x57   : > { %s10043_s4 = smov 128   ;;  %s10045_s22 = smov 8  }
  0x58   : > { %5834 = dma.hbm_to_vmem [thread:$0]  (!%p6811_p11), %s10200_s3, 2048, %s6815_s12, [#allocation13], %s10043_s4, %s10043_s4, %s10045_s22  }
  0x59   : > { %p161_p13 = scmp.eq.s32.totalorder %s6778_s28, 7  ;;  %s36_s14 = sadd.s32 1, %s6651_s24 }
  0x5a   : > { %p37_p12 = scmp.ge.s32.totalorder %s36_s14, 2  ;;  %s39_s18 = sadd.s32 1, %s6655_s25 }
  0x5b   : > { %s43_s6 = sadd.s32 1, %s6659_s26  ;;  %p59_p1 = scmp.ne.s32.totalorder %s6635_s20, %s6631_s19 }
  0x5c   : > { %s10658_s14 = smov (%p37_p12, %s36_s14), 0  ;;  %s10660_s18 = smov (!%p37_p12, %s39_s18), %s6655_s25 }
  0x5d   : > { %10201 = sst [smem:[#allocation28_spill]] %s10658_s14  ;;  %s52_s10 = sadd.s32 1, %s6635_s20 }
  0x5e   : > { %p10057_p3 = scmp.eq.s32.totalorder %s6663_s27, 0  ;;  %p41_p11 = scmp.ge.s32.totalorder %s10660_s18, 2 }
  0x5f   : > { %p6878_p5 = por %p161_p13, %p59_p1  ;;  %s76_s29 = ssub.s32 %s6651_s24, %s10658_s14 }
  0x60   : > { %p6884_p7 = por %p10057_p3, %p59_p1  ;;  %s10662_s18 = smov (%p41_p11, %s10660_s18), 0 }
  0x61   : > { %s10202_s12 = scalar_select %p6878_p5, 1, 0 }
  0x62   : > { %10205 = sst [smem:[#allocation30_spill]] %s10662_s18  ;;  %s10664_s6 = smov (!%p41_p11, %s43_s6), %s6659_s26 }
  0x63   : > { %10203 = sst [smem:[#allocation29_spill]] %s10202_s12  ;;  %p10056_p9 = scmp.lt.s32.totalorder %s6663_s27, 8 }
  0x64   : > { %s213_s8 = sand.u32 1, %s6635_s20   ;;  %p45_p0 = scmp.ge.s32.totalorder %s10664_s6, 2 }
  0x65   : > { %s48_s11 = ssub.s32 %s6655_s25, %s10662_s18  ;;  %s5256_s9 = sshll.u32 %s213_s8, 7 }
  0x66   : > { %s5257_s23 = sshll.u32 %s6655_s25, 4  ;;  %s10666_s6 = smov (%p45_p0, %s10664_s6), 0 }
  0x67   : > { %s5258_s13 = sshll.u32 %s6659_s26, 5  ;;  %s47_s4 = ssub.s32 %s6659_s26, %s10666_s6 }
  0x68   : > { %s223_s22 = sadd.s32 %s5258_s13, %s5257_s23  ;;  %s49_s2 = sor.u32 %s48_s11, %s47_s4 }
  0x69   : > { %p50_p2 = scmp.eq.s32.totalorder %s49_s2, 0  ;;  %s6903_s3 = sor.u32 %s76_s29, %s47_s4 }
  0x6a   : > { %s5259_s14 = sshll.u32 %s223_s22, 7  ;;  %s217_s12 = scalar_lea.vmem [#allocation6], %s5256_s9 }
  0x6b   : > { %s226_s21 = sshll.u32 %s217_s12, 4  ;;  %s6911_s25 = scalar_lea.hbm %s10031_s0, %s5259_s14  ;;  %s6913_s21 = int_to_ptr.vmem [resolvable:$true] %s226_s21 }
  0x6c   : > { %s6906_s18 = scalar_select %p50_p2, %s6635_s20, %s52_s10  }
  0x6d   : > { %p6919_p4 = pnand %p10056_p9, %p6884_p7  ;;  %s5261_s4 = sshll.u32 %s6651_s24, 4 }
  0x6e   : > { %s6924_s22 = sadd.s32 %s5261_s4, %s5258_s13  ;;  %s6927_s28 = scalar_lea.sflag [#allocation7], %s213_s8 }
  0x6f   : > { %s6453_s5 = scalar_lea.hbm %s6911_s25, 2048  ;;  %p6455_p10 = pneg %p6919_p4 }
  0x70   : > { %p6454_p8 = scmp.ne.s32.totalorder %s6911_s25, %s6453_s5  ;;  %s6458_s12 = scalar_lea.hbm %s10031_s0, 8192 }
  0x71   : > { %p6459_p1 = scmp.lt.u32.totalorder %s6911_s25, %s10031_s0  ;;  %p6460_p11 = scmp.lt.u32.totalorder %s6458_s12, %s6453_s5 }
  0x72   : > { %p6456_p13 = pnand %p6455_p10, %p6454_p8  ;;  %p6462_p0 = scmp.lt.u32.totalorder %s6453_s5, %s6911_s25 }
  0x73   : > { %p6461_p7 = por %p6460_p11, %p6459_p1 }
  0x74   : > { %p6457_p12 = pneg %p6456_p13 }
  0x75   : > { %p6463_p2 = por %p6462_p0, %p6461_p7 }
  0x77   : > { %p6464_p9 = pnand %p6463_p2, %p6457_p12 }
  0x79   : > { %6467 = shalt.err (!%p6464_p9)
}
  0x7a   : > { %s6468_s8 = scalar_lea.vmem %s6913_s21, 2048  ;;  %s6671_s11 = smov [#allocation6]  }
  0x7b   : > { %p6469_p8 = scmp.ne.s32.totalorder %s6913_s21, %s6468_s8  ;;  %s6473_s9 = sshll.u32 %s6671_s11, 4  ;;  %s6474_s9 = int_to_ptr.vmem [resolvable:$false] %s6473_s9 }
  0x7c   : > { %s6475_s23 = scalar_lea.vmem %s6474_s9, 4096  ;;  %p6476_p6 = scmp.lt.s32.totalorder %s6913_s21, %s6474_s9 }
  0x7d   : > { %p6471_p13 = pnand %p6469_p8, %p6455_p10  ;;  %p6477_p1 = scmp.lt.s32.totalorder %s6475_s23, %s6468_s8 }
  0x7f   : > { %p6472_p3 = pneg %p6471_p13  ;;  %p6478_p11 = por %p6477_p1, %p6476_p6 }
  0x81   : > { %p6479_p7 = pnand %p6478_p11, %p6472_p3 }
  0x83   : > { %6482 = shalt.err (!%p6479_p7)
}
  0x84   : > { %s10207_s13 = smov 8   ;;  %s10208_s4 = smov 128  }
  0x85   : > { %5838 = dma.hbm_to_vmem [thread:$0]  (!%p6919_p4), %s6911_s25, 2048, %s6913_s21, %s6927_s28, %s10208_s4, %s10208_s4, %s10207_s13  }
  0x86   : > { %s5263_s5 = sshll.u32 %s6924_s22, 7  ;;  %s80_s14 = sadd.s32 1, %s6623_s17 }
  0x87   : > { %p87_p3 = scmp.ne.s32.totalorder %s6623_s17, %s6619_s16  ;;  %p10209_p9 = scmp.eq.s32.totalorder %s6903_s3, 0 }
  0x88   : > { %p10210_p6 = scmp.eq.s32.totalorder %s6663_s27, 0  ;;  %s236_s10 = sand.u32 1, %s6663_s27  }
  0x89   : > { %s6965_s2 = scalar_select %p10209_p9, %s6623_s17, %s80_s14  }
  0x8a   : > { %p89_p10 = por %p87_p3, %p10210_p6  ;;  %s6973_s29 = scalar_lea.hbm %s10032_s1, %s5263_s5 }
  0x8b   : > { %s238_s8 = sand.u32 1, %s6623_s17   ;;  %p10211_p4 = scmp.lt.s32.totalorder %s6663_s27, 8 }
  0x8c   : > { %s5260_s21 = sshll.u32 %s238_s8, 7  ;;  %s6984_s28 = scalar_lea.sflag [#allocation10], %s236_s10 }
  0x8d   : > { %p6978_p12 = pnand %p10211_p4, %p89_p10  ;;  %s240_s3 = scalar_lea.vmem [#allocation9], %s5260_s21 }
  0x8e   : > { %s249_s22 = sshll.u32 %s240_s3, 4  ;;  %s6483_s11 = scalar_lea.hbm %s6973_s29, 2048  ;;  %s6982_s22 = int_to_ptr.vmem [resolvable:$true] %s249_s22 }
  0x8f   : > { %p6484_p0 = scmp.ne.s32.totalorder %s6973_s29, %s6483_s11  ;;  %p6485_p2 = pneg %p6978_p12 }
  0x90   : > { %s6488_s5 = scalar_lea.hbm %s10032_s1, 8192  ;;  %p6489_p1 = scmp.lt.u32.totalorder %s6973_s29, %s10032_s1 }
  0x91   : > { %p6486_p8 = pnand %p6485_p2, %p6484_p0  ;;  %p6490_p11 = scmp.lt.u32.totalorder %s6488_s5, %s6483_s11 }
  0x92   : > { %p6492_p3 = scmp.lt.u32.totalorder %s6483_s11, %s6973_s29 }
  0x93   : > { %p6487_p13 = pneg %p6486_p8  ;;  %p6491_p7 = por %p6490_p11, %p6489_p1 }
  0x95   : > { %p6493_p9 = por %p6492_p3, %p6491_p7 }
  0x97   : > { %p6494_p6 = pnand %p6493_p9, %p6487_p13 }
  0x99   : > { %6497 = shalt.err (!%p6494_p6)
}
  0x9a   : > { %s6498_s10 = scalar_lea.vmem %s6982_s22, 2048  ;;  %s6672_s15 = smov [#allocation9]  }
  0x9b   : > { %p6499_p10 = scmp.ne.s32.totalorder %s6982_s22, %s6498_s10  ;;  %s6503_s8 = sshll.u32 %s6672_s15, 4  ;;  %s6504_s8 = int_to_ptr.vmem [resolvable:$false] %s6503_s8 }
  0x9c   : > { %s6505_s21 = scalar_lea.vmem %s6504_s8, 4096  ;;  %p6506_p8 = scmp.lt.s32.totalorder %s6982_s22, %s6504_s8 }
  0x9d   : > { %p6501_p4 = pnand %p6499_p10, %p6485_p2  ;;  %p6507_p1 = scmp.lt.s32.totalorder %s6505_s21, %s6498_s10 }
  0x9f   : > { %p6502_p0 = pneg %p6501_p4  ;;  %p6508_p11 = por %p6507_p1, %p6506_p8 }
  0xa1   : > { %p6509_p7 = pnand %p6508_p11, %p6502_p0 }
  0xa3   : > { %6512 = shalt.err (!%p6509_p7)
}
  0xa4   : > { %5841 = dma.hbm_to_vmem [thread:$0]  (!%p6978_p12), %s6973_s29, 2048, %s6982_s22, %s6984_s28, %s10208_s4, %s10208_s4, %s10207_s13  }
  0xa5   : > { %p10213_p2 = scmp.ne.s32.totalorder %s10197_s7, 0 }
  0xa7   : > { %261 = sbr.rel (%p10213_p2) target bundleno = 3386 (0xd3a), region = 36 }
  0xae   : > { %s7018_s3 = sand.u32 1, %s6631_s19   ;;  %p10214_p13 = scmp.ne.s32.totalorder %s10192_s30, 0 }
  0xaf   : > { %s5265_s11 = sshll.u32 %s7018_s3, 7  ;;  %s264_s9 = scalar_lea.sflag [#allocation7], %s7018_s3 }
  0xb0   : > { %s7022_s23 = scalar_lea.vmem [#allocation6], %s5265_s11 }
  0xb1   : > { %6594 = dma.done.wait (%p10214_p13), %s264_s9, 2048  }
  0xb2   : > { %6596 = vsyncadd (%p10214_p13), %s264_s9, 4294965248  ;;  %s10215_s25 = sld [smem:[#allocation25_spill]]  ;;  %s10216_s13 = sld [smem:[#allocation26_spill]] }
  0xb3   : > { %s274_s4 = sand.u32 1, %s6619_s16  }
  0xb4   : > { %s5266_s29 = sshll.u32 %s274_s4, 7 }
  0xb5   : > { %s7030_s28 = scalar_lea.vmem [#allocation9], %s5266_s29 }
  0xb8   : > { %s272_s7 = sand.u32 1, %s10215_s25   ;;  %p10217_p12 = scmp.ne.s32.totalorder %s10216_s13, 0 }
  0xb9   : > { %s273_s22 = scalar_lea.sflag [#allocation10], %s272_s7 }
  0xba   : > { %6598 = dma.done.wait (%p10217_p12), %s273_s22, 2048  }
  0xbb   : > { %6600 = vsyncadd (%p10217_p12), %s273_s22, 4294965248  ;;  %p10218_p3 = scmp.eq.s32.totalorder %s10215_s25, 0 }
  0xbd   : > { %6602 = dma.done.wait (%p10218_p3), [#allocation10], 1024   ;;  %p10219_p9 = pmov %p10218_p3 }
  0xbe   : > { %p10220_p6 = pmov %p10218_p3 }
  0xbf   : > { %6604 = vsyncadd (%p10219_p9), [#allocation10], 4294966272 }
  0xc0   : > { %6606 = dma.done.wait (%p10220_p6), [#allocation13], 2048   ;;  %p10221_p10 = pmov %p10218_p3 }
  0xc1   : > { %s7044_s30 = scalar_lea.vmem [#allocation14], %s5265_s11  ;;  %s10222_s5 = sld [smem:[#allocation21_spill]] }
  0xc2   : > { %6608 = vsyncadd (%p10221_p10), [#allocation13], 4294965248 }
  0xc7   : > { %p5270_p4 = scmp.ne.s32.totalorder %s10222_s5, 0 }
  0xc8   : > { %v5977_v0 = vld [vmem:[#allocation11] sm:$0xff] (!%p5270_p4)   ;;  %v5978_v1 = vld [vmem:[#allocation11 + $0x8] sm:$0xff] (!%p5270_p4)   ;;  %v5979_v2 = vld [vmem:[#allocation11 + $0x10] sm:$0xff] (!%p5270_p4)   ;;  %vm531_vm0 = vcmask (!%p5270_p4), 261120   ;;  %s6673_s14 = smov (!%p5270_p4), 96   ;;  %s6674_s12 = smov (!%p5270_p4), 64  }
  0xc9   : > { %321 = sbr.rel (%p5270_p4) target bundleno = 611 (0x263), region = 56  ;;  %5478 = vmatprep.subr.bf16.mxu0 (!%p5270_p4), %v5977_v0  ;;  %5766 = vmatprep.subr.bf16.mxu1 (!%p5270_p4), %v5977_v0  ;;  %v5980_v3 = vld [vmem:[#allocation11 + $0x18] sm:$0xff] (!%p5270_p4)   ;;  %v322_v4 = vld [vmem:[%s7022_s23] sm:$0xff] (!%p5270_p4)  ;;  %v323_v5 = vld [vmem:[%s7022_s23 + $0x8] sm:$0xff] (!%p5270_p4)  ;;  %s6675_s10 = smov (!%p5270_p4), 32   ;;  %vm647_vm1 = vcmask (!%p5270_p4), 7168  }
  0xca   : > { %5479 = vmatpush3.bf16.msra.mxu0 (!%p5270_p4), %v5977_v0  ;;  %5774 = vmatpush3.bf16.msra.mxu1 (!%p5270_p4), %v5977_v0  ;;  %v330_v6 = vld [vmem:[%s7022_s23 + $0x40] sm:$0xff] (!%p5270_p4)  ;;  %v338_v7 = vpack.c.bf16 (!%p5270_p4), %v323_v5, %v322_v4  ;;  %v331_v8 = vld [vmem:[%s7022_s23 + $0x48] sm:$0xff] (!%p5270_p4)  ;;  %v5983_v12 = vld [vmem:[#allocation11 + $0x30] sm:$0xff] (!%p5270_p4)  }
  0xcb   : > { %5480 = vmatprep.subr.bf16.mxu0 (!%p5270_p4), %v5978_v1  ;;  %5767 = vmatprep.subr.bf16.mxu1 (!%p5270_p4), %v5978_v1  ;;  %v342_v9 = vpack.c.bf16 (!%p5270_p4), %v331_v8, %v330_v6  ;;  %v5981_v10 = vld [vmem:[#allocation11 + $0x20] sm:$0xff] (!%p5270_p4)   ;;  %v5982_v11 = vld [vmem:[#allocation11 + $0x28] sm:$0xff] (!%p5270_p4)   ;;  %v5984_v13 = vld [vmem:[#allocation11 + $0x38] sm:$0xff] (!%p5270_p4)   ;;  %v6676_v8 = vmov (!%p5270_p4), -inf  }
  0xcc   : > { %5494 = vmatprep.mubr.bf16.mxu0 (!%p5270_p4), %v338_v7  ;;  %v324_v14 = vld [vmem:[%s7022_s23 + $0x10] sm:$0xff] (!%p5270_p4)  ;;  %v325_v15 = vld [vmem:[%s7022_s23 + $0x18] sm:$0xff] (!%p5270_p4)  ;;  %v326_v18 = vld [vmem:[%s7022_s23 + $0x20] sm:$0xff] (!%p5270_p4)  ;;  %648 = vst.msk [vmem:[#allocation3] sm:$0xff] (!%p5270_p4), %vm647_vm1, %v6676_v8 }
  0xcd   : > { %5502 = vmatprep.mubr.bf16.mxu1 (!%p5270_p4), %v342_v9  ;;  %v332_v16 = vld [vmem:[%s7022_s23 + $0x50] sm:$0xff] (!%p5270_p4)  ;;  %v333_v17 = vld [vmem:[%s7022_s23 + $0x58] sm:$0xff] (!%p5270_p4)  ;;  %v327_v19 = vld [vmem:[%s7022_s23 + $0x28] sm:$0xff] (!%p5270_p4)  ;;  %v339_v22 = vpack.c.bf16 (!%p5270_p4), %v325_v15, %v324_v14  ;;  %649 = vst.msk [vmem:[#allocation3 + $0x8] sm:$0xff] (!%p5270_p4), %vm647_vm1, %v6676_v8  ;;  %v6677_v9 = vmov (!%p5270_p4), 0.0  }
  0xce   : > { %5481 = vmatpush3.bf16.msra.mxu0 (!%p5270_p4), %v5978_v1  ;;  %5775 = vmatpush3.bf16.msra.mxu1 (!%p5270_p4), %v5978_v1  ;;  %v334_v20 = vld [vmem:[%s7022_s23 + $0x60] sm:$0xff] (!%p5270_p4)  ;;  %v335_v21 = vld [vmem:[%s7022_s23 + $0x68] sm:$0xff] (!%p5270_p4)  ;;  %v343_v23 = vpack.c.bf16 (!%p5270_p4), %v333_v17, %v332_v16  ;;  %v340_v24 = vpack.c.bf16 (!%p5270_p4), %v327_v19, %v326_v18  ;;  %v328_v26 = vld [vmem:[%s7022_s23 + $0x30] sm:$0xff] (!%p5270_p4)  ;;  %650 = vst.msk [vmem:[#allocation3 + $0x10] sm:$0xff] (!%p5270_p4), %vm647_vm1, %v6676_v8 }
  0xcf   : > { %5482 = vmatprep.subr.bf16.mxu0 (!%p5270_p4), %v5979_v2  ;;  %5768 = vmatprep.subr.bf16.mxu1 (!%p5270_p4), %v5979_v2  ;;  %v344_v25 = vpack.c.bf16 (!%p5270_p4), %v335_v21, %v334_v20  ;;  %v329_v27 = vld [vmem:[%s7022_s23 + $0x38] sm:$0xff] (!%p5270_p4)  ;;  %v336_v28 = vld [vmem:[%s7022_s23 + $0x70] sm:$0xff] (!%p5270_p4)  ;;  %651 = vst.msk [vmem:[#allocation3 + $0x18] sm:$0xff] (!%p5270_p4), %vm647_vm1, %v6676_v8  ;;  %652 = vst.msk [vmem:[#allocation3 + $0x20] sm:$0xff] (!%p5270_p4), %vm647_vm1, %v6676_v8 }
  0xd0   : > { %v337_v29 = vld [vmem:[%s7022_s23 + $0x78] sm:$0xff]  ;;  %v341_v30 = vpack.c.bf16 %v329_v27, %v328_v26  ;;  %653 = vst.msk [vmem:[#allocation3 + $0x28] sm:$0xff] %vm647_vm1, %v6676_v8  ;;  %654 = vst.msk [vmem:[#allocation3 + $0x30] sm:$0xff] %vm647_vm1, %v6676_v8 }
  0xd1   : > { %v345_v31 = vpack.c.bf16 %v337_v29, %v336_v28  ;;  %655 = vst.msk [vmem:[#allocation3 + $0x38] sm:$0xff] %vm647_vm1, %v6676_v8  ;;  %656 = vst.msk [vmem:[#allocation3 + $0x40] sm:$0xff] %vm647_vm1, %v6676_v8 }
  0xd2   : > { %5483 = vmatpush3.bf16.msra.mxu0 %v5979_v2  ;;  %5776 = vmatpush3.bf16.msra.mxu1 %v5979_v2  ;;  %657 = vst.msk [vmem:[#allocation3 + $0x48] sm:$0xff] %vm647_vm1, %v6676_v8  ;;  %658 = vst.msk [vmem:[#allocation3 + $0x50] sm:$0xff] %vm647_vm1, %v6676_v8 }
  0xd3   : > { %5484 = vmatprep.subr.bf16.mxu0 %v5980_v3  ;;  %5769 = vmatprep.subr.bf16.mxu1 %v5980_v3  ;;  %659 = vst.msk [vmem:[#allocation3 + $0x58] sm:$0xff] %vm647_vm1, %v6676_v8  ;;  %660 = vst.msk [vmem:[#allocation3 + $0x60] sm:$0xff] %vm647_vm1, %v6676_v8 }
  0xd4   : > { %661 = vst.msk [vmem:[#allocation3 + $0x68] sm:$0xff] %vm647_vm1, %v6676_v8  ;;  %662 = vst.msk [vmem:[#allocation3 + $0x70] sm:$0xff] %vm647_vm1, %v6676_v8 }
  0xd5   : > { %663 = vst.msk [vmem:[#allocation3 + $0x78] sm:$0xff] %vm647_vm1, %v6676_v8  ;;  %664 = vst.msk [vmem:[#allocation3 + $0x80] sm:$0xff] %vm647_vm1, %v6676_v8 }
  0xd6   : > { %5485 = vmatpush3.bf16.msra.mxu0 %v5980_v3  ;;  %5777 = vmatpush3.bf16.msra.mxu1 %v5980_v3  ;;  %665 = vst.msk [vmem:[#allocation3 + $0x88] sm:$0xff] %vm647_vm1, %v6676_v8  ;;  %666 = vst.msk [vmem:[#allocation3 + $0x90] sm:$0xff] %vm647_vm1, %v6676_v8 }
  0xd7   : > { %5486 = vmatprep.subr.bf16.mxu0 %v5981_v10  ;;  %5770 = vmatprep.subr.bf16.mxu1 %v5981_v10  ;;  %667 = vst.msk [vmem:[#allocation3 + $0x98] sm:$0xff] %vm647_vm1, %v6676_v8  ;;  %668 = vst.msk [vmem:[#allocation3 + $0xa0] sm:$0xff] %vm647_vm1, %v6676_v8 }
  0xd8   : > { %669 = vst.msk [vmem:[#allocation3 + $0xa8] sm:$0xff] %vm647_vm1, %v6676_v8  ;;  %670 = vst.msk [vmem:[#allocation3 + $0xb0] sm:$0xff] %vm647_vm1, %v6676_v8 }
  0xd9   : > { %671 = vst.msk [vmem:[#allocation3 + $0xb8] sm:$0xff] %vm647_vm1, %v6676_v8  ;;  %672 = vst.msk [vmem:[#allocation3 + $0xc0] sm:$0xff] %vm647_vm1, %v6676_v8 }
  0xda   : > { %5487 = vmatpush3.bf16.msra.mxu0 %v5981_v10  ;;  %5778 = vmatpush3.bf16.msra.mxu1 %v5981_v10  ;;  %673 = vst.msk [vmem:[#allocation3 + $0xc8] sm:$0xff] %vm647_vm1, %v6676_v8  ;;  %674 = vst.msk [vmem:[#allocation3 + $0xd0] sm:$0xff] %vm647_vm1, %v6676_v8 }
  0xdb   : > { %5488 = vmatprep.subr.bf16.mxu0 %v5982_v11  ;;  %5771 = vmatprep.subr.bf16.mxu1 %v5982_v11  ;;  %675 = vst.msk [vmem:[#allocation3 + $0xd8] sm:$0xff] %vm647_vm1, %v6676_v8  ;;  %676 = vst.msk [vmem:[#allocation3 + $0xe0] sm:$0xff] %vm647_vm1, %v6676_v8 }
  0xdc   : > { %677 = vst.msk [vmem:[#allocation3 + $0xe8] sm:$0xff] %vm647_vm1, %v6676_v8  ;;  %678 = vst.msk [vmem:[#allocation3 + $0xf0] sm:$0xff] %vm647_vm1, %v6676_v8 }
  0xdd   : > { %679 = vst.msk [vmem:[#allocation3 + $0xf8] sm:$0xff] %vm647_vm1, %v6676_v8  ;;  %680 = vst.msk [vmem:[#allocation3 + $0x100] sm:$0xff] %vm647_vm1, %v6676_v8 }
  0xde   : > { %5489 = vmatpush3.bf16.msra.mxu0 %v5982_v11  ;;  %5779 = vmatpush3.bf16.msra.mxu1 %v5982_v11  ;;  %681 = vst.msk [vmem:[#allocation3 + $0x108] sm:$0xff] %vm647_vm1, %v6676_v8  ;;  %682 = vst.msk [vmem:[#allocation3 + $0x110] sm:$0xff] %vm647_vm1, %v6676_v8 }
  0xdf   : > { %5490 = vmatprep.subr.bf16.mxu0 %v5983_v12  ;;  %5772 = vmatprep.subr.bf16.mxu1 %v5983_v12  ;;  %683 = vst.msk [vmem:[#allocation3 + $0x118] sm:$0xff] %vm647_vm1, %v6676_v8  ;;  %684 = vst.msk [vmem:[#allocation3 + $0x120] sm:$0xff] %vm647_vm1, %v6676_v8 }
  0xe0   : > { %685 = vst.msk [vmem:[#allocation3 + $0x128] sm:$0xff] %vm647_vm1, %v6676_v8  ;;  %686 = vst.msk [vmem:[#allocation3 + $0x130] sm:$0xff] %vm647_vm1, %v6676_v8 }
  0xe1   : > { %687 = vst.msk [vmem:[#allocation3 + $0x138] sm:$0xff] %vm647_vm1, %v6676_v8  ;;  %688 = vst.msk [vmem:[#allocation3 + $0x140] sm:$0xff] %vm647_vm1, %v6676_v8 }
  0xe2   : > { %5491 = vmatpush3.bf16.msra.mxu0 %v5983_v12  ;;  %5780 = vmatpush3.bf16.msra.mxu1 %v5983_v12  ;;  %689 = vst.msk [vmem:[#allocation3 + $0x148] sm:$0xff] %vm647_vm1, %v6676_v8  ;;  %690 = vst.msk [vmem:[#allocation3 + $0x150] sm:$0xff] %vm647_vm1, %v6676_v8 }
  0xe3   : > { %5492 = vmatprep.subr.bf16.mxu0 %v5984_v13  ;;  %5773 = vmatprep.subr.bf16.mxu1 %v5984_v13  ;;  %691 = vst.msk [vmem:[#allocation3 + $0x158] sm:$0xff] %vm647_vm1, %v6676_v8  ;;  %692 = vst.msk [vmem:[#allocation3 + $0x160] sm:$0xff] %vm647_vm1, %v6676_v8 }
  0xe4   : > { %693 = vst.msk [vmem:[#allocation3 + $0x168] sm:$0xff] %vm647_vm1, %v6676_v8  ;;  %694 = vst.msk [vmem:[#allocation3 + $0x170] sm:$0xff] %vm647_vm1, %v6676_v8 }
  0xe5   : > { %695 = vst.msk [vmem:[#allocation3 + $0x178] sm:$0xff] %vm647_vm1, %v6676_v8  ;;  %696 = vst.msk [vmem:[#allocation3 + $0x180] sm:$0xff] %vm647_vm1, %v6676_v8 }
  0xe6   : > { %5493 = vmatpush3.bf16.msra.mxu0 %v5984_v13  ;;  %5781 = vmatpush3.bf16.msra.mxu1 %v5984_v13  ;;  %697 = vst.msk [vmem:[#allocation3 + $0x188] sm:$0xff] %vm647_vm1, %v6676_v8  ;;  %698 = vst.msk [vmem:[#allocation3 + $0x190] sm:$0xff] %vm647_vm1, %v6676_v8 }
  0xe7   : > { %699 = vst.msk [vmem:[#allocation3 + $0x198] sm:$0xff] %vm647_vm1, %v6676_v8  ;;  %700 = vst.msk [vmem:[#allocation3 + $0x1a0] sm:$0xff] %vm647_vm1, %v6676_v8 }
  0xe8   : > { %701 = vst.msk [vmem:[#allocation3 + $0x1a8] sm:$0xff] %vm647_vm1, %v6676_v8  ;;  %702 = vst.msk [vmem:[#allocation3 + $0x1b0] sm:$0xff] %vm647_vm1, %v6676_v8 }
  0xe9   : > { %5495 = vmatmul.mubr.bf16.vlgmr.msra.gmra.mrb[0].mxu0 %v339_v22  ;;  %5503 = vmatmul.mubr.bf16.vlgmr.msra.gmra.mrb[0].mxu1 %v343_v23  ;;  %703 = vst.msk [vmem:[#allocation3 + $0x1b8] sm:$0xff] %vm647_vm1, %v6676_v8  ;;  %704 = vst.msk [vmem:[#allocation3 + $0x1c0] sm:$0xff] %vm647_vm1, %v6676_v8 }
  0xea   : > { %5498 = vmatprep.mubr.bf16.mxu0 %v340_v24  ;;  %5506 = vmatprep.mubr.bf16.mxu1 %v344_v25  ;;  %705 = vst.msk [vmem:[#allocation3 + $0x1c8] sm:$0xff] %vm647_vm1, %v6676_v8  ;;  %706 = vst.msk [vmem:[#allocation3 + $0x1d0] sm:$0xff] %vm647_vm1, %v6676_v8 }
  0xeb   : > { %707 = vst.msk [vmem:[#allocation3 + $0x1d8] sm:$0xff] %vm647_vm1, %v6676_v8  ;;  %708 = vst.msk [vmem:[#allocation3 + $0x1e0] sm:$0xff] %vm647_vm1, %v6676_v8 }
  0xec   : > { %709 = vst.msk [vmem:[#allocation3 + $0x1e8] sm:$0xff] %vm647_vm1, %v6676_v8  ;;  %710 = vst.msk [vmem:[#allocation3 + $0x1f0] sm:$0xff] %vm647_vm1, %v6676_v8 }
  0xed   : > { %711 = vst.msk [vmem:[#allocation3 + $0x1f8] sm:$0xff] %vm647_vm1, %v6676_v8  ;;  %712 = vst.msk [vmem:[#allocation4] sm:$0xff] %vm647_vm1, %v6677_v9 }
  0xee   : > { %713 = vst.msk [vmem:[#allocation4 + $0x8] sm:$0xff] %vm647_vm1, %v6677_v9  ;;  %714 = vst.msk [vmem:[#allocation4 + $0x10] sm:$0xff] %vm647_vm1, %v6677_v9 }
  0xef   : > { %715 = vst.msk [vmem:[#allocation4 + $0x18] sm:$0xff] %vm647_vm1, %v6677_v9  ;;  %716 = vst.msk [vmem:[#allocation4 + $0x20] sm:$0xff] %vm647_vm1, %v6677_v9 }
  0xf0   : > { %717 = vst.msk [vmem:[#allocation4 + $0x28] sm:$0xff] %vm647_vm1, %v6677_v9  ;;  %718 = vst.msk [vmem:[#allocation4 + $0x30] sm:$0xff] %vm647_vm1, %v6677_v9 }
  0xf1   : > { %5499 = vmatmul.mubr.bf16.gmra.mrb[4].mxu0 %v341_v30  ;;  %5507 = vmatmul.mubr.bf16.gmra.mrb[4].mxu1 %v345_v31  ;;  %719 = vst.msk [vmem:[#allocation4 + $0x38] sm:$0xff] %vm647_vm1, %v6677_v9  ;;  %720 = vst.msk [vmem:[#allocation4 + $0x40] sm:$0xff] %vm647_vm1, %v6677_v9 }
  0xf2   : > { %721 = vst.msk [vmem:[#allocation4 + $0x48] sm:$0xff] %vm647_vm1, %v6677_v9  ;;  %722 = vst.msk [vmem:[#allocation4 + $0x50] sm:$0xff] %vm647_vm1, %v6677_v9 }
  0xf3   : > { %723 = vst.msk [vmem:[#allocation4 + $0x58] sm:$0xff] %vm647_vm1, %v6677_v9  ;;  %724 = vst.msk [vmem:[#allocation4 + $0x60] sm:$0xff] %vm647_vm1, %v6677_v9 }
  0xf4   : > { %725 = vst.msk [vmem:[#allocation4 + $0x68] sm:$0xff] %vm647_vm1, %v6677_v9  ;;  %726 = vst.msk [vmem:[#allocation4 + $0x70] sm:$0xff] %vm647_vm1, %v6677_v9 }
  0xf5   : > { %727 = vst.msk [vmem:[#allocation4 + $0x78] sm:$0xff] %vm647_vm1, %v6677_v9  ;;  %728 = vst.msk [vmem:[#allocation4 + $0x80] sm:$0xff] %vm647_vm1, %v6677_v9 }
  0xf6   : > { %729 = vst.msk [vmem:[#allocation4 + $0x88] sm:$0xff] %vm647_vm1, %v6677_v9  ;;  %730 = vst.msk [vmem:[#allocation4 + $0x90] sm:$0xff] %vm647_vm1, %v6677_v9 }
  0xf7   : > { %731 = vst.msk [vmem:[#allocation4 + $0x98] sm:$0xff] %vm647_vm1, %v6677_v9  ;;  %732 = vst.msk [vmem:[#allocation4 + $0xa0] sm:$0xff] %vm647_vm1, %v6677_v9 }
  0xf8   : > { %733 = vst.msk [vmem:[#allocation4 + $0xa8] sm:$0xff] %vm647_vm1, %v6677_v9  ;;  %734 = vst.msk [vmem:[#allocation4 + $0xb0] sm:$0xff] %vm647_vm1, %v6677_v9 }
  0xf9   : > { %735 = vst.msk [vmem:[#allocation4 + $0xb8] sm:$0xff] %vm647_vm1, %v6677_v9  ;;  %736 = vst.msk [vmem:[#allocation4 + $0xc0] sm:$0xff] %vm647_vm1, %v6677_v9 }
  0xfa   : > { %737 = vst.msk [vmem:[#allocation4 + $0xc8] sm:$0xff] %vm647_vm1, %v6677_v9  ;;  %738 = vst.msk [vmem:[#allocation4 + $0xd0] sm:$0xff] %vm647_vm1, %v6677_v9 }
  0xfb   : > { %739 = vst.msk [vmem:[#allocation4 + $0xd8] sm:$0xff] %vm647_vm1, %v6677_v9  ;;  %740 = vst.msk [vmem:[#allocation4 + $0xe0] sm:$0xff] %vm647_vm1, %v6677_v9 }
  0xfc   : > { %741 = vst.msk [vmem:[#allocation4 + $0xe8] sm:$0xff] %vm647_vm1, %v6677_v9  ;;  %742 = vst.msk [vmem:[#allocation4 + $0xf0] sm:$0xff] %vm647_vm1, %v6677_v9 }
  0xfd   : > { %743 = vst.msk [vmem:[#allocation4 + $0xf8] sm:$0xff] %vm647_vm1, %v6677_v9  ;;  %744 = vst.msk [vmem:[#allocation4 + $0x100] sm:$0xff] %vm647_vm1, %v6677_v9 }
  0xfe   : > { %745 = vst.msk [vmem:[#allocation4 + $0x108] sm:$0xff] %vm647_vm1, %v6677_v9  ;;  %746 = vst.msk [vmem:[#allocation4 + $0x110] sm:$0xff] %vm647_vm1, %v6677_v9 }
  0xff   : > { %747 = vst.msk [vmem:[#allocation4 + $0x118] sm:$0xff] %vm647_vm1, %v6677_v9  ;;  %748 = vst.msk [vmem:[#allocation4 + $0x120] sm:$0xff] %vm647_vm1, %v6677_v9 }
 0x100   : > { %749 = vst.msk [vmem:[#allocation4 + $0x128] sm:$0xff] %vm647_vm1, %v6677_v9  ;;  %750 = vst.msk [vmem:[#allocation4 + $0x130] sm:$0xff] %vm647_vm1, %v6677_v9 }
 0x101   : > { %751 = vst.msk [vmem:[#allocation4 + $0x138] sm:$0xff] %vm647_vm1, %v6677_v9  ;;  %752 = vst.msk [vmem:[#allocation4 + $0x140] sm:$0xff] %vm647_vm1, %v6677_v9 }
 0x102   : > { %753 = vst.msk [vmem:[#allocation4 + $0x148] sm:$0xff] %vm647_vm1, %v6677_v9  ;;  %754 = vst.msk [vmem:[#allocation4 + $0x150] sm:$0xff] %vm647_vm1, %v6677_v9 }
 0x103   : > { %755 = vst.msk [vmem:[#allocation4 + $0x158] sm:$0xff] %vm647_vm1, %v6677_v9  ;;  %756 = vst.msk [vmem:[#allocation4 + $0x160] sm:$0xff] %vm647_vm1, %v6677_v9 }
 0x104   : > { %757 = vst.msk [vmem:[#allocation4 + $0x168] sm:$0xff] %vm647_vm1, %v6677_v9  ;;  %758 = vst.msk [vmem:[#allocation4 + $0x170] sm:$0xff] %vm647_vm1, %v6677_v9 }
 0x105   : > { %759 = vst.msk [vmem:[#allocation4 + $0x178] sm:$0xff] %vm647_vm1, %v6677_v9  ;;  %760 = vst.msk [vmem:[#allocation4 + $0x180] sm:$0xff] %vm647_vm1, %v6677_v9 }
 0x106   : > { %761 = vst.msk [vmem:[#allocation4 + $0x188] sm:$0xff] %vm647_vm1, %v6677_v9  ;;  %762 = vst.msk [vmem:[#allocation4 + $0x190] sm:$0xff] %vm647_vm1, %v6677_v9 }
 0x107   : > { %763 = vst.msk [vmem:[#allocation4 + $0x198] sm:$0xff] %vm647_vm1, %v6677_v9  ;;  %764 = vst.msk [vmem:[#allocation4 + $0x1a0] sm:$0xff] %vm647_vm1, %v6677_v9 }
 0x108   : > { %765 = vst.msk [vmem:[#allocation4 + $0x1a8] sm:$0xff] %vm647_vm1, %v6677_v9  ;;  %766 = vst.msk [vmem:[#allocation4 + $0x1b0] sm:$0xff] %vm647_vm1, %v6677_v9 }
 0x109   : > { %767 = vst.msk [vmem:[#allocation4 + $0x1b8] sm:$0xff] %vm647_vm1, %v6677_v9  ;;  %768 = vst.msk [vmem:[#allocation4 + $0x1c0] sm:$0xff] %vm647_vm1, %v6677_v9 }
 0x10a   : > { %769 = vst.msk [vmem:[#allocation4 + $0x1c8] sm:$0xff] %vm647_vm1, %v6677_v9  ;;  %770 = vst.msk [vmem:[#allocation4 + $0x1d0] sm:$0xff] %vm647_vm1, %v6677_v9 }
 0x10b   : > { %771 = vst.msk [vmem:[#allocation4 + $0x1d8] sm:$0xff] %vm647_vm1, %v6677_v9  ;;  %772 = vst.msk [vmem:[#allocation4 + $0x1e0] sm:$0xff] %vm647_vm1, %v6677_v9 }
 0x10c   : > { %773 = vst.msk [vmem:[#allocation4 + $0x1e8] sm:$0xff] %vm647_vm1, %v6677_v9  ;;  %774 = vst.msk [vmem:[#allocation4 + $0x1f0] sm:$0xff] %vm647_vm1, %v6677_v9 }
 0x10d   : > { %775 = vst.msk [vmem:[#allocation4 + $0x1f8] sm:$0xff] %vm647_vm1, %v6677_v9 }
 0x10e   : > { %776 = vst.msk [vmem:[#allocation5] sm:$0xff] %vm531_vm0, %v6677_v9  ;;  %777 = vst.msk [vmem:[#allocation5 + $0x8] sm:$0xff] %vm531_vm0, %v6677_v9 }
 0x10f   : > { %778 = vst.msk [vmem:[#allocation5 + $0x10] sm:$0xff] %vm531_vm0, %v6677_v9  ;;  %779 = vst.msk [vmem:[#allocation5 + $0x18] sm:$0xff] %vm531_vm0, %v6677_v9 }
 0x110   : > { %780 = vst.msk [vmem:[#allocation5 + $0x20] sm:$0xff] %vm531_vm0, %v6677_v9  ;;  %781 = vst.msk [vmem:[#allocation5 + $0x28] sm:$0xff] %vm531_vm0, %v6677_v9 }
 0x111   : > { %782 = vst.msk [vmem:[#allocation5 + $0x30] sm:$0xff] %vm531_vm0, %v6677_v9  ;;  %783 = vst.msk [vmem:[#allocation5 + $0x38] sm:$0xff] %vm531_vm0, %v6677_v9 }
 0x112   : > { %784 = vst.msk [vmem:[#allocation5 + $0x40] sm:$0xff] %vm531_vm0, %v6677_v9  ;;  %785 = vst.msk [vmem:[#allocation5 + $0x48] sm:$0xff] %vm531_vm0, %v6677_v9 }
 0x113   : > { %786 = vst.msk [vmem:[#allocation5 + $0x50] sm:$0xff] %vm531_vm0, %v6677_v9  ;;  %787 = vst.msk [vmem:[#allocation5 + $0x58] sm:$0xff] %vm531_vm0, %v6677_v9 }
 0x114   : > { %788 = vst.msk [vmem:[#allocation5 + $0x60] sm:$0xff] %vm531_vm0, %v6677_v9  ;;  %789 = vst.msk [vmem:[#allocation5 + $0x68] sm:$0xff] %vm531_vm0, %v6677_v9 }
 0x115   : > { %790 = vst.msk [vmem:[#allocation5 + $0x70] sm:$0xff] %vm531_vm0, %v6677_v9  ;;  %791 = vst.msk [vmem:[#allocation5 + $0x78] sm:$0xff] %vm531_vm0, %v6677_v9 }
 0x116   : > { %792 = vst.msk [vmem:[#allocation5 + $0x80] sm:$0xff] %vm531_vm0, %v6677_v9  ;;  %793 = vst.msk [vmem:[#allocation5 + $0x88] sm:$0xff] %vm531_vm0, %v6677_v9 }
 0x117   : > { %794 = vst.msk [vmem:[#allocation5 + $0x90] sm:$0xff] %vm531_vm0, %v6677_v9  ;;  %795 = vst.msk [vmem:[#allocation5 + $0x98] sm:$0xff] %vm531_vm0, %v6677_v9 }
 0x118   : > { %796 = vst.msk [vmem:[#allocation5 + $0xa0] sm:$0xff] %vm531_vm0, %v6677_v9  ;;  %797 = vst.msk [vmem:[#allocation5 + $0xa8] sm:$0xff] %vm531_vm0, %v6677_v9 }
 0x119   : > { %798 = vst.msk [vmem:[#allocation5 + $0xb0] sm:$0xff] %vm531_vm0, %v6677_v9  ;;  %799 = vst.msk [vmem:[#allocation5 + $0xb8] sm:$0xff] %vm531_vm0, %v6677_v9 }
 0x11a   : > { %800 = vst.msk [vmem:[#allocation5 + $0xc0] sm:$0xff] %vm531_vm0, %v6677_v9  ;;  %801 = vst.msk [vmem:[#allocation5 + $0xc8] sm:$0xff] %vm531_vm0, %v6677_v9 }
 0x11b   : > { %802 = vst.msk [vmem:[#allocation5 + $0xd0] sm:$0xff] %vm531_vm0, %v6677_v9  ;;  %803 = vst.msk [vmem:[#allocation5 + $0xd8] sm:$0xff] %vm531_vm0, %v6677_v9 }
 0x11c   : > { %804 = vst.msk [vmem:[#allocation5 + $0xe0] sm:$0xff] %vm531_vm0, %v6677_v9  ;;  %805 = vst.msk [vmem:[#allocation5 + $0xe8] sm:$0xff] %vm531_vm0, %v6677_v9 }
 0x11d   : > { %806 = vst.msk [vmem:[#allocation5 + $0xf0] sm:$0xff] %vm531_vm0, %v6677_v9  ;;  %807 = vst.msk [vmem:[#allocation5 + $0xf8] sm:$0xff] %vm531_vm0, %v6677_v9 }
 0x11e   : > { %808 = vst.msk [vmem:[#allocation5 + $0x100] sm:$0xff] %vm531_vm0, %v6677_v9  ;;  %809 = vst.msk [vmem:[#allocation5 + $0x108] sm:$0xff] %vm531_vm0, %v6677_v9 }
 0x11f   : > { %810 = vst.msk [vmem:[#allocation5 + $0x110] sm:$0xff] %vm531_vm0, %v6677_v9  ;;  %811 = vst.msk [vmem:[#allocation5 + $0x118] sm:$0xff] %vm531_vm0, %v6677_v9 }
 0x120   : > { %812 = vst.msk [vmem:[#allocation5 + $0x120] sm:$0xff] %vm531_vm0, %v6677_v9  ;;  %813 = vst.msk [vmem:[#allocation5 + $0x128] sm:$0xff] %vm531_vm0, %v6677_v9 }
 0x121   : > { %814 = vst.msk [vmem:[#allocation5 + $0x130] sm:$0xff] %vm531_vm0, %v6677_v9  ;;  %815 = vst.msk [vmem:[#allocation5 + $0x138] sm:$0xff] %vm531_vm0, %v6677_v9 }
 0x122   : > { %816 = vst.msk [vmem:[#allocation5 + $0x140] sm:$0xff] %vm531_vm0, %v6677_v9  ;;  %817 = vst.msk [vmem:[#allocation5 + $0x148] sm:$0xff] %vm531_vm0, %v6677_v9 }
 0x123   : > { %818 = vst.msk [vmem:[#allocation5 + $0x150] sm:$0xff] %vm531_vm0, %v6677_v9  ;;  %819 = vst.msk [vmem:[#allocation5 + $0x158] sm:$0xff] %vm531_vm0, %v6677_v9 }
 0x124   : > { %820 = vst.msk [vmem:[#allocation5 + $0x160] sm:$0xff] %vm531_vm0, %v6677_v9  ;;  %821 = vst.msk [vmem:[#allocation5 + $0x168] sm:$0xff] %vm531_vm0, %v6677_v9 }
 0x125   : > { %822 = vst.msk [vmem:[#allocation5 + $0x170] sm:$0xff] %vm531_vm0, %v6677_v9  ;;  %823 = vst.msk [vmem:[#allocation5 + $0x178] sm:$0xff] %vm531_vm0, %v6677_v9 }
 0x126   : > { %824 = vst.msk [vmem:[#allocation5 + $0x180] sm:$0xff] %vm531_vm0, %v6677_v9  ;;  %825 = vst.msk [vmem:[#allocation5 + $0x188] sm:$0xff] %vm531_vm0, %v6677_v9 }
 0x127   : > { %826 = vst.msk [vmem:[#allocation5 + $0x190] sm:$0xff] %vm531_vm0, %v6677_v9  ;;  %827 = vst.msk [vmem:[#allocation5 + $0x198] sm:$0xff] %vm531_vm0, %v6677_v9 }
 0x128   : > { %828 = vst.msk [vmem:[#allocation5 + $0x1a0] sm:$0xff] %vm531_vm0, %v6677_v9  ;;  %829 = vst.msk [vmem:[#allocation5 + $0x1a8] sm:$0xff] %vm531_vm0, %v6677_v9 }
 0x129   : > { %830 = vst.msk [vmem:[#allocation5 + $0x1b0] sm:$0xff] %vm531_vm0, %v6677_v9  ;;  %831 = vst.msk [vmem:[#allocation5 + $0x1b8] sm:$0xff] %vm531_vm0, %v6677_v9 }
 0x12a   : > { %832 = vst.msk [vmem:[#allocation5 + $0x1c0] sm:$0xff] %vm531_vm0, %v6677_v9  ;;  %833 = vst.msk [vmem:[#allocation5 + $0x1c8] sm:$0xff] %vm531_vm0, %v6677_v9 }
 0x12b   : > { %834 = vst.msk [vmem:[#allocation5 + $0x1d0] sm:$0xff] %vm531_vm0, %v6677_v9  ;;  %835 = vst.msk [vmem:[#allocation5 + $0x1d8] sm:$0xff] %vm531_vm0, %v6677_v9 }
 0x12c   : > { %836 = vst.msk [vmem:[#allocation5 + $0x1e0] sm:$0xff] %vm531_vm0, %v6677_v9  ;;  %837 = vst.msk [vmem:[#allocation5 + $0x1e8] sm:$0xff] %vm531_vm0, %v6677_v9 }
 0x12d   : > { %838 = vst.msk [vmem:[#allocation5 + $0x1f0] sm:$0xff] %vm531_vm0, %v6677_v9  ;;  %839 = vst.msk [vmem:[#allocation5 + $0x1f8] sm:$0xff] %vm531_vm0, %v6677_v9 }
 0x1bc   : > { %v5496_v32 = vpop.f32.mrb[0].mxu0  ;;  %v5504_v33 = vpop.f32.mrb[0].mxu1 }
 0x1bd   : > { %v509_v34 = vmul.f32 0.17677669, %v5496_v32  ;;  %v444_v35 = vpop.f32.mrb[1].mxu0  ;;  %v476_v36 = vpop.f32.mrb[1].mxu1  ;;  %v517_v37 = vmul.f32 0.17677669, %v5504_v33 }
 0x1be   : > { %v507_v38 = vmul.f32 0.17677669, %v444_v35  ;;  %v5497_v39 = vpop.f32.mrb[2].mxu0  ;;  %v5505_v40 = vpop.f32.mrb[2].mxu1  ;;  %v515_v45 = vmul.f32 0.17677669, %v476_v36 }
 0x1bf   : > { %v510_v41 = vmul.f32 0.17677669, %v5497_v39  ;;  %v518_v42 = vmul.f32 0.17677669, %v5505_v40  ;;  %v447_v43 = vpop.f32.mrb[3].mxu0  ;;  %v479_v44 = vpop.f32.mrb[3].mxu1 }
 0x1c0   : > { %v508_v46 = vmul.f32 0.17677669, %v447_v43  ;;  %v516_v47 = vmul.f32 0.17677669, %v479_v44 }
 0x1c1   : > { %v524_v48 = vpack.c.bf16 %v510_v41, %v509_v34  ;;  %v528_v49 = vpack.c.bf16 %v518_v42, %v517_v37 }
 0x1c2   : > { %v523_v50 = vpack.c.bf16 %v508_v46, %v507_v38  ;;  %v527_v51 = vpack.c.bf16 %v516_v47, %v515_v45 }
 0x1c3   : > { %533 = vst.msk [vmem:[#allocation2 + $0x8] sm:$0xff] %vm531_vm0, %v524_v48  ;;  %537 = vst.msk [vmem:[#allocation2 + $0x28] sm:$0xff] %vm531_vm0, %v528_v49  ;;  %558 = vrot.lane.b32.xlu1 %v528_v49, %s6673_s14  ;;  %550 = vrot.lane.b32.xlu0 %v524_v48, %s6673_s14 }
 0x1c4   : > { %532 = vst.msk [vmem:[#allocation2] sm:$0xff] %vm531_vm0, %v523_v50  ;;  %536 = vst.msk [vmem:[#allocation2 + $0x20] sm:$0xff] %vm531_vm0, %v527_v51  ;;  %v5500_v52 = vpop.f32.mrb[4].mxu0  ;;  %v5508_v53 = vpop.f32.mrb[4].mxu1 }
 0x1c5   : > { %v513_v54 = vmul.f32 0.17677669, %v5500_v52  ;;  %v460_v55 = vpop.f32.mrb[5].mxu0  ;;  %v521_v56 = vmul.f32 0.17677669, %v5508_v53  ;;  %v492_v57 = vpop.f32.mrb[5].mxu1 }
 0x1c6   : > { %v511_v58 = vmul.f32 0.17677669, %v460_v55  ;;  %v5501_v59 = vpop.f32.mrb[6].mxu0  ;;  %v519_v60 = vmul.f32 0.17677669, %v492_v57  ;;  %v5509_v61 = vpop.f32.mrb[6].mxu1 }
 0x1c7   : > { %583 = vrot.lane.b32.xlu1 %v524_v48, %s6674_s12  ;;  %548 = vrot.lane.b32.xlu0 %v523_v50, %s6673_s14  ;;  %v514_v62 = vmul.f32 0.17677669, %v5501_v59  ;;  %v463_v63 = vpop.f32.mrb[7].mxu0  ;;  %v522_v0 = vmul.f32 0.17677669, %v5509_v61  ;;  %v495_v1 = vpop.f32.mrb[7].mxu1 }
 0x1c8   : > { %v512_v2 = vmul.f32 0.17677669, %v463_v63  ;;  %v520_v3 = vmul.f32 0.17677669, %v495_v1 }
 0x1c9   : > { %v7071_v4 = vpack.c.bf16 %v514_v62, %v513_v54  ;;  %v7073_v5 = vpack.c.bf16 %v522_v0, %v521_v56 }
 0x1ca   : > { %v7075_v6 = vpack.c.bf16 %v512_v2, %v511_v58  ;;  %v7077_v7 = vpack.c.bf16 %v520_v3, %v519_v60 }
 0x1cb   : > { %591 = vrot.lane.b32.xlu1 %v528_v49, %s6674_s12  ;;  %556 = vrot.lane.b32.xlu0 %v527_v51, %s6673_s14  ;;  %535 = vst.msk [vmem:[#allocation2 + $0x18] sm:$0xff] %vm531_vm0, %v7071_v4  ;;  %539 = vst.msk [vmem:[#allocation2 + $0x38] sm:$0xff] %vm531_vm0, %v7073_v5 }
 0x1cc   : > { %534 = vst.msk [vmem:[#allocation2 + $0x10] sm:$0xff] %vm531_vm0, %v7075_v6  ;;  %538 = vst.msk [vmem:[#allocation2 + $0x30] sm:$0xff] %vm531_vm0, %v7077_v7 }
 0x1cf   : > { %616 = vrot.lane.b32.xlu1 %v524_v48, %s6675_s10  ;;  %581 = vrot.lane.b32.xlu0 %v523_v50, %s6674_s12 }
 0x1d3   : > { %624 = vrot.lane.b32.xlu1 %v528_v49, %s6675_s10  ;;  %589 = vrot.lane.b32.xlu0 %v527_v51, %s6674_s12 }
 0x1d7   : > { %614 = vrot.lane.b32.xlu0 %v523_v50, %s6675_s10  ;;  %554 = vrot.lane.b32.xlu1 %v7071_v4, %s6673_s14 }
 0x1db   : > { %622 = vrot.lane.b32.xlu0 %v527_v51, %s6675_s10  ;;  %562 = vrot.lane.b32.xlu1 %v7073_v5, %s6673_s14 }
 0x1df   : > { %560 = vrot.lane.b32.xlu0 %v7077_v7, %s6673_s14  ;;  %587 = vrot.lane.b32.xlu1 %v7071_v4, %s6674_s12 }
 0x1e3   : > { %595 = vrot.lane.b32.xlu1 %v7073_v5, %s6674_s12  ;;  %585 = vrot.lane.b32.xlu0 %v7075_v6, %s6674_s12 }
 0x1e7   : > { %620 = vrot.lane.b32.xlu1 %v7071_v4, %s6675_s10  ;;  %593 = vrot.lane.b32.xlu0 %v7077_v7, %s6674_s12 }
 0x1eb   : > { %618 = vrot.lane.b32.xlu0 %v7075_v6, %s6675_s10  ;;  %552 = vrot.lane.b32.xlu1 %v7075_v6, %s6673_s14 }
 0x1ef   : > { %626 = vrot.lane.b32.xlu0 %v7077_v7, %s6675_s10  ;;  %628 = vrot.lane.b32.xlu1 %v7073_v5, %s6675_s10 }
 0x235   : > { %v559_v10 = vpop.permute.xlu1 %558  ;;  %v551_v11 = vpop.permute.xlu0 %550 }
 0x236   : > { %578 = vst.msk [vmem:[#allocation2 + $0x68] sm:$0xff] %vm531_vm0, %v559_v10  ;;  %574 = vst.msk [vmem:[#allocation2 + $0x48] sm:$0xff] %vm531_vm0, %v551_v11 }
 0x239   : > { %v584_v12 = vpop.permute.xlu1 %583  ;;  %v549_v13 = vpop.permute.xlu0 %548 }
 0x23a   : > { %607 = vst.msk [vmem:[#allocation2 + $0x88] sm:$0xff] %vm531_vm0, %v584_v12  ;;  %573 = vst.msk [vmem:[#allocation2 + $0x40] sm:$0xff] %vm531_vm0, %v549_v13 }
 0x23d   : > { %v592_v14 = vpop.permute.xlu1 %591  ;;  %v557_v15 = vpop.permute.xlu0 %556 }
 0x23e   : > { %611 = vst.msk [vmem:[#allocation2 + $0xa8] sm:$0xff] %vm531_vm0, %v592_v14  ;;  %577 = vst.msk [vmem:[#allocation2 + $0x60] sm:$0xff] %vm531_vm0, %v557_v15 }
 0x241   : > { %v617_v16 = vpop.permute.xlu1 %616  ;;  %v582_v17 = vpop.permute.xlu0 %581 }
 0x242   : > { %640 = vst.msk [vmem:[#allocation2 + $0xc8] sm:$0xff] %vm531_vm0, %v617_v16  ;;  %606 = vst.msk [vmem:[#allocation2 + $0x80] sm:$0xff] %vm531_vm0, %v582_v17 }
 0x245   : > { %v625_v18 = vpop.permute.xlu1 %624  ;;  %v590_v19 = vpop.permute.xlu0 %589 }
 0x246   : > { %644 = vst.msk [vmem:[#allocation2 + $0xe8] sm:$0xff] %vm531_vm0, %v625_v18  ;;  %610 = vst.msk [vmem:[#allocation2 + $0xa0] sm:$0xff] %vm531_vm0, %v590_v19 }
 0x249   : > { %v615_v20 = vpop.permute.xlu0 %614  ;;  %v555_v21 = vpop.permute.xlu1 %554 }
 0x24a   : > { %639 = vst.msk [vmem:[#allocation2 + $0xc0] sm:$0xff] %vm531_vm0, %v615_v20  ;;  %576 = vst.msk [vmem:[#allocation2 + $0x58] sm:$0xff] %vm531_vm0, %v555_v21 }
 0x24d   : > { %v623_v22 = vpop.permute.xlu0 %622  ;;  %v563_v23 = vpop.permute.xlu1 %562 }
 0x24e   : > { %643 = vst.msk [vmem:[#allocation2 + $0xe0] sm:$0xff] %vm531_vm0, %v623_v22  ;;  %580 = vst.msk [vmem:[#allocation2 + $0x78] sm:$0xff] %vm531_vm0, %v563_v23 }
 0x251   : > { %v561_v24 = vpop.permute.xlu0 %560  ;;  %v588_v25 = vpop.permute.xlu1 %587 }
 0x252   : > { %579 = vst.msk [vmem:[#allocation2 + $0x70] sm:$0xff] %vm531_vm0, %v561_v24  ;;  %609 = vst.msk [vmem:[#allocation2 + $0x98] sm:$0xff] %vm531_vm0, %v588_v25 }
 0x255   : > { %v596_v26 = vpop.permute.xlu1 %595  ;;  %v586_v27 = vpop.permute.xlu0 %585 }
 0x256   : > { %613 = vst.msk [vmem:[#allocation2 + $0xb8] sm:$0xff] %vm531_vm0, %v596_v26  ;;  %608 = vst.msk [vmem:[#allocation2 + $0x90] sm:$0xff] %vm531_vm0, %v586_v27 }
 0x259   : > { %v621_v28 = vpop.permute.xlu1 %620  ;;  %v594_v29 = vpop.permute.xlu0 %593 }
 0x25a   : > { %642 = vst.msk [vmem:[#allocation2 + $0xd8] sm:$0xff] %vm531_vm0, %v621_v28  ;;  %612 = vst.msk [vmem:[#allocation2 + $0xb0] sm:$0xff] %vm531_vm0, %v594_v29 }
 0x25d   : > { %v619_v30 = vpop.permute.xlu0 %618  ;;  %v553_v31 = vpop.permute.xlu1 %552 }
 0x25e   : > { %641 = vst.msk [vmem:[#allocation2 + $0xd0] sm:$0xff] %vm531_vm0, %v619_v30  ;;  %575 = vst.msk [vmem:[#allocation2 + $0x50] sm:$0xff] %vm531_vm0, %v553_v31 }
 0x261   : > { %v627_v32 = vpop.permute.xlu0 %626  ;;  %v629_v33 = vpop.permute.xlu1 %628 }
 0x262   : > { %645 = vst.msk [vmem:[#allocation2 + $0xf0] sm:$0xff] %vm531_vm0, %v627_v32  ;;  %646 = vst.msk [vmem:[#allocation2 + $0xf8] sm:$0xff] %vm531_vm0, %v629_v33 }
 0x263 PF: > { %v5987_v34 = vld [vmem:[#allocation12 + $0x4] ss:$8 sps:$4 sm:$0xff]   ;;  %v5989_v35 = vld [vmem:[#allocation12] ss:$8 sps:$4 sm:$0xff]   ;;  %v6678_v36 = vmov 0   ;;  %v842_v54 = vld [vmem:[%s7030_s28 + $0x10] sm:$0xff] }
 0x264   : > { %992 = vmatprep.mubr.bf16.mxu0 %v6678_v36  ;;  %5985 = vset.pattern.permute.xlu1 %v6678_v36  ;;  %v5990_v37 = vld [vmem:[#allocation12 + $0x14] ss:$8 sps:$4 sm:$0xff]   ;;  %v5992_v38 = vld [vmem:[#allocation12 + $0x10] ss:$8 sps:$4 sm:$0xff]   ;;  %v5993_v39 = vld [vmem:[#allocation12 + $0x24] ss:$8 sps:$4 sm:$0xff]  }
 0x265   : > { %960 = vmatprep.subr.bf16.mxu0 %v5987_v34  ;;  %5986 = vset.pattern.permute.xlu0 %v6678_v36  ;;  %v5995_v40 = vld [vmem:[#allocation12 + $0x20] ss:$8 sps:$4 sm:$0xff]   ;;  %v5996_v41 = vld [vmem:[#allocation12 + $0x34] ss:$8 sps:$4 sm:$0xff]   ;;  %v5998_v42 = vld [vmem:[#allocation12 + $0x30] ss:$8 sps:$4 sm:$0xff]  }
 0x266   : > { %961 = vmatpush1.bf16.msra.mxu0 %v5989_v35  ;;  %v5999_v43 = vld [vmem:[#allocation12 + $0x44] ss:$8 sps:$4 sm:$0xff]   ;;  %v6001_v44 = vld [vmem:[#allocation12 + $0x40] ss:$8 sps:$4 sm:$0xff]   ;;  %v6002_v45 = vld [vmem:[#allocation12 + $0x54] ss:$8 sps:$4 sm:$0xff]  }
 0x267   : > { %962 = vmatprep.subr.bf16.mxu0 %v5990_v37  ;;  %v6004_v46 = vld [vmem:[#allocation12 + $0x50] ss:$8 sps:$4 sm:$0xff]   ;;  %v6005_v47 = vld [vmem:[#allocation12 + $0x64] ss:$8 sps:$4 sm:$0xff]   ;;  %v6007_v48 = vld [vmem:[#allocation12 + $0x60] ss:$8 sps:$4 sm:$0xff]  }
 0x268   : > { %v6008_v49 = vld [vmem:[#allocation12 + $0x74] ss:$8 sps:$4 sm:$0xff]   ;;  %v6010_v50 = vld [vmem:[#allocation12 + $0x70] ss:$8 sps:$4 sm:$0xff]   ;;  %v840_v51 = vld [vmem:[%s7030_s28] sm:$0xff]  ;;  %vm1097_vm2 = vcmask 261120  }
 0x269   : > { %v841_v52 = vld [vmem:[%s7030_s28 + $0x8] sm:$0xff]  ;;  %v843_v55 = vld [vmem:[%s7030_s28 + $0x18] sm:$0xff]  ;;  %v844_v57 = vld [vmem:[%s7030_s28 + $0x20] sm:$0xff]  ;;  %s6679_s15 = smov 96   ;;  %vm1563_vm3 = vcmask 7168   ;;  %s6680_s8 = smov 64  }
 0x26a   : > { %963 = vmatpush1.bf16.msra.mxu0 %v5992_v38  ;;  %v856_v53 = vpack.c.bf16 %v841_v52, %v840_v51  ;;  %v857_v56 = vpack.c.bf16 %v843_v55, %v842_v54  ;;  %v845_v58 = vld [vmem:[%s7030_s28 + $0x28] sm:$0xff]  ;;  %v846_v60 = vld [vmem:[%s7030_s28 + $0x30] sm:$0xff]  ;;  %v847_v61 = vld [vmem:[%s7030_s28 + $0x38] sm:$0xff]  ;;  %s6681_s21 = smov 32   ;;  %s10631_s11 = sld [smem:[#allocation21_spill]] }
 0x26b   : > { %964 = vmatprep.subr.bf16.mxu0 %v5993_v39  ;;  %v858_v59 = vpack.c.bf16 %v845_v58, %v844_v57  ;;  %v859_v62 = vpack.c.bf16 %v847_v61, %v846_v60  ;;  %v848_v63 = vld [vmem:[%s7030_s28 + $0x40] sm:$0xff]  ;;  %v849_v0 = vld [vmem:[%s7030_s28 + $0x48] sm:$0xff]  ;;  %v850_v2 = vld [vmem:[%s7030_s28 + $0x50] sm:$0xff] }
 0x26c   : > { %v860_v1 = vpack.c.bf16 %v849_v0, %v848_v63  ;;  %v851_v3 = vld [vmem:[%s7030_s28 + $0x58] sm:$0xff]  ;;  %v852_v5 = vld [vmem:[%s7030_s28 + $0x60] sm:$0xff]  ;;  %v853_v6 = vld [vmem:[%s7030_s28 + $0x68] sm:$0xff] }
 0x26d   : > { %v861_v4 = vpack.c.bf16 %v851_v3, %v850_v2  ;;  %v862_v7 = vpack.c.bf16 %v853_v6, %v852_v5  ;;  %v854_v8 = vld [vmem:[%s7030_s28 + $0x70] sm:$0xff]  ;;  %v855_v9 = vld [vmem:[%s7030_s28 + $0x78] sm:$0xff]  ;;  %v1089_v11 = vld [vmem:[#allocation2] sm:$0xff] }
 0x26e   : > { %965 = vmatpush1.bf16.msra.mxu0 %v5995_v40  ;;  %v863_v10 = vpack.c.bf16 %v855_v9, %v854_v8  ;;  %5526 = vmatprep.mubr.msk.bf16.mxu1 %vm1097_vm2, %v1089_v11  ;;  %v1091_v5 = vld [vmem:[#allocation2 + $0x10] sm:$0xff]  ;;  %v1092_v6 = vld [vmem:[#allocation2 + $0x18] sm:$0xff]  ;;  %v1094_v8 = vld [vmem:[#allocation2 + $0x28] sm:$0xff] }
 0x26f   : > { %966 = vmatprep.subr.bf16.mxu0 %v5996_v41  ;;  %v1095_v9 = vld [vmem:[#allocation2 + $0x30] sm:$0xff]  ;;  %v1846_v11 = vld [vmem:[#allocation2 + $0x40] sm:$0xff] }
 0x270   : > { %p5327_p0 = scmp.ne.s32.totalorder %s10631_s11, 1 }
 0x271   : > { %s6683_s9 = smov (!%p5327_p0), 32   ;;  %s6684_s23 = smov (!%p5327_p0), 64   ;;  %vm5043_vm4 = vcmask (!%p5327_p0), 523264   ;;  %vm5060_vm5 = vcmask (!%p5327_p0), 785408  }
 0x272   : > { %967 = vmatpush1.bf16.msra.mxu0 %v5998_v42  ;;  %s6685_s25 = smov (!%p5327_p0), 96  }
 0x273   : > { %968 = vmatprep.subr.bf16.mxu0 %v5999_v43 }
 0x276   : > { %969 = vmatpush1.bf16.msra.mxu0 %v6001_v44 }
 0x277   : > { %970 = vmatprep.subr.bf16.mxu0 %v6002_v45 }
 0x27a   : > { %971 = vmatpush1.bf16.msra.mxu0 %v6004_v46 }
 0x27b   : > { %972 = vmatprep.subr.bf16.mxu0 %v6005_v47 }
 0x27e   : > { %973 = vmatpush1.bf16.msra.mxu0 %v6007_v48 }
 0x27f   : > { %974 = vmatprep.subr.bf16.mxu0 %v6008_v49 }
 0x282   : > { %975 = vmatpush1.bf16.msra.mxu0 %v6010_v50 }
 0x285   : > { %993 = vmatmul.mubr.bf16.vlgmr.msra.gmra.mrb[0].mxu0 %v856_v53 }
 0x286   : > { %1002 = vmatprep.mubr.bf16.mxu0 %v6678_v36 }
 0x28d   : > { %1003 = vmatmul.mubr.bf16.gmra.mrb[4].mxu0 %v857_v56 }
 0x28e   : > { %1012 = vmatprep.mubr.bf16.mxu0 %v6678_v36 }
 0x295   : > { %1013 = vmatmul.mubr.bf16.gmra.mrb[8].mxu0 %v858_v59 }
 0x296   : > { %1022 = vmatprep.mubr.bf16.mxu0 %v6678_v36 }
 0x29d   : > { %1023 = vmatmul.mubr.bf16.gmra.mrb[12].mxu0 %v859_v62 }
 0x29e   : > { %1032 = vmatprep.mubr.bf16.mxu0 %v6678_v36 }
 0x2a5   : > { %1033 = vmatmul.mubr.bf16.gmra.mrb[16].mxu0 %v860_v1 }
 0x2a6   : > { %1042 = vmatprep.mubr.bf16.mxu0 %v6678_v36 }
 0x2ad   : > { %1043 = vmatmul.mubr.bf16.gmra.mrb[20].mxu0 %v861_v4  ;;  %v1090_v4 = vld [vmem:[#allocation2 + $0x8] sm:$0xff] }
 0x2ae   : > { %1052 = vmatprep.mubr.bf16.mxu0 %v6678_v36 }
 0x2b5   : > { %1053 = vmatmul.mubr.bf16.gmra.mrb[24].mxu0 %v862_v7  ;;  %v1093_v7 = vld [vmem:[#allocation2 + $0x20] sm:$0xff] }
 0x2b6   : > { %1062 = vmatprep.mubr.bf16.mxu0 %v6678_v36 }
 0x2bd   : > { %1063 = vmatmul.mubr.bf16.gmra.mrb[28].mxu0 %v863_v10  ;;  %v1096_v10 = vld [vmem:[#allocation2 + $0x38] sm:$0xff] }
 0x358   : > { %v994_v12 = vpop.f32.mrb[0].mxu0 }
 0x359   : > { %v996_v13 = vpop.f32.mrb[1].mxu0 }
 0x35a   : > { %v998_v14 = vpop.f32.mrb[2].mxu0 }
 0x35b   : > { %v7554_v15 = vpack.c.bf16 %v998_v14, %v994_v12  ;;  %v1000_v16 = vpop.f32.mrb[3].mxu0 }
 0x35c   : > { %v7556_v17 = vpack.c.bf16 %v1000_v16, %v996_v13 }
 0x35d   : > { %1862 = vrot.lane.b32.xlu0 %v7554_v15, %s6679_s15  ;;  %5782 = vmatprep.subr.msk.bf16.mxu1 %vm1097_vm2, %v7554_v15  ;;  %v1123_v18 = vsel %vm1097_vm2, %v7554_v15, 0 }
 0x35e   : > { %10223 = vst [vmem:[#allocation31_spill] sm:$0xff] %v7556_v17  ;;  %5511 = vmatpush3.bf16.xpose.msra.mxu1 %v1123_v18  ;;  %5542 = vmatprep.subr.bf16.mxu0 %v7556_v17 }
 0x35f   : > { %5543 = vmatpush3.bf16.msra.mxu0 %v7556_v17 }
 0x360   : > { %v1004_v19 = vpop.f32.mrb[4].mxu0 }
 0x361   : > { %v1006_v20 = vpop.f32.mrb[5].mxu0 }
 0x362   : > { %v1008_v21 = vpop.f32.mrb[6].mxu0 }
 0x363   : > { %v7566_v22 = vpack.c.bf16 %v1008_v21, %v1004_v19  ;;  %v1010_v23 = vpop.f32.mrb[7].mxu0 }
 0x364   : > { %v7568_v24 = vpack.c.bf16 %v1010_v23, %v1006_v20 }
 0x365   : > { %1864 = vrot.lane.b32.xlu0 %v7566_v22, %s6679_s15  ;;  %5783 = vmatprep.subr.msk.bf16.mxu1 %vm1097_vm2, %v7566_v22  ;;  %v1126_v25 = vsel %vm1097_vm2, %v7566_v22, 0 }
 0x366   : > { %10224 = vst [vmem:[#allocation32_spill] sm:$0xff] %v7568_v24  ;;  %5513 = vmatpush3.bf16.xpose.msra.mxu1 %v1126_v25  ;;  %5544 = vmatprep.subr.bf16.mxu0 %v7568_v24 }
 0x367   : > { %5545 = vmatpush3.bf16.msra.mxu0 %v7568_v24 }
 0x368   : > { %v1014_v26 = vpop.f32.mrb[8].mxu0 }
 0x369   : > { %v1016_v27 = vpop.f32.mrb[9].mxu0 }
 0x36a   : > { %v1018_v28 = vpop.f32.mrb[10].mxu0 }
 0x36b   : > { %v7578_v29 = vpack.c.bf16 %v1018_v28, %v1014_v26  ;;  %v1020_v30 = vpop.f32.mrb[11].mxu0 }
 0x36c   : > { %v7580_v31 = vpack.c.bf16 %v1020_v30, %v1016_v27 }
 0x36d   : > { %1866 = vrot.lane.b32.xlu1 %v7578_v29, %s6679_s15  ;;  %5784 = vmatprep.subr.msk.bf16.mxu1 %vm1097_vm2, %v7578_v29  ;;  %v1129_v32 = vsel %vm1097_vm2, %v7578_v29, 0 }
 0x36e   : > { %10225 = vst [vmem:[#allocation33_spill] sm:$0xff] %v7580_v31  ;;  %5515 = vmatpush3.bf16.xpose.msra.mxu1 %v1129_v32  ;;  %5546 = vmatprep.subr.bf16.mxu0 %v7580_v31 }
 0x36f   : > { %5547 = vmatpush3.bf16.msra.mxu0 %v7580_v31 }
 0x370   : > { %v1024_v33 = vpop.f32.mrb[12].mxu0 }
 0x371   : > { %v1026_v34 = vpop.f32.mrb[13].mxu0 }
 0x372   : > { %v1028_v35 = vpop.f32.mrb[14].mxu0 }
 0x373   : > { %v7590_v36 = vpack.c.bf16 %v1028_v35, %v1024_v33  ;;  %v1030_v37 = vpop.f32.mrb[15].mxu0  ;;  %v1848_v35 = vld [vmem:[#allocation2 + $0x50] sm:$0xff] }
 0x374   : > { %v7592_v38 = vpack.c.bf16 %v1030_v37, %v1026_v34  ;;  %v1847_v34 = vld [vmem:[#allocation2 + $0x48] sm:$0xff]  ;;  %v1849_v37 = vld [vmem:[#allocation2 + $0x58] sm:$0xff] }
 0x375   : > { %1868 = vrot.lane.b32.xlu1 %v7590_v36, %s6679_s15  ;;  %5785 = vmatprep.subr.msk.bf16.mxu1 %vm1097_vm2, %v7590_v36  ;;  %v1132_v39 = vsel %vm1097_vm2, %v7590_v36, 0 }
 0x376   : > { %10226 = vst [vmem:[#allocation34_spill] sm:$0xff] %v7592_v38  ;;  %5517 = vmatpush3.bf16.xpose.msra.mxu1 %v1132_v39  ;;  %5548 = vmatprep.subr.bf16.mxu0 %v7592_v38  ;;  %v1850_v39 = vld [vmem:[#allocation2 + $0x60] sm:$0xff] }
 0x377   : > { %5549 = vmatpush3.bf16.msra.mxu0 %v7592_v38 }
 0x378   : > { %v1034_v40 = vpop.f32.mrb[16].mxu0 }
 0x379   : > { %v1036_v41 = vpop.f32.mrb[17].mxu0 }
 0x37a   : > { %v1038_v42 = vpop.f32.mrb[18].mxu0 }
 0x37b   : > { %v7602_v43 = vpack.c.bf16 %v1038_v42, %v1034_v40  ;;  %v1040_v44 = vpop.f32.mrb[19].mxu0  ;;  %v1851_v40 = vld [vmem:[#allocation2 + $0x68] sm:$0xff]  ;;  %v1853_v42 = vld [vmem:[#allocation2 + $0x78] sm:$0xff] }
 0x37c   : > { %v7604_v45 = vpack.c.bf16 %v1040_v44, %v1036_v41  ;;  %v1852_v41 = vld [vmem:[#allocation2 + $0x70] sm:$0xff] }
 0x37d   : > { %1870 = vrot.lane.b32.xlu0 %v7602_v43, %s6679_s15  ;;  %5786 = vmatprep.subr.msk.bf16.mxu1 %vm1097_vm2, %v7602_v43  ;;  %v1135_v46 = vsel %vm1097_vm2, %v7602_v43, 0 }
 0x37e   : > { %5519 = vmatpush3.bf16.xpose.msra.mxu1 %v1135_v46  ;;  %5550 = vmatprep.subr.bf16.mxu0 %v7604_v45 }
 0x37f   : > { %5551 = vmatpush3.bf16.msra.mxu0 %v7604_v45 }
 0x380   : > { %v1044_v47 = vpop.f32.mrb[20].mxu0 }
 0x381   : > { %v1046_v48 = vpop.f32.mrb[21].mxu0 }
 0x382   : > { %v1048_v49 = vpop.f32.mrb[22].mxu0 }
 0x383   : > { %v7614_v50 = vpack.c.bf16 %v1048_v49, %v1044_v47  ;;  %v1050_v51 = vpop.f32.mrb[23].mxu0 }
 0x384   : > { %v7616_v52 = vpack.c.bf16 %v1050_v51, %v1046_v48 }
 0x385   : > { %1872 = vrot.lane.b32.xlu1 %v7614_v50, %s6679_s15  ;;  %5787 = vmatprep.subr.msk.bf16.mxu1 %vm1097_vm2, %v7614_v50  ;;  %v1138_v53 = vsel %vm1097_vm2, %v7614_v50, 0 }
 0x386   : > { %5521 = vmatpush3.bf16.xpose.msra.mxu1 %v1138_v53  ;;  %5552 = vmatprep.subr.bf16.mxu0 %v7616_v52 }
 0x387   : > { %5553 = vmatpush3.bf16.msra.mxu0 %v7616_v52 }
 0x388   : > { %v1054_v54 = vpop.f32.mrb[24].mxu0 }
 0x389   : > { %v1056_v55 = vpop.f32.mrb[25].mxu0 }
 0x38a   : > { %v1058_v56 = vpop.f32.mrb[26].mxu0 }
 0x38b   : > { %v7626_v57 = vpack.c.bf16 %v1058_v56, %v1054_v54  ;;  %v1060_v58 = vpop.f32.mrb[27].mxu0 }
 0x38c   : > { %v7628_v59 = vpack.c.bf16 %v1060_v58, %v1056_v55 }
 0x38d   : > { %1874 = vrot.lane.b32.xlu0 %v7626_v57, %s6679_s15  ;;  %5788 = vmatprep.subr.msk.bf16.mxu1 %vm1097_vm2, %v7626_v57  ;;  %v1141_v60 = vsel %vm1097_vm2, %v7626_v57, 0 }
 0x38e   : > { %5523 = vmatpush3.bf16.xpose.msra.mxu1 %v1141_v60  ;;  %5554 = vmatprep.subr.bf16.mxu0 %v7628_v59 }
 0x38f   : > { %5555 = vmatpush3.bf16.msra.mxu0 %v7628_v59 }
 0x390   : > { %v1064_v61 = vpop.f32.mrb[28].mxu0 }
 0x391   : > { %v1066_v62 = vpop.f32.mrb[29].mxu0 }
 0x392   : > { %v1068_v63 = vpop.f32.mrb[30].mxu0 }
 0x393   : > { %v7638_v0 = vpack.c.bf16 %v1068_v63, %v1064_v61  ;;  %v1070_v1 = vpop.f32.mrb[31].mxu0 }
 0x394   : > { %v7640_v2 = vpack.c.bf16 %v1070_v1, %v1066_v62 }
 0x395   : > { %1876 = vrot.lane.b32.xlu1 %v7638_v0, %s6679_s15  ;;  %5789 = vmatprep.subr.msk.bf16.mxu1 %vm1097_vm2, %v7638_v0  ;;  %v1144_v3 = vsel %vm1097_vm2, %v7638_v0, 0 }
 0x396   : > { %5525 = vmatpush3.bf16.xpose.msra.mxu1 %v1144_v3  ;;  %5556 = vmatprep.subr.bf16.mxu0 %v7640_v2 }
 0x397   : > { %5557 = vmatpush3.bf16.msra.mxu0 %v7640_v2 }
 0x39d   : > { %5527 = vmatmul.mubr.msk.bf16.vlgmr.msra.gmra.mrb[0].mxu1 %vm1097_vm2, %v1090_v4 }
 0x39e   : > { %5530 = vmatprep.mubr.msk.bf16.mxu1 %vm1097_vm2, %v1091_v5 }
 0x3a5   : > { %5531 = vmatmul.mubr.msk.bf16.gmra.mrb[4].mxu1 %vm1097_vm2, %v1092_v6 }
 0x3a6   : > { %5534 = vmatprep.mubr.msk.bf16.mxu1 %vm1097_vm2, %v1093_v7 }
 0x3ad   : > { %5535 = vmatmul.mubr.msk.bf16.gmra.mrb[8].mxu1 %vm1097_vm2, %v1094_v8 }
 0x3ae   : > { %5538 = vmatprep.mubr.msk.bf16.mxu1 %vm1097_vm2, %v1095_v9 }
 0x3b5   : > { %5539 = vmatmul.mubr.msk.bf16.gmra.mrb[12].mxu1 %vm1097_vm2, %v1096_v10 }
 0x3b6   : > { %5590 = vmatprep.mubr.msk.bf16.mxu1 %vm1097_vm2, %v1846_v11 }
 0x3cf   : > { %v1863_v12 = vpop.permute.xlu0 %1862 }
 0x3d0   : > { %5790 = vmatprep.subr.msk.bf16.mxu1 %vm1097_vm2, %v1863_v12  ;;  %v1903_v13 = vsel %vm1097_vm2, %v1863_v12, 0 }
 0x3d1   : > { %5575 = vmatpush3.bf16.xpose.msra.mxu1 %v1903_v13 }
 0x3d7   : > { %v1865_v14 = vpop.permute.xlu0 %1864 }
 0x3d8   : > { %5791 = vmatprep.subr.msk.bf16.mxu1 %vm1097_vm2, %v1865_v14  ;;  %v1906_v16 = vsel %vm1097_vm2, %v1865_v14, 0 }
 0x3d9   : > { %5577 = vmatpush3.bf16.xpose.msra.mxu1 %v1906_v16 }
 0x3df   : > { %v1867_v18 = vpop.permute.xlu1 %1866 }
 0x3e0   : > { %5792 = vmatprep.subr.msk.bf16.mxu1 %vm1097_vm2, %v1867_v18  ;;  %v1909_v19 = vsel %vm1097_vm2, %v1867_v18, 0 }
 0x3e1   : > { %5579 = vmatpush3.bf16.xpose.msra.mxu1 %v1909_v19  ;;  %v7769_v19 = vld [vmem:[#allocation3 + $0x10] sm:$0xff] }
 0x3e2   : > { %10230 = vst [vmem:[#allocation38_spill] sm:$0xff] %v7769_v19 }
 0x3e7   : > { %v1869_v20 = vpop.permute.xlu1 %1868 }
 0x3e8   : > { %5793 = vmatprep.subr.msk.bf16.mxu1 %vm1097_vm2, %v1869_v20  ;;  %v1912_v21 = vsel %vm1097_vm2, %v1869_v20, 0 }
 0x3e9   : > { %5581 = vmatpush3.bf16.xpose.msra.mxu1 %v1912_v21 }
 0x3ef   : > { %v1871_v23 = vpop.permute.xlu0 %1870 }
 0x3f0   : > { %5794 = vmatprep.subr.msk.bf16.mxu1 %vm1097_vm2, %v1871_v23  ;;  %v1915_v25 = vsel %vm1097_vm2, %v1871_v23, 0 }
 0x3f1   : > { %5583 = vmatpush3.bf16.xpose.msra.mxu1 %v1915_v25 }
 0x3f7   : > { %v1873_v26 = vpop.permute.xlu1 %1872 }
 0x3f8   : > { %5795 = vmatprep.subr.msk.bf16.mxu1 %vm1097_vm2, %v1873_v26  ;;  %v1918_v27 = vsel %vm1097_vm2, %v1873_v26, 0  ;;  %v7778_v26 = vld [vmem:[#allocation3 + $0x8] sm:$0xff] }
 0x3f9   : > { %5585 = vmatpush3.bf16.xpose.msra.mxu1 %v1918_v27  ;;  %10233 = vst [vmem:[#allocation41_spill] sm:$0xff] %v7778_v26  ;;  %v7782_v27 = vld [vmem:[#allocation3] sm:$0xff] }
 0x3fa   : > { %10234 = vst [vmem:[#allocation42_spill] sm:$0xff] %v7782_v27 }
 0x3ff   : > { %v1875_v28 = vpop.permute.xlu0 %1874 }
 0x400   : > { %5796 = vmatprep.subr.msk.bf16.mxu1 %vm1097_vm2, %v1875_v28  ;;  %v1921_v30 = vsel %vm1097_vm2, %v1875_v28, 0  ;;  %v7833_v28 = vld [vmem:[#allocation3 + $0x50] sm:$0xff] }
 0x401   : > { %5587 = vmatpush3.bf16.xpose.msra.mxu1 %v1921_v30  ;;  %10244 = vst [vmem:[#allocation52_spill] sm:$0xff] %v7833_v28 }
 0x407   : > { %v1877_v32 = vpop.permute.xlu1 %1876 }
 0x408   : > { %5797 = vmatprep.subr.msk.bf16.mxu1 %vm1097_vm2, %v1877_v32  ;;  %v1924_v33 = vsel %vm1097_vm2, %v1877_v32, 0 }
 0x409   : > { %5589 = vmatpush3.bf16.xpose.msra.mxu1 %v1924_v33 }
 0x410   : > { %5591 = vmatmul.mubr.msk.bf16.vlgmr.msra.gmra.mrb[16].mxu1 %vm1097_vm2, %v1847_v34 }
 0x411   : > { %5594 = vmatprep.mubr.msk.bf16.mxu1 %vm1097_vm2, %v1848_v35  ;;  %v7795_v35 = vld [vmem:[#allocation3 + $0x18] sm:$0xff] }
 0x412   : > { %10236 = vst [vmem:[#allocation44_spill] sm:$0xff] %v7795_v35 }
 0x418   : > { %5595 = vmatmul.mubr.msk.bf16.gmra.mrb[20].mxu1 %vm1097_vm2, %v1849_v37  ;;  %v7815_v37 = vld [vmem:[#allocation3 + $0x38] sm:$0xff] }
 0x419   : > { %5598 = vmatprep.mubr.msk.bf16.mxu1 %vm1097_vm2, %v1850_v39  ;;  %v7801_v39 = vld [vmem:[#allocation3 + $0x30] sm:$0xff]  ;;  %10240 = vst [vmem:[#allocation48_spill] sm:$0xff] %v7815_v37 }
 0x41a   : > { %10237 = vst [vmem:[#allocation45_spill] sm:$0xff] %v7801_v39 }
 0x420   : > { %5599 = vmatmul.mubr.msk.bf16.gmra.mrb[24].mxu1 %vm1097_vm2, %v1851_v40  ;;  %v7887_v40 = vld [vmem:[#allocation3 + $0x78] sm:$0xff] }
 0x421   : > { %5602 = vmatprep.mubr.msk.bf16.mxu1 %vm1097_vm2, %v1852_v41  ;;  %10255 = vst [vmem:[#allocation63_spill] sm:$0xff] %v7887_v40 }
 0x428   : > { %5603 = vmatmul.mubr.msk.bf16.gmra.mrb[28].mxu1 %vm1097_vm2, %v1853_v42 }
 0x470   : > { %v7681_v44 = vpop.f32.mrb[0].mxu1 }
 0x471   : > { %1263 = vmax.xlane.f32.xlu0 %v7681_v44  ;;  %v7684_v46 = vpop.f32.mrb[1].mxu1 }
 0x472   : > { %v7686_v47 = vpop.f32.mrb[2].mxu1 }
 0x473   : > { %v7688_v48 = vpop.f32.mrb[3].mxu1 }
 0x474   : > { %1261 = vmax.xlane.f32.xlu1 %v7688_v48 }
 0x475   : > { %1259 = vmax.xlane.f32.xlu0 %v7684_v46 }
 0x478   : > { %v7692_v49 = vpop.f32.mrb[4].mxu1 }
 0x479   : > { %1265 = vmax.xlane.f32.xlu0 %v7686_v47  ;;  %1271 = vmax.xlane.f32.xlu1 %v7692_v49  ;;  %v7696_v51 = vpop.f32.mrb[5].mxu1 }
 0x47a   : > { %v7698_v53 = vpop.f32.mrb[6].mxu1 }
 0x47b   : > { %v7700_v54 = vpop.f32.mrb[7].mxu1 }
 0x47d   : > { %1267 = vmax.xlane.f32.xlu1 %v7696_v51  ;;  %1273 = vmax.xlane.f32.xlu0 %v7698_v53 }
 0x480   : > { %v7704_v55 = vpop.f32.mrb[8].mxu1 }
 0x481   : > { %1269 = vmax.xlane.f32.xlu0 %v7700_v54  ;;  %1279 = vmax.xlane.f32.xlu1 %v7704_v55  ;;  %v7708_v56 = vpop.f32.mrb[9].mxu1 }
 0x482   : > { %v7710_v58 = vpop.f32.mrb[10].mxu1 }
 0x483   : > { %v7712_v60 = vpop.f32.mrb[11].mxu1 }
 0x485   : > { %1275 = vmax.xlane.f32.xlu1 %v7708_v56  ;;  %1281 = vmax.xlane.f32.xlu0 %v7710_v58 }
 0x488   : > { %v7716_v61 = vpop.f32.mrb[12].mxu1 }
 0x489   : > { %1277 = vmax.xlane.f32.xlu0 %v7712_v60  ;;  %v7719_v62 = vpop.f32.mrb[13].mxu1  ;;  %1287 = vmax.xlane.f32.xlu1 %v7716_v61 }
 0x48a   : > { %v7722_v63 = vpop.f32.mrb[14].mxu1 }
 0x48b   : > { %v7724_v1 = vpop.f32.mrb[15].mxu1 }
 0x48d   : > { %1289 = vmax.xlane.f32.xlu0 %v7722_v63  ;;  %1283 = vmax.xlane.f32.xlu1 %v7719_v62 }
 0x491   : > { %1285 = vmax.xlane.f32.xlu0 %v7724_v1 }
 0x4e3   : > { %v7729_v3 = vpop.f32.mrb[16].mxu1 }
 0x4e4   : > { %2044 = vmax.xlane.f32.xlu1 %v7729_v3  ;;  %v7732_v4 = vpop.f32.mrb[17].mxu1 }
 0x4e5   : > { %v7734_v5 = vpop.f32.mrb[18].mxu1 }
 0x4e6   : > { %2046 = vmax.xlane.f32.xlu0 %v7734_v5  ;;  %v7737_v6 = vpop.f32.mrb[19].mxu1 }
 0x4e8   : > { %2040 = vmax.xlane.f32.xlu1 %v7732_v4 }
 0x4ea   : > { %2042 = vmax.xlane.f32.xlu0 %v7737_v6 }
 0x4eb   : > { %v7741_v7 = vpop.f32.mrb[20].mxu1 }
 0x4ec   : > { %2052 = vmax.xlane.f32.xlu1 %v7741_v7  ;;  %v7744_v8 = vpop.f32.mrb[21].mxu1 }
 0x4ed   : > { %v7746_v9 = vpop.f32.mrb[22].mxu1 }
 0x4ee   : > { %v7748_v10 = vpop.f32.mrb[23].mxu1 }
 0x4ef   : > { %2050 = vmax.xlane.f32.xlu0 %v7748_v10 }
 0x4f0   : > { %2048 = vmax.xlane.f32.xlu1 %v7744_v8 }
 0x4f3   : > { %v7752_v11 = vpop.f32.mrb[24].mxu1 }
 0x4f4   : > { %2054 = vmax.xlane.f32.xlu1 %v7746_v9  ;;  %v7755_v12 = vpop.f32.mrb[25].mxu1 }
 0x4f5   : > { %10227 = vst [vmem:[#allocation35_spill] sm:$0xff] %v7755_v12  ;;  %v7757_v13 = vpop.f32.mrb[26].mxu1 }
 0x4f6   : > { %2062 = vmax.xlane.f32.xlu0 %v7757_v13  ;;  %v7760_v14 = vpop.f32.mrb[27].mxu1 }
 0x4f8   : > { %2060 = vmax.xlane.f32.xlu1 %v7752_v11 }
 0x4fb   : > { %v7763_v16 = vpop.f32.mrb[28].mxu1 }
 0x4fc   : > { %10228 = vst [vmem:[#allocation36_spill] sm:$0xff] %v7763_v16  ;;  %2056 = vmax.xlane.f32.xlu1 %v7755_v12  ;;  %2068 = vmax.xlane.f32.xlu0 %v7763_v16  ;;  %v7767_v18 = vpop.f32.mrb[29].mxu1  ;;  %v7867_v12 = vld [vmem:[#allocation3 + $0x48] sm:$0xff] }
 0x4fd   : > { %10229 = vst [vmem:[#allocation37_spill] sm:$0xff] %v7767_v18  ;;  %v7771_v20 = vpop.f32.mrb[30].mxu1  ;;  %10251 = vst [vmem:[#allocation59_spill] sm:$0xff] %v7867_v12 }
 0x4fe   : > { %v7773_v21 = vpop.f32.mrb[31].mxu1  ;;  %v1264_v23 = vpop.xlane.xlu0 %1263 }
 0x4ff   : > { %10231 = vst [vmem:[#allocation39_spill] sm:$0xff] %v7773_v21  ;;  %v7776_v25 = vmax.f32 %v7769_v19, %v1264_v23 }
 0x500   : > { %2058 = vmax.xlane.f32.xlu1 %v7760_v14  ;;  %2064 = vmax.xlane.f32.xlu0 %v7767_v18 }
 0x501   : > { %10232 = vst [vmem:[#allocation40_spill] sm:$0xff] %v7776_v25  ;;  %1831 = vst.msk [vmem:[#allocation3 + $0x10] sm:$0xff] %vm1563_vm3, %v7776_v25  ;;  %v1262_v30 = vpop.xlane.xlu1 %1261 }
 0x502   : > { %v1260_v32 = vpop.xlane.xlu0 %1259  ;;  %v7789_v33 = vmax.f32 %v7778_v26, %v1262_v30 }
 0x503   : > { %v7792_v34 = vmax.f32 %v7782_v27, %v1260_v32  ;;  %v7813_v32 = vld [vmem:[#allocation3 + $0x20] sm:$0xff]  ;;  %v7831_v27 = vld [vmem:[#allocation3 + $0x28] sm:$0xff] }
 0x504   : > { %10235 = vst [vmem:[#allocation43_spill] sm:$0xff] %v7789_v33  ;;  %2066 = vmax.xlane.f32.xlu1 %v7773_v21  ;;  %1830 = vst.msk [vmem:[#allocation3 + $0x8] sm:$0xff] %vm1563_vm3, %v7789_v33  ;;  %v7849_v21 = vld [vmem:[#allocation3 + $0x40] sm:$0xff] }
 0x505   : > { %1829 = vst.msk [vmem:[#allocation3] sm:$0xff] %vm1563_vm3, %v7792_v34  ;;  %10239 = vst [vmem:[#allocation47_spill] sm:$0xff] %v7813_v32 }
 0x506   : > { %v1266_v41 = vpop.xlane.xlu0 %1265  ;;  %v1272_v42 = vpop.xlane.xlu1 %1271  ;;  %10243 = vst [vmem:[#allocation51_spill] sm:$0xff] %v7831_v27  ;;  %10247 = vst [vmem:[#allocation55_spill] sm:$0xff] %v7849_v21 }
 0x507   : > { %v7808_v23 = vmax.f32 %v7795_v35, %v1266_v41  ;;  %v7811_v30 = vmax.f32 %v7801_v39, %v1272_v42  ;;  %v7851_v35 = vld [vmem:[#allocation3 + $0x58] sm:$0xff] }
 0x508   : > { %10248 = vst [vmem:[#allocation56_spill] sm:$0xff] %v7851_v35 }
 0x509   : > { %10238 = vst [vmem:[#allocation46_spill] sm:$0xff] %v7811_v30  ;;  %1832 = vst.msk [vmem:[#allocation3 + $0x18] sm:$0xff] %vm1563_vm3, %v7808_v23 }
 0x50a   : > { %1835 = vst.msk [vmem:[#allocation3 + $0x30] sm:$0xff] %vm1563_vm3, %v7811_v30  ;;  %v1268_v41 = vpop.xlane.xlu1 %1267  ;;  %v1274_v26 = vpop.xlane.xlu0 %1273 }
 0x50b   : > { %v7826_v42 = vmax.f32 %v7813_v32, %v1268_v41  ;;  %v7829_v19 = vmax.f32 %v7815_v37, %v1274_v26  ;;  %v7869_v32 = vld [vmem:[#allocation3 + $0x70] sm:$0xff] }
 0x50c   : > { %10252 = vst [vmem:[#allocation60_spill] sm:$0xff] %v7869_v32 }
 0x50d   : > { %10241 = vst [vmem:[#allocation49_spill] sm:$0xff] %v7826_v42  ;;  %10242 = vst [vmem:[#allocation50_spill] sm:$0xff] %v7829_v19 }
 0x50e   : > { %1833 = vst.msk [vmem:[#allocation3 + $0x20] sm:$0xff] %vm1563_vm3, %v7826_v42  ;;  %1836 = vst.msk [vmem:[#allocation3 + $0x38] sm:$0xff] %vm1563_vm3, %v7829_v19  ;;  %v1270_v41 = vpop.xlane.xlu0 %1269  ;;  %v1280_v39 = vpop.xlane.xlu1 %1279 }
 0x50f   : > { %v7844_v26 = vmax.f32 %v7831_v27, %v1270_v41  ;;  %v7847_v16 = vmax.f32 %v7833_v28, %v1280_v39 }
 0x511   : > { %10245 = vst [vmem:[#allocation53_spill] sm:$0xff] %v7844_v26  ;;  %10246 = vst [vmem:[#allocation54_spill] sm:$0xff] %v7847_v16 }
 0x512   : > { %1834 = vst.msk [vmem:[#allocation3 + $0x28] sm:$0xff] %vm1563_vm3, %v7844_v26  ;;  %1839 = vst.msk [vmem:[#allocation3 + $0x50] sm:$0xff] %vm1563_vm3, %v7847_v16  ;;  %v1276_v41 = vpop.xlane.xlu1 %1275  ;;  %v1282_v37 = vpop.xlane.xlu0 %1281 }
 0x513   : > { %v7862_v39 = vmax.f32 %v7849_v21, %v1276_v41  ;;  %v7865_v18 = vmax.f32 %v7851_v35, %v1282_v37  ;;  %v7889_v21 = vld [vmem:[#allocation3 + $0x60] sm:$0xff] }
 0x514   : > { %10256 = vst [vmem:[#allocation64_spill] sm:$0xff] %v7889_v21 }
 0x515   : > { %10249 = vst [vmem:[#allocation57_spill] sm:$0xff] %v7862_v39  ;;  %10250 = vst [vmem:[#allocation58_spill] sm:$0xff] %v7865_v18  ;;  %1367 = vperm.xlu1 %5985, %v7776_v25  }
 0x516   : > { %1837 = vst.msk [vmem:[#allocation3 + $0x40] sm:$0xff] %vm1563_vm3, %v7862_v39  ;;  %1840 = vst.msk [vmem:[#allocation3 + $0x58] sm:$0xff] %vm1563_vm3, %v7865_v18  ;;  %1362 = vperm.xlu0 %5986, %v7789_v33   ;;  %v1278_v37 = vpop.xlane.xlu0 %1277  ;;  %v1288_v41 = vpop.xlane.xlu1 %1287  ;;  %v7904_v33 = vld [vmem:[#allocation3 + $0x68] sm:$0xff] }
 0x517   : > { %v7882_v27 = vmax.f32 %v7867_v12, %v1278_v37  ;;  %v7885_v25 = vmax.f32 %v7869_v32, %v1288_v41  ;;  %10259 = vst [vmem:[#allocation67_spill] sm:$0xff] %v7904_v33 }
 0x519   : > { %10253 = vst [vmem:[#allocation61_spill] sm:$0xff] %v7882_v27  ;;  %10254 = vst [vmem:[#allocation62_spill] sm:$0xff] %v7885_v25  ;;  %1357 = vperm.xlu1 %5985, %v7792_v34  }
 0x51a   : > { %1838 = vst.msk [vmem:[#allocation3 + $0x48] sm:$0xff] %vm1563_vm3, %v7882_v27  ;;  %1843 = vst.msk [vmem:[#allocation3 + $0x70] sm:$0xff] %vm1563_vm3, %v7885_v25  ;;  %v1290_v37 = vpop.xlane.xlu0 %1289  ;;  %v1284_v35 = vpop.xlane.xlu1 %1283 }
 0x51b   : > { %v7899_v41 = vmax.f32 %v7887_v40, %v1290_v37  ;;  %v7902_v32 = vmax.f32 %v7889_v21, %v1284_v35  ;;  %v7943_v35 = vld [vmem:[#allocation3 + $0x98] sm:$0xff]  ;;  %v7948_v21 = vld [vmem:[#allocation3 + $0x80] sm:$0xff] }
 0x51c   : > { %10262 = vst [vmem:[#allocation70_spill] sm:$0xff] %v7943_v35  ;;  %10264 = vst [vmem:[#allocation72_spill] sm:$0xff] %v7948_v21 }
 0x51d   : > { %10257 = vst [vmem:[#allocation65_spill] sm:$0xff] %v7899_v41  ;;  %10258 = vst [vmem:[#allocation66_spill] sm:$0xff] %v7902_v32  ;;  %1372 = vperm.xlu1 %5985, %v7808_v23  }
 0x51e   : > { %1844 = vst.msk [vmem:[#allocation3 + $0x78] sm:$0xff] %vm1563_vm3, %v7899_v41  ;;  %1841 = vst.msk [vmem:[#allocation3 + $0x60] sm:$0xff] %vm1563_vm3, %v7902_v32  ;;  %v1286_v12 = vpop.xlane.xlu0 %1285 }
 0x51f   : > { %v7914_v37 = vmax.f32 %v7904_v33, %v1286_v12  ;;  %v7941_v12 = vld [vmem:[#allocation3 + $0x90] sm:$0xff]  ;;  %v7958_v33 = vld [vmem:[#allocation3 + $0x88] sm:$0xff] }
 0x520   : > { %10261 = vst [vmem:[#allocation69_spill] sm:$0xff] %v7941_v12  ;;  %10266 = vst [vmem:[#allocation74_spill] sm:$0xff] %v7958_v33 }
 0x521   : > { %10260 = vst [vmem:[#allocation68_spill] sm:$0xff] %v7914_v37  ;;  %2492 = vrot.lane.b32.xlu1 %v7568_v24, %s6679_s15  ;;  %1842 = vst.msk [vmem:[#allocation3 + $0x68] sm:$0xff] %vm1563_vm3, %v7914_v37 }
 0x525   : > { %1387 = vperm.xlu1 %5985, %v7811_v30  }
 0x529   : > { %1377 = vperm.xlu1 %5985, %v7826_v42  }
 0x52d   : > { %1392 = vperm.xlu1 %5985, %v7829_v19   ;;  %v8059_v19 = vld [vmem:[#allocation3 + $0xc8] sm:$0xff] }
 0x52e   : > { %10285 = vst [vmem:[#allocation93_spill] sm:$0xff] %v8059_v19 }
 0x531   : > { %1407 = vperm.xlu1 %5985, %v7847_v16  }
 0x535   : > { %2070 = vmax.xlane.f32.xlu0 %v7771_v20  ;;  %1397 = vperm.xlu1 %5985, %v7862_v39  }
 0x539   : > { %1412 = vperm.xlu1 %5985, %v7865_v18  }
 0x53d   : > { %1432 = vperm.xlu1 %5985, %v7899_v41  }
 0x541   : > { %1422 = vperm.xlu1 %5985, %v7914_v37  }
 0x545   : > { %2496 = vrot.lane.b32.xlu1 %v7592_v38, %s6679_s15 }
 0x54b   : > { %2490 = vrot.lane.b32.xlu0 %v7556_v17, %s6679_s15 }
 0x54f   : > { %1382 = vperm.xlu0 %5986, %v7844_v26  }
 0x553   : > { %2494 = vrot.lane.b32.xlu0 %v7580_v31, %s6679_s15 }
 0x557   : > { %1402 = vperm.xlu0 %5986, %v7882_v27  }
 0x55b   : > { %1427 = vperm.xlu0 %5986, %v7885_v25  }
 0x55f   : > { %1417 = vperm.xlu0 %5986, %v7902_v32  }
 0x571   : > { %v2045_v28 = vpop.xlane.xlu1 %2044 }
 0x572   : > { %v7946_v41 = vmax.f32 %v7941_v12, %v2045_v28  ;;  %v7967_v12 = vld [vmem:[#allocation3 + $0xb0] sm:$0xff] }
 0x573   : > { %v2047_v40 = vpop.xlane.xlu0 %2046  ;;  %10268 = vst [vmem:[#allocation76_spill] sm:$0xff] %v7967_v12 }
 0x574   : > { %10263 = vst [vmem:[#allocation71_spill] sm:$0xff] %v7946_v41  ;;  %2645 = vst.msk [vmem:[#allocation3 + $0x90] sm:$0xff] %vm1563_vm3, %v7946_v41  ;;  %v7955_v25 = vmax.f32 %v7943_v35, %v2047_v40  ;;  %2148 = vperm.xlu0 %5986, %v7946_v41   ;;  %v7985_v40 = vld [vmem:[#allocation3 + $0xa8] sm:$0xff] }
 0x575   : > { %v2041_v32 = vpop.xlane.xlu1 %2040  ;;  %10271 = vst [vmem:[#allocation79_spill] sm:$0xff] %v7985_v40 }
 0x576   : > { %10265 = vst [vmem:[#allocation73_spill] sm:$0xff] %v7955_v25  ;;  %2646 = vst.msk [vmem:[#allocation3 + $0x98] sm:$0xff] %vm1563_vm3, %v7955_v25  ;;  %v7965_v16 = vmax.f32 %v7948_v21, %v2041_v32  ;;  %v7987_v21 = vld [vmem:[#allocation3 + $0xa0] sm:$0xff] }
 0x577   : > { %v2043_v37 = vpop.xlane.xlu0 %2042  ;;  %10272 = vst [vmem:[#allocation80_spill] sm:$0xff] %v7987_v21 }
 0x578   : > { %10267 = vst [vmem:[#allocation75_spill] sm:$0xff] %v7965_v16  ;;  %2643 = vst.msk [vmem:[#allocation3 + $0x80] sm:$0xff] %vm1563_vm3, %v7965_v16  ;;  %v7974_v41 = vmax.f32 %v7958_v33, %v2043_v37  ;;  %2138 = vperm.xlu0 %5986, %v7965_v16   ;;  %v8006_v37 = vld [vmem:[#allocation3 + $0xb8] sm:$0xff] }
 0x579   : > { %v2053_v28 = vpop.xlane.xlu1 %2052  ;;  %10275 = vst [vmem:[#allocation83_spill] sm:$0xff] %v8006_v37 }
 0x57a   : > { %10269 = vst [vmem:[#allocation77_spill] sm:$0xff] %v7974_v41  ;;  %2644 = vst.msk [vmem:[#allocation3 + $0x88] sm:$0xff] %vm1563_vm3, %v7974_v41  ;;  %v7982_v32 = vmax.f32 %v7967_v12, %v2053_v28  ;;  %2143 = vperm.xlu1 %5985, %v7974_v41   ;;  %v8041_v12 = vld [vmem:[#allocation3 + $0xc0] sm:$0xff] }
 0x57b   : > { %10281 = vst [vmem:[#allocation89_spill] sm:$0xff] %v8041_v12 }
 0x57c   : > { %10270 = vst [vmem:[#allocation78_spill] sm:$0xff] %v7982_v32  ;;  %2649 = vst.msk [vmem:[#allocation3 + $0xb0] sm:$0xff] %vm1563_vm3, %v7982_v32  ;;  %v2051_v16 = vpop.xlane.xlu0 %2050  ;;  %2498 = vrot.lane.b32.xlu0 %v7604_v45, %s6679_s15 }
 0x57d   : > { %v7996_v35 = vmax.f32 %v7985_v40, %v2051_v16  ;;  %v2049_v28 = vpop.xlane.xlu1 %2048  ;;  %v8021_v40 = vld [vmem:[#allocation3 + $0xd0] sm:$0xff] }
 0x57e   : > { %v7999_v41 = vmax.f32 %v7987_v21, %v2049_v28  ;;  %2153 = vperm.xlu1 %5985, %v7955_v25   ;;  %v8014_v28 = vld [vmem:[#allocation3 + $0xd8] sm:$0xff]  ;;  %10278 = vst [vmem:[#allocation86_spill] sm:$0xff] %v8021_v40 }
 0x57f   : > { %10273 = vst [vmem:[#allocation81_spill] sm:$0xff] %v7996_v35  ;;  %2648 = vst.msk [vmem:[#allocation3 + $0xa8] sm:$0xff] %vm1563_vm3, %v7996_v35 }
 0x580   : > { %10274 = vst [vmem:[#allocation82_spill] sm:$0xff] %v7999_v41  ;;  %2647 = vst.msk [vmem:[#allocation3 + $0xa0] sm:$0xff] %vm1563_vm3, %v7999_v41  ;;  %2502 = vrot.lane.b32.xlu0 %v7628_v59, %s6679_s15 }
 0x581   : > { %v2055_v16 = vpop.xlane.xlu1 %2054  ;;  %10276 = vst [vmem:[#allocation84_spill] sm:$0xff] %v8014_v28 }
 0x582   : > { %v8017_v25 = vmax.f32 %v8006_v37, %v2055_v16  ;;  %2500 = vrot.lane.b32.xlu1 %v7616_v52, %s6679_s15  ;;  %v8061_v37 = vld [vmem:[#allocation3 + $0xe0] sm:$0xff] }
 0x583   : > { %v2063_v33 = vpop.xlane.xlu0 %2062  ;;  %10286 = vst [vmem:[#allocation94_spill] sm:$0xff] %v8061_v37 }
 0x584   : > { %10277 = vst [vmem:[#allocation85_spill] sm:$0xff] %v8017_v25  ;;  %2650 = vst.msk [vmem:[#allocation3 + $0xb8] sm:$0xff] %vm1563_vm3, %v8017_v25  ;;  %v8028_v21 = vmax.f32 %v8014_v28, %v2063_v33  ;;  %2668 = vrot.lane.b32.xlu0 %v7554_v15, %s6680_s8  ;;  %v8043_v33 = vld [vmem:[#allocation3 + $0xf0] sm:$0xff] }
 0x585   : > { %v2061_v16 = vpop.xlane.xlu1 %2060  ;;  %10282 = vst [vmem:[#allocation90_spill] sm:$0xff] %v8043_v33 }
 0x586   : > { %10279 = vst [vmem:[#allocation87_spill] sm:$0xff] %v8028_v21  ;;  %2654 = vst.msk [vmem:[#allocation3 + $0xd8] sm:$0xff] %vm1563_vm3, %v8028_v21  ;;  %v8037_v39 = vmax.f32 %v8021_v40, %v2061_v16  ;;  %2504 = vrot.lane.b32.xlu1 %v7640_v2, %s6679_s15  ;;  %v8079_v40 = vld [vmem:[#allocation3 + $0xe8] sm:$0xff] }
 0x587   : > { %10289 = vst [vmem:[#allocation97_spill] sm:$0xff] %v8079_v40 }
 0x588   : > { %10280 = vst [vmem:[#allocation88_spill] sm:$0xff] %v8037_v39  ;;  %2653 = vst.msk [vmem:[#allocation3 + $0xd0] sm:$0xff] %vm1563_vm3, %v8037_v39  ;;  %2672 = vrot.lane.b32.xlu0 %v7578_v29, %s6680_s8 }
 0x589   : > { %v2057_v18 = vpop.xlane.xlu1 %2056  ;;  %v2069_v28 = vpop.xlane.xlu0 %2068 }
 0x58a   : > { %v8052_v16 = vmax.f32 %v8041_v12, %v2057_v18  ;;  %v8055_v27 = vmax.f32 %v8043_v33, %v2069_v28  ;;  %2670 = vrot.lane.b32.xlu1 %v7566_v22, %s6680_s8 }
 0x58c   : > { %10283 = vst [vmem:[#allocation91_spill] sm:$0xff] %v8052_v16  ;;  %10284 = vst [vmem:[#allocation92_spill] sm:$0xff] %v8055_v27  ;;  %2168 = vperm.xlu0 %5986, %v7982_v32  }
 0x58d   : > { %2651 = vst.msk [vmem:[#allocation3 + $0xc0] sm:$0xff] %vm1563_vm3, %v8052_v16  ;;  %2657 = vst.msk [vmem:[#allocation3 + $0xf0] sm:$0xff] %vm1563_vm3, %v8055_v27  ;;  %v2059_v28 = vpop.xlane.xlu1 %2058  ;;  %v2065_v42 = vpop.xlane.xlu0 %2064 }
 0x58e   : > { %v8073_v30 = vmax.f32 %v8059_v19, %v2059_v28  ;;  %v8076_v26 = vmax.f32 %v8061_v37, %v2065_v42  ;;  %2173 = vperm.xlu1 %5985, %v8017_v25  }
 0x590   : > { %10287 = vst [vmem:[#allocation95_spill] sm:$0xff] %v8073_v30  ;;  %10288 = vst [vmem:[#allocation96_spill] sm:$0xff] %v8076_v26  ;;  %2158 = vperm.xlu0 %5986, %v7999_v41  }
 0x591   : > { %2652 = vst.msk [vmem:[#allocation3 + $0xc8] sm:$0xff] %vm1563_vm3, %v8073_v30  ;;  %2655 = vst.msk [vmem:[#allocation3 + $0xe0] sm:$0xff] %vm1563_vm3, %v8076_v26  ;;  %v2067_v42 = vpop.xlane.xlu1 %2066 }
 0x592   : > { %v8091_v28 = vmax.f32 %v8079_v40, %v2067_v42  ;;  %2163 = vperm.xlu1 %5985, %v7996_v35  }
 0x594   : > { %10290 = vst [vmem:[#allocation98_spill] sm:$0xff] %v8091_v28  ;;  %2656 = vst.msk [vmem:[#allocation3 + $0xe8] sm:$0xff] %vm1563_vm3, %v8091_v28  ;;  %2193 = vperm.xlu0 %5986, %v8028_v21  }
 0x595   : > { %v1363_v33 = vpop.permute.xlu0 %1362  ;;  %v1368_v37 = vpop.permute.xlu1 %1367 }
 0x596   : > { %v1436_v19 = vsub.f32 %v7688_v48, %v1363_v33  ;;  %2188 = vperm.xlu1 %5985, %v8037_v39   ;;  %v1437_v12 = vsub.f32 %v7681_v44, %v1368_v37 }
 0x598   : > { %2183 = vperm.xlu0 %5986, %v8073_v30   ;;  %v1453_v42 = vmul.f32 1.442695, %v1436_v19  ;;  %v1455_v40 = vmul.f32 1.442695, %v1437_v12 }
 0x599   : > { %v1358_v25 = vpop.permute.xlu1 %1357 }
 0x59a   : > { %v1435_v35 = vsub.f32 %v7684_v46, %v1358_v25  ;;  %2178 = vperm.xlu1 %5985, %v8052_v16   ;;  %6011 = vpow2.f32 %v1453_v42 }
 0x59c   : > { %v1451_v18 = vmul.f32 1.442695, %v1435_v35  ;;  %2208 = vperm.xlu0 %5986, %v8055_v27  }
 0x59d   : > { %v1373_v21 = vpop.permute.xlu1 %1372 }
 0x59e   : > { %6013 = vpow2.f32 %v1451_v18  ;;  %v1438_v48 = vsub.f32 %v7686_v47, %v1373_v21  ;;  %2674 = vrot.lane.b32.xlu1 %v7590_v36, %s6680_s8 }
 0x59f   : > { %6015 = vpow2.f32 %v1455_v40 }
 0x5a0   : > { %v1457_v19 = vmul.f32 1.442695, %v1438_v48  ;;  %2198 = vperm.xlu0 %5986, %v8076_v26   ;;  %v8127_v48 = vld [vmem:[#allocation3 + $0xf8] sm:$0xff] }
 0x5a1   : > { %v2493_v44 = vpop.permute.xlu1 %2492  ;;  %10291 = vst [vmem:[#allocation99_spill] sm:$0xff] %v8127_v48 }
 0x5a2   : > { %6017 = vpow2.f32 %v1457_v19  ;;  %2203 = vperm.xlu1 %5985, %v8091_v28  }
 0x5a4   : > { %2676 = vrot.lane.b32.xlu0 %v7602_v43, %s6680_s8  ;;  %v8113_v25 = vpop.eup %6011 }
 0x5a5   : > { %v1388_v46 = vpop.permute.xlu1 %1387 }
 0x5a6   : > { %v1441_v39 = vsub.f32 %v7692_v49, %v1388_v46 }
 0x5a8   : > { %v8115_v35 = vpop.eup %6013  ;;  %2680 = vrot.lane.b32.xlu0 %v7626_v57, %s6680_s8  ;;  %v1463_v32 = vmul.f32 1.442695, %v1441_v39 }
 0x5a9   : > { %v1692_v47 = vpack.c.bf16 %v8113_v25, %v8115_v35  ;;  %v1378_v21 = vpop.permute.xlu1 %1377  ;;  %v8121_v12 = vpop.eup %6015 }
 0x5aa   : > { %v1439_v30 = vsub.f32 %v7696_v51, %v1378_v21 }
 0x5ab   : > { %5558 = vmatprep.mubr.bf16.mxu0 %v1692_v47 }
 0x5ac   : > { %v8123_v40 = vpop.eup %6017  ;;  %v1459_v26 = vmul.f32 1.442695, %v1439_v30 }
 0x5ad   : > { %v1693_v37 = vpack.c.bf16 %v8123_v40, %v8121_v12  ;;  %v1393_v33 = vpop.permute.xlu1 %1392 }
 0x5ae   : > { %6019 = vpow2.f32 %v1459_v26 }
 0x5af   : > { %5559 = vmatmul.mubr.bf16.vlgmr.msra.gmra.mrb[32].mxu0 %v1693_v37 }
 0x5b1   : > { %v1408_v18 = vpop.permute.xlu1 %1407 }
 0x5b2   : > { %v1445_v30 = vsub.f32 %v7704_v55, %v1408_v18 }
 0x5b5   : > { %v1398_v42 = vpop.permute.xlu1 %1397 }
 0x5b6   : > { %v1443_v51 = vsub.f32 %v7708_v56, %v1398_v42 }
 0x5b8   : > { %v8154_v55 = vpop.eup %6019 }
 0x5b9   : > { %v1413_v19 = vpop.permute.xlu1 %1412 }
 0x5ba   : > { %v1446_v49 = vsub.f32 %v7710_v58, %v1413_v19 }
 0x5bc   : > { %v1473_v56 = vmul.f32 1.442695, %v1446_v49 }
 0x5bd   : > { %v1433_v37 = vpop.permute.xlu1 %1432 }
 0x5be   : > { %v1450_v18 = vsub.f32 %v7722_v63, %v1433_v37 }
 0x5c2   : > { %v2071_v28 = vpop.xlane.xlu0 %2070 }
 0x5c3   : > { %v8130_v27 = vmax.f32 %v8127_v48, %v2071_v28  ;;  %v1442_v28 = vsub.f32 %v7698_v53, %v1393_v33  ;;  %v1423_v48 = vpop.permute.xlu1 %1422 }
 0x5c4   : > { %v1448_v58 = vsub.f32 %v7724_v1, %v1423_v48 }
 0x5c5   : > { %10292 = vst [vmem:[#allocation100_spill] sm:$0xff] %v8130_v27  ;;  %2658 = vst.msk [vmem:[#allocation3 + $0xf8] sm:$0xff] %vm1563_vm3, %v8130_v27  ;;  %2213 = vperm.xlu1 %5985, %v8130_v27   ;;  %v1465_v27 = vmul.f32 1.442695, %v1442_v28 }
 0x5c6   : > { %v2491_v47 = vpop.permute.xlu0 %2490 }
 0x5c7   : > { %5606 = vmatprep.subr.bf16.mxu0 %v2491_v47  ;;  %6021 = vpow2.f32 %v1465_v27  ;;  %v1471_v27 = vmul.f32 1.442695, %v1445_v30 }
 0x5c8   : > { %5607 = vmatpush3.bf16.msra.mxu0 %v2491_v47 }
 0x5c9   : > { %2678 = vrot.lane.b32.xlu1 %v7614_v50, %s6680_s8  ;;  %5608 = vmatprep.subr.bf16.mxu0 %v2493_v44 }
 0x5cc   : > { %5609 = vmatpush3.bf16.msra.mxu0 %v2493_v44  ;;  %v2497_v44 = vpop.permute.xlu1 %2496 }
 0x5cd   : > { %2682 = vrot.lane.b32.xlu1 %v7638_v0, %s6680_s8 }
 0x5ce   : > { %v1383_v16 = vpop.permute.xlu0 %1382 }
 0x5cf   : > { %v1440_v47 = vsub.f32 %v7700_v54, %v1383_v16  ;;  %v1467_v54 = vmul.f32 1.442695, %v1443_v51  ;;  %v1481_v51 = vmul.f32 1.442695, %v1450_v18 }
 0x5d1   : > { %v1461_v21 = vmul.f32 1.442695, %v1440_v47  ;;  %3288 = vrot.lane.b32.xlu1 %v7556_v17, %s6680_s8  ;;  %v8157_v33 = vpop.eup %6021 }
 0x5d2   : > { %v2495_v53 = vpop.permute.xlu0 %2494 }
 0x5d3   : > { %6023 = vpow2.f32 %v1461_v21  ;;  %5610 = vmatprep.subr.bf16.mxu0 %v2495_v53 }
 0x5d4   : > { %6025 = vpow2.f32 %v1463_v32  ;;  %5611 = vmatpush3.bf16.msra.mxu0 %v2495_v53 }
 0x5d5   : > { %3292 = vrot.lane.b32.xlu1 %v7580_v31, %s6680_s8  ;;  %5612 = vmatprep.subr.bf16.mxu0 %v2497_v44  ;;  %6027 = vpow2.f32 %v1467_v54 }
 0x5d6   : > { %v1403_v26 = vpop.permute.xlu0 %1402  ;;  %6029 = vpow2.f32 %v1473_v56 }
 0x5d7   : > { %v1444_v39 = vsub.f32 %v7712_v60, %v1403_v26  ;;  %v1477_v60 = vmul.f32 1.442695, %v1448_v58 }
 0x5d8   : > { %5613 = vmatpush3.bf16.msra.mxu0 %v2497_v44 }
 0x5d9   : > { %v1469_v16 = vmul.f32 1.442695, %v1444_v39 }
 0x5da   : > { %v1428_v32 = vpop.permute.xlu0 %1427 }
 0x5db   : > { %6031 = vpow2.f32 %v1469_v16  ;;  %v1449_v46 = vsub.f32 %v7716_v61, %v1428_v32 }
 0x5dc   : > { %6033 = vpow2.f32 %v1471_v27 }
 0x5dd   : > { %v8160_v42 = vpop.eup %6023  ;;  %v1479_v28 = vmul.f32 1.442695, %v1449_v46  ;;  %6035 = vpow2.f32 %v1477_v60 }
 0x5de   : > { %v8162_v19 = vpop.eup %6025  ;;  %v1418_v1 = vpop.permute.xlu0 %1417  ;;  %v1694_v48 = vpack.c.bf16 %v8160_v42, %v8154_v55 }
 0x5df   : > { %v1447_v47 = vsub.f32 %v7719_v62, %v1418_v1  ;;  %v1695_v61 = vpack.c.bf16 %v8157_v33, %v8162_v19  ;;  %6037 = vpow2.f32 %v1479_v28  ;;  %v8169_v63 = vpop.eup %6027 }
 0x5e0   : > { %5562 = vmatprep.mubr.bf16.mxu0 %v1694_v48  ;;  %v8171_v37 = vpop.eup %6029 }
 0x5e1   : > { %v1475_v21 = vmul.f32 1.442695, %v1447_v47  ;;  %5563 = vmatmul.mubr.bf16.gmra.mrb[36].mxu0 %v1695_v61 }
 0x5e3   : > { %6039 = vpow2.f32 %v1475_v21 }
 0x5e4   : > { %6041 = vpow2.f32 %v1481_v51 }
 0x5e5   : > { %v8173_v49 = vpop.eup %6031 }
 0x5e6   : > { %v8175_v53 = vpop.eup %6033  ;;  %v1696_v62 = vpack.c.bf16 %v8173_v49, %v8169_v63 }
 0x5e7   : > { %v1697_v30 = vpack.c.bf16 %v8171_v37, %v8175_v53  ;;  %v8181_v44 = vpop.eup %6035 }
 0x5e8   : > { %5566 = vmatprep.mubr.bf16.mxu0 %v1696_v62 }
 0x5e9   : > { %5567 = vmatmul.mubr.bf16.gmra.mrb[40].mxu0 %v1697_v30  ;;  %v8183_v54 = vpop.eup %6037 }
 0x5ed   : > { %v8185_v56 = vpop.eup %6039 }
 0x5ee   : > { %v8187_v26 = vpop.eup %6041  ;;  %v1698_v39 = vpack.c.bf16 %v8181_v44, %v8185_v56 }
 0x5ef   : > { %v1699_v27 = vpack.c.bf16 %v8187_v26, %v8183_v54 }
 0x5f0   : > { %5570 = vmatprep.mubr.bf16.mxu0 %v1698_v39 }
 0x5f1   : > { %5571 = vmatmul.mubr.bf16.gmra.mrb[44].mxu0 %v1699_v27 }
 0x5f3   : > { %v2149_v58 = vpop.permute.xlu0 %2148 }
 0x5f4   : > { %v2218_v46 = vsub.f32 %v7729_v3, %v2149_v58 }
 0x5f6   : > { %v2236_v47 = vmul.f32 1.442695, %v2218_v46 }
 0x5f7   : > { %v2139_v16 = vpop.permute.xlu0 %2138 }
 0x5f8   : > { %v2216_v32 = vsub.f32 %v7732_v4, %v2139_v16 }
 0x5f9   : > { %v2144_v18 = vpop.permute.xlu1 %2143 }
 0x5fa   : > { %v2232_v60 = vmul.f32 1.442695, %v2216_v32  ;;  %v2217_v28 = vsub.f32 %v7737_v6, %v2144_v18 }
 0x5fb   : > { %v2499_v1 = vpop.permute.xlu0 %2498 }
 0x5fc   : > { %v2234_v48 = vmul.f32 1.442695, %v2217_v28  ;;  %5614 = vmatprep.subr.bf16.mxu0 %v2499_v1  ;;  %6043 = vpow2.f32 %v2232_v60 }
 0x5fd   : > { %v2154_v61 = vpop.permute.xlu1 %2153  ;;  %5615 = vmatpush3.bf16.msra.mxu0 %v2499_v1 }
 0x5fe   : > { %6045 = vpow2.f32 %v2234_v48  ;;  %v2219_v51 = vsub.f32 %v7734_v5, %v2154_v61 }
 0x5ff   : > { %v2503_v21 = vpop.permute.xlu0 %2502  ;;  %6047 = vpow2.f32 %v2236_v47 }
 0x600   : > { %v2238_v62 = vmul.f32 1.442695, %v2219_v51 }
 0x601   : > { %v2501_v4 = vpop.permute.xlu1 %2500 }
 0x602   : > { %6049 = vpow2.f32 %v2238_v62  ;;  %5616 = vmatprep.subr.bf16.mxu0 %v2501_v4 }
 0x603   : > { %v2669_v3 = vpop.permute.xlu0 %2668  ;;  %5617 = vmatpush3.bf16.msra.mxu0 %v2501_v4 }
 0x604   : > { %5618 = vmatprep.subr.bf16.mxu0 %v2503_v21 }
 0x605   : > { %v2505_v6 = vpop.permute.xlu1 %2504 }
 0x606   : > { %v8197_v30 = vpop.eup %6043 }
 0x607   : > { %v8199_v39 = vpop.permute.xlu0 %2672  ;;  %5619 = vmatpush3.bf16.msra.mxu0 %v2503_v21 }
 0x608   : > { %v8201_v27 = vpop.eup %6045  ;;  %5620 = vmatprep.subr.bf16.mxu0 %v2505_v6 }
 0x609   : > { %v2671_v58 = vpop.permute.xlu1 %2670  ;;  %v2474_v5 = vpack.c.bf16 %v8201_v27, %v8197_v30  ;;  %v8205_v16 = vpop.eup %6047 }
 0x60b   : > { %v2169_v32 = vpop.permute.xlu0 %2168  ;;  %5621 = vmatpush3.bf16.msra.mxu0 %v2505_v6  ;;  %5622 = vmatprep.mubr.bf16.mxu0 %v2474_v5  ;;  %v2709_v5 = vsel %vm1097_vm2, %v2669_v3, 0 }
 0x60c   : > { %v8207_v46 = vpop.eup %6049  ;;  %5798 = vmatprep.subr.msk.bf16.mxu0 %vm1097_vm2, %v2669_v3  ;;  %v2222_v1 = vsub.f32 %v7741_v7, %v2169_v32  ;;  %v10293_v3 = vld [vmem:[#allocation35_spill] sm:$0xff] }
 0x60d   : > { %v2174_v18 = vpop.permute.xlu1 %2173  ;;  %v2475_v60 = vpack.c.bf16 %v8207_v46, %v8205_v16 }
 0x60e   : > { %v2223_v28 = vsub.f32 %v7746_v9, %v2174_v18  ;;  %v2244_v4 = vmul.f32 1.442695, %v2222_v1 }
 0x60f   : > { %v2159_v48 = vpop.permute.xlu0 %2158  ;;  %5623 = vmatmul.mubr.bf16.vlgmr.msra.gmra.mrb[48].mxu0 %v2475_v60 }
 0x610   : > { %v2246_v47 = vmul.f32 1.442695, %v2223_v28  ;;  %v2220_v61 = vsub.f32 %v7744_v8, %v2159_v48 }
 0x611   : > { %v2164_v51 = vpop.permute.xlu1 %2163 }
 0x612   : > { %v2240_v21 = vmul.f32 1.442695, %v2220_v61  ;;  %v2221_v62 = vsub.f32 %v7748_v10, %v2164_v51  ;;  %6051 = vpow2.f32 %v2246_v47  ;;  %v2712_v61 = vsel %vm1097_vm2, %v2671_v58, 0 }
 0x613   : > { %v2194_v6 = vpop.permute.xlu0 %2193 }
 0x614   : > { %v2242_v17 = vmul.f32 1.442695, %v2221_v62  ;;  %5639 = vmatpush3.bf16.xpose.msra.mxu0 %v2709_v5  ;;  %6053 = vpow2.f32 %v2240_v21  ;;  %v2227_v8 = vsub.f32 %v7757_v13, %v2194_v6  ;;  %v10294_v62 = vld [vmem:[#allocation37_spill] sm:$0xff] }
 0x615   : > { %v2189_v9 = vpop.permute.xlu1 %2188  ;;  %5799 = vmatprep.subr.msk.bf16.mxu0 %vm1097_vm2, %v2671_v58 }
 0x616   : > { %6055 = vpow2.f32 %v2242_v17  ;;  %v2226_v7 = vsub.f32 %v7752_v11, %v2189_v9  ;;  %v2254_v48 = vmul.f32 1.442695, %v2227_v8 }
 0x617   : > { %6057 = vpow2.f32 %v2244_v4  ;;  %v2184_v32 = vpop.permute.xlu0 %2183 }
 0x618   : > { %v2252_v18 = vmul.f32 1.442695, %v2226_v7  ;;  %v2225_v10 = vsub.f32 %v7760_v14, %v2184_v32  ;;  %v10295_v7 = vld [vmem:[#allocation39_spill] sm:$0xff] }
 0x619   : > { %v2179_v60 = vpop.permute.xlu1 %2178 }
 0x61a   : > { %v2250_v28 = vmul.f32 1.442695, %v2225_v10  ;;  %v2224_v1 = vsub.f32 %v10293_v3, %v2179_v60  ;;  %6059 = vpow2.f32 %v2252_v18  ;;  %v2715_v10 = vsel %vm1097_vm2, %v8199_v39, 0 }
 0x61b   : > { %v2209_v47 = vpop.permute.xlu0 %2208 }
 0x61c   : > { %v2248_v51 = vmul.f32 1.442695, %v2224_v1  ;;  %5641 = vmatpush3.bf16.xpose.msra.mxu0 %v2712_v61  ;;  %6061 = vpow2.f32 %v2250_v28  ;;  %v8225_v11 = vpop.eup %6051 }
 0x61d   : > { %v2675_v17 = vpop.permute.xlu1 %2674  ;;  %5800 = vmatprep.subr.msk.bf16.mxu0 %vm1097_vm2, %v8199_v39 }
 0x61e   : > { %6063 = vpow2.f32 %v2248_v51  ;;  %v8227_v13 = vpop.eup %6053  ;;  %v2718_v39 = vsel %vm1097_vm2, %v2675_v17, 0 }
 0x61f   : > { %6065 = vpow2.f32 %v2254_v48  ;;  %v2199_v14 = vpop.permute.xlu0 %2198 }
 0x620   : > { %v8229_v21 = vpop.eup %6055  ;;  %v2228_v4 = vsub.f32 %v10294_v62, %v2199_v14 }
 0x621   : > { %v8232_v58 = vpop.eup %6057  ;;  %v2204_v6 = vpop.permute.xlu1 %2203  ;;  %v2476_v5 = vpack.c.bf16 %v8229_v21, %v8227_v13 }
 0x622   : > { %v2256_v9 = vmul.f32 1.442695, %v2228_v4  ;;  %v2229_v8 = vsub.f32 %v10295_v7, %v2204_v6  ;;  %v2477_v32 = vpack.c.bf16 %v8225_v11, %v8232_v58 }
 0x623   : > { %5626 = vmatprep.mubr.bf16.mxu0 %v2476_v5  ;;  %v2677_v51 = vpop.permute.xlu0 %2676  ;;  %v10296_v5 = vld [vmem:[#allocation36_spill] sm:$0xff] }
 0x624   : > { %v2258_v18 = vmul.f32 1.442695, %v2229_v8  ;;  %5627 = vmatmul.mubr.bf16.gmra.mrb[52].mxu0 %v2477_v32  ;;  %6067 = vpow2.f32 %v2256_v9  ;;  %v8241_v60 = vpop.eup %6059  ;;  %v2721_v6 = vsel %vm1097_vm2, %v2677_v51, 0  ;;  %v2230_v9 = vsub.f32 %v10296_v5, %v2209_v47 }
 0x625   : > { %5643 = vmatpush3.bf16.xpose.msra.mxu0 %v2715_v10 }
 0x626   : > { %6069 = vpow2.f32 %v2258_v18  ;;  %5801 = vmatprep.subr.msk.bf16.mxu0 %vm1097_vm2, %v2675_v17  ;;  %v8244_v28 = vpop.eup %6061  ;;  %v2260_v7 = vmul.f32 1.442695, %v2230_v9  ;;  %v2661_v9 = vld [vmem:[#allocation2 + $0x88] sm:$0xff] }
 0x628   : > { %v8246_v3 = vpop.eup %6063  ;;  %6071 = vpow2.f32 %v2260_v7  ;;  %v2662_v7 = vld [vmem:[#allocation2 + $0x90] sm:$0xff] }
 0x629   : > { %v8248_v1 = vpop.eup %6065  ;;  %v2478_v48 = vpack.c.bf16 %v8244_v28, %v8246_v3 }
 0x62a   : > { %v2479_v61 = vpack.c.bf16 %v8248_v1, %v8241_v60 }
 0x62b   : > { %5630 = vmatprep.mubr.bf16.mxu0 %v2478_v48  ;;  %v2681_v48 = vpop.permute.xlu0 %2680 }
 0x62c   : > { %5631 = vmatmul.mubr.bf16.gmra.mrb[56].mxu0 %v2479_v61  ;;  %v2727_v47 = vsel %vm1097_vm2, %v2681_v48, 0 }
 0x62d   : > { %5645 = vmatpush3.bf16.xpose.msra.mxu0 %v2718_v39 }
 0x62e   : > { %5802 = vmatprep.subr.msk.bf16.mxu0 %vm1097_vm2, %v2677_v51  ;;  %v8256_v14 = vpop.eup %6067 }
 0x630   : > { %v8258_v62 = vpop.eup %6069 }
 0x631   : > { %v2480_v4 = vpack.c.bf16 %v8258_v62, %v8256_v14 }
 0x632   : > { %v8269_v51 = vpop.eup %6071 }
 0x633   : > { %5634 = vmatprep.mubr.bf16.mxu0 %v2480_v4 }
 0x635   : > { %5647 = vmatpush3.bf16.xpose.msra.mxu0 %v2721_v6  ;;  %v2660_v6 = vld [vmem:[#allocation2 + $0x80] sm:$0xff] }
 0x644   : > { %v2214_v8 = vpop.permute.xlu1 %2213 }
 0x645   : > { %v2231_v17 = vsub.f32 %v7771_v20, %v2214_v8  ;;  %v2663_v8 = vld [vmem:[#allocation2 + $0x98] sm:$0xff] }
 0x647   : > { %v2262_v32 = vmul.f32 1.442695, %v2231_v17  ;;  %v2664_v17 = vld [vmem:[#allocation2 + $0xa0] sm:$0xff] }
 0x648   : > { %v2679_v18 = vpop.permute.xlu1 %2678 }
 0x649   : > { %6073 = vpow2.f32 %v2262_v32  ;;  %5803 = vmatprep.subr.msk.bf16.mxu0 %vm1097_vm2, %v2679_v18  ;;  %v2724_v10 = vsel %vm1097_vm2, %v2679_v18, 0  ;;  %v2665_v32 = vld [vmem:[#allocation2 + $0xa8] sm:$0xff]  ;;  %v2666_v18 = vld [vmem:[#allocation2 + $0xb0] sm:$0xff] }
 0x64a   : > { %5649 = vmatpush3.bf16.xpose.msra.mxu0 %v2724_v10  ;;  %v2667_v10 = vld [vmem:[#allocation2 + $0xb8] sm:$0xff] }
 0x64b   : > { %5804 = vmatprep.subr.msk.bf16.mxu0 %vm1097_vm2, %v2681_v48 }
 0x64c   : > { %v2683_v61 = vpop.permute.xlu1 %2682 }
 0x64d   : > { %v2730_v5 = vsel %vm1097_vm2, %v2683_v61, 0 }
 0x650   : > { %v3289_v39 = vpop.permute.xlu1 %3288 }
 0x651   : > { %5670 = vmatprep.subr.bf16.mxu1 %v3289_v39 }
 0x652   : > { %5651 = vmatpush3.bf16.xpose.msra.mxu0 %v2727_v47  ;;  %5671 = vmatpush3.bf16.msra.mxu1 %v3289_v39 }
 0x653   : > { %v8271_v20 = vpop.eup %6073  ;;  %5805 = vmatprep.subr.msk.bf16.mxu0 %vm1097_vm2, %v2683_v61 }
 0x654   : > { %v2481_v4 = vpack.c.bf16 %v8271_v20, %v8269_v51 }
 0x656   : > { %5635 = vmatmul.mubr.bf16.gmra.mrb[60].mxu0 %v2481_v4 }
 0x657   : > { %5654 = vmatprep.mubr.msk.bf16.mxu0 %vm1097_vm2, %v2660_v6 }
 0x65a   : > { %5653 = vmatpush3.bf16.xpose.msra.mxu0 %v2730_v5 }
 0x661   : > { %5655 = vmatmul.mubr.msk.bf16.vlgmr.msra.gmra.mrb[64].mxu0 %vm1097_vm2, %v2661_v9 }
 0x662   : > { %5658 = vmatprep.mubr.msk.bf16.mxu0 %vm1097_vm2, %v2662_v7 }
 0x669   : > { %5659 = vmatmul.mubr.msk.bf16.gmra.mrb[68].mxu0 %vm1097_vm2, %v2663_v8 }
 0x66a   : > { %5662 = vmatprep.mubr.msk.bf16.mxu0 %vm1097_vm2, %v2664_v17 }
 0x671   : > { %5663 = vmatmul.mubr.msk.bf16.gmra.mrb[72].mxu0 %vm1097_vm2, %v2665_v32 }
 0x672   : > { %5666 = vmatprep.mubr.msk.bf16.mxu0 %vm1097_vm2, %v2666_v18 }
 0x679   : > { %5667 = vmatmul.mubr.msk.bf16.gmra.mrb[76].mxu0 %vm1097_vm2, %v2667_v10 }
 0x682   : > { %v8285_v48 = vpop.f32.mrb[32].mxu0 }
 0x683   : > { %10297 = vst [vmem:[#allocation35_spill] sm:$0xff] %v8285_v48  ;;  %v8287_v61 = vpop.f32.mrb[33].mxu0 }
 0x684   : > { %10298 = vst [vmem:[#allocation37_spill] sm:$0xff] %v8287_v61  ;;  %v8289_v39 = vpop.f32.mrb[34].mxu0 }
 0x685   : > { %10299 = vst [vmem:[#allocation39_spill] sm:$0xff] %v8289_v39  ;;  %v8291_v47 = vpop.f32.mrb[35].mxu0 }
 0x686   : > { %10300 = vst [vmem:[#allocation36_spill] sm:$0xff] %v8291_v47 }
 0x6b4   : > { %v8293_v4 = vpop.f32.mrb[36].mxu0 }
 0x6b5   : > { %10301 = vst [vmem:[#allocation101_spill] sm:$0xff] %v8293_v4  ;;  %v8295_v6 = vpop.f32.mrb[37].mxu0 }
 0x6b6   : > { %10302 = vst [vmem:[#allocation102_spill] sm:$0xff] %v8295_v6  ;;  %v8297_v5 = vpop.f32.mrb[38].mxu0 }
 0x6b7   : > { %10303 = vst [vmem:[#allocation103_spill] sm:$0xff] %v8297_v5  ;;  %v8299_v9 = vpop.f32.mrb[39].mxu0 }
 0x6b8   : > { %10304 = vst [vmem:[#allocation104_spill] sm:$0xff] %v8299_v9 }
 0x6bc   : > { %v8301_v7 = vpop.f32.mrb[40].mxu0 }
 0x6bd   : > { %10305 = vst [vmem:[#allocation105_spill] sm:$0xff] %v8301_v7  ;;  %v8303_v8 = vpop.f32.mrb[41].mxu0 }
 0x6be   : > { %10306 = vst [vmem:[#allocation106_spill] sm:$0xff] %v8303_v8  ;;  %v8305_v17 = vpop.f32.mrb[42].mxu0 }
 0x6bf   : > { %10307 = vst [vmem:[#allocation107_spill] sm:$0xff] %v8305_v17  ;;  %v8307_v32 = vpop.f32.mrb[43].mxu0 }
 0x6c0   : > { %10308 = vst [vmem:[#allocation108_spill] sm:$0xff] %v8307_v32 }
 0x6c4   : > { %v8309_v18 = vpop.f32.mrb[44].mxu0 }
 0x6c5   : > { %10309 = vst [vmem:[#allocation109_spill] sm:$0xff] %v8309_v18  ;;  %v8311_v10 = vpop.f32.mrb[45].mxu0 }
 0x6c6   : > { %10310 = vst [vmem:[#allocation110_spill] sm:$0xff] %v8311_v10  ;;  %v8313_v31 = vpop.f32.mrb[46].mxu0 }
 0x6c7   : > { %10311 = vst [vmem:[#allocation111_spill] sm:$0xff] %v8313_v31  ;;  %v8315_v4 = vpop.f32.mrb[47].mxu0 }
 0x6c8   : > { %10312 = vst [vmem:[#allocation112_spill] sm:$0xff] %v8315_v4 }
 0x6e2   : > { %v8317_v6 = vpop.f32.mrb[48].mxu0 }
 0x6e3   : > { %10313 = vst [vmem:[#allocation113_spill] sm:$0xff] %v8317_v6  ;;  %v8319_v5 = vpop.f32.mrb[49].mxu0 }
 0x6e4   : > { %10314 = vst [vmem:[#allocation114_spill] sm:$0xff] %v8319_v5  ;;  %v8321_v9 = vpop.f32.mrb[50].mxu0 }
 0x6e5   : > { %10315 = vst [vmem:[#allocation115_spill] sm:$0xff] %v8321_v9  ;;  %v8323_v7 = vpop.f32.mrb[51].mxu0 }
 0x6e6   : > { %10316 = vst [vmem:[#allocation116_spill] sm:$0xff] %v8323_v7 }
 0x6f7   : > { %v8325_v8 = vpop.f32.mrb[52].mxu0 }
 0x6f8   : > { %10317 = vst [vmem:[#allocation117_spill] sm:$0xff] %v8325_v8  ;;  %v8327_v17 = vpop.f32.mrb[53].mxu0 }
 0x6f9   : > { %10318 = vst [vmem:[#allocation118_spill] sm:$0xff] %v8327_v17  ;;  %v8329_v32 = vpop.f32.mrb[54].mxu0 }
 0x6fa   : > { %10319 = vst [vmem:[#allocation119_spill] sm:$0xff] %v8329_v32  ;;  %v8331_v18 = vpop.f32.mrb[55].mxu0 }
 0x6fb   : > { %10320 = vst [vmem:[#allocation120_spill] sm:$0xff] %v8331_v18 }
 0x6ff   : > { %v8333_v10 = vpop.f32.mrb[56].mxu0 }
 0x700   : > { %10321 = vst [vmem:[#allocation121_spill] sm:$0xff] %v8333_v10  ;;  %v8335_v31 = vpop.f32.mrb[57].mxu0 }
 0x701   : > { %10322 = vst [vmem:[#allocation122_spill] sm:$0xff] %v8335_v31  ;;  %v8337_v4 = vpop.f32.mrb[58].mxu0 }
 0x702   : > { %10323 = vst [vmem:[#allocation123_spill] sm:$0xff] %v8337_v4  ;;  %v8339_v6 = vpop.f32.mrb[59].mxu0 }
 0x703   : > { %10324 = vst [vmem:[#allocation124_spill] sm:$0xff] %v8339_v6 }
 0x729   : > { %v8341_v5 = vpop.f32.mrb[60].mxu0 }
 0x72a   : > { %10325 = vst [vmem:[#allocation125_spill] sm:$0xff] %v8341_v5  ;;  %v8343_v9 = vpop.f32.mrb[61].mxu0 }
 0x72b   : > { %10326 = vst [vmem:[#allocation126_spill] sm:$0xff] %v8343_v9  ;;  %v8345_v7 = vpop.f32.mrb[62].mxu0 }
 0x72c   : > { %10327 = vst [vmem:[#allocation127_spill] sm:$0xff] %v8345_v7  ;;  %v8347_v8 = vpop.f32.mrb[63].mxu0 }
 0x72d   : > { %10328 = vst [vmem:[#allocation128_spill] sm:$0xff] %v8347_v8 }
 0x734   : > { %v8349_v17 = vpop.f32.mrb[64].mxu0 }
 0x735   : > { %2850 = vmax.xlane.f32.xlu0 %v8349_v17  ;;  %v8352_v32 = vpop.f32.mrb[65].mxu0 }
 0x736   : > { %v8354_v10 = vpop.f32.mrb[66].mxu0 }
 0x737   : > { %v8356_v31 = vpop.f32.mrb[67].mxu0 }
 0x738   : > { %2848 = vmax.xlane.f32.xlu1 %v8356_v31 }
 0x739   : > { %2846 = vmax.xlane.f32.xlu0 %v8352_v32 }
 0x73c   : > { %v8360_v5 = vpop.f32.mrb[68].mxu0 }
 0x73d   : > { %2852 = vmax.xlane.f32.xlu0 %v8354_v10  ;;  %v8363_v9 = vpop.f32.mrb[69].mxu0 }
 0x73e   : > { %v8365_v7 = vpop.f32.mrb[70].mxu0 }
 0x73f   : > { %v8367_v8 = vpop.f32.mrb[71].mxu0 }
 0x740   : > { %10329 = vst [vmem:[#allocation129_spill] sm:$0xff] %v8367_v8 }
 0x744   : > { %v8369_v4 = vpop.f32.mrb[72].mxu0 }
 0x745   : > { %10330 = vst [vmem:[#allocation130_spill] sm:$0xff] %v8369_v4  ;;  %v8371_v6 = vpop.f32.mrb[73].mxu0 }
 0x746   : > { %10331 = vst [vmem:[#allocation131_spill] sm:$0xff] %v8371_v6  ;;  %v8373_v18 = vpop.f32.mrb[74].mxu0 }
 0x747   : > { %10332 = vst [vmem:[#allocation132_spill] sm:$0xff] %v8373_v18  ;;  %v8375_v47 = vpop.f32.mrb[75].mxu0 }
 0x748   : > { %10333 = vst [vmem:[#allocation133_spill] sm:$0xff] %v8375_v47 }
 0x749   : > { %3294 = vrot.lane.b32.xlu1 %v7592_v38, %s6680_s8  ;;  %v8401_v38 = vld [vmem:[#allocation3 + $0x110] sm:$0xff] }
 0x74a   : > { %10338 = vst [vmem:[#allocation138_spill] sm:$0xff] %v8401_v38 }
 0x74c   : > { %v8379_v39 = vpop.f32.mrb[76].mxu0 }
 0x74d   : > { %10334 = vst [vmem:[#allocation134_spill] sm:$0xff] %v8379_v39  ;;  %v8381_v48 = vpop.f32.mrb[77].mxu0 }
 0x74e   : > { %10335 = vst [vmem:[#allocation135_spill] sm:$0xff] %v8381_v48  ;;  %v8383_v61 = vpop.f32.mrb[78].mxu0 }
 0x74f   : > { %10336 = vst [vmem:[#allocation136_spill] sm:$0xff] %v8383_v61  ;;  %v8385_v41 = vpop.f32.mrb[79].mxu0 }
 0x750   : > { %10337 = vst [vmem:[#allocation137_spill] sm:$0xff] %v8385_v41 }
 0x753   : > { %3290 = vrot.lane.b32.xlu0 %v7568_v24, %s6680_s8  ;;  %v3293_v24 = vpop.permute.xlu1 %3292 }
 0x76d   : > { %2858 = vmax.xlane.f32.xlu1 %v8360_v5 }
 0x771   : > { %2854 = vmax.xlane.f32.xlu1 %v8363_v9 }
 0x772   : > { %2860 = vmax.xlane.f32.xlu0 %v8365_v7 }
 0x775   : > { %2866 = vmax.xlane.f32.xlu1 %v8369_v4 }
 0x776   : > { %2856 = vmax.xlane.f32.xlu0 %v8367_v8 }
 0x779   : > { %2862 = vmax.xlane.f32.xlu1 %v8371_v6  ;;  %v8406_v6 = vld [vmem:[#allocation3 + $0x108] sm:$0xff] }
 0x77a   : > { %2868 = vmax.xlane.f32.xlu0 %v8373_v18  ;;  %10340 = vst [vmem:[#allocation140_spill] sm:$0xff] %v8406_v6  ;;  %v8408_v18 = vld [vmem:[#allocation3 + $0x100] sm:$0xff] }
 0x77d   : > { %2874 = vmax.xlane.f32.xlu1 %v8379_v39  ;;  %v8426_v39 = vld [vmem:[#allocation3 + $0x118] sm:$0xff] }
 0x77e   : > { %2864 = vmax.xlane.f32.xlu0 %v8375_v47  ;;  %10342 = vst [vmem:[#allocation142_spill] sm:$0xff] %v8426_v39 }
 0x781   : > { %2870 = vmax.xlane.f32.xlu1 %v8381_v48 }
 0x782   : > { %2876 = vmax.xlane.f32.xlu0 %v8383_v61 }
 0x786   : > { %2872 = vmax.xlane.f32.xlu0 %v8385_v41 }
 0x7c2   : > { %v2851_v4 = vpop.xlane.xlu0 %2850 }
 0x7c3   : > { %v8404_v8 = vmax.f32 %v8401_v38, %v2851_v4 }
 0x7c5   : > { %10339 = vst [vmem:[#allocation139_spill] sm:$0xff] %v8404_v8  ;;  %3443 = vst.msk [vmem:[#allocation3 + $0x110] sm:$0xff] %vm1563_vm3, %v8404_v8  ;;  %v2849_v61 = vpop.xlane.xlu1 %2848  ;;  %2954 = vperm.xlu0 %5986, %v8404_v8  }
 0x7c6   : > { %v8416_v48 = vmax.f32 %v8406_v6, %v2849_v61  ;;  %v2847_v41 = vpop.xlane.xlu0 %2846 }
 0x7c7   : > { %v8419_v4 = vmax.f32 %v8408_v18, %v2847_v41 }
 0x7c8   : > { %10341 = vst [vmem:[#allocation141_spill] sm:$0xff] %v8416_v48  ;;  %3442 = vst.msk [vmem:[#allocation3 + $0x108] sm:$0xff] %vm1563_vm3, %v8416_v48  ;;  %2949 = vperm.xlu1 %5985, %v8416_v48   ;;  %v8460_v48 = vld [vmem:[#allocation3 + $0x120] sm:$0xff] }
 0x7c9   : > { %3441 = vst.msk [vmem:[#allocation3 + $0x100] sm:$0xff] %vm1563_vm3, %v8419_v4  ;;  %2944 = vperm.xlu0 %5986, %v8419_v4   ;;  %10346 = vst [vmem:[#allocation146_spill] sm:$0xff] %v8460_v48 }
 0x7ca   : > { %v2853_v41 = vpop.xlane.xlu0 %2852 }
 0x7cb   : > { %v8434_v61 = vmax.f32 %v8426_v39, %v2853_v41  ;;  %v3295_v41 = vpop.permute.xlu1 %3294  ;;  %v8495_v39 = vld [vmem:[#allocation3 + $0x140] sm:$0xff] }
 0x7cc   : > { %10354 = vst [vmem:[#allocation154_spill] sm:$0xff] %v8495_v39 }
 0x7cd   : > { %10343 = vst [vmem:[#allocation143_spill] sm:$0xff] %v8434_v61  ;;  %3444 = vst.msk [vmem:[#allocation3 + $0x118] sm:$0xff] %vm1563_vm3, %v8434_v61  ;;  %2959 = vperm.xlu1 %5985, %v8434_v61   ;;  %3296 = vrot.lane.b32.xlu0 %v7604_v45, %s6680_s8  ;;  %v8475_v61 = vld [vmem:[#allocation3 + $0x150] sm:$0xff] }
 0x7ce   : > { %v3291_v8 = vpop.permute.xlu0 %3290  ;;  %10350 = vst [vmem:[#allocation150_spill] sm:$0xff] %v8475_v61 }
 0x7cf   : > { %5672 = vmatprep.subr.bf16.mxu1 %v3291_v8 }
 0x7d0   : > { %5673 = vmatpush3.bf16.msra.mxu1 %v3291_v8  ;;  %v8455_v8 = vld [vmem:[#allocation3 + $0x130] sm:$0xff] }
 0x7d1   : > { %5674 = vmatprep.subr.bf16.mxu1 %v3293_v24  ;;  %3298 = vrot.lane.b32.xlu1 %v7616_v52, %s6680_s8  ;;  %10344 = vst [vmem:[#allocation144_spill] sm:$0xff] %v8455_v8 }
 0x7d2   : > { %3300 = vrot.lane.b32.xlu0 %v7628_v59, %s6680_s8 }
 0x7d4   : > { %5675 = vmatpush3.bf16.msra.mxu1 %v3293_v24 }
 0x7d5   : > { %5676 = vmatprep.subr.bf16.mxu1 %v3295_v41  ;;  %3302 = vrot.lane.b32.xlu1 %v7640_v2, %s6680_s8 }
 0x7d6   : > { %3466 = vrot.lane.b32.xlu0 %v7554_v15, %s6681_s21  ;;  %v8467_v15 = vld [vmem:[#allocation3 + $0x138] sm:$0xff] }
 0x7d7   : > { %10347 = vst [vmem:[#allocation147_spill] sm:$0xff] %v8467_v15 }
 0x7d8   : > { %5677 = vmatpush3.bf16.msra.mxu1 %v3295_v41 }
 0x7d9   : > { %3468 = vrot.lane.b32.xlu1 %v7566_v22, %s6681_s21 }
 0x7da   : > { %3470 = vrot.lane.b32.xlu0 %v7578_v29, %s6681_s21 }
 0x7fa   : > { %v2859_v47 = vpop.xlane.xlu1 %2858 }
 0x7fb   : > { %v8458_v24 = vmax.f32 %v8455_v8, %v2859_v47 }
 0x7fd   : > { %10345 = vst [vmem:[#allocation145_spill] sm:$0xff] %v8458_v24  ;;  %3447 = vst.msk [vmem:[#allocation3 + $0x130] sm:$0xff] %vm1563_vm3, %v8458_v24  ;;  %2974 = vperm.xlu0 %5986, %v8458_v24   ;;  %v8482_v24 = vld [vmem:[#allocation3 + $0x128] sm:$0xff] }
 0x7fe   : > { %v2855_v22 = vpop.xlane.xlu1 %2854  ;;  %10351 = vst [vmem:[#allocation151_spill] sm:$0xff] %v8482_v24 }
 0x7ff   : > { %v8470_v29 = vmax.f32 %v8460_v48, %v2855_v22  ;;  %v2861_v41 = vpop.xlane.xlu0 %2860  ;;  %v8501_v22 = vld [vmem:[#allocation3 + $0x158] sm:$0xff] }
 0x800   : > { %v8473_v47 = vmax.f32 %v8467_v15, %v2861_v41  ;;  %10355 = vst [vmem:[#allocation155_spill] sm:$0xff] %v8501_v22 }
 0x801   : > { %10348 = vst [vmem:[#allocation148_spill] sm:$0xff] %v8470_v29  ;;  %3445 = vst.msk [vmem:[#allocation3 + $0x120] sm:$0xff] %vm1563_vm3, %v8470_v29  ;;  %2964 = vperm.xlu0 %5986, %v8470_v29  }
 0x802   : > { %10349 = vst [vmem:[#allocation149_spill] sm:$0xff] %v8473_v47  ;;  %3448 = vst.msk [vmem:[#allocation3 + $0x138] sm:$0xff] %vm1563_vm3, %v8473_v47  ;;  %v2867_v41 = vpop.xlane.xlu1 %2866  ;;  %2979 = vperm.xlu1 %5985, %v8473_v47   ;;  %v8520_v47 = vld [vmem:[#allocation3 + $0x148] sm:$0xff] }
 0x803   : > { %v8490_v8 = vmax.f32 %v8475_v61, %v2867_v41  ;;  %v2857_v6 = vpop.xlane.xlu0 %2856  ;;  %v8514_v61 = vld [vmem:[#allocation3 + $0x170] sm:$0xff] }
 0x804   : > { %v8493_v48 = vmax.f32 %v8482_v24, %v2857_v6  ;;  %10358 = vst [vmem:[#allocation158_spill] sm:$0xff] %v8514_v61 }
 0x805   : > { %10352 = vst [vmem:[#allocation152_spill] sm:$0xff] %v8490_v8  ;;  %3451 = vst.msk [vmem:[#allocation3 + $0x150] sm:$0xff] %vm1563_vm3, %v8490_v8 }
 0x806   : > { %10353 = vst [vmem:[#allocation153_spill] sm:$0xff] %v8493_v48  ;;  %3446 = vst.msk [vmem:[#allocation3 + $0x128] sm:$0xff] %vm1563_vm3, %v8493_v48  ;;  %v2863_v41 = vpop.xlane.xlu1 %2862  ;;  %2969 = vperm.xlu1 %5985, %v8493_v48  }
 0x807   : > { %v8509_v6 = vmax.f32 %v8495_v39, %v2863_v41  ;;  %v2869_v15 = vpop.xlane.xlu0 %2868  ;;  %v8534_v39 = vld [vmem:[#allocation3 + $0x160] sm:$0xff] }
 0x808   : > { %v8512_v29 = vmax.f32 %v8501_v22, %v2869_v15  ;;  %10360 = vst [vmem:[#allocation160_spill] sm:$0xff] %v8534_v39  ;;  %v8540_v22 = vld [vmem:[#allocation3 + $0x178] sm:$0xff] }
 0x809   : > { %10356 = vst [vmem:[#allocation156_spill] sm:$0xff] %v8509_v6  ;;  %3449 = vst.msk [vmem:[#allocation3 + $0x140] sm:$0xff] %vm1563_vm3, %v8509_v6 }
 0x80a   : > { %10357 = vst [vmem:[#allocation157_spill] sm:$0xff] %v8512_v29  ;;  %3452 = vst.msk [vmem:[#allocation3 + $0x158] sm:$0xff] %vm1563_vm3, %v8512_v29  ;;  %2994 = vperm.xlu1 %5985, %v8490_v8   ;;  %2999 = vperm.xlu0 %5986, %v8512_v29   ;;  %v2875_v15 = vpop.xlane.xlu1 %2874  ;;  %v8558_v8 = vld [vmem:[#allocation3 + $0x168] sm:$0xff] }
 0x80b   : > { %v2865_v41 = vpop.xlane.xlu0 %2864  ;;  %v8529_v24 = vmax.f32 %v8514_v61, %v2875_v15  ;;  %10361 = vst [vmem:[#allocation161_spill] sm:$0xff] %v8540_v22 }
 0x80c   : > { %v8532_v38 = vmax.f32 %v8520_v47, %v2865_v41 }
 0x80d   : > { %10359 = vst [vmem:[#allocation159_spill] sm:$0xff] %v8529_v24  ;;  %3455 = vst.msk [vmem:[#allocation3 + $0x170] sm:$0xff] %vm1563_vm3, %v8529_v24 }
 0x80e   : > { %3450 = vst.msk [vmem:[#allocation3 + $0x148] sm:$0xff] %vm1563_vm3, %v8532_v38  ;;  %2984 = vperm.xlu1 %5985, %v8509_v6   ;;  %2989 = vperm.xlu0 %5986, %v8532_v38   ;;  %v2871_v15 = vpop.xlane.xlu1 %2870 }
 0x80f   : > { %v8549_v41 = vmax.f32 %v8534_v39, %v2871_v15  ;;  %v2877_v48 = vpop.xlane.xlu0 %2876 }
 0x810   : > { %v8552_v61 = vmax.f32 %v8540_v22, %v2877_v48  ;;  %v3465_v22 = vld [vmem:[#allocation2 + $0xf8] sm:$0xff] }
 0x811   : > { %10362 = vst [vmem:[#allocation162_spill] sm:$0xff] %v8549_v41  ;;  %3453 = vst.msk [vmem:[#allocation3 + $0x160] sm:$0xff] %vm1563_vm3, %v8549_v41 }
 0x812   : > { %10363 = vst [vmem:[#allocation163_spill] sm:$0xff] %v8552_v61  ;;  %3456 = vst.msk [vmem:[#allocation3 + $0x178] sm:$0xff] %vm1563_vm3, %v8552_v61  ;;  %3472 = vrot.lane.b32.xlu1 %v7590_v36, %s6681_s21  ;;  %3014 = vperm.xlu0 %5986, %v8529_v24  }
 0x813   : > { %v2873_v48 = vpop.xlane.xlu0 %2872 }
 0x814   : > { %v8568_v15 = vmax.f32 %v8558_v8, %v2873_v48 }
 0x816   : > { %10364 = vst [vmem:[#allocation164_spill] sm:$0xff] %v8568_v15  ;;  %3454 = vst.msk [vmem:[#allocation3 + $0x168] sm:$0xff] %vm1563_vm3, %v8568_v15  ;;  %3004 = vperm.xlu0 %5986, %v8549_v41   ;;  %3009 = vperm.xlu1 %5985, %v8568_v15  }
 0x81a   : > { %3474 = vrot.lane.b32.xlu0 %v7602_v43, %s6681_s21  ;;  %3019 = vperm.xlu1 %5985, %v8552_v61  }
 0x81e   : > { %3478 = vrot.lane.b32.xlu0 %v7626_v57, %s6681_s21  ;;  %3476 = vrot.lane.b32.xlu1 %v7614_v50, %s6681_s21 }
 0x822   : > { %3480 = vrot.lane.b32.xlu1 %v7638_v0, %s6681_s21 }
 0x83d   : > { %1515 = vadd.xlane.f32.xlu0 %v8115_v35 }
 0x841   : > { %1519 = vadd.xlane.f32.xlu0 %v8121_v12 }
 0x844   : > { %v2955_v36 = vpop.permute.xlu0 %2954 }
 0x845   : > { %1521 = vadd.xlane.f32.xlu0 %v8123_v40  ;;  %v3024_v48 = vsub.f32 %v8349_v17, %v2955_v36 }
 0x846   : > { %1517 = vadd.xlane.f32.xlu1 %v8113_v25 }
 0x847   : > { %v2950_v43 = vpop.permute.xlu1 %2949  ;;  %v3042_v12 = vmul.f32 1.442695, %v3024_v48 }
 0x848   : > { %v3023_v57 = vsub.f32 %v8356_v31, %v2950_v43  ;;  %v2945_v6 = vpop.permute.xlu0 %2944 }
 0x849   : > { %v3022_v50 = vsub.f32 %v8352_v32, %v2945_v6  ;;  %1525 = vadd.xlane.f32.xlu0 %v8160_v42  ;;  %v10373_v6 = vld [vmem:[#allocation44_spill] sm:$0xff] }
 0x84a   : > { %v3040_v0 = vmul.f32 1.442695, %v3023_v57  ;;  %1523 = vadd.xlane.f32.xlu1 %v8154_v55 }
 0x84b   : > { %v3038_v35 = vmul.f32 1.442695, %v3022_v50 }
 0x84c   : > { %6075 = vpow2.f32 %v3040_v0  ;;  %v2960_v29 = vpop.permute.xlu1 %2959  ;;  %v3297_v40 = vpop.permute.xlu0 %3296 }
 0x84d   : > { %6077 = vpow2.f32 %v3038_v35  ;;  %v3025_v25 = vsub.f32 %v8354_v10, %v2960_v29  ;;  %1529 = vadd.xlane.f32.xlu0 %v8157_v33  ;;  %5678 = vmatprep.subr.bf16.mxu1 %v3297_v40  ;;  %v10377_v35 = vld [vmem:[#allocation53_spill] sm:$0xff] }
 0x84e   : > { %1527 = vadd.xlane.f32.xlu1 %v8162_v19  ;;  %5679 = vmatpush3.bf16.msra.mxu1 %v3297_v40  ;;  %6079 = vpow2.f32 %v3042_v12 }
 0x84f   : > { %v3044_v31 = vmul.f32 1.442695, %v3025_v25 }
 0x850   : > { %v3299_v42 = vpop.permute.xlu1 %3298  ;;  %v3301_v55 = vpop.permute.xlu0 %3300 }
 0x851   : > { %6081 = vpow2.f32 %v3044_v31  ;;  %1533 = vadd.xlane.f32.xlu0 %v8173_v49  ;;  %5680 = vmatprep.subr.bf16.mxu1 %v3299_v42  ;;  %v10379_v31 = vld [vmem:[#allocation45_spill] sm:$0xff] }
 0x852   : > { %1531 = vadd.xlane.f32.xlu1 %v8169_v63  ;;  %5681 = vmatpush3.bf16.msra.mxu1 %v3299_v42 }
 0x853   : > { %5682 = vmatprep.subr.bf16.mxu1 %v3301_v55 }
 0x854   : > { %v3303_v33 = vpop.permute.xlu1 %3302  ;;  %v3467_v63 = vpop.permute.xlu0 %3466 }
 0x855   : > { %1537 = vadd.xlane.f32.xlu0 %v8171_v37 }
 0x856   : > { %v8600_v17 = vpop.eup %6075  ;;  %1535 = vadd.xlane.f32.xlu1 %v8175_v53  ;;  %5683 = vmatpush3.bf16.msra.mxu1 %v3301_v55 }
 0x857   : > { %v8603_v19 = vpop.eup %6077  ;;  %5684 = vmatprep.subr.bf16.mxu1 %v3303_v33 }
 0x858   : > { %v3280_v49 = vpack.c.bf16 %v8600_v17, %v8603_v19  ;;  %v8608_v32 = vpop.eup %6079 }
 0x859   : > { %1541 = vadd.xlane.f32.xlu0 %v8181_v44  ;;  %v3507_v44 = vsel %vm1097_vm2, %v3467_v63, 0 }
 0x85a   : > { %1539 = vadd.xlane.f32.xlu1 %v8185_v56  ;;  %5685 = vmatpush3.bf16.msra.mxu1 %v3303_v33  ;;  %v3469_v56 = vpop.permute.xlu1 %3468 }
 0x85b   : > { %v8611_v37 = vpop.eup %6081  ;;  %5686 = vmatprep.mubr.bf16.mxu1 %v3280_v49  ;;  %5806 = vmatprep.subr.msk.bf16.mxu1 %vm1097_vm2, %v3467_v63  ;;  %v10382_v63 = vld [vmem:[#allocation47_spill] sm:$0xff] }
 0x85c   : > { %v3281_v53 = vpack.c.bf16 %v8611_v37, %v8608_v32 }
 0x85d   : > { %1545 = vadd.xlane.f32.xlu0 %v8187_v26  ;;  %v3471_v26 = vpop.permute.xlu0 %3470 }
 0x85e   : > { %1543 = vadd.xlane.f32.xlu1 %v8183_v54  ;;  %5687 = vmatmul.mubr.bf16.vlgmr.msra.gmra.mrb[32].mxu1 %v3281_v53  ;;  %v3510_v54 = vsel %vm1097_vm2, %v3469_v56, 0  ;;  %v10383_v53 = vld [vmem:[#allocation49_spill] sm:$0xff] }
 0x861   : > { %2297 = vadd.xlane.f32.xlu0 %v8197_v30  ;;  %v3513_v30 = vsel %vm1097_vm2, %v3471_v26, 0 }
 0x862   : > { %2299 = vadd.xlane.f32.xlu1 %v8201_v27  ;;  %v10365_v27 = vld [vmem:[#allocation42_spill] sm:$0xff] }
 0x863   : > { %5703 = vmatpush3.bf16.xpose.msra.mxu1 %v3507_v44  ;;  %v10384_v44 = vsub.f32 %v10382_v63, %v10383_v53  ;;  %v10401_v63 = vld [vmem:[#allocation52_spill] sm:$0xff]  ;;  %v10402_v53 = vld [vmem:[#allocation54_spill] sm:$0xff] }
 0x864   : > { %5807 = vmatprep.subr.msk.bf16.mxu1 %vm1097_vm2, %v3469_v56 }
 0x865   : > { %2301 = vadd.xlane.f32.xlu0 %v8205_v16  ;;  %v10366_v16 = vsub.f32 %v10365_v27, %v7792_v34  ;;  %v1331_v56 = vmul.f32 1.442695, %v10384_v44  ;;  %v10403_v44 = vsub.f32 %v10401_v63, %v10402_v53 }
 0x866   : > { %2305 = vadd.xlane.f32.xlu1 %v8227_v13 }
 0x869   : > { %2303 = vadd.xlane.f32.xlu0 %v8207_v46  ;;  %v1323_v46 = vmul.f32 1.442695, %v10366_v16  ;;  %v10387_v16 = vld [vmem:[#allocation48_spill] sm:$0xff] }
 0x86a   : > { %2309 = vadd.xlane.f32.xlu1 %v8232_v58 }
 0x86b   : > { %5705 = vmatpush3.bf16.xpose.msra.mxu1 %v3510_v54  ;;  %6083 = vpow2.f32 %v1323_v46  ;;  %v10385_v54 = vld [vmem:[#allocation130_spill] sm:$0xff] }
 0x86c   : > { %5808 = vmatprep.subr.msk.bf16.mxu1 %vm1097_vm2, %v3471_v26  ;;  %v10388_v46 = vld [vmem:[#allocation50_spill] sm:$0xff] }
 0x86d   : > { %2307 = vadd.xlane.f32.xlu0 %v8229_v21  ;;  %v10368_v21 = vld [vmem:[#allocation40_spill] sm:$0xff] }
 0x86e   : > { %2313 = vadd.xlane.f32.xlu1 %v8246_v3 }
 0x871   : > { %2311 = vadd.xlane.f32.xlu0 %v8225_v11  ;;  %v10367_v11 = vld [vmem:[#allocation38_spill] sm:$0xff] }
 0x872   : > { %2317 = vadd.xlane.f32.xlu1 %v8241_v60  ;;  %v10369_v58 = vsub.f32 %v10367_v11, %v10368_v21 }
 0x873   : > { %5707 = vmatpush3.bf16.xpose.msra.mxu1 %v3513_v30  ;;  %v10386_v30 = vld [vmem:[#allocation132_spill] sm:$0xff] }
 0x874   : > { %v1327_v60 = vmul.f32 1.442695, %v10369_v58 }
 0x875   : > { %2315 = vadd.xlane.f32.xlu0 %v8244_v28  ;;  %v8661_v49 = vpop.eup %6083 }
 0x876   : > { %2321 = vadd.xlane.f32.xlu1 %v8256_v14  ;;  %6085 = vpow2.f32 %v1327_v60 }
 0x879   : > { %2319 = vadd.xlane.f32.xlu0 %v8248_v1  ;;  %v10370_v1 = vld [vmem:[#allocation41_spill] sm:$0xff] }
 0x87a   : > { %2325 = vadd.xlane.f32.xlu1 %v8269_v51  ;;  %v10371_v51 = vld [vmem:[#allocation43_spill] sm:$0xff] }
 0x87b   : > { %v10372_v10 = vsub.f32 %v10370_v1, %v10371_v51  ;;  %v10391_v51 = vld [vmem:[#allocation133_spill] sm:$0xff] }
 0x87c   : > { %v2975_v13 = vpop.permute.xlu0 %2974 }
 0x87d   : > { %2323 = vadd.xlane.f32.xlu0 %v8258_v62  ;;  %v1325_v29 = vmul.f32 1.442695, %v10372_v10  ;;  %v10374_v62 = vsub.f32 %v10373_v6, %v7808_v23  ;;  %v3028_v43 = vsub.f32 %v8360_v5, %v2975_v13  ;;  %v10380_v23 = vld [vmem:[#allocation46_spill] sm:$0xff]  ;;  %v10389_v13 = vsub.f32 %v10387_v16, %v10388_v46  ;;  %v10393_v6 = vld [vmem:[#allocation61_spill] sm:$0xff] }
 0x87e   : > { %v10381_v42 = vsub.f32 %v10379_v31, %v10380_v23  ;;  %v10398_v31 = vld [vmem:[#allocation56_spill] sm:$0xff]  ;;  %v10399_v23 = vld [vmem:[#allocation58_spill] sm:$0xff] }
 0x87f   : > { %v1329_v36 = vmul.f32 1.442695, %v10374_v62  ;;  %6087 = vpow2.f32 %v1325_v29  ;;  %v3050_v25 = vmul.f32 1.442695, %v3028_v43  ;;  %v1337_v11 = vmul.f32 1.442695, %v10389_v13 }
 0x880   : > { %v2965_v3 = vpop.permute.xlu0 %2964  ;;  %v1335_v55 = vmul.f32 1.442695, %v10381_v42  ;;  %v10400_v42 = vsub.f32 %v10398_v31, %v10399_v23  ;;  %v10405_v13 = vld [vmem:[#allocation137_spill] sm:$0xff] }
 0x881   : > { %v3026_v28 = vsub.f32 %v8363_v9, %v2965_v3  ;;  %v2980_v14 = vpop.permute.xlu1 %2979  ;;  %2327 = vadd.xlane.f32.xlu0 %v8271_v20  ;;  %v10375_v9 = vld [vmem:[#allocation129_spill] sm:$0xff]  ;;  %6089 = vpow2.f32 %v1329_v36  ;;  %v10376_v20 = vld [vmem:[#allocation51_spill] sm:$0xff] }
 0x882   : > { %v3029_v34 = vsub.f32 %v8365_v7, %v2980_v14  ;;  %v10378_v12 = vsub.f32 %v10376_v20, %v10377_v35  ;;  %v10390_v14 = vld [vmem:[#allocation131_spill] sm:$0xff]  ;;  %v10396_v35 = vld [vmem:[#allocation57_spill] sm:$0xff] }
 0x883   : > { %v3046_v48 = vmul.f32 1.442695, %v3026_v28  ;;  %v8672_v28 = vpop.eup %6085  ;;  %v10395_v20 = vld [vmem:[#allocation55_spill] sm:$0xff] }
 0x884   : > { %v3052_v57 = vmul.f32 1.442695, %v3029_v34  ;;  %v1333_v40 = vmul.f32 1.442695, %v10378_v12  ;;  %v10392_v34 = vld [vmem:[#allocation59_spill] sm:$0xff]  ;;  %v10397_v12 = vsub.f32 %v10395_v20, %v10396_v35 }
 0x885   : > { %v2970_v50 = vpop.permute.xlu1 %2969  ;;  %6091 = vpow2.f32 %v3046_v48  ;;  %v10394_v62 = vsub.f32 %v10392_v34, %v10393_v6  ;;  %v10410_v6 = vld [vmem:[#allocation66_spill] sm:$0xff] }
 0x886   : > { %v3027_v0 = vsub.f32 %v10375_v9, %v2970_v50  ;;  %6093 = vpow2.f32 %v3052_v57 }
 0x887   : > { %v1341_v36 = vmul.f32 1.442695, %v10394_v62  ;;  %v10411_v62 = vld [vmem:[#allocation64_spill] sm:$0xff] }
 0x888   : > { %v3048_v7 = vmul.f32 1.442695, %v3027_v0 }
 0x889   : > { %v2995_v5 = vpop.permute.xlu1 %2994  ;;  %v3000_v33 = vpop.permute.xlu0 %2999 }
 0x88a   : > { %6095 = vpow2.f32 %v3048_v7  ;;  %v3032_v26 = vsub.f32 %v10385_v54, %v2995_v5  ;;  %v3033_v27 = vsub.f32 %v10386_v30, %v3000_v33  ;;  %v8677_v29 = vpop.eup %6087  ;;  %v10404_v54 = vld [vmem:[#allocation134_spill] sm:$0xff] }
 0x88b   : > { %6097 = vpow2.f32 %v1333_v40  ;;  %1598 = vperm.xlu1 %5985, %v8661_v49   ;;  %v8682_v57 = vpop.eup %6089  ;;  %v1339_v40 = vmul.f32 1.442695, %v10397_v12 }
 0x88c   : > { %6099 = vpow2.f32 %v3050_v25  ;;  %v3058_v21 = vmul.f32 1.442695, %v3032_v26  ;;  %v3060_v58 = vmul.f32 1.442695, %v3033_v27 }
 0x88d   : > { %6101 = vpow2.f32 %v1335_v55  ;;  %v2985_v60 = vpop.permute.xlu1 %2984  ;;  %v2990_v3 = vpop.permute.xlu0 %2989  ;;  %v1345_v55 = vmul.f32 1.442695, %v10400_v42  ;;  %v10413_v42 = vld [vmem:[#allocation63_spill] sm:$0xff] }
 0x88e   : > { %6103 = vpow2.f32 %v1331_v56  ;;  %v3030_v1 = vsub.f32 %v10390_v14, %v2985_v60  ;;  %v3031_v10 = vsub.f32 %v10391_v51, %v2990_v3  ;;  %v1343_v56 = vmul.f32 1.442695, %v10403_v44  ;;  %v10408_v51 = vld [vmem:[#allocation68_spill] sm:$0xff]  ;;  %v10416_v44 = vld [vmem:[#allocation62_spill] sm:$0xff] }
 0x88f   : > { %6105 = vpow2.f32 %v1337_v11  ;;  %1608 = vperm.xlu1 %5985, %v8672_v28   ;;  %v8684_v0 = vpop.eup %6091 }
 0x890   : > { %6107 = vpow2.f32 %v3058_v21  ;;  %v3054_v43 = vmul.f32 1.442695, %v3030_v1  ;;  %v3056_v48 = vmul.f32 1.442695, %v3031_v10  ;;  %v8691_v7 = vpop.eup %6093  ;;  %v10406_v21 = vld [vmem:[#allocation135_spill] sm:$0xff] }
 0x891   : > { %6109 = vpow2.f32 %v3060_v58  ;;  %v3473_v50 = vpop.permute.xlu1 %3472  ;;  %v3015_v9 = vpop.permute.xlu0 %3014  ;;  %v10407_v1 = vld [vmem:[#allocation67_spill] sm:$0xff] }
 0x892   : > { %6111 = vpow2.f32 %v3054_v43  ;;  %5809 = vmatprep.subr.msk.bf16.mxu1 %vm1097_vm2, %v3473_v50  ;;  %v3516_v25 = vsel %vm1097_vm2, %v3473_v50, 0  ;;  %v3036_v26 = vsub.f32 %v10404_v54, %v3015_v9  ;;  %v10409_v10 = vsub.f32 %v10407_v1, %v10408_v51  ;;  %v10418_v51 = vld [vmem:[#allocation72_spill] sm:$0xff] }
 0x893   : > { %6113 = vpow2.f32 %v3056_v48  ;;  %1613 = vperm.xlu1 %5985, %v8682_v57   ;;  %5709 = vmatpush3.bf16.xpose.msra.mxu1 %v3516_v25 }
 0x894   : > { %v8697_v5 = vpop.eup %6095  ;;  %6115 = vpow2.f32 %v1341_v36  ;;  %v1349_v34 = vmul.f32 1.442695, %v10409_v10  ;;  %v1319_v36 = vsub.f32 %v10411_v62, %v10410_v6  ;;  %v3066_v9 = vmul.f32 1.442695, %v3036_v26  ;;  %v10419_v10 = vld [vmem:[#allocation75_spill] sm:$0xff] }
 0x895   : > { %v8699_v33 = vpop.eup %6097  ;;  %v3010_v30 = vpop.permute.xlu1 %3009  ;;  %v3282_v16 = vpack.c.bf16 %v8697_v5, %v8684_v0  ;;  %6117 = vpow2.f32 %v1339_v40  ;;  %v10412_v40 = vld [vmem:[#allocation136_spill] sm:$0xff] }
 0x896   : > { %v3005_v27 = vpop.permute.xlu0 %3004  ;;  %v8707_v46 = vpop.eup %6099  ;;  %v3035_v11 = vsub.f32 %v10405_v13, %v3010_v30  ;;  %6119 = vpow2.f32 %v1345_v55  ;;  %v10414_v55 = vld [vmem:[#allocation65_spill] sm:$0xff]  ;;  %v1347_v30 = vmul.f32 1.442695, %v1319_v36 }
 0x897   : > { %v3034_v58 = vsub.f32 %v10406_v21, %v3005_v27  ;;  %v8711_v60 = vpop.eup %6101  ;;  %1603 = vperm.xlu0 %5986, %v8677_v29   ;;  %1623 = vperm.xlu1 %5985, %v8699_v33   ;;  %v3283_v3 = vpack.c.bf16 %v8691_v7, %v8707_v46  ;;  %6121 = vpow2.f32 %v1343_v56  ;;  %v10415_v63 = vsub.f32 %v10413_v42, %v10414_v55  ;;  %v10417_v56 = vld [vmem:[#allocation60_spill] sm:$0xff] }
 0x898   : > { %v8717_v14 = vpop.eup %6103  ;;  %v3064_v43 = vmul.f32 1.442695, %v3035_v11  ;;  %5690 = vmatprep.mubr.bf16.mxu1 %v3282_v16  ;;  %v1321_v54 = vsub.f32 %v10417_v56, %v10416_v44 }
 0x899   : > { %v3062_v48 = vmul.f32 1.442695, %v3034_v58  ;;  %v8724_v50 = vpop.eup %6105  ;;  %5691 = vmatmul.mubr.bf16.gmra.mrb[36].mxu1 %v3283_v3  ;;  %v3020_v20 = vpop.permute.xlu1 %3019  ;;  %v1353_v53 = vmul.f32 1.442695, %v10415_v63 }
 0x89a   : > { %v3475_v35 = vpop.permute.xlu0 %3474  ;;  %v8726_v12 = vpop.eup %6107  ;;  %6123 = vpow2.f32 %v3064_v43  ;;  %v3037_v25 = vsub.f32 %v10412_v40, %v3020_v20  ;;  %v1351_v58 = vmul.f32 1.442695, %v1321_v54  ;;  %v10421_v43 = vld [vmem:[#allocation69_spill] sm:$0xff] }
 0x89b   : > { %5810 = vmatprep.subr.msk.bf16.mxu1 %vm1097_vm2, %v3475_v35  ;;  %v3519_v31 = vsel %vm1097_vm2, %v3475_v35, 0  ;;  %v8731_v23 = vpop.eup %6109  ;;  %6125 = vpow2.f32 %v3062_v48  ;;  %1618 = vperm.xlu0 %5986, %v8717_v14   ;;  %v10422_v48 = vld [vmem:[#allocation71_spill] sm:$0xff] }
 0x89c   : > { %1633 = vperm.xlu1 %5985, %v8724_v50   ;;  %v8740_v26 = vpop.eup %6111  ;;  %6127 = vpow2.f32 %v1349_v34  ;;  %v3068_v27 = vmul.f32 1.442695, %v3037_v25  ;;  %5711 = vmatpush3.bf16.xpose.msra.mxu1 %v3519_v31  ;;  %v3285_v3 = vpack.c.bf16 %v8731_v23, %v8726_v12  ;;  %v10420_v34 = vsub.f32 %v10418_v51, %v10419_v10  ;;  %v10424_v25 = vld [vmem:[#allocation74_spill] sm:$0xff]  ;;  %v10425_v31 = vld [vmem:[#allocation77_spill] sm:$0xff] }
 0x89d   : > { %v8742_v16 = vpop.eup %6113  ;;  %6129 = vpow2.f32 %v3066_v9  ;;  %v3477_v13 = vpop.permute.xlu1 %3476  ;;  %v10423_v9 = vsub.f32 %v10421_v43, %v10422_v48  ;;  %v10426_v42 = vsub.f32 %v10424_v25, %v10425_v31  ;;  %v10431_v51 = vld [vmem:[#allocation82_spill] sm:$0xff] }
 0x89e   : > { %v8744_v11 = vpop.eup %6115  ;;  %6131 = vpow2.f32 %v3068_v27  ;;  %5811 = vmatprep.subr.msk.bf16.mxu1 %vm1097_vm2, %v3477_v13  ;;  %v3284_v21 = vpack.c.bf16 %v8742_v16, %v8740_v26  ;;  %v2104_v6 = vmul.f32 1.442695, %v10420_v34  ;;  %v3522_v35 = vsel %vm1097_vm2, %v3477_v13, 0  ;;  %v3479_v63 = vpop.permute.xlu0 %3478  ;;  %v10428_v27 = vld [vmem:[#allocation73_spill] sm:$0xff] }
 0x89f   : > { %6133 = vpow2.f32 %v1353_v53  ;;  %1628 = vperm.xlu0 %5986, %v8711_v60   ;;  %v8753_v1 = vpop.eup %6117  ;;  %v2108_v20 = vmul.f32 1.442695, %v10423_v9  ;;  %v2106_v55 = vmul.f32 1.442695, %v10426_v42  ;;  %v3458_v9 = vld [vmem:[#allocation2 + $0xc0] sm:$0xff] }
 0x8a0   : > { %1643 = vperm.xlu1 %5985, %v8744_v11   ;;  %6135 = vpow2.f32 %v1347_v30  ;;  %5694 = vmatprep.mubr.bf16.mxu1 %v3284_v21  ;;  %v8758_v62 = vpop.eup %6119  ;;  %v10427_v30 = vld [vmem:[#allocation70_spill] sm:$0xff]  ;;  %v10436_v42 = vld [vmem:[#allocation79_spill] sm:$0xff] }
 0x8a1   : > { %5695 = vmatmul.mubr.bf16.gmra.mrb[40].mxu1 %v3285_v3  ;;  %v8760_v36 = vpop.eup %6121  ;;  %6137 = vpow2.f32 %v1351_v58  ;;  %v10429_v13 = vsub.f32 %v10427_v30, %v10428_v27  ;;  %v10430_v3 = vld [vmem:[#allocation80_spill] sm:$0xff]  ;;  %v3525_v27 = vsel %vm1097_vm2, %v3479_v63, 0 }
 0x8a2   : > { %6139 = vpow2.f32 %v2104_v6  ;;  %v10432_v10 = vsub.f32 %v10430_v3, %v10431_v51  ;;  %v3481_v3 = vpop.permute.xlu1 %3480  ;;  %v10439_v51 = vld [vmem:[#allocation83_spill] sm:$0xff] }
 0x8a3   : > { %1638 = vperm.xlu0 %5986, %v8753_v1   ;;  %6141 = vpow2.f32 %v2108_v20  ;;  %v2110_v21 = vmul.f32 1.442695, %v10429_v13  ;;  %v10433_v20 = vld [vmem:[#allocation76_spill] sm:$0xff] }
 0x8a4   : > { %1653 = vperm.xlu1 %5985, %v8758_v62   ;;  %v8768_v40 = vpop.eup %6123  ;;  %5713 = vmatpush3.bf16.xpose.msra.mxu1 %v3522_v35  ;;  %6143 = vpow2.f32 %v2106_v55  ;;  %v2112_v34 = vmul.f32 1.442695, %v10432_v10  ;;  %v10434_v35 = vld [vmem:[#allocation78_spill] sm:$0xff]  ;;  %v10437_v55 = vld [vmem:[#allocation81_spill] sm:$0xff] }
 0x8a5   : > { %v8773_v53 = vpop.eup %6125  ;;  %5812 = vmatprep.subr.msk.bf16.mxu1 %vm1097_vm2, %v3479_v63  ;;  %6145 = vpow2.f32 %v2110_v21  ;;  %v10435_v25 = vsub.f32 %v10433_v20, %v10434_v35  ;;  %v10440_v10 = vld [vmem:[#allocation85_spill] sm:$0xff]  ;;  %v10443_v35 = vld [vmem:[#allocation91_spill] sm:$0xff] }
 0x8a6   : > { %v8776_v44 = vpop.eup %6127  ;;  %v3286_v56 = vpack.c.bf16 %v8768_v40, %v8773_v53  ;;  %6147 = vpow2.f32 %v2112_v34  ;;  %v10441_v34 = vsub.f32 %v10439_v51, %v10440_v10  ;;  %v3460_v10 = vld [vmem:[#allocation2 + $0xd0] sm:$0xff] }
 0x8a7   : > { %v8780_v54 = vpop.eup %6129  ;;  %1648 = vperm.xlu0 %5986, %v8760_v36   ;;  %v2116_v31 = vmul.f32 1.442695, %v10435_v25 }
 0x8a8   : > { %1663 = vperm.xlu1 %5985, %v8776_v44   ;;  %v8787_v58 = vpop.eup %6131  ;;  %5698 = vmatprep.mubr.bf16.mxu1 %v3286_v56  ;;  %v10438_v56 = vsub.f32 %v10436_v42, %v10437_v55  ;;  %v2118_v63 = vmul.f32 1.442695, %v10441_v34  ;;  %v3528_v42 = vsel %vm1097_vm2, %v3481_v3, 0  ;;  %v3461_v34 = vld [vmem:[#allocation2 + $0xd8] sm:$0xff] }
 0x8a9   : > { %v8792_v6 = vpop.eup %6133  ;;  %v3287_v43 = vpack.c.bf16 %v8787_v58, %v8780_v54  ;;  %6149 = vpow2.f32 %v2116_v31 }
 0x8aa   : > { %v8796_v48 = vpop.eup %6135  ;;  %v2114_v30 = vmul.f32 1.442695, %v10438_v56 }
 0x8ab   : > { %1658 = vperm.xlu0 %5986, %v8796_v48   ;;  %5699 = vmatmul.mubr.bf16.gmra.mrb[44].mxu1 %v3287_v43  ;;  %v8807_v13 = vpop.eup %6137 }
 0x8ac   : > { %1673 = vperm.xlu1 %5985, %v8792_v6   ;;  %5715 = vmatpush3.bf16.xpose.msra.mxu1 %v3525_v27  ;;  %v8810_v21 = vpop.eup %6139  ;;  %6151 = vpow2.f32 %v2114_v30  ;;  %v3459_v27 = vld [vmem:[#allocation2 + $0xc8] sm:$0xff] }
 0x8ad   : > { %5718 = vmatprep.mubr.msk.bf16.mxu1 %vm1097_vm2, %v3458_v9  ;;  %5813 = vmatprep.subr.msk.bf16.mxu1 %vm1097_vm2, %v3481_v3  ;;  %v8818_v43 = vpop.eup %6141  ;;  %6153 = vpow2.f32 %v2118_v63  ;;  %v10442_v9 = vld [vmem:[#allocation89_spill] sm:$0xff] }
 0x8ae   : > { %v8820_v20 = vpop.eup %6143  ;;  %v10444_v25 = vsub.f32 %v10442_v9, %v10443_v35  ;;  %v3462_v9 = vld [vmem:[#allocation2 + $0xe0] sm:$0xff] }
 0x8af   : > { %1668 = vperm.xlu0 %5986, %v8807_v13   ;;  %v8828_v55 = vpop.eup %6145  ;;  %v1483_v35 = vld [vmem:[#allocation4] sm:$0xff] }
 0x8b0   : > { %2380 = vperm.xlu1 %5985, %v8810_v21   ;;  %v2120_v31 = vmul.f32 1.442695, %v10444_v25  ;;  %v8830_v56 = vpop.eup %6147  ;;  %v3463_v25 = vld [vmem:[#allocation2 + $0xe8] sm:$0xff] }
 0x8b2   : > { %6155 = vpow2.f32 %v2120_v31  ;;  %v1499_v31 = vmul.f32 %v8661_v49, %v1483_v35 }
 0x8b3   : > { %2385 = vperm.xlu0 %5986, %v8820_v20   ;;  %v8834_v30 = vpop.eup %6149 }
 0x8b4   : > { %2390 = vperm.xlu1 %5985, %v8818_v43   ;;  %5717 = vmatpush3.bf16.xpose.msra.mxu1 %v3528_v42 }
 0x8b6   : > { %v8836_v51 = vpop.eup %6151 }
 0x8b7   : > { %2400 = vperm.xlu0 %5986, %v8830_v56   ;;  %v8842_v3 = vpop.eup %6153 }
 0x8b8   : > { %2395 = vperm.xlu1 %5985, %v8828_v55  }
 0x8bb   : > { %2410 = vperm.xlu0 %5986, %v8834_v30   ;;  %5719 = vmatmul.mubr.msk.bf16.vlgmr.msra.gmra.mrb[48].mxu1 %vm1097_vm2, %v3459_v27  ;;  %v1485_v27 = vld [vmem:[#allocation4 + $0x10] sm:$0xff] }
 0x8bc   : > { %2405 = vperm.xlu1 %5985, %v8836_v51   ;;  %5722 = vmatprep.mubr.msk.bf16.mxu1 %vm1097_vm2, %v3460_v10  ;;  %v8845_v63 = vpop.eup %6155  ;;  %v3464_v10 = vld [vmem:[#allocation2 + $0xf0] sm:$0xff]  ;;  %v1501_v41 = vmul.f32 %v8672_v28, %v1485_v27 }
 0x8c0   : > { %2415 = vperm.xlu1 %5985, %v8842_v3  }
 0x8c3   : > { %5723 = vmatmul.mubr.msk.bf16.gmra.mrb[52].mxu1 %vm1097_vm2, %v3461_v34  ;;  %v1486_v34 = vld [vmem:[#allocation4 + $0x18] sm:$0xff] }
 0x8c4   : > { %2420 = vperm.xlu1 %5985, %v8845_v63   ;;  %5726 = vmatprep.mubr.msk.bf16.mxu1 %vm1097_vm2, %v3462_v9  ;;  %v1484_v9 = vld [vmem:[#allocation4 + $0x8] sm:$0xff]  ;;  %v1502_v49 = vmul.f32 %v8682_v57, %v1486_v34  ;;  %v1490_v57 = vld [vmem:[#allocation4 + $0x38] sm:$0xff] }
 0x8ca   : > { %v1516_v42 = vpop.xlane.xlu0 %1515 }
 0x8cb   : > { %v1547_v24 = vadd.f32 %v1516_v42, %v1499_v31  ;;  %5727 = vmatmul.mubr.msk.bf16.gmra.mrb[56].mxu1 %vm1097_vm2, %v3463_v25  ;;  %v1500_v31 = vmul.f32 %v8677_v29, %v1484_v9  ;;  %v1488_v42 = vld [vmem:[#allocation4 + $0x28] sm:$0xff]  ;;  %v1489_v29 = vld [vmem:[#allocation4 + $0x30] sm:$0xff]  ;;  %v1506_v9 = vmul.f32 %v8724_v50, %v1490_v57  ;;  %v1494_v50 = vld [vmem:[#allocation4 + $0x58] sm:$0xff] }
 0x8cc   : > { %5730 = vmatprep.mubr.msk.bf16.mxu1 %vm1097_vm2, %v3464_v10 }
 0x8cd   : > { %1564 = vst.msk [vmem:[#allocation4] sm:$0xff] %vm1563_vm3, %v1547_v24  ;;  %v1487_v24 = vld [vmem:[#allocation4 + $0x20] sm:$0xff] }
 0x8ce   : > { %v1520_v39 = vpop.xlane.xlu0 %1519 }
 0x8cf   : > { %v1549_v61 = vadd.f32 %v1520_v39, %v1501_v41  ;;  %v1504_v39 = vmul.f32 %v8699_v33, %v1488_v42  ;;  %v1503_v41 = vmul.f32 %v8717_v14, %v1487_v24  ;;  %v1492_v33 = vld [vmem:[#allocation4 + $0x48] sm:$0xff] }
 0x8d0   : > { %v1508_v14 = vmul.f32 %v8744_v11, %v1492_v33  ;;  %v1496_v11 = vld [vmem:[#allocation4 + $0x68] sm:$0xff] }
 0x8d1   : > { %1566 = vst.msk [vmem:[#allocation4 + $0x10] sm:$0xff] %vm1563_vm3, %v1549_v61 }
 0x8d2   : > { %v1522_v35 = vpop.xlane.xlu0 %1521 }
 0x8d3   : > { %v1550_v25 = vadd.f32 %v1522_v35, %v1502_v49  ;;  %v1518_v15 = vpop.xlane.xlu1 %1517  ;;  %5731 = vmatmul.mubr.msk.bf16.gmra.mrb[60].mxu1 %vm1097_vm2, %v3465_v22 }
 0x8d4   : > { %v1548_v28 = vadd.f32 %v1518_v15, %v1500_v31  ;;  %v1505_v15 = vmul.f32 %v8711_v60, %v1489_v29  ;;  %v1491_v31 = vld [vmem:[#allocation4 + $0x40] sm:$0xff]  ;;  %v1510_v60 = vmul.f32 %v8758_v62, %v1494_v50  ;;  %v1498_v62 = vld [vmem:[#allocation4 + $0x78] sm:$0xff]  ;;  %v2266_v50 = vld [vmem:[#allocation4 + $0x88] sm:$0xff] }
 0x8d5   : > { %1567 = vst.msk [vmem:[#allocation4 + $0x18] sm:$0xff] %vm1563_vm3, %v1550_v25  ;;  %v1507_v24 = vmul.f32 %v8753_v1, %v1491_v31  ;;  %v1512_v1 = vmul.f32 %v8776_v44, %v1496_v11  ;;  %v2265_v44 = vld [vmem:[#allocation4 + $0x80] sm:$0xff] }
 0x8d6   : > { %1565 = vst.msk [vmem:[#allocation4 + $0x8] sm:$0xff] %vm1563_vm3, %v1548_v28  ;;  %v1526_v61 = vpop.xlane.xlu0 %1525 }
 0x8d7   : > { %v1552_v27 = vadd.f32 %v1526_v61, %v1504_v39  ;;  %v1524_v10 = vpop.xlane.xlu1 %1523  ;;  %v1493_v61 = vld [vmem:[#allocation4 + $0x50] sm:$0xff] }
 0x8d8   : > { %v1551_v34 = vadd.f32 %v1524_v10, %v1503_v41 }
 0x8d9   : > { %1569 = vst.msk [vmem:[#allocation4 + $0x28] sm:$0xff] %vm1563_vm3, %v1552_v27  ;;  %v1509_v27 = vmul.f32 %v8760_v36, %v1493_v61  ;;  %v1514_v36 = vmul.f32 %v8792_v6, %v1498_v62  ;;  %v10452_v62 = vld [vmem:[#allocation96_spill] sm:$0xff] }
 0x8da   : > { %1568 = vst.msk [vmem:[#allocation4 + $0x20] sm:$0xff] %vm1563_vm3, %v1551_v34  ;;  %v1530_v22 = vpop.xlane.xlu0 %1529  ;;  %v1495_v34 = vld [vmem:[#allocation4 + $0x60] sm:$0xff] }
 0x8db   : > { %v1554_v49 = vadd.f32 %v1530_v22, %v1506_v9  ;;  %v1528_v35 = vpop.xlane.xlu1 %1527 }
 0x8dc   : > { %v1553_v42 = vadd.f32 %v1528_v35, %v1505_v15  ;;  %v1511_v15 = vmul.f32 %v8796_v48, %v1495_v34  ;;  %v1497_v35 = vld [vmem:[#allocation4 + $0x70] sm:$0xff]  ;;  %v10445_v48 = vld [vmem:[#allocation86_spill] sm:$0xff]  ;;  %v10449_v34 = vld [vmem:[#allocation95_spill] sm:$0xff] }
 0x8dd   : > { %1571 = vst.msk [vmem:[#allocation4 + $0x38] sm:$0xff] %vm1563_vm3, %v1554_v49 }
 0x8de   : > { %1570 = vst.msk [vmem:[#allocation4 + $0x30] sm:$0xff] %vm1563_vm3, %v1553_v42  ;;  %v1534_v25 = vpop.xlane.xlu0 %1533 }
 0x8df   : > { %v1556_v28 = vadd.f32 %v1534_v25, %v1508_v14  ;;  %v1532_v39 = vpop.xlane.xlu1 %1531  ;;  %v1513_v14 = vmul.f32 %v8807_v13, %v1497_v35 }
 0x8e0   : > { %v1555_v41 = vadd.f32 %v1532_v39, %v1507_v24  ;;  %v10446_v39 = vld [vmem:[#allocation88_spill] sm:$0xff] }
 0x8e1   : > { %1573 = vst.msk [vmem:[#allocation4 + $0x48] sm:$0xff] %vm1563_vm3, %v1556_v28  ;;  %v10447_v61 = vsub.f32 %v10445_v48, %v10446_v39  ;;  %v10457_v48 = vld [vmem:[#allocation90_spill] sm:$0xff]  ;;  %v10458_v39 = vld [vmem:[#allocation92_spill] sm:$0xff] }
 0x8e2   : > { %1572 = vst.msk [vmem:[#allocation4 + $0x40] sm:$0xff] %vm1563_vm3, %v1555_v41  ;;  %v1538_v57 = vpop.xlane.xlu0 %1537 }
 0x8e3   : > { %v1558_v10 = vadd.f32 %v1538_v57, %v1510_v60  ;;  %v1536_v29 = vpop.xlane.xlu1 %1535  ;;  %v2124_v41 = vmul.f32 1.442695, %v10447_v61  ;;  %v2281_v60 = vmul.f32 %v8810_v21, %v2265_v44  ;;  %v2282_v57 = vmul.f32 %v8820_v20, %v2266_v50  ;;  %v10454_v44 = vld [vmem:[#allocation84_spill] sm:$0xff] }
 0x8e4   : > { %v1557_v9 = vadd.f32 %v1536_v29, %v1509_v27  ;;  %v2267_v27 = vld [vmem:[#allocation4 + $0x90] sm:$0xff]  ;;  %v10459_v61 = vsub.f32 %v10457_v48, %v10458_v39 }
 0x8e5   : > { %1575 = vst.msk [vmem:[#allocation4 + $0x58] sm:$0xff] %vm1563_vm3, %v1558_v10  ;;  %v2269_v10 = vld [vmem:[#allocation4 + $0xa0] sm:$0xff]  ;;  %v10448_v29 = vld [vmem:[#allocation93_spill] sm:$0xff]  ;;  %6157 = vpow2.f32 %v2124_v41  ;;  %v2283_v21 = vmul.f32 %v8818_v43, %v2267_v27 }
 0x8e6   : > { %1574 = vst.msk [vmem:[#allocation4 + $0x50] sm:$0xff] %vm1563_vm3, %v1557_v9  ;;  %v1542_v22 = vpop.xlane.xlu0 %1541  ;;  %v10450_v9 = vsub.f32 %v10448_v29, %v10449_v34  ;;  %v2285_v35 = vmul.f32 %v8830_v56, %v2269_v10  ;;  %v2132_v41 = vmul.f32 1.442695, %v10459_v61  ;;  %v10461_v10 = vld [vmem:[#allocation98_spill] sm:$0xff] }
 0x8e7   : > { %v1560_v33 = vadd.f32 %v1542_v22, %v1512_v1  ;;  %v1540_v49 = vpop.xlane.xlu1 %1539 }
 0x8e8   : > { %v1559_v31 = vadd.f32 %v1540_v49, %v1511_v15  ;;  %v2122_v1 = vmul.f32 1.442695, %v10450_v9  ;;  %v10451_v15 = vld [vmem:[#allocation94_spill] sm:$0xff] }
 0x8e9   : > { %1577 = vst.msk [vmem:[#allocation4 + $0x68] sm:$0xff] %vm1563_vm3, %v1560_v33  ;;  %v10453_v33 = vsub.f32 %v10451_v15, %v10452_v62 }
 0x8ea   : > { %1576 = vst.msk [vmem:[#allocation4 + $0x60] sm:$0xff] %vm1563_vm3, %v1559_v31  ;;  %v1546_v42 = vpop.xlane.xlu0 %1545  ;;  %v2268_v31 = vld [vmem:[#allocation4 + $0x98] sm:$0xff]  ;;  %6159 = vpow2.f32 %v2122_v1 }
 0x8eb   : > { %v1562_v25 = vadd.f32 %v1546_v42, %v1514_v36  ;;  %v1544_v24 = vpop.xlane.xlu1 %1543  ;;  %v2128_v49 = vmul.f32 1.442695, %v10453_v33  ;;  %v2284_v43 = vmul.f32 %v8828_v55, %v2268_v31 }
 0x8ec   : > { %v1561_v28 = vadd.f32 %v1544_v24, %v1513_v14  ;;  %v2271_v14 = vld [vmem:[#allocation4 + $0xb0] sm:$0xff] }
 0x8ed   : > { %1579 = vst.msk [vmem:[#allocation4 + $0x78] sm:$0xff] %vm1563_vm3, %v1562_v25  ;;  %v10455_v25 = vld [vmem:[#allocation87_spill] sm:$0xff]  ;;  %6161 = vpow2.f32 %v2128_v49  ;;  %v2275_v49 = vld [vmem:[#allocation4 + $0xd0] sm:$0xff] }
 0x8ee   : > { %1578 = vst.msk [vmem:[#allocation4 + $0x70] sm:$0xff] %vm1563_vm3, %v1561_v28  ;;  %v2298_v6 = vpop.xlane.xlu0 %2297  ;;  %v10456_v24 = vsub.f32 %v10454_v44, %v10455_v25  ;;  %v2274_v44 = vld [vmem:[#allocation4 + $0xc8] sm:$0xff] }
 0x8ef   : > { %v2329_v13 = vadd.f32 %v2298_v6, %v2281_v60  ;;  %v2300_v11 = vpop.xlane.xlu1 %2299  ;;  %v2287_v60 = vmul.f32 %v8834_v30, %v2271_v14  ;;  %v2270_v6 = vld [vmem:[#allocation4 + $0xa8] sm:$0xff]  ;;  %v8917_v15 = vpop.eup %6157 }
 0x8f0   : > { %v2330_v22 = vadd.f32 %v2300_v11, %v2282_v57  ;;  %v2126_v50 = vmul.f32 1.442695, %v10456_v24  ;;  %v10460_v11 = vld [vmem:[#allocation97_spill] sm:$0xff]  ;;  %v2286_v55 = vmul.f32 %v8836_v51, %v2270_v6  ;;  %v2291_v14 = vmul.f32 %v8917_v15, %v2275_v49  ;;  %v2280_v49 = vld [vmem:[#allocation4 + $0xf8] sm:$0xff] }
 0x8f1   : > { %2345 = vst.msk [vmem:[#allocation4 + $0x80] sm:$0xff] %vm1563_vm3, %v2329_v13  ;;  %v2273_v13 = vld [vmem:[#allocation4 + $0xc0] sm:$0xff]  ;;  %v10462_v29 = vsub.f32 %v10460_v11, %v10461_v10 }
 0x8f2   : > { %2346 = vst.msk [vmem:[#allocation4 + $0x88] sm:$0xff] %vm1563_vm3, %v2330_v22  ;;  %v2302_v20 = vpop.xlane.xlu0 %2301  ;;  %6163 = vpow2.f32 %v2126_v50  ;;  %v2289_v30 = vmul.f32 %v8845_v63, %v2273_v13  ;;  %v2272_v22 = vld [vmem:[#allocation4 + $0xb8] sm:$0xff] }
 0x8f3   : > { %v2331_v36 = vadd.f32 %v2302_v20, %v2283_v21  ;;  %v2306_v42 = vpop.xlane.xlu1 %2305  ;;  %v2130_v34 = vmul.f32 1.442695, %v10462_v29  ;;  %6165 = vpow2.f32 %v2132_v41  ;;  %v10463_v21 = vld [vmem:[#allocation99_spill] sm:$0xff]  ;;  %v10464_v20 = vld [vmem:[#allocation100_spill] sm:$0xff]  ;;  %v2288_v51 = vmul.f32 %v8842_v3, %v2272_v22 }
 0x8f4   : > { %v2333_v28 = vadd.f32 %v2306_v42, %v2285_v35  ;;  %v10465_v35 = vsub.f32 %v10463_v21, %v10464_v20  ;;  %v8924_v42 = vpop.eup %6159  ;;  %v1580_v22 = vld [vmem:[#allocation5] sm:$0xff] }
 0x8f5   : > { %2347 = vst.msk [vmem:[#allocation4 + $0x90] sm:$0xff] %vm1563_vm3, %v2331_v36  ;;  %6167 = vpow2.f32 %v2130_v34  ;;  %v2290_v39 = vmul.f32 %v8924_v42, %v2274_v44  ;;  %v2278_v34 = vld [vmem:[#allocation4 + $0xe8] sm:$0xff] }
 0x8f6   : > { %2349 = vst.msk [vmem:[#allocation4 + $0xa0] sm:$0xff] %vm1563_vm3, %v2333_v28  ;;  %v2304_v56 = vpop.xlane.xlu0 %2303  ;;  %v2134_v31 = vmul.f32 1.442695, %v10465_v35  ;;  %v2277_v28 = vld [vmem:[#allocation4 + $0xe0] sm:$0xff] }
 0x8f7   : > { %v2332_v57 = vadd.f32 %v2304_v56, %v2284_v43  ;;  %v2310_v27 = vpop.xlane.xlu1 %2309  ;;  %v8928_v25 = vpop.eup %6161  ;;  %v2276_v43 = vld [vmem:[#allocation4 + $0xd8] sm:$0xff] }
 0x8f8   : > { %v2335_v9 = vadd.f32 %v2310_v27, %v2287_v60  ;;  %6169 = vpow2.f32 %v2134_v31  ;;  %v2293_v41 = vmul.f32 %v8928_v25, %v2277_v28  ;;  %v1583_v28 = vld [vmem:[#allocation5 + $0x18] sm:$0xff] }
 0x8f9   : > { %2348 = vst.msk [vmem:[#allocation4 + $0x98] sm:$0xff] %vm1563_vm3, %v2332_v57  ;;  %v2279_v57 = vld [vmem:[#allocation4 + $0xf0] sm:$0xff] }
 0x8fa   : > { %2351 = vst.msk [vmem:[#allocation4 + $0xb0] sm:$0xff] %vm1563_vm3, %v2335_v9  ;;  %v2308_v1 = vpop.xlane.xlu0 %2307 }
 0x8fb   : > { %v2334_v62 = vadd.f32 %v2308_v1, %v2286_v55  ;;  %v2314_v33 = vpop.xlane.xlu1 %2313 }
 0x8fc   : > { %v2337_v36 = vadd.f32 %v2314_v33, %v2289_v30  ;;  %v8932_v3 = vpop.eup %6163 }
 0x8fd   : > { %2350 = vst.msk [vmem:[#allocation4 + $0xa8] sm:$0xff] %vm1563_vm3, %v2334_v62  ;;  %v8936_v56 = vpop.eup %6165  ;;  %v2292_v13 = vmul.f32 %v8932_v3, %v2276_v43  ;;  %v1581_v43 = vld [vmem:[#allocation5 + $0x8] sm:$0xff] }
 0x8fe   : > { %2353 = vst.msk [vmem:[#allocation4 + $0xc0] sm:$0xff] %vm1563_vm3, %v2337_v36  ;;  %v2312_v63 = vpop.xlane.xlu0 %2311  ;;  %v2295_v29 = vmul.f32 %v8936_v56, %v2279_v57  ;;  %v1582_v36 = vld [vmem:[#allocation5 + $0x10] sm:$0xff] }
 0x8ff   : > { %v2336_v24 = vadd.f32 %v2312_v63, %v2288_v51  ;;  %v2318_v50 = vpop.xlane.xlu1 %2317  ;;  %v8940_v11 = vpop.eup %6167  ;;  %v10466_v51 = vld [vmem:[#allocation37_spill] sm:$0xff] }
 0x900   : > { %v2339_v48 = vadd.f32 %v2318_v50, %v2291_v14  ;;  %v2294_v30 = vmul.f32 %v8940_v11, %v2278_v34  ;;  %v1584_v34 = vld [vmem:[#allocation5 + $0x20] sm:$0xff] }
 0x901   : > { %2352 = vst.msk [vmem:[#allocation4 + $0xb8] sm:$0xff] %vm1563_vm3, %v2336_v24 }
 0x902   : > { %2355 = vst.msk [vmem:[#allocation4 + $0xd0] sm:$0xff] %vm1563_vm3, %v2339_v48  ;;  %v2316_v61 = vpop.xlane.xlu0 %2315  ;;  %v8946_v62 = vpop.eup %6169  ;;  %v10467_v48 = vld [vmem:[#allocation35_spill] sm:$0xff] }
 0x903   : > { %v2338_v60 = vadd.f32 %v2316_v61, %v2290_v39  ;;  %v2322_v6 = vpop.xlane.xlu1 %2321  ;;  %v2296_v31 = vmul.f32 %v8946_v62, %v2280_v49 }
 0x904   : > { %v2341_v27 = vadd.f32 %v2322_v6, %v2293_v41  ;;  %v10468_v6 = vld [vmem:[#allocation39_spill] sm:$0xff] }
 0x905   : > { %2354 = vst.msk [vmem:[#allocation4 + $0xc8] sm:$0xff] %vm1563_vm3, %v2338_v60  ;;  %v1585_v60 = vld [vmem:[#allocation5 + $0x28] sm:$0xff] }
 0x906   : > { %2357 = vst.msk [vmem:[#allocation4 + $0xe0] sm:$0xff] %vm1563_vm3, %v2341_v27  ;;  %v2320_v10 = vpop.xlane.xlu0 %2319 }
 0x907   : > { %v2340_v9 = vadd.f32 %v2320_v10, %v2292_v13  ;;  %v2326_v55 = vpop.xlane.xlu1 %2325 }
 0x908   : > { %v2343_v1 = vadd.f32 %v2326_v55, %v2295_v29 }
 0x909   : > { %2356 = vst.msk [vmem:[#allocation4 + $0xd8] sm:$0xff] %vm1563_vm3, %v2340_v9  ;;  %v10469_v9 = vld [vmem:[#allocation36_spill] sm:$0xff] }
 0x90a   : > { %2359 = vst.msk [vmem:[#allocation4 + $0xf0] sm:$0xff] %vm1563_vm3, %v2343_v1  ;;  %v2324_v33 = vpop.xlane.xlu0 %2323  ;;  %v1587_v1 = vld [vmem:[#allocation5 + $0x38] sm:$0xff] }
 0x90b   : > { %v2342_v21 = vadd.f32 %v2324_v33, %v2294_v30  ;;  %v1599_v20 = vpop.permute.xlu1 %1598  ;;  %v10470_v30 = vld [vmem:[#allocation104_spill] sm:$0xff] }
 0x90c   : > { %v1676_v35 = vmul.f32 %v1599_v20, %v1580_v22 }
 0x90d   : > { %2358 = vst.msk [vmem:[#allocation4 + $0xe8] sm:$0xff] %vm1563_vm3, %v2342_v21 }
 0x90e   : > { %v1797_v63 = vadd.f32 %v10466_v51, %v1676_v35  ;;  %v2328_v14 = vpop.xlane.xlu0 %2327  ;;  %v1586_v35 = vld [vmem:[#allocation5 + $0x30] sm:$0xff]  ;;  %v1589_v51 = vld [vmem:[#allocation5 + $0x48] sm:$0xff] }
 0x90f   : > { %v2344_v44 = vadd.f32 %v2328_v14, %v2296_v31  ;;  %v1609_v24 = vpop.permute.xlu1 %1608  ;;  %v10471_v31 = vld [vmem:[#allocation102_spill] sm:$0xff] }
 0x910   : > { %1813 = vst.msk [vmem:[#allocation5] sm:$0xff] %vm1097_vm2, %v1797_v63  ;;  %v1678_v50 = vmul.f32 %v1609_v24, %v1582_v36  ;;  %v10472_v63 = vld [vmem:[#allocation103_spill] sm:$0xff] }
 0x911   : > { %2360 = vst.msk [vmem:[#allocation4 + $0xf8] sm:$0xff] %vm1563_vm3, %v2344_v44 }
 0x912   : > { %v1799_v39 = vadd.f32 %v10467_v48, %v1678_v50  ;;  %v1588_v48 = vld [vmem:[#allocation5 + $0x40] sm:$0xff] }
 0x913   : > { %v1614_v61 = vpop.permute.xlu1 %1613 }
 0x914   : > { %1815 = vst.msk [vmem:[#allocation5 + $0x10] sm:$0xff] %vm1097_vm2, %v1799_v39  ;;  %v1679_v41 = vmul.f32 %v1614_v61, %v1583_v28  ;;  %v10473_v39 = vld [vmem:[#allocation101_spill] sm:$0xff] }
 0x916   : > { %v1800_v57 = vadd.f32 %v10468_v6, %v1679_v41  ;;  %v1604_v27 = vpop.permute.xlu0 %1603  ;;  %v1591_v41 = vld [vmem:[#allocation5 + $0x58] sm:$0xff] }
 0x917   : > { %v1677_v13 = vmul.f32 %v1604_v27, %v1581_v43  ;;  %v1624_v10 = vpop.permute.xlu1 %1623  ;;  %v10474_v43 = vld [vmem:[#allocation108_spill] sm:$0xff] }
 0x918   : > { %1816 = vst.msk [vmem:[#allocation5 + $0x18] sm:$0xff] %vm1097_vm2, %v1800_v57  ;;  %v1681_v29 = vmul.f32 %v1624_v10, %v1585_v60  ;;  %v1590_v10 = vld [vmem:[#allocation5 + $0x50] sm:$0xff] }
 0x919   : > { %v1798_v55 = vadd.f32 %v10469_v9, %v1677_v13  ;;  %v1593_v9 = vld [vmem:[#allocation5 + $0x68] sm:$0xff] }
 0x91a   : > { %v1802_v22 = vadd.f32 %v10470_v30, %v1681_v29  ;;  %v1619_v33 = vpop.permute.xlu0 %1618  ;;  %v10475_v29 = vld [vmem:[#allocation106_spill] sm:$0xff] }
 0x91b   : > { %1814 = vst.msk [vmem:[#allocation5 + $0x8] sm:$0xff] %vm1097_vm2, %v1798_v55  ;;  %v1680_v49 = vmul.f32 %v1619_v33, %v1584_v34  ;;  %v1634_v21 = vpop.permute.xlu1 %1633  ;;  %v10476_v55 = vld [vmem:[#allocation107_spill] sm:$0xff] }
 0x91c   : > { %1818 = vst.msk [vmem:[#allocation5 + $0x28] sm:$0xff] %vm1097_vm2, %v1802_v22  ;;  %v1683_v20 = vmul.f32 %v1634_v21, %v1587_v1  ;;  %v1592_v21 = vld [vmem:[#allocation5 + $0x60] sm:$0xff] }
 0x91d   : > { %v1801_v36 = vadd.f32 %v10471_v31, %v1680_v49  ;;  %v1595_v31 = vld [vmem:[#allocation5 + $0x78] sm:$0xff] }
 0x91e   : > { %v1804_v14 = vadd.f32 %v10472_v63, %v1683_v20  ;;  %v1629_v44 = vpop.permute.xlu0 %1628  ;;  %v10477_v20 = vld [vmem:[#allocation105_spill] sm:$0xff] }
 0x91f   : > { %1817 = vst.msk [vmem:[#allocation5 + $0x20] sm:$0xff] %vm1097_vm2, %v1801_v36  ;;  %v1682_v24 = vmul.f32 %v1629_v44, %v1586_v35  ;;  %v1644_v50 = vpop.permute.xlu1 %1643  ;;  %v10478_v36 = vld [vmem:[#allocation112_spill] sm:$0xff] }
 0x920   : > { %1820 = vst.msk [vmem:[#allocation5 + $0x38] sm:$0xff] %vm1097_vm2, %v1804_v14  ;;  %v1685_v28 = vmul.f32 %v1644_v50, %v1589_v51  ;;  %v1594_v50 = vld [vmem:[#allocation5 + $0x70] sm:$0xff] }
 0x921   : > { %v1803_v61 = vadd.f32 %v10473_v39, %v1682_v24  ;;  %v2362_v39 = vld [vmem:[#allocation5 + $0x80] sm:$0xff] }
 0x922   : > { %v1806_v60 = vadd.f32 %v10474_v43, %v1685_v28  ;;  %v1639_v6 = vpop.permute.xlu0 %1638  ;;  %v10479_v28 = vld [vmem:[#allocation110_spill] sm:$0xff] }
 0x923   : > { %1819 = vst.msk [vmem:[#allocation5 + $0x30] sm:$0xff] %vm1097_vm2, %v1803_v61  ;;  %v1684_v57 = vmul.f32 %v1639_v6, %v1588_v48  ;;  %v1654_v27 = vpop.permute.xlu1 %1653  ;;  %v10480_v61 = vld [vmem:[#allocation111_spill] sm:$0xff] }
 0x924   : > { %1822 = vst.msk [vmem:[#allocation5 + $0x48] sm:$0xff] %vm1097_vm2, %v1806_v60  ;;  %v1687_v13 = vmul.f32 %v1654_v27, %v1591_v41  ;;  %v2363_v27 = vld [vmem:[#allocation5 + $0x88] sm:$0xff] }
 0x925   : > { %v1805_v34 = vadd.f32 %v10475_v29, %v1684_v57 }
 0x926   : > { %v1808_v1 = vadd.f32 %v10476_v55, %v1687_v13  ;;  %v1649_v30 = vpop.permute.xlu0 %1648  ;;  %v10481_v13 = vld [vmem:[#allocation109_spill] sm:$0xff] }
 0x927   : > { %1821 = vst.msk [vmem:[#allocation5 + $0x40] sm:$0xff] %vm1097_vm2, %v1805_v34  ;;  %v1686_v22 = vmul.f32 %v1649_v30, %v1590_v10  ;;  %v1664_v33 = vpop.permute.xlu1 %1663  ;;  %v2364_v34 = vld [vmem:[#allocation5 + $0x90] sm:$0xff] }
 0x928   : > { %1824 = vst.msk [vmem:[#allocation5 + $0x58] sm:$0xff] %vm1097_vm2, %v1808_v1  ;;  %v1689_v49 = vmul.f32 %v1664_v33, %v1593_v9  ;;  %v10483_v9 = vld [vmem:[#allocation114_spill] sm:$0xff] }
 0x929   : > { %v1807_v35 = vadd.f32 %v10477_v20, %v1686_v22 }
 0x92a   : > { %v1810_v51 = vadd.f32 %v10478_v36, %v1689_v49  ;;  %v1659_v63 = vpop.permute.xlu0 %1658 }
 0x92b   : > { %1823 = vst.msk [vmem:[#allocation5 + $0x50] sm:$0xff] %vm1097_vm2, %v1807_v35  ;;  %v1688_v14 = vmul.f32 %v1659_v63, %v1592_v21  ;;  %v1674_v44 = vpop.permute.xlu1 %1673  ;;  %v2366_v35 = vld [vmem:[#allocation5 + $0xa0] sm:$0xff]  ;;  %v10488_v63 = vld [vmem:[#allocation113_spill] sm:$0xff] }
 0x92c   : > { %1826 = vst.msk [vmem:[#allocation5 + $0x68] sm:$0xff] %vm1097_vm2, %v1810_v51  ;;  %v1691_v24 = vmul.f32 %v1674_v44, %v1595_v31  ;;  %v10487_v31 = vld [vmem:[#allocation116_spill] sm:$0xff]  ;;  %v2365_v51 = vld [vmem:[#allocation5 + $0x98] sm:$0xff] }
 0x92d   : > { %v1809_v48 = vadd.f32 %v10479_v28, %v1688_v14 }
 0x92e   : > { %v1812_v41 = vadd.f32 %v10480_v61, %v1691_v24  ;;  %v1669_v43 = vpop.permute.xlu0 %1668 }
 0x92f   : > { %1825 = vst.msk [vmem:[#allocation5 + $0x60] sm:$0xff] %vm1097_vm2, %v1809_v48  ;;  %v1690_v60 = vmul.f32 %v1669_v43, %v1594_v50  ;;  %v2381_v6 = vpop.permute.xlu1 %2380  ;;  %v2368_v48 = vld [vmem:[#allocation5 + $0xb0] sm:$0xff]  ;;  %v10490_v43 = vld [vmem:[#allocation115_spill] sm:$0xff] }
 0x930   : > { %1828 = vst.msk [vmem:[#allocation5 + $0x78] sm:$0xff] %vm1097_vm2, %v1812_v41  ;;  %v2458_v57 = vmul.f32 %v2381_v6, %v2362_v39  ;;  %v10489_v39 = vld [vmem:[#allocation118_spill] sm:$0xff]  ;;  %v2367_v41 = vld [vmem:[#allocation5 + $0xa8] sm:$0xff] }
 0x931   : > { %v1811_v10 = vadd.f32 %v10481_v13, %v1690_v60  ;;  %v8983_v29 = vpop.f32.mrb[32].mxu1 }
 0x932   : > { %10482 = vst [vmem:[#allocation42_spill] sm:$0xff] %v8983_v29  ;;  %v2611_v55 = vadd.f32 %v10483_v9, %v2458_v57  ;;  %v8986_v1 = vpop.f32.mrb[33].mxu1  ;;  %v2386_v30 = vpop.permute.xlu0 %2385  ;;  %v2369_v9 = vld [vmem:[#allocation5 + $0xb8] sm:$0xff]  ;;  %v9155_v29 = vld [vmem:[#allocation3 + $0x1d0] sm:$0xff] }
 0x933   : > { %10484 = vst [vmem:[#allocation38_spill] sm:$0xff] %v8986_v1  ;;  %1827 = vst.msk [vmem:[#allocation5 + $0x70] sm:$0xff] %vm1097_vm2, %v1811_v10  ;;  %v2459_v22 = vmul.f32 %v2386_v30, %v2363_v27  ;;  %v2391_v33 = vpop.permute.xlu1 %2390  ;;  %v8989_v49 = vpop.f32.mrb[34].mxu1  ;;  %v10491_v10 = vld [vmem:[#allocation117_spill] sm:$0xff]  ;;  %v9157_v1 = vld [vmem:[#allocation3 + $0x1a8] sm:$0xff] }
 0x934   : > { %10485 = vst [vmem:[#allocation40_spill] sm:$0xff] %v8989_v49  ;;  %2627 = vst.msk [vmem:[#allocation5 + $0x80] sm:$0xff] %vm1097_vm2, %v2611_v55  ;;  %v2460_v21 = vmul.f32 %v2391_v33, %v2364_v34  ;;  %v8992_v20 = vpop.f32.mrb[35].mxu1  ;;  %v10492_v55 = vld [vmem:[#allocation120_spill] sm:$0xff] }
 0x935   : > { %10486 = vst [vmem:[#allocation41_spill] sm:$0xff] %v8992_v20  ;;  %v2612_v36 = vadd.f32 %v10487_v31, %v2459_v22  ;;  %v9137_v20 = vld [vmem:[#allocation3 + $0x1b8] sm:$0xff]  ;;  %10520 = vst [vmem:[#allocation52_spill] sm:$0xff] %v9155_v29 }
 0x936   : > { %v2613_v14 = vadd.f32 %v10488_v63, %v2460_v21  ;;  %v2401_v44 = vpop.permute.xlu0 %2400  ;;  %v2370_v21 = vld [vmem:[#allocation5 + $0xc0] sm:$0xff]  ;;  %v10494_v63 = vld [vmem:[#allocation122_spill] sm:$0xff]  ;;  %10518 = vst [vmem:[#allocation56_spill] sm:$0xff] %v9137_v20 }
 0x937   : > { %2628 = vst.msk [vmem:[#allocation5 + $0x88] sm:$0xff] %vm1097_vm2, %v2612_v36  ;;  %v2462_v24 = vmul.f32 %v2401_v44, %v2366_v35  ;;  %v2396_v50 = vpop.permute.xlu1 %2395  ;;  %v10493_v35 = vld [vmem:[#allocation119_spill] sm:$0xff] }
 0x938   : > { %2629 = vst.msk [vmem:[#allocation5 + $0x90] sm:$0xff] %vm1097_vm2, %v2613_v14  ;;  %v2461_v28 = vmul.f32 %v2396_v50, %v2365_v51 }
 0x939   : > { %v2615_v61 = vadd.f32 %v10489_v39, %v2462_v24 }
 0x93a   : > { %v2614_v60 = vadd.f32 %v10490_v43, %v2461_v28  ;;  %v2411_v6 = vpop.permute.xlu0 %2410 }
 0x93b   : > { %2631 = vst.msk [vmem:[#allocation5 + $0xa0] sm:$0xff] %vm1097_vm2, %v2615_v61  ;;  %v2464_v57 = vmul.f32 %v2411_v6, %v2368_v48  ;;  %v2406_v27 = vpop.permute.xlu1 %2405 }
 0x93c   : > { %2630 = vst.msk [vmem:[#allocation5 + $0x98] sm:$0xff] %vm1097_vm2, %v2614_v60  ;;  %v2463_v13 = vmul.f32 %v2406_v27, %v2367_v41 }
 0x93d   : > { %v2617_v34 = vadd.f32 %v10491_v10, %v2464_v57 }
 0x93e   : > { %v2616_v30 = vadd.f32 %v10492_v55, %v2463_v13 }
 0x93f   : > { %2633 = vst.msk [vmem:[#allocation5 + $0xb0] sm:$0xff] %vm1097_vm2, %v2617_v34  ;;  %v2416_v22 = vpop.permute.xlu1 %2415 }
 0x940   : > { %2632 = vst.msk [vmem:[#allocation5 + $0xa8] sm:$0xff] %vm1097_vm2, %v2616_v30  ;;  %v2465_v33 = vmul.f32 %v2416_v22, %v2369_v9 }
 0x942   : > { %v2618_v31 = vadd.f32 %v10493_v35, %v2465_v33 }
 0x943   : > { %v2421_v36 = vpop.permute.xlu1 %2420 }
 0x944   : > { %2634 = vst.msk [vmem:[#allocation5 + $0xb8] sm:$0xff] %vm1097_vm2, %v2618_v31  ;;  %v2466_v51 = vmul.f32 %v2421_v36, %v2370_v21 }
 0x946   : > { %v2619_v14 = vadd.f32 %v10494_v63, %v2466_v51 }
 0x948   : > { %2635 = vst.msk [vmem:[#allocation5 + $0xc0] sm:$0xff] %vm1097_vm2, %v2619_v14 }
 0x96c   : > { %v9010_v44 = vpop.f32.mrb[36].mxu1 }
 0x96d   : > { %10495 = vst [vmem:[#allocation43_spill] sm:$0xff] %v9010_v44  ;;  %v9012_v24 = vpop.f32.mrb[37].mxu1  ;;  %v9122_v44 = vld [vmem:[#allocation3 + $0x198] sm:$0xff] }
 0x96e   : > { %10496 = vst [vmem:[#allocation44_spill] sm:$0xff] %v9012_v24  ;;  %v9014_v50 = vpop.f32.mrb[38].mxu1 }
 0x96f   : > { %10497 = vst [vmem:[#allocation129_spill] sm:$0xff] %v9014_v50  ;;  %v9016_v28 = vpop.f32.mrb[39].mxu1  ;;  %v9135_v50 = vld [vmem:[#allocation3 + $0x1a0] sm:$0xff] }
 0x970   : > { %10498 = vst [vmem:[#allocation51_spill] sm:$0xff] %v9016_v28 }
 0x974   : > { %v9018_v48 = vpop.f32.mrb[40].mxu1 }
 0x975   : > { %10499 = vst [vmem:[#allocation53_spill] sm:$0xff] %v9018_v48  ;;  %v9020_v39 = vpop.f32.mrb[41].mxu1  ;;  %v10515_v48 = vld [vmem:[#allocation34_spill] sm:$0xff] }
 0x976   : > { %10500 = vst [vmem:[#allocation45_spill] sm:$0xff] %v9020_v39  ;;  %v9022_v61 = vpop.f32.mrb[42].mxu1  ;;  %v9101_v39 = vld [vmem:[#allocation3 + $0x188] sm:$0xff] }
 0x977   : > { %10501 = vst [vmem:[#allocation46_spill] sm:$0xff] %v9022_v61  ;;  %v9024_v41 = vpop.f32.mrb[43].mxu1 }
 0x978   : > { %10502 = vst [vmem:[#allocation47_spill] sm:$0xff] %v9024_v41 }
 0x97e   : > { %v9026_v43 = vpop.f32.mrb[44].mxu1 }
 0x97f   : > { %10503 = vst [vmem:[#allocation49_spill] sm:$0xff] %v9026_v43  ;;  %v9028_v60 = vpop.f32.mrb[45].mxu1  ;;  %v10512_v43 = vld [vmem:[#allocation32_spill] sm:$0xff] }
 0x980   : > { %10504 = vst [vmem:[#allocation130_spill] sm:$0xff] %v9028_v60  ;;  %v9030_v6 = vpop.f32.mrb[46].mxu1  ;;  %v10513_v60 = vld [vmem:[#allocation33_spill] sm:$0xff] }
 0x981   : > { %10505 = vst [vmem:[#allocation132_spill] sm:$0xff] %v9030_v6  ;;  %v9032_v57 = vpop.f32.mrb[47].mxu1  ;;  %v10514_v6 = vld [vmem:[#allocation31_spill] sm:$0xff] }
 0x982   : > { %10506 = vst [vmem:[#allocation48_spill] sm:$0xff] %v9032_v57  ;;  %v9096_v57 = vld [vmem:[#allocation3 + $0x190] sm:$0xff] }
 0x98e   : > { %v9034_v27 = vpop.f32.mrb[48].mxu1 }
 0x98f   : > { %3648 = vmax.xlane.f32.xlu0 %v9034_v27  ;;  %v9037_v13 = vpop.f32.mrb[49].mxu1 }
 0x990   : > { %v9039_v10 = vpop.f32.mrb[50].mxu1 }
 0x991   : > { %v9041_v34 = vpop.f32.mrb[51].mxu1 }
 0x992   : > { %3646 = vmax.xlane.f32.xlu1 %v9041_v34 }
 0x993   : > { %3644 = vmax.xlane.f32.xlu0 %v9037_v13 }
 0x996   : > { %v9045_v9 = vpop.f32.mrb[52].mxu1 }
 0x997   : > { %3650 = vmax.xlane.f32.xlu0 %v9039_v10  ;;  %3656 = vmax.xlane.f32.xlu1 %v9045_v9  ;;  %v9049_v55 = vpop.f32.mrb[53].mxu1 }
 0x998   : > { %v9051_v30 = vpop.f32.mrb[54].mxu1 }
 0x999   : > { %v9053_v22 = vpop.f32.mrb[55].mxu1 }
 0x99b   : > { %3652 = vmax.xlane.f32.xlu1 %v9049_v55  ;;  %3658 = vmax.xlane.f32.xlu0 %v9051_v30 }
 0x99e   : > { %v9057_v33 = vpop.f32.mrb[56].mxu1 }
 0x99f   : > { %3654 = vmax.xlane.f32.xlu0 %v9053_v22  ;;  %3664 = vmax.xlane.f32.xlu1 %v9057_v33  ;;  %v9061_v21 = vpop.f32.mrb[57].mxu1 }
 0x9a0   : > { %v9063_v35 = vpop.f32.mrb[58].mxu1 }
 0x9a1   : > { %v9065_v31 = vpop.f32.mrb[59].mxu1 }
 0x9a2   : > { %10507 = vst [vmem:[#allocation50_spill] sm:$0xff] %v9065_v31 }
 0x9a3   : > { %3660 = vmax.xlane.f32.xlu1 %v9061_v21  ;;  %3666 = vmax.xlane.f32.xlu0 %v9063_v35 }
 0x9a6   : > { %v9069_v36 = vpop.f32.mrb[60].mxu1 }
 0x9a7   : > { %10508 = vst [vmem:[#allocation131_spill] sm:$0xff] %v9069_v36  ;;  %3662 = vmax.xlane.f32.xlu0 %v9065_v31  ;;  %3672 = vmax.xlane.f32.xlu1 %v9069_v36  ;;  %v9073_v51 = vpop.f32.mrb[61].mxu1  ;;  %v9175_v36 = vld [vmem:[#allocation3 + $0x1c0] sm:$0xff]  ;;  %v9217_v31 = vld [vmem:[#allocation3 + $0x1f8] sm:$0xff] }
 0x9a8   : > { %10509 = vst [vmem:[#allocation133_spill] sm:$0xff] %v9073_v51  ;;  %v9075_v63 = vpop.f32.mrb[62].mxu1  ;;  %10522 = vst [vmem:[#allocation134_spill] sm:$0xff] %v9175_v36 }
 0x9a9   : > { %10510 = vst [vmem:[#allocation59_spill] sm:$0xff] %v9075_v63  ;;  %v9077_v14 = vpop.f32.mrb[63].mxu1  ;;  %10528 = vst [vmem:[#allocation64_spill] sm:$0xff] %v9217_v31 }
 0x9aa   : > { %10511 = vst [vmem:[#allocation61_spill] sm:$0xff] %v9077_v14 }
 0x9ab   : > { %3668 = vmax.xlane.f32.xlu1 %v9073_v51  ;;  %3674 = vmax.xlane.f32.xlu0 %v9075_v63  ;;  %v9177_v51 = vld [vmem:[#allocation3 + $0x1d8] sm:$0xff] }
 0x9ac   : > { %10523 = vst [vmem:[#allocation137_spill] sm:$0xff] %v9177_v51 }
 0x9af   : > { %3670 = vmax.xlane.f32.xlu0 %v9077_v14 }
 0x9bc   : > { %4088 = vrot.lane.b32.xlu1 %v10512_v43, %s6681_s21 }
 0x9c0   : > { %4090 = vrot.lane.b32.xlu1 %v10513_v60, %s6681_s21 }
 0x9c4   : > { %4094 = vrot.lane.b32.xlu1 %v7604_v45, %s6681_s21  ;;  %v9103_v45 = vld [vmem:[#allocation3 + $0x180] sm:$0xff] }
 0x9c5   : > { %4086 = vrot.lane.b32.xlu0 %v10514_v6, %s6681_s21  ;;  %v9120_v6 = vld [vmem:[#allocation3 + $0x1b0] sm:$0xff] }
 0x9c6   : > { %10516 = vst [vmem:[#allocation55_spill] sm:$0xff] %v9120_v6 }
 0x9c8   : > { %4098 = vrot.lane.b32.xlu1 %v7628_v59, %s6681_s21 }
 0x9c9   : > { %4092 = vrot.lane.b32.xlu0 %v10515_v48, %s6681_s21 }
 0x9cd   : > { %4096 = vrot.lane.b32.xlu0 %v7616_v52, %s6681_s21 }
 0xa1c   : > { %v3649_v43 = vpop.xlane.xlu0 %3648 }
 0xa1d   : > { %v9099_v60 = vmax.f32 %v9096_v57, %v3649_v43 }
 0xa1f   : > { %4241 = vst.msk [vmem:[#allocation3 + $0x190] sm:$0xff] %vm1563_vm3, %v9099_v60  ;;  %v3647_v59 = vpop.xlane.xlu1 %3646  ;;  %3752 = vperm.xlu1 %5985, %v9099_v60  }
 0xa20   : > { %v9111_v52 = vmax.f32 %v9101_v39, %v3647_v59  ;;  %v3645_v48 = vpop.xlane.xlu0 %3644 }
 0xa21   : > { %v9114_v43 = vmax.f32 %v9103_v45, %v3645_v48 }
 0xa22   : > { %4240 = vst.msk [vmem:[#allocation3 + $0x188] sm:$0xff] %vm1563_vm3, %v9111_v52 }
 0xa23   : > { %4239 = vst.msk [vmem:[#allocation3 + $0x180] sm:$0xff] %vm1563_vm3, %v9114_v43  ;;  %3742 = vperm.xlu1 %5985, %v9114_v43  }
 0xa24   : > { %v3657_v59 = vpop.xlane.xlu1 %3656  ;;  %v3651_v48 = vpop.xlane.xlu0 %3650 }
 0xa25   : > { %v9130_v24 = vmax.f32 %v9120_v6, %v3657_v59  ;;  %v9133_v61 = vmax.f32 %v9122_v44, %v3651_v48 }
 0xa27   : > { %10517 = vst [vmem:[#allocation57_spill] sm:$0xff] %v9130_v24  ;;  %4245 = vst.msk [vmem:[#allocation3 + $0x1b0] sm:$0xff] %vm1563_vm3, %v9130_v24  ;;  %3772 = vperm.xlu1 %5985, %v9130_v24   ;;  %3757 = vperm.xlu0 %5986, %v9133_v61  }
 0xa28   : > { %4242 = vst.msk [vmem:[#allocation3 + $0x198] sm:$0xff] %vm1563_vm3, %v9133_v61  ;;  %v3653_v59 = vpop.xlane.xlu1 %3652  ;;  %v3659_v48 = vpop.xlane.xlu0 %3658 }
 0xa29   : > { %v9150_v49 = vmax.f32 %v9135_v50, %v3653_v59  ;;  %v9153_v41 = vmax.f32 %v9137_v20, %v3659_v48  ;;  %v9197_v20 = vld [vmem:[#allocation3 + $0x1c8] sm:$0xff] }
 0xa2b   : > { %10519 = vst [vmem:[#allocation58_spill] sm:$0xff] %v9153_v41  ;;  %4243 = vst.msk [vmem:[#allocation3 + $0x1a0] sm:$0xff] %vm1563_vm3, %v9150_v49  ;;  %3762 = vperm.xlu1 %5985, %v9150_v49   ;;  %3747 = vperm.xlu0 %5986, %v9111_v52  }
 0xa2c   : > { %4246 = vst.msk [vmem:[#allocation3 + $0x1b8] sm:$0xff] %vm1563_vm3, %v9153_v41  ;;  %v3665_v59 = vpop.xlane.xlu1 %3664  ;;  %v3655_v48 = vpop.xlane.xlu0 %3654 }
 0xa2d   : > { %v9170_v14 = vmax.f32 %v9155_v29, %v3665_v59  ;;  %v9173_v28 = vmax.f32 %v9157_v1, %v3655_v48  ;;  %v9195_v29 = vld [vmem:[#allocation3 + $0x1f0] sm:$0xff] }
 0xa2e   : > { %10525 = vst [vmem:[#allocation67_spill] sm:$0xff] %v9195_v29 }
 0xa2f   : > { %10521 = vst [vmem:[#allocation54_spill] sm:$0xff] %v9170_v14  ;;  %4249 = vst.msk [vmem:[#allocation3 + $0x1d0] sm:$0xff] %vm1563_vm3, %v9170_v14  ;;  %3792 = vperm.xlu1 %5985, %v9170_v14   ;;  %3777 = vperm.xlu0 %5986, %v9153_v41  }
 0xa30   : > { %4244 = vst.msk [vmem:[#allocation3 + $0x1a8] sm:$0xff] %vm1563_vm3, %v9173_v28  ;;  %v3661_v59 = vpop.xlane.xlu1 %3660  ;;  %v3667_v48 = vpop.xlane.xlu0 %3666 }
 0xa31   : > { %v9190_v6 = vmax.f32 %v9175_v36, %v3661_v59  ;;  %v9193_v63 = vmax.f32 %v9177_v51, %v3667_v48  ;;  %v9215_v36 = vld [vmem:[#allocation3 + $0x1e0] sm:$0xff] }
 0xa32   : > { %10527 = vst [vmem:[#allocation66_spill] sm:$0xff] %v9215_v36 }
 0xa33   : > { %10524 = vst [vmem:[#allocation135_spill] sm:$0xff] %v9190_v6  ;;  %4247 = vst.msk [vmem:[#allocation3 + $0x1c0] sm:$0xff] %vm1563_vm3, %v9190_v6  ;;  %3782 = vperm.xlu1 %5985, %v9190_v6   ;;  %3767 = vperm.xlu0 %5986, %v9173_v28  }
 0xa34   : > { %4250 = vst.msk [vmem:[#allocation3 + $0x1d8] sm:$0xff] %vm1563_vm3, %v9193_v63  ;;  %v3673_v59 = vpop.xlane.xlu1 %3672  ;;  %v3663_v48 = vpop.xlane.xlu0 %3662 }
 0xa35   : > { %v9210_v41 = vmax.f32 %v9195_v29, %v3673_v59  ;;  %v9213_v24 = vmax.f32 %v9197_v20, %v3663_v48  ;;  %v9235_v29 = vld [vmem:[#allocation3 + $0x1e8] sm:$0xff] }
 0xa37   : > { %10526 = vst [vmem:[#allocation68_spill] sm:$0xff] %v9210_v41  ;;  %4253 = vst.msk [vmem:[#allocation3 + $0x1f0] sm:$0xff] %vm1563_vm3, %v9210_v41  ;;  %3812 = vperm.xlu1 %5985, %v9210_v41   ;;  %3797 = vperm.xlu0 %5986, %v9193_v63  }
 0xa38   : > { %4248 = vst.msk [vmem:[#allocation3 + $0x1c8] sm:$0xff] %vm1563_vm3, %v9213_v24  ;;  %v3669_v59 = vpop.xlane.xlu1 %3668  ;;  %v3675_v48 = vpop.xlane.xlu0 %3674 }
 0xa39   : > { %v9230_v51 = vmax.f32 %v9215_v36, %v3669_v59  ;;  %v9233_v14 = vmax.f32 %v9217_v31, %v3675_v48 }
 0xa3b   : > { %10529 = vst [vmem:[#allocation136_spill] sm:$0xff] %v9230_v51  ;;  %4251 = vst.msk [vmem:[#allocation3 + $0x1e0] sm:$0xff] %vm1563_vm3, %v9230_v51  ;;  %3802 = vperm.xlu1 %5985, %v9230_v51   ;;  %3787 = vperm.xlu0 %5986, %v9213_v24  }
 0xa3c   : > { %4254 = vst.msk [vmem:[#allocation3 + $0x1f8] sm:$0xff] %vm1563_vm3, %v9233_v14  ;;  %v3671_v59 = vpop.xlane.xlu0 %3670  ;;  %v4089_v41 = vpop.permute.xlu1 %4088 }
 0xa3d   : > { %v9248_v48 = vmax.f32 %v9235_v29, %v3671_v59 }
 0xa3f   : > { %4252 = vst.msk [vmem:[#allocation3 + $0x1e8] sm:$0xff] %vm1563_vm3, %v9248_v48  ;;  %4100 = vrot.lane.b32.xlu0 %v7640_v2, %s6681_s21 }
 0xa40   : > { %v4087_v31 = vpop.permute.xlu0 %4086  ;;  %v4091_v51 = vpop.permute.xlu1 %4090 }
 0xa41   : > { %5734 = vmatprep.subr.bf16.mxu0 %v4087_v31 }
 0xa42   : > { %5735 = vmatpush3.bf16.msra.mxu0 %v4087_v31 }
 0xa43   : > { %3807 = vperm.xlu0 %5986, %v9248_v48   ;;  %5736 = vmatprep.subr.bf16.mxu0 %v4089_v41 }
 0xa44   : > { %v4093_v59 = vpop.permute.xlu0 %4092  ;;  %v4095_v6 = vpop.permute.xlu1 %4094 }
 0xa46   : > { %5737 = vmatpush3.bf16.msra.mxu0 %v4089_v41 }
 0xa47   : > { %3817 = vperm.xlu0 %5986, %v9233_v14   ;;  %5738 = vmatprep.subr.bf16.mxu0 %v4091_v51 }
 0xa48   : > { %v4097_v36 = vpop.permute.xlu0 %4096  ;;  %v4099_v2 = vpop.permute.xlu1 %4098 }
 0xa4a   : > { %5739 = vmatpush3.bf16.msra.mxu0 %v4091_v51  ;;  %v10547_v51 = vld [vmem:[#allocation148_spill] sm:$0xff] }
 0xa4b   : > { %5740 = vmatprep.subr.bf16.mxu0 %v4093_v59 }
 0xa4e   : > { %5741 = vmatpush3.bf16.msra.mxu0 %v4093_v59 }
 0xa4f   : > { %5742 = vmatprep.subr.bf16.mxu0 %v4095_v6 }
 0xa52   : > { %5743 = vmatpush3.bf16.msra.mxu0 %v4095_v6 }
 0xa53   : > { %5744 = vmatprep.subr.bf16.mxu0 %v4097_v36 }
 0xa56   : > { %5745 = vmatpush3.bf16.msra.mxu0 %v4097_v36 }
 0xa57   : > { %5746 = vmatprep.subr.bf16.mxu0 %v4099_v2 }
 0xa5a   : > { %5747 = vmatpush3.bf16.msra.mxu0 %v4099_v2  ;;  %v10549_v2 = vsub.f32 %v8520_v47, %v8532_v38 }
 0xa5f   : > { %3105 = vadd.xlane.f32.xlu1 %v8600_v17  ;;  %v10530_v17 = vsub.f32 %v8408_v18, %v8419_v4  ;;  %v10538_v18 = vld [vmem:[#allocation153_spill] sm:$0xff] }
 0xa63   : > { %3111 = vadd.xlane.f32.xlu1 %v8684_v0 }
 0xa66   : > { %3103 = vadd.xlane.f32.xlu0 %v8603_v19  ;;  %v2910_v19 = vmul.f32 1.442695, %v10530_v17  ;;  %v2928_v17 = vmul.f32 1.442695, %v10549_v2  ;;  %v10565_v2 = vld [vmem:[#allocation163_spill] sm:$0xff] }
 0xa67   : > { %3115 = vadd.xlane.f32.xlu1 %v8707_v46  ;;  %v10535_v46 = vld [vmem:[#allocation143_spill] sm:$0xff] }
 0xa68   : > { %6171 = vpow2.f32 %v2910_v19 }
 0xa6a   : > { %3107 = vadd.xlane.f32.xlu0 %v8608_v32  ;;  %v10531_v32 = vld [vmem:[#allocation138_spill] sm:$0xff] }
 0xa6b   : > { %3119 = vadd.xlane.f32.xlu1 %v8740_v26  ;;  %v10537_v26 = vld [vmem:[#allocation151_spill] sm:$0xff] }
 0xa6c   : > { %v10539_v4 = vsub.f32 %v10537_v26, %v10538_v18  ;;  %v10556_v18 = vld [vmem:[#allocation154_spill] sm:$0xff] }
 0xa6e   : > { %3109 = vadd.xlane.f32.xlu0 %v8611_v37  ;;  %v10532_v37 = vld [vmem:[#allocation139_spill] sm:$0xff] }
 0xa6f   : > { %3123 = vadd.xlane.f32.xlu1 %v8726_v12  ;;  %v10533_v0 = vsub.f32 %v10531_v32, %v10532_v37  ;;  %v10550_v37 = vld [vmem:[#allocation144_spill] sm:$0xff] }
 0xa72   : > { %3113 = vadd.xlane.f32.xlu0 %v8697_v5  ;;  %v10534_v5 = vld [vmem:[#allocation142_spill] sm:$0xff] }
 0xa73   : > { %3127 = vadd.xlane.f32.xlu1 %v8773_v53  ;;  %v10536_v12 = vsub.f32 %v10534_v5, %v10535_v46  ;;  %v10540_v53 = vld [vmem:[#allocation140_spill] sm:$0xff]  ;;  %v10553_v46 = vld [vmem:[#allocation155_spill] sm:$0xff] }
 0xa76   : > { %3117 = vadd.xlane.f32.xlu0 %v8691_v7  ;;  %v2914_v7 = vmul.f32 1.442695, %v10533_v0  ;;  %v10551_v0 = vld [vmem:[#allocation145_spill] sm:$0xff] }
 0xa77   : > { %3131 = vadd.xlane.f32.xlu1 %v8780_v54  ;;  %v10541_v54 = vld [vmem:[#allocation141_spill] sm:$0xff] }
 0xa78   : > { %6173 = vpow2.f32 %v2914_v7  ;;  %v10552_v7 = vsub.f32 %v10550_v37, %v10551_v0 }
 0xa7a   : > { %3121 = vadd.xlane.f32.xlu0 %v8742_v16  ;;  %v2920_v16 = vmul.f32 1.442695, %v10539_v4  ;;  %v2922_v5 = vmul.f32 1.442695, %v10552_v7  ;;  %v10557_v4 = vld [vmem:[#allocation156_spill] sm:$0xff] }
 0xa7b   : > { %v10567_v7 = vld [vmem:[#allocation160_spill] sm:$0xff] }
 0xa7e   : > { %3125 = vadd.xlane.f32.xlu0 %v8731_v23  ;;  %v2916_v23 = vmul.f32 1.442695, %v10536_v12  ;;  %v10554_v12 = vld [vmem:[#allocation157_spill] sm:$0xff] }
 0xa80   : > { %6175 = vpow2.f32 %v2916_v23 }
 0xa81   : > { %6177 = vpow2.f32 %v2920_v16  ;;  %v10558_v16 = vsub.f32 %v10556_v18, %v10557_v4  ;;  %v10570_v18 = vsub.f32 %v9103_v45, %v9114_v43  ;;  %v10574_v45 = vsub.f32 %v9096_v57, %v9099_v60 }
 0xa82   : > { %3129 = vadd.xlane.f32.xlu0 %v8768_v40  ;;  %v9290_v40 = vpop.eup %6171  ;;  %v10575_v60 = vsub.f32 %v9122_v44, %v9133_v61 }
 0xa83   : > { %v9299_v36 = vpop.eup %6173  ;;  %v3708_v4 = vmul.f32 1.442695, %v10570_v18  ;;  %v3712_v43 = vmul.f32 1.442695, %v10574_v45  ;;  %v10583_v45 = vld [vmem:[#allocation55_spill] sm:$0xff] }
 0xa86   : > { %3133 = vadd.xlane.f32.xlu0 %v8787_v58  ;;  %v10542_v58 = vsub.f32 %v10540_v53, %v10541_v54  ;;  %v2926_v53 = vmul.f32 1.442695, %v10558_v16 }
 0xa88   : > { %2425 = vperm.xlu1 %5985, %v8924_v42   ;;  %v2912_v42 = vmul.f32 1.442695, %v10542_v58 }
 0xa8a   : > { %6179 = vpow2.f32 %v2912_v42  ;;  %v9309_v32 = vpop.eup %6175 }
 0xa8b   : > { %v9319_v38 = vpop.eup %6177 }
 0xa8c   : > { %2435 = vperm.xlu1 %5985, %v8932_v3   ;;  %v10543_v3 = vld [vmem:[#allocation147_spill] sm:$0xff] }
 0xa90   : > { %2445 = vperm.xlu1 %5985, %v8940_v11   ;;  %v10544_v11 = vld [vmem:[#allocation149_spill] sm:$0xff] }
 0xa91   : > { %v10545_v41 = vsub.f32 %v10543_v3, %v10544_v11  ;;  %v10561_v3 = vld [vmem:[#allocation150_spill] sm:$0xff]  ;;  %v10562_v11 = vld [vmem:[#allocation152_spill] sm:$0xff] }
 0xa93   : > { %v2924_v31 = vmul.f32 1.442695, %v10545_v41  ;;  %v10563_v41 = vsub.f32 %v10561_v3, %v10562_v11 }
 0xa94   : > { %2455 = vperm.xlu1 %5985, %v8946_v62   ;;  %v10546_v62 = vld [vmem:[#allocation146_spill] sm:$0xff]  ;;  %v9330_v42 = vpop.eup %6179 }
 0xa95   : > { %v10548_v6 = vsub.f32 %v10546_v62, %v10547_v51  ;;  %6181 = vpow2.f32 %v2924_v31 }
 0xa97   : > { %v2918_v59 = vmul.f32 1.442695, %v10548_v6 }
 0xa98   : > { %3186 = vperm.xlu1 %5985, %v9290_v40  }
 0xa99   : > { %6183 = vpow2.f32 %v2918_v59 }
 0xa9a   : > { %6185 = vpow2.f32 %v2928_v17 }
 0xa9b   : > { %6187 = vpow2.f32 %v2922_v5  ;;  %v10568_v5 = vld [vmem:[#allocation162_spill] sm:$0xff] }
 0xa9c   : > { %3196 = vperm.xlu1 %5985, %v9299_v36   ;;  %2430 = vperm.xlu0 %5986, %v8917_v15   ;;  %v10555_v15 = vsub.f32 %v10553_v46, %v10554_v12  ;;  %v10569_v46 = vsub.f32 %v10567_v7, %v10568_v5 }
 0xa9e   : > { %v3753_v19 = vpop.permute.xlu1 %3752  ;;  %v2932_v23 = vmul.f32 1.442695, %v10555_v15 }
 0xa9f   : > { %v3822_v47 = vsub.f32 %v9034_v27, %v3753_v19  ;;  %v2930_v27 = vmul.f32 1.442695, %v10563_v41  ;;  %v9335_v51 = vpop.eup %6181 }
 0xaa0   : > { %3201 = vperm.xlu1 %5985, %v9309_v32   ;;  %2440 = vperm.xlu0 %5986, %v8928_v25   ;;  %6189 = vpow2.f32 %v2932_v23  ;;  %v10559_v25 = vld [vmem:[#allocation164_spill] sm:$0xff] }
 0xaa1   : > { %v10560_v54 = vsub.f32 %v8558_v8, %v10559_v25  ;;  %v3840_v6 = vmul.f32 1.442695, %v3822_v47  ;;  %6191 = vpow2.f32 %v2926_v53  ;;  %v10564_v8 = vld [vmem:[#allocation161_spill] sm:$0xff]  ;;  %v10571_v25 = vld [vmem:[#allocation158_spill] sm:$0xff] }
 0xaa2   : > { %v3743_v26 = vpop.permute.xlu1 %3742  ;;  %v10566_v17 = vsub.f32 %v10564_v8, %v10565_v2 }
 0xaa3   : > { %v2936_v58 = vmul.f32 1.442695, %v10560_v54  ;;  %v3820_v59 = vsub.f32 %v9037_v13, %v3743_v26  ;;  %v9344_v0 = vpop.eup %6183  ;;  %v2934_v13 = vmul.f32 1.442695, %v10569_v46  ;;  %v10572_v54 = vld [vmem:[#allocation159_spill] sm:$0xff] }
 0xaa4   : > { %3211 = vperm.xlu1 %5985, %v9319_v38   ;;  %2450 = vperm.xlu0 %5986, %v8936_v56   ;;  %v2940_v19 = vmul.f32 1.442695, %v10566_v17  ;;  %v9349_v15 = vpop.eup %6185 }
 0xaa5   : > { %6193 = vpow2.f32 %v2936_v58  ;;  %v3836_v23 = vmul.f32 1.442695, %v3820_v59  ;;  %v9358_v53 = vpop.eup %6187  ;;  %v10573_v58 = vsub.f32 %v10571_v25, %v10572_v54 }
 0xaa6   : > { %v3773_v31 = vpop.permute.xlu1 %3772  ;;  %v3758_v62 = vpop.permute.xlu0 %3757  ;;  %6195 = vpow2.f32 %v2930_v27 }
 0xaa7   : > { %v3823_v56 = vsub.f32 %v9039_v10, %v3758_v62  ;;  %6197 = vpow2.f32 %v3840_v6  ;;  %v3826_v26 = vsub.f32 %v9045_v9, %v3773_v31  ;;  %v2938_v3 = vmul.f32 1.442695, %v10573_v58  ;;  %v10579_v58 = vld [vmem:[#allocation50_spill] sm:$0xff] }
 0xaa8   : > { %3221 = vperm.xlu1 %5985, %v9335_v51   ;;  %3191 = vperm.xlu0 %5986, %v9330_v42  }
 0xaa9   : > { %v3842_v37 = vmul.f32 1.442695, %v3823_v56  ;;  %v3848_v27 = vmul.f32 1.442695, %v3826_v26 }
 0xaaa   : > { %v3763_v12 = vpop.permute.xlu1 %3762  ;;  %v3748_v10 = vpop.permute.xlu0 %3747 }
 0xaab   : > { %v3821_v47 = vsub.f32 %v9041_v34, %v3748_v10  ;;  %6199 = vpow2.f32 %v3842_v37  ;;  %v3824_v34 = vsub.f32 %v9049_v55, %v3763_v12  ;;  %v9364_v41 = vpop.eup %6189 }
 0xaac   : > { %3231 = vperm.xlu1 %5985, %v9349_v15   ;;  %3206 = vperm.xlu0 %5986, %v9344_v0   ;;  %6201 = vpow2.f32 %v2940_v19  ;;  %v9372_v55 = vpop.eup %6191  ;;  %v3714_v19 = vmul.f32 1.442695, %v10575_v60 }
 0xaad   : > { %v3838_v16 = vmul.f32 1.442695, %v3821_v47  ;;  %6203 = vpow2.f32 %v2934_v13  ;;  %v3844_v6 = vmul.f32 1.442695, %v3824_v34  ;;  %v10581_v34 = vld [vmem:[#allocation58_spill] sm:$0xff] }
 0xaae   : > { %v3793_v9 = vpop.permute.xlu1 %3792  ;;  %v3778_v11 = vpop.permute.xlu0 %3777  ;;  %6205 = vpow2.f32 %v3836_v23 }
 0xaaf   : > { %v3827_v31 = vsub.f32 %v9051_v30, %v3778_v11  ;;  %6207 = vpow2.f32 %v3838_v16  ;;  %v9374_v8 = vpop.eup %6193  ;;  %v3830_v30 = vsub.f32 %v9057_v33, %v3793_v9 }
 0xab0   : > { %3241 = vperm.xlu1 %5985, %v9364_v41   ;;  %3216 = vperm.xlu0 %5986, %v9358_v53   ;;  %6209 = vpow2.f32 %v3708_v4  ;;  %v9378_v17 = vpop.eup %6195 }
 0xab1   : > { %v3850_v62 = vmul.f32 1.442695, %v3827_v31  ;;  %6211 = vpow2.f32 %v2938_v3  ;;  %v9382_v57 = vpop.eup %6197  ;;  %v3856_v12 = vmul.f32 1.442695, %v3830_v30 }
 0xab2   : > { %v3783_v59 = vpop.permute.xlu1 %3782  ;;  %v3768_v56 = vpop.permute.xlu0 %3767  ;;  %6213 = vpow2.f32 %v3848_v27 }
 0xab3   : > { %v3825_v2 = vsub.f32 %v9053_v22, %v3768_v56  ;;  %6215 = vpow2.f32 %v3850_v62  ;;  %v10576_v22 = vsub.f32 %v9101_v39, %v9111_v52  ;;  %v3828_v10 = vsub.f32 %v9061_v21, %v3783_v59  ;;  %v10586_v59 = vld [vmem:[#allocation133_spill] sm:$0xff] }
 0xab4   : > { %3251 = vperm.xlu1 %5985, %v9374_v8   ;;  %3226 = vperm.xlu0 %5986, %v9372_v55   ;;  %6217 = vpow2.f32 %v3712_v43  ;;  %v10577_v52 = vsub.f32 %v9157_v1, %v9173_v28  ;;  %v10584_v43 = vld [vmem:[#allocation57_spill] sm:$0xff] }
 0xab5   : > { %v3846_v37 = vmul.f32 1.442695, %v3825_v2  ;;  %v9387_v7 = vpop.eup %6199  ;;  %v3710_v33 = vmul.f32 1.442695, %v10576_v22  ;;  %6219 = vpow2.f32 %v3844_v6  ;;  %v3852_v25 = vmul.f32 1.442695, %v3828_v10 }
 0xab6   : > { %v9392_v5 = vpop.permute.xlu1 %3812  ;;  %v3798_v46 = vpop.permute.xlu0 %3797  ;;  %v4079_v44 = vpack.c.bf16 %v9387_v7, %v9382_v57  ;;  %v3718_v26 = vmul.f32 1.442695, %v10577_v52  ;;  %v10585_v62 = vsub.f32 %v10583_v45, %v10584_v43  ;;  %v10588_v22 = vld [vmem:[#allocation54_spill] sm:$0xff] }
 0xab7   : > { %v9394_v13 = vpop.eup %6201  ;;  %v3831_v23 = vsub.f32 %v9063_v35, %v3798_v46  ;;  %6221 = vpow2.f32 %v3846_v37  ;;  %v10578_v35 = vsub.f32 %v9135_v50, %v9150_v49  ;;  %v10580_v50 = vld [vmem:[#allocation56_spill] sm:$0xff] }
 0xab8   : > { %v9400_v61 = vpop.eup %6203  ;;  %3261 = vperm.xlu1 %5985, %v9394_v13   ;;  %3236 = vperm.xlu0 %5986, %v9378_v17   ;;  %6223 = vpow2.f32 %v3714_v19  ;;  %v10582_v9 = vsub.f32 %v10580_v50, %v10581_v34  ;;  %v3720_v6 = vmul.f32 1.442695, %v10585_v62  ;;  %v10587_v37 = vld [vmem:[#allocation52_spill] sm:$0xff] }
 0xab9   : > { %v9404_v39 = vpop.eup %6205  ;;  %v3858_v21 = vmul.f32 1.442695, %v3831_v23  ;;  %6225 = vpow2.f32 %v3710_v33  ;;  %v3716_v18 = vmul.f32 1.442695, %v10578_v35  ;;  %v10589_v33 = vsub.f32 %v10587_v37, %v10588_v22 }
 0xaba   : > { %v9409_v47 = vpop.eup %6207  ;;  %v3788_v4 = vpop.permute.xlu0 %3787  ;;  %6227 = vpow2.f32 %v3856_v12  ;;  %v3722_v11 = vmul.f32 1.442695, %v10582_v9  ;;  %v10590_v12 = vld [vmem:[#allocation137_spill] sm:$0xff]  ;;  %v10597_v9 = vsub.f32 %v9197_v20, %v9213_v24  ;;  %v10599_v24 = vsub.f32 %v9235_v29, %v9248_v48 }
 0xabb   : > { %v9414_v16 = vpop.eup %6209  ;;  %v3803_v54 = vpop.permute.xlu1 %3802  ;;  %v3829_v3 = vsub.f32 %v10579_v58, %v3788_v4  ;;  %v4078_v1 = vpack.c.bf16 %v9409_v47, %v9404_v39  ;;  %6229 = vpow2.f32 %v3858_v21  ;;  %v3728_v46 = vmul.f32 1.442695, %v10589_v33 }
 0xabc   : > { %v9419_v28 = vpop.eup %6211  ;;  %3984 = vperm.xlu1 %5985, %v9414_v16   ;;  %3246 = vperm.xlu0 %5986, %v9400_v61   ;;  %6231 = vpow2.f32 %v3718_v26  ;;  %v3832_v56 = vsub.f32 %v10586_v59, %v3803_v54  ;;  %v10591_v10 = vsub.f32 %v10590_v12, %v9193_v63  ;;  %v10592_v26 = vld [vmem:[#allocation131_spill] sm:$0xff]  ;;  %v10594_v63 = vld [vmem:[#allocation134_spill] sm:$0xff]  ;;  %v3734_v37 = vmul.f32 1.442695, %v10599_v24  ;;  %v10601_v12 = vld [vmem:[#allocation136_spill] sm:$0xff] }
 0xabd   : > { %v9423_v49 = vpop.eup %6213  ;;  %v3854_v27 = vmul.f32 1.442695, %v3829_v3  ;;  %5750 = vmatprep.mubr.bf16.mxu0 %v4078_v1  ;;  %6233 = vpow2.f32 %v3716_v18  ;;  %v3834_v21 = vsub.f32 %v10592_v26, %v9392_v5  ;;  %v10595_v1 = vld [vmem:[#allocation135_spill] sm:$0xff] }
 0xabe   : > { %v9428_v31 = vpop.eup %6215  ;;  %v4101_v30 = vpop.permute.xlu0 %4100  ;;  %6235 = vpow2.f32 %v3852_v25  ;;  %v3730_v23 = vmul.f32 1.442695, %v10591_v10  ;;  %v3860_v35 = vmul.f32 1.442695, %v3832_v56  ;;  %v10593_v25 = vld [vmem:[#allocation61_spill] sm:$0xff]  ;;  %v10596_v50 = vsub.f32 %v10594_v63, %v10595_v1 }
 0xabf   : > { %v9434_v2 = vpop.eup %6217  ;;  %5748 = vmatprep.subr.bf16.mxu0 %v4101_v30  ;;  %v4081_v60 = vpack.c.bf16 %v9428_v31, %v9423_v49  ;;  %6237 = vpow2.f32 %v3854_v27  ;;  %v3864_v43 = vmul.f32 1.442695, %v3834_v21 }
 0xac0   : > { %v9438_v19 = vpop.eup %6219  ;;  %3994 = vperm.xlu1 %5985, %v9434_v2   ;;  %3256 = vperm.xlu0 %5986, %v9419_v28   ;;  %6239 = vpow2.f32 %v3722_v11  ;;  %v3724_v34 = vmul.f32 1.442695, %v10596_v50  ;;  %v3726_v11 = vmul.f32 1.442695, %v10597_v9 }
 0xac1   : > { %5749 = vmatpush3.bf16.msra.mxu0 %v4101_v30  ;;  %v9448_v52 = vpop.eup %6221  ;;  %6241 = vpow2.f32 %v3720_v6 }
 0xac2   : > { %v3808_v18 = vpop.permute.xlu0 %3807  ;;  %v9452_v4 = vpop.eup %6223  ;;  %v4080_v58 = vpack.c.bf16 %v9448_v52, %v9438_v19  ;;  %6243 = vpow2.f32 %v3728_v46  ;;  %v10600_v46 = vld [vmem:[#allocation66_spill] sm:$0xff] }
 0xac3   : > { %v3833_v54 = vsub.f32 %v10593_v25, %v3808_v18  ;;  %v9457_v3 = vpop.eup %6225  ;;  %6245 = vpow2.f32 %v3730_v23  ;;  %v10602_v10 = vsub.f32 %v10600_v46, %v10601_v12 }
 0xac4   : > { %5751 = vmatmul.mubr.bf16.vlgmr.msra.gmra.mrb[80].mxu0 %v4079_v44  ;;  %3999 = vperm.xlu1 %5985, %v9452_v4   ;;  %v9463_v5 = vpop.eup %6227  ;;  %6247 = vpow2.f32 %v3860_v35  ;;  %v10598_v44 = vld [vmem:[#allocation59_spill] sm:$0xff] }
 0xac5   : > { %v3862_v27 = vmul.f32 1.442695, %v3833_v54  ;;  %3989 = vperm.xlu0 %5986, %v9457_v3   ;;  %5754 = vmatprep.mubr.bf16.mxu0 %v4080_v58  ;;  %v9469_v45 = vpop.eup %6229  ;;  %v3732_v23 = vmul.f32 1.442695, %v10602_v10 }
 0xac6   : > { %v3818_v62 = vpop.permute.xlu0 %3817  ;;  %v9471_v6 = vpop.eup %6231  ;;  %v4083_v56 = vpack.c.bf16 %v9469_v45, %v9463_v5 }
 0xac7   : > { %6249 = vpow2.f32 %v3862_v27  ;;  %v3835_v59 = vsub.f32 %v10598_v44, %v3818_v62  ;;  %v9476_v30 = vpop.eup %6233  ;;  %v3075_v62 = vld [vmem:[#allocation4 + $0x120] sm:$0xff] }
 0xac8   : > { %6251 = vpow2.f32 %v3724_v34  ;;  %4009 = vperm.xlu1 %5985, %v9471_v6   ;;  %v9479_v20 = vpop.eup %6235 }
 0xac9   : > { %6253 = vpow2.f32 %v3726_v11  ;;  %v3866_v22 = vmul.f32 1.442695, %v3835_v59  ;;  %4004 = vperm.xlu0 %5986, %v9476_v30   ;;  %v9485_v33 = vpop.eup %6237  ;;  %v3072_v11 = vld [vmem:[#allocation4 + $0x108] sm:$0xff]  ;;  %v3091_v59 = vmul.f32 %v9344_v0, %v3075_v62 }
 0xaca   : > { %6255 = vpow2.f32 %v3864_v43  ;;  %v9490_v26 = vpop.eup %6239  ;;  %v4082_v21 = vpack.c.bf16 %v9485_v33, %v9479_v20  ;;  %v3088_v27 = vmul.f32 %v9330_v42, %v3072_v11 }
 0xacb   : > { %6257 = vpow2.f32 %v3866_v22  ;;  %v9494_v35 = vpop.eup %6241 }
 0xacc   : > { %5755 = vmatmul.mubr.bf16.gmra.mrb[84].mxu0 %v4081_v60  ;;  %4019 = vperm.xlu1 %5985, %v9490_v26   ;;  %6259 = vpow2.f32 %v3734_v37  ;;  %v9498_v29 = vpop.eup %6243  ;;  %v3077_v37 = vld [vmem:[#allocation4 + $0x130] sm:$0xff] }
 0xacd   : > { %4014 = vperm.xlu0 %5986, %v9494_v35   ;;  %5758 = vmatprep.mubr.bf16.mxu0 %v4082_v21  ;;  %6261 = vpow2.f32 %v3732_v23  ;;  %v9500_v48 = vpop.eup %6245  ;;  %v3093_v10 = vmul.f32 %v9358_v53, %v3077_v37  ;;  %v3073_v23 = vld [vmem:[#allocation4 + $0x110] sm:$0xff] }
 0xace   : > { %v9502_v18 = vpop.eup %6247  ;;  %v3089_v0 = vmul.f32 %v9299_v36, %v3073_v23  ;;  %v3081_v53 = vld [vmem:[#allocation4 + $0x150] sm:$0xff] }
 0xacf   : > { %v3097_v36 = vmul.f32 %v9378_v17, %v3081_v53  ;;  %v3085_v23 = vld [vmem:[#allocation4 + $0x170] sm:$0xff]  ;;  %v3084_v53 = vld [vmem:[#allocation4 + $0x168] sm:$0xff] }
 0xad0   : > { %4039 = vperm.xlu1 %5985, %v9500_v48  }
 0xad1   : > { %v9505_v25 = vpop.eup %6249  ;;  %4034 = vperm.xlu0 %5986, %v9498_v29  }
 0xad2   : > { %v9508_v60 = vpop.eup %6251  ;;  %v4084_v54 = vpack.c.bf16 %v9505_v25, %v9502_v18 }
 0xad3   : > { %v9512_v58 = vpop.eup %6253 }
 0xad4   : > { %v9514_v63 = vpop.eup %6255  ;;  %5759 = vmatmul.mubr.bf16.gmra.mrb[88].mxu0 %v4083_v56  ;;  %4029 = vperm.xlu1 %5985, %v9512_v58   ;;  %v3071_v56 = vld [vmem:[#allocation4 + $0x100] sm:$0xff] }
 0xad5   : > { %v9517_v1 = vpop.eup %6257  ;;  %4024 = vperm.xlu0 %5986, %v9508_v60   ;;  %5762 = vmatprep.mubr.bf16.mxu0 %v4084_v54  ;;  %v3087_v46 = vmul.f32 %v9290_v40, %v3071_v56  ;;  %v3079_v54 = vld [vmem:[#allocation4 + $0x140] sm:$0xff]  ;;  %v3074_v40 = vld [vmem:[#allocation4 + $0x118] sm:$0xff] }
 0xad6   : > { %v4085_v50 = vpack.c.bf16 %v9517_v1, %v9514_v63  ;;  %v9522_v34 = vpop.eup %6259 }
 0xad7   : > { %v9524_v9 = vpop.eup %6261 }
 0xad8   : > { %4049 = vperm.xlu1 %5985, %v9522_v34  }
 0xad9   : > { %4044 = vperm.xlu0 %5986, %v9524_v9  }
 0xadc   : > { %5763 = vmatmul.mubr.bf16.gmra.mrb[92].mxu0 %v4085_v50 }
 0xaec   : > { %v3106_v43 = vpop.xlane.xlu1 %3105 }
 0xaed   : > { %v3136_v44 = vadd.f32 %v3106_v43, %v3088_v27  ;;  %v3095_v27 = vmul.f32 %v9372_v55, %v3079_v54  ;;  %v3080_v54 = vld [vmem:[#allocation4 + $0x148] sm:$0xff] }
 0xaef   : > { %3152 = vst.msk [vmem:[#allocation4 + $0x108] sm:$0xff] %vm1563_vm3, %v3136_v44 }
 0xaf0   : > { %v3112_v24 = vpop.xlane.xlu1 %3111 }
 0xaf1   : > { %v3139_v22 = vadd.f32 %v3112_v24, %v3091_v59  ;;  %v3090_v59 = vmul.f32 %v9309_v32, %v3074_v40  ;;  %v3076_v24 = vld [vmem:[#allocation4 + $0x128] sm:$0xff]  ;;  %v2373_v40 = vld [vmem:[#allocation5 + $0xd8] sm:$0xff] }
 0xaf3   : > { %3155 = vst.msk [vmem:[#allocation4 + $0x120] sm:$0xff] %vm1563_vm3, %v3139_v22  ;;  %v3104_v12 = vpop.xlane.xlu0 %3103 }
 0xaf4   : > { %v3135_v42 = vadd.f32 %v3104_v12, %v3087_v46  ;;  %v3116_v21 = vpop.xlane.xlu1 %3115  ;;  %v3092_v46 = vmul.f32 %v9319_v38, %v3076_v24 }
 0xaf5   : > { %v3141_v50 = vadd.f32 %v3116_v21, %v3093_v10  ;;  %v3078_v10 = vld [vmem:[#allocation4 + $0x138] sm:$0xff]  ;;  %v3101_v21 = vmul.f32 %v9419_v28, %v3085_v23  ;;  %v10608_v23 = vld [vmem:[#allocation127_spill] sm:$0xff] }
 0xaf6   : > { %3151 = vst.msk [vmem:[#allocation4 + $0x100] sm:$0xff] %vm1563_vm3, %v3135_v42  ;;  %v3094_v42 = vmul.f32 %v9335_v51, %v3078_v10 }
 0xaf7   : > { %3157 = vst.msk [vmem:[#allocation4 + $0x130] sm:$0xff] %vm1563_vm3, %v3141_v50  ;;  %v3108_v11 = vpop.xlane.xlu0 %3107 }
 0xaf8   : > { %3905 = vadd.xlane.f32.xlu0 %v9382_v57  ;;  %v3137_v43 = vadd.f32 %v3108_v11, %v3089_v0  ;;  %v3120_v62 = vpop.xlane.xlu1 %3119  ;;  %v3083_v57 = vld [vmem:[#allocation4 + $0x160] sm:$0xff]  ;;  %v2371_v0 = vld [vmem:[#allocation5 + $0xc8] sm:$0xff]  ;;  %v3082_v11 = vld [vmem:[#allocation4 + $0x158] sm:$0xff] }
 0xaf9   : > { %v3143_v44 = vadd.f32 %v3120_v62, %v3095_v27  ;;  %v3099_v12 = vmul.f32 %v9400_v61, %v3083_v57 }
 0xafa   : > { %3153 = vst.msk [vmem:[#allocation4 + $0x110] sm:$0xff] %vm1563_vm3, %v3137_v43  ;;  %v10603_v43 = vld [vmem:[#allocation124_spill] sm:$0xff] }
 0xafb   : > { %3159 = vst.msk [vmem:[#allocation4 + $0x140] sm:$0xff] %vm1563_vm3, %v3143_v44  ;;  %v3110_v56 = vpop.xlane.xlu0 %3109 }
 0xafc   : > { %3901 = vadd.xlane.f32.xlu0 %v9404_v39  ;;  %v3138_v55 = vadd.f32 %v3110_v56, %v3090_v59  ;;  %v3124_v37 = vpop.xlane.xlu1 %3123  ;;  %3903 = vadd.xlane.f32.xlu1 %v9409_v47  ;;  %v2375_v56 = vld [vmem:[#allocation5 + $0xe8] sm:$0xff] }
 0xafd   : > { %v3145_v22 = vadd.f32 %v3124_v37, %v3097_v36 }
 0xafe   : > { %3154 = vst.msk [vmem:[#allocation4 + $0x118] sm:$0xff] %vm1563_vm3, %v3138_v55  ;;  %v3086_v55 = vld [vmem:[#allocation4 + $0x178] sm:$0xff] }
 0xaff   : > { %3161 = vst.msk [vmem:[#allocation4 + $0x150] sm:$0xff] %vm1563_vm3, %v3145_v22  ;;  %v3114_v32 = vpop.xlane.xlu0 %3113  ;;  %v3102_v57 = vmul.f32 %v9394_v13, %v3086_v55  ;;  %v2377_v22 = vld [vmem:[#allocation5 + $0xf8] sm:$0xff]  ;;  %v3168_v13 = vld [vmem:[#allocation5 + $0x100] sm:$0xff] }
 0xb00   : > { %3907 = vadd.xlane.f32.xlu0 %v9387_v7  ;;  %v3140_v17 = vadd.f32 %v3114_v32, %v3092_v46  ;;  %v3128_v39 = vpop.xlane.xlu1 %3127  ;;  %3913 = vadd.xlane.f32.xlu1 %v9423_v49  ;;  %v3096_v49 = vmul.f32 %v9349_v15, %v3080_v54 }
 0xb01   : > { %v3147_v47 = vadd.f32 %v3128_v39, %v3099_v12 }
 0xb02   : > { %3156 = vst.msk [vmem:[#allocation4 + $0x128] sm:$0xff] %vm1563_vm3, %v3140_v17 }
 0xb03   : > { %3163 = vst.msk [vmem:[#allocation4 + $0x160] sm:$0xff] %vm1563_vm3, %v3147_v47  ;;  %v3118_v38 = vpop.xlane.xlu0 %3117 }
 0xb04   : > { %3915 = vadd.xlane.f32.xlu0 %v9428_v31  ;;  %v3142_v61 = vadd.f32 %v3118_v38, %v3094_v42  ;;  %v3132_v7 = vpop.xlane.xlu1 %3131  ;;  %3909 = vadd.xlane.f32.xlu1 %v9438_v19  ;;  %v3098_v19 = vmul.f32 %v9364_v41, %v3082_v11  ;;  %v10604_v41 = vld [vmem:[#allocation123_spill] sm:$0xff]  ;;  %v2372_v38 = vld [vmem:[#allocation5 + $0xd0] sm:$0xff]  ;;  %v3171_v11 = vld [vmem:[#allocation5 + $0x118] sm:$0xff] }
 0xb05   : > { %v3149_v50 = vadd.f32 %v3132_v7, %v3101_v21  ;;  %v10609_v21 = vld [vmem:[#allocation38_spill] sm:$0xff] }
 0xb06   : > { %3158 = vst.msk [vmem:[#allocation4 + $0x138] sm:$0xff] %vm1563_vm3, %v3142_v61 }
 0xb07   : > { %3165 = vst.msk [vmem:[#allocation4 + $0x170] sm:$0xff] %vm1563_vm3, %v3149_v50  ;;  %v3122_v51 = vpop.xlane.xlu0 %3121 }
 0xb08   : > { %3911 = vadd.xlane.f32.xlu0 %v9448_v52  ;;  %v3144_v28 = vadd.f32 %v3122_v51, %v3096_v49  ;;  %v2426_v27 = vpop.permute.xlu1 %2425  ;;  %3921 = vadd.xlane.f32.xlu1 %v9463_v5  ;;  %v3100_v5 = vmul.f32 %v9374_v8, %v3084_v53  ;;  %v10605_v8 = vld [vmem:[#allocation128_spill] sm:$0xff]  ;;  %v2374_v49 = vld [vmem:[#allocation5 + $0xe0] sm:$0xff] }
 0xb09   : > { %v2467_v31 = vmul.f32 %v2426_v27, %v2371_v0  ;;  %v10610_v0 = vld [vmem:[#allocation121_spill] sm:$0xff] }
 0xb0a   : > { %3160 = vst.msk [vmem:[#allocation4 + $0x148] sm:$0xff] %vm1563_vm3, %v3144_v28  ;;  %v10612_v28 = vld [vmem:[#allocation68_spill] sm:$0xff] }
 0xb0b   : > { %v2620_v62 = vadd.f32 %v10603_v43, %v2467_v31  ;;  %v3126_v15 = vpop.xlane.xlu0 %3125 }
 0xb0c   : > { %3923 = vadd.xlane.f32.xlu0 %v9469_v45  ;;  %v3146_v44 = vadd.f32 %v3126_v15, %v3098_v19  ;;  %v2436_v59 = vpop.permute.xlu1 %2435  ;;  %3917 = vadd.xlane.f32.xlu1 %v9479_v20  ;;  %v10614_v19 = vld [vmem:[#allocation42_spill] sm:$0xff] }
 0xb0d   : > { %2636 = vst.msk [vmem:[#allocation5 + $0xc8] sm:$0xff] %vm1097_vm2, %v2620_v62  ;;  %v2469_v52 = vmul.f32 %v2436_v59, %v2373_v40  ;;  %v10615_v59 = vld [vmem:[#allocation126_spill] sm:$0xff] }
 0xb0e   : > { %3162 = vst.msk [vmem:[#allocation4 + $0x158] sm:$0xff] %vm1563_vm3, %v3146_v44  ;;  %v2376_v44 = vld [vmem:[#allocation5 + $0xf0] sm:$0xff] }
 0xb0f   : > { %v2622_v36 = vadd.f32 %v10604_v41, %v2469_v52  ;;  %v3130_v24 = vpop.xlane.xlu0 %3129 }
 0xb10   : > { %3919 = vadd.xlane.f32.xlu0 %v9485_v33  ;;  %v3148_v37 = vadd.f32 %v3130_v24, %v3100_v5  ;;  %v2446_v45 = vpop.permute.xlu1 %2445  ;;  %3929 = vadd.xlane.f32.xlu1 %v9514_v63  ;;  %v10606_v63 = vld [vmem:[#allocation64_spill] sm:$0xff] }
 0xb11   : > { %2638 = vst.msk [vmem:[#allocation5 + $0xd8] sm:$0xff] %vm1097_vm2, %v2622_v36  ;;  %v2471_v20 = vmul.f32 %v2446_v45, %v2375_v56  ;;  %v10607_v17 = vsub.f32 %v10606_v63, %v9233_v14  ;;  %v3173_v5 = vld [vmem:[#allocation5 + $0x128] sm:$0xff] }
 0xb12   : > { %3164 = vst.msk [vmem:[#allocation4 + $0x168] sm:$0xff] %vm1563_vm3, %v3148_v37  ;;  %v10616_v56 = vld [vmem:[#allocation40_spill] sm:$0xff] }
 0xb13   : > { %v2624_v46 = vadd.f32 %v10605_v8, %v2471_v20  ;;  %v3134_v32 = vpop.xlane.xlu0 %3133  ;;  %v3738_v39 = vmul.f32 1.442695, %v10607_v17  ;;  %v3169_v20 = vld [vmem:[#allocation5 + $0x108] sm:$0xff]  ;;  %v3175_v8 = vld [vmem:[#allocation5 + $0x138] sm:$0xff]  ;;  %v3172_v17 = vld [vmem:[#allocation5 + $0x120] sm:$0xff] }
 0xb14   : > { %3931 = vadd.xlane.f32.xlu0 %v9517_v1  ;;  %v3150_v12 = vadd.f32 %v3134_v32, %v3102_v57  ;;  %v2456_v10 = vpop.permute.xlu1 %2455  ;;  %3925 = vadd.xlane.f32.xlu1 %v9502_v18  ;;  %v3170_v18 = vld [vmem:[#allocation5 + $0x110] sm:$0xff] }
 0xb15   : > { %2640 = vst.msk [vmem:[#allocation5 + $0xe8] sm:$0xff] %vm1097_vm2, %v2624_v46  ;;  %v2473_v33 = vmul.f32 %v2456_v10, %v2377_v22  ;;  %6263 = vpow2.f32 %v3738_v39  ;;  %v10617_v57 = vld [vmem:[#allocation125_spill] sm:$0xff]  ;;  %v10618_v46 = vld [vmem:[#allocation51_spill] sm:$0xff] }
 0xb16   : > { %3166 = vst.msk [vmem:[#allocation4 + $0x178] sm:$0xff] %vm1563_vm3, %v3150_v12  ;;  %v10619_v39 = vld [vmem:[#allocation41_spill] sm:$0xff] }
 0xb17   : > { %v2626_v47 = vadd.f32 %v10608_v23, %v2473_v33  ;;  %v3177_v23 = vld [vmem:[#allocation5 + $0x148] sm:$0xff] }
 0xb18   : > { %3927 = vadd.xlane.f32.xlu0 %v9505_v25  ;;  %v3187_v42 = vpop.permute.xlu1 %3186  ;;  %v10611_v25 = vld [vmem:[#allocation67_spill] sm:$0xff] }
 0xb19   : > { %2642 = vst.msk [vmem:[#allocation5 + $0xf8] sm:$0xff] %vm1097_vm2, %v2626_v47  ;;  %v3264_v1 = vmul.f32 %v3187_v42, %v3168_v13  ;;  %v10613_v27 = vsub.f32 %v10611_v25, %v10612_v28  ;;  %v10620_v47 = vld [vmem:[#allocation129_spill] sm:$0xff] }
 0xb1b   : > { %v3409_v54 = vadd.f32 %v10609_v21, %v3264_v1  ;;  %v2431_v61 = vpop.permute.xlu0 %2430  ;;  %v3736_v31 = vmul.f32 1.442695, %v10613_v27  ;;  %v3176_v27 = vld [vmem:[#allocation5 + $0x140] sm:$0xff] }
 0xb1c   : > { %v2468_v7 = vmul.f32 %v2431_v61, %v2372_v38  ;;  %v3197_v14 = vpop.permute.xlu1 %3196  ;;  %v3174_v61 = vld [vmem:[#allocation5 + $0x130] sm:$0xff] }
 0xb1d   : > { %3425 = vst.msk [vmem:[#allocation5 + $0x100] sm:$0xff] %vm1097_vm2, %v3409_v54  ;;  %v3266_v50 = vmul.f32 %v3197_v14, %v3170_v18  ;;  %6265 = vpow2.f32 %v3736_v31  ;;  %v10623_v31 = vld [vmem:[#allocation43_spill] sm:$0xff] }
 0xb1e   : > { %v2621_v51 = vadd.f32 %v10610_v0, %v2468_v7  ;;  %v10621_v7 = vld [vmem:[#allocation44_spill] sm:$0xff] }
 0xb1f   : > { %v3411_v40 = vadd.f32 %v10614_v19, %v3266_v50  ;;  %v2441_v43 = vpop.permute.xlu0 %2440  ;;  %v9598_v24 = vpop.eup %6263  ;;  %v3179_v50 = vld [vmem:[#allocation5 + $0x158] sm:$0xff] }
 0xb20   : > { %2637 = vst.msk [vmem:[#allocation5 + $0xd0] sm:$0xff] %vm1097_vm2, %v2621_v51  ;;  %v2470_v62 = vmul.f32 %v2441_v43, %v2374_v49  ;;  %v3202_v15 = vpop.permute.xlu1 %3201  ;;  %v10622_v49 = vld [vmem:[#allocation47_spill] sm:$0xff]  ;;  %v10624_v43 = vld [vmem:[#allocation46_spill] sm:$0xff] }
 0xb21   : > { %3427 = vst.msk [vmem:[#allocation5 + $0x110] sm:$0xff] %vm1097_vm2, %v3411_v40  ;;  %v3267_v53 = vmul.f32 %v3202_v15, %v3171_v11  ;;  %v3181_v40 = vld [vmem:[#allocation5 + $0x168] sm:$0xff] }
 0xb22   : > { %v2623_v52 = vadd.f32 %v10615_v59, %v2470_v62 }
 0xb23   : > { %v3412_v41 = vadd.f32 %v10616_v56, %v3267_v53  ;;  %v2451_v36 = vpop.permute.xlu0 %2450 }
 0xb24   : > { %2639 = vst.msk [vmem:[#allocation5 + $0xe0] sm:$0xff] %vm1097_vm2, %v2623_v52  ;;  %v2472_v55 = vmul.f32 %v2451_v36, %v2376_v44  ;;  %v3212_v37 = vpop.permute.xlu1 %3211  ;;  %v3178_v52 = vld [vmem:[#allocation5 + $0x150] sm:$0xff]  ;;  %v10626_v36 = vld [vmem:[#allocation48_spill] sm:$0xff] }
 0xb25   : > { %3428 = vst.msk [vmem:[#allocation5 + $0x118] sm:$0xff] %vm1097_vm2, %v3412_v41  ;;  %v3269_v45 = vmul.f32 %v3212_v37, %v3173_v5  ;;  %4059 = vperm.xlu1 %5985, %v9598_v24   ;;  %v10625_v5 = vld [vmem:[#allocation45_spill] sm:$0xff]  ;;  %v3183_v41 = vld [vmem:[#allocation5 + $0x178] sm:$0xff] }
 0xb26   : > { %v2625_v22 = vadd.f32 %v10617_v57, %v2472_v55 }
 0xb27   : > { %v3414_v32 = vadd.f32 %v10618_v46, %v3269_v45  ;;  %v3192_v12 = vpop.permute.xlu0 %3191  ;;  %v9610_v21 = vpop.eup %6265 }
 0xb28   : > { %2641 = vst.msk [vmem:[#allocation5 + $0xf0] sm:$0xff] %vm1097_vm2, %v2625_v22  ;;  %v3265_v10 = vmul.f32 %v3192_v12, %v3169_v20  ;;  %v3222_v33 = vpop.permute.xlu1 %3221  ;;  %v3180_v22 = vld [vmem:[#allocation5 + $0x160] sm:$0xff] }
 0xb29   : > { %3430 = vst.msk [vmem:[#allocation5 + $0x128] sm:$0xff] %vm1097_vm2, %v3414_v32  ;;  %v3271_v63 = vmul.f32 %v3222_v33, %v3175_v8  ;;  %v10627_v8 = vld [vmem:[#allocation53_spill] sm:$0xff]  ;;  %v10628_v32 = vld [vmem:[#allocation132_spill] sm:$0xff] }
 0xb2a   : > { %v3410_v13 = vadd.f32 %v10619_v39, %v3265_v10 }
 0xb2b   : > { %v3416_v42 = vadd.f32 %v10620_v47, %v3271_v63  ;;  %v3207_v1 = vpop.permute.xlu0 %3206  ;;  %v3182_v63 = vld [vmem:[#allocation5 + $0x170] sm:$0xff] }
 0xb2c   : > { %3426 = vst.msk [vmem:[#allocation5 + $0x108] sm:$0xff] %vm1097_vm2, %v3410_v13  ;;  %v3268_v38 = vmul.f32 %v3207_v1, %v3172_v17  ;;  %v3232_v18 = vpop.permute.xlu1 %3231  ;;  %v10629_v17 = vld [vmem:[#allocation130_spill] sm:$0xff]  ;;  %v10630_v47 = vld [vmem:[#allocation49_spill] sm:$0xff] }
 0xb2d   : > { %3432 = vst.msk [vmem:[#allocation5 + $0x138] sm:$0xff] %vm1097_vm2, %v3416_v42  ;;  %v3273_v54 = vmul.f32 %v3232_v18, %v3177_v23 }
 0xb2e   : > { %v3413_v14 = vadd.f32 %v10621_v7, %v3268_v38  ;;  %4054 = vperm.xlu0 %5986, %v9610_v21  }
 0xb2f   : > { %v3418_v0 = vadd.f32 %v10622_v49, %v3273_v54  ;;  %v3217_v51 = vpop.permute.xlu0 %3216 }
 0xb30   : > { %3429 = vst.msk [vmem:[#allocation5 + $0x120] sm:$0xff] %vm1097_vm2, %v3413_v14  ;;  %v3270_v11 = vmul.f32 %v3217_v51, %v3174_v61  ;;  %v3242_v25 = vpop.permute.xlu1 %3241 }
 0xb31   : > { %3434 = vst.msk [vmem:[#allocation5 + $0x148] sm:$0xff] %vm1097_vm2, %v3418_v0  ;;  %v3275_v28 = vmul.f32 %v3242_v25, %v3179_v50 }
 0xb32   : > { %v3415_v19 = vadd.f32 %v10623_v31, %v3270_v11 }
 0xb33   : > { %v3420_v62 = vadd.f32 %v10624_v43, %v3275_v28  ;;  %v3227_v15 = vpop.permute.xlu0 %3226  ;;  %v3871_v28 = vld [vmem:[#allocation4 + $0x190] sm:$0xff]  ;;  %v3870_v43 = vld [vmem:[#allocation4 + $0x188] sm:$0xff] }
 0xb34   : > { %3431 = vst.msk [vmem:[#allocation5 + $0x130] sm:$0xff] %vm1097_vm2, %v3415_v19  ;;  %v3272_v53 = vmul.f32 %v3227_v15, %v3176_v27  ;;  %v3252_v44 = vpop.permute.xlu1 %3251  ;;  %v3887_v27 = vmul.f32 %v9434_v2, %v3871_v28 }
 0xb35   : > { %3436 = vst.msk [vmem:[#allocation5 + $0x158] sm:$0xff] %vm1097_vm2, %v3420_v62  ;;  %v3277_v59 = vmul.f32 %v3252_v44, %v3181_v40  ;;  %v3869_v40 = vld [vmem:[#allocation4 + $0x180] sm:$0xff] }
 0xb36   : > { %v3417_v56 = vadd.f32 %v10625_v5, %v3272_v53  ;;  %v3885_v15 = vmul.f32 %v9414_v16, %v3869_v40  ;;  %v3886_v53 = vmul.f32 %v9457_v3, %v3870_v43  ;;  %v3875_v5 = vld [vmem:[#allocation4 + $0x1b0] sm:$0xff]  ;;  %v3873_v16 = vld [vmem:[#allocation4 + $0x1a0] sm:$0xff] }
 0xb37   : > { %v3422_v55 = vadd.f32 %v10626_v36, %v3277_v59  ;;  %v3237_v37 = vpop.permute.xlu0 %3236  ;;  %v3891_v36 = vmul.f32 %v9494_v35, %v3875_v5 }
 0xb38   : > { %3433 = vst.msk [vmem:[#allocation5 + $0x140] sm:$0xff] %vm1097_vm2, %v3417_v56  ;;  %v3274_v45 = vmul.f32 %v3237_v37, %v3178_v52  ;;  %v3262_v20 = vpop.permute.xlu1 %3261  ;;  %v3872_v52 = vld [vmem:[#allocation4 + $0x198] sm:$0xff] }
 0xb39   : > { %3438 = vst.msk [vmem:[#allocation5 + $0x168] sm:$0xff] %vm1097_vm2, %v3422_v55  ;;  %v3279_v57 = vmul.f32 %v3262_v20, %v3183_v41  ;;  %v3888_v2 = vmul.f32 %v9452_v4, %v3872_v52  ;;  %v3879_v4 = vld [vmem:[#allocation4 + $0x1d0] sm:$0xff]  ;;  %v3878_v52 = vld [vmem:[#allocation4 + $0x1c8] sm:$0xff] }
 0xb3a   : > { %v3419_v46 = vadd.f32 %v10627_v8, %v3274_v45  ;;  %v3876_v45 = vld [vmem:[#allocation4 + $0x1b8] sm:$0xff] }
 0xb3b   : > { %v3424_v12 = vadd.f32 %v10628_v32, %v3279_v57  ;;  %v3247_v10 = vpop.permute.xlu0 %3246  ;;  %v3892_v57 = vmul.f32 %v9490_v26, %v3876_v45  ;;  %v3874_v32 = vld [vmem:[#allocation4 + $0x1a8] sm:$0xff] }
 0xb3c   : > { %3435 = vst.msk [vmem:[#allocation5 + $0x150] sm:$0xff] %vm1097_vm2, %v3419_v46  ;;  %v3276_v33 = vmul.f32 %v3247_v10, %v3180_v22  ;;  %v9634_v1 = vpop.permute.xlu1 %3984  ;;  %v3889_v22 = vmul.f32 %v9476_v30, %v3873_v16  ;;  %v3968_v10 = vld [vmem:[#allocation5 + $0x190] sm:$0xff]  ;;  %v3880_v30 = vld [vmem:[#allocation4 + $0x1d8] sm:$0xff] }
 0xb3d   : > { %3440 = vst.msk [vmem:[#allocation5 + $0x178] sm:$0xff] %vm1097_vm2, %v3424_v12  ;;  %v3884_v16 = vld [vmem:[#allocation4 + $0x1f8] sm:$0xff] }
 0xb3e   : > { %v3421_v39 = vadd.f32 %v10629_v17, %v3276_v33  ;;  %v3966_v33 = vld [vmem:[#allocation5 + $0x180] sm:$0xff]  ;;  %v3895_v17 = vmul.f32 %v9498_v29, %v3879_v4 }
 0xb3f   : > { %v3257_v13 = vpop.permute.xlu0 %3256 }
 0xb40   : > { %3437 = vst.msk [vmem:[#allocation5 + $0x160] sm:$0xff] %vm1097_vm2, %v3421_v39  ;;  %v3278_v23 = vmul.f32 %v3257_v13, %v3182_v63  ;;  %v3995_v38 = vpop.permute.xlu1 %3994  ;;  %v3890_v63 = vmul.f32 %v9471_v6, %v3874_v32  ;;  %v3969_v39 = vld [vmem:[#allocation5 + $0x198] sm:$0xff] }
 0xb42   : > { %v3423_v42 = vadd.f32 %v10630_v47, %v3278_v23  ;;  %v4064_v23 = vmul.f32 %v3995_v38, %v3968_v10  ;;  %v3967_v47 = vld [vmem:[#allocation5 + $0x188] sm:$0xff]  ;;  %v3900_v10 = vmul.f32 %v9598_v24, %v3884_v16  ;;  %v4259_v16 = vld [vmem:[#allocation4] sm:$0xff] (!%p5327_p0) }
 0xb44   : > { %3439 = vst.msk [vmem:[#allocation5 + $0x170] sm:$0xff] %vm1097_vm2, %v3423_v42  ;;  %v9636_v18 = vpop.permute.xlu0 %3989  ;;  %v9638_v54 = vpop.permute.xlu1 %3999 }
 0xb45   : > { %v4065_v43 = vmul.f32 %v9638_v54, %v3969_v39 }
 0xb48   : > { %v9640_v61 = vpop.permute.xlu0 %4004  ;;  %v9642_v7 = vpop.permute.xlu1 %4009 }
 0xb4c   : > { %v9644_v14 = vpop.permute.xlu0 %4014  ;;  %v9646_v50 = vpop.permute.xlu1 %4019 }
 0xb50   : > { %v9648_v49 = vpop.permute.xlu0 %4034  ;;  %v9650_v0 = vpop.permute.xlu1 %4039 }
 0xb54   : > { %v9652_v51 = vpop.permute.xlu0 %4024  ;;  %v9654_v11 = vpop.permute.xlu1 %4029 }
 0xb58   : > { %v9656_v25 = vpop.permute.xlu0 %4044  ;;  %v9659_v31 = vpop.permute.xlu1 %4049 }
 0xb85   : > { %v3906_v19 = vpop.xlane.xlu0 %3905 }
 0xb86   : > { %v3935_v62 = vadd.f32 %v3906_v19, %v3887_v27  ;;  %v3877_v27 = vld [vmem:[#allocation4 + $0x1c0] sm:$0xff]  ;;  %v4062_v19 = vmul.f32 %v9634_v1, %v3966_v33 }
 0xb88   : > { %3951 = vst.msk [vmem:[#allocation4 + $0x190] sm:$0xff] %vm1563_vm3, %v3935_v62  ;;  %v3896_v62 = vmul.f32 %v9500_v48, %v3880_v30  ;;  %v3976_v30 = vld [vmem:[#allocation5 + $0x1d0] sm:$0xff] }
 0xb89   : > { %v3902_v44 = vpop.xlane.xlu0 %3901  ;;  %v3904_v59 = vpop.xlane.xlu1 %3903 }
 0xb8a   : > { %v3933_v56 = vadd.f32 %v3902_v44, %v3885_v15  ;;  %v3934_v41 = vadd.f32 %v3904_v59, %v3886_v53  ;;  %v4063_v15 = vmul.f32 %v9636_v18, %v3967_v47  ;;  %v3893_v59 = vmul.f32 %v9508_v60, %v3877_v27  ;;  %v3973_v18 = vld [vmem:[#allocation5 + $0x1b8] sm:$0xff]  ;;  %v3975_v27 = vld [vmem:[#allocation5 + $0x1c8] sm:$0xff] }
 0xb8b   : > { %v3894_v60 = vmul.f32 %v9512_v58, %v3878_v52  ;;  %v4069_v58 = vmul.f32 %v9646_v50, %v3973_v18 }
 0xb8c   : > { %3949 = vst.msk [vmem:[#allocation4 + $0x180] sm:$0xff] %vm1563_vm3, %v3933_v56  ;;  %3950 = vst.msk [vmem:[#allocation4 + $0x188] sm:$0xff] %vm1563_vm3, %v3934_v41  ;;  %v3883_v41 = vld [vmem:[#allocation4 + $0x1f0] sm:$0xff] }
 0xb8d   : > { %v3908_v55 = vpop.xlane.xlu0 %3907  ;;  %v3914_v37 = vpop.xlane.xlu1 %3913  ;;  %v3899_v45 = vmul.f32 %v9610_v21, %v3883_v41 }
 0xb8e   : > { %v3936_v20 = vadd.f32 %v3908_v55, %v3888_v2  ;;  %v3939_v3 = vadd.f32 %v3914_v37, %v3891_v36  ;;  %v3972_v2 = vld [vmem:[#allocation5 + $0x1b0] sm:$0xff]  ;;  %v3970_v55 = vld [vmem:[#allocation5 + $0x1a0] sm:$0xff] }
 0xb90   : > { %3952 = vst.msk [vmem:[#allocation4 + $0x198] sm:$0xff] %vm1563_vm3, %v3936_v20  ;;  %3955 = vst.msk [vmem:[#allocation4 + $0x1b0] sm:$0xff] %vm1563_vm3, %v3939_v3  ;;  %v3971_v20 = vld [vmem:[#allocation5 + $0x1a8] sm:$0xff]  ;;  %v4068_v3 = vmul.f32 %v9644_v14, %v3972_v2 }
 0xb91   : > { %v3916_v8 = vpop.xlane.xlu0 %3915  ;;  %v3910_v46 = vpop.xlane.xlu1 %3909  ;;  %v4067_v21 = vmul.f32 %v9642_v7, %v3971_v20  ;;  %v3974_v7 = vld [vmem:[#allocation5 + $0x1c0] sm:$0xff]  ;;  %v4262_v20 = vld [vmem:[#allocation4 + $0x18] sm:$0xff] (!%p5327_p0) }
 0xb92   : > { %v3940_v12 = vadd.f32 %v3916_v8, %v3892_v57  ;;  %v3937_v35 = vadd.f32 %v3910_v46, %v3889_v22  ;;  %v3881_v8 = vld [vmem:[#allocation4 + $0x1e0] sm:$0xff]  ;;  %v4066_v46 = vmul.f32 %v9640_v61, %v3970_v55  ;;  %v3882_v61 = vld [vmem:[#allocation4 + $0x1e8] sm:$0xff] }
 0xb93   : > { %v3898_v47 = vmul.f32 %v9522_v34, %v3882_v61  ;;  %v4071_v34 = vmul.f32 %v9654_v11, %v3975_v27  ;;  %v4405_v27 = vld [vmem:[#allocation4 + $0x90] sm:$0xff] (!%p5327_p0) }
 0xb94   : > { %3956 = vst.msk [vmem:[#allocation4 + $0x1b8] sm:$0xff] %vm1563_vm3, %v3940_v12  ;;  %3953 = vst.msk [vmem:[#allocation4 + $0x1a0] sm:$0xff] %vm1563_vm3, %v3937_v35 }
 0xb95   : > { %v3912_v26 = vpop.xlane.xlu0 %3911  ;;  %v3922_v13 = vpop.xlane.xlu1 %3921 }
 0xb96   : > { %v3938_v42 = vadd.f32 %v3912_v26, %v3890_v63  ;;  %v3943_v28 = vadd.f32 %v3922_v13, %v3895_v17  ;;  %v3897_v17 = vmul.f32 %v9524_v9, %v3881_v8  ;;  %v3977_v9 = vld [vmem:[#allocation5 + $0x1d8] sm:$0xff] }
 0xb97   : > { %v5752_v40 = vpop.f32.mrb[80].mxu0  ;;  %v4266_v8 = vld [vmem:[#allocation4 + $0x38] sm:$0xff] (!%p5327_p0) }
 0xb98   : > { %3954 = vst.msk [vmem:[#allocation4 + $0x1a8] sm:$0xff] %vm1563_vm3, %v3938_v42  ;;  %3959 = vst.msk [vmem:[#allocation4 + $0x1d0] sm:$0xff] %vm1563_vm3, %v3943_v28  ;;  %v4209_v6 = vadd.f32 %v5752_v40, %v4064_v23  ;;  %v4144_v29 = vpop.f32.mrb[81].mxu0  ;;  %v4072_v28 = vmul.f32 %v9648_v49, %v3976_v30  ;;  %v4070_v40 = vmul.f32 %v9652_v51, %v3974_v7  ;;  %v3978_v51 = vld [vmem:[#allocation5 + $0x1e0] sm:$0xff]  ;;  %v4273_v30 = vld [vmem:[#allocation4 + $0x70] sm:$0xff] (!%p5327_p0) }
 0xb99   : > { %v4207_v38 = vadd.f32 %v4144_v29, %v4062_v19  ;;  %v5753_v53 = vpop.f32.mrb[82].mxu0  ;;  %v3924_v44 = vpop.xlane.xlu0 %3923 }
 0xb9a   : > { %4225 = vst.msk [vmem:[#allocation5 + $0x190] sm:$0xff] %vm1097_vm2, %v4209_v6  ;;  %v4210_v1 = vadd.f32 %v5753_v53, %v4065_v43  ;;  %v3944_v54 = vadd.f32 %v3924_v44, %v3896_v62  ;;  %v3918_v5 = vpop.xlane.xlu1 %3917  ;;  %v4147_v56 = vpop.f32.mrb[83].mxu0  ;;  %v4073_v6 = vmul.f32 %v9650_v0, %v3977_v9  ;;  %v3981_v0 = vld [vmem:[#allocation5 + $0x1f8] sm:$0xff] }
 0xb9b   : > { %4223 = vst.msk [vmem:[#allocation5 + $0x180] sm:$0xff] %vm1097_vm2, %v4207_v38  ;;  %v3941_v36 = vadd.f32 %v3918_v5, %v3893_v59  ;;  %v4208_v48 = vadd.f32 %v4147_v56, %v4063_v15  ;;  %v3980_v59 = vld [vmem:[#allocation5 + $0x1f0] sm:$0xff]  ;;  %v4074_v5 = vmul.f32 %v9656_v25, %v3978_v51  ;;  %v4414_v51 = vld [vmem:[#allocation4 + $0xd8] sm:$0xff] (!%p5327_p0) }
 0xb9c   : > { %4226 = vst.msk [vmem:[#allocation5 + $0x198] sm:$0xff] %vm1097_vm2, %v4210_v1  ;;  %v4261_v25 = vld [vmem:[#allocation4 + $0x10] sm:$0xff] (!%p5327_p0) }
 0xb9d   : > { %3960 = vst.msk [vmem:[#allocation4 + $0x1d8] sm:$0xff] %vm1563_vm3, %v3944_v54  ;;  %3957 = vst.msk [vmem:[#allocation4 + $0x1c0] sm:$0xff] %vm1563_vm3, %v3941_v36  ;;  %v3920_v37 = vpop.xlane.xlu0 %3919  ;;  %v3979_v54 = vld [vmem:[#allocation5 + $0x1e8] sm:$0xff]  ;;  %6269 = vrcp.f32 (!%p5327_p0), %v4261_v25 }
 0xb9e   : > { %4224 = vst.msk [vmem:[#allocation5 + $0x188] sm:$0xff] %vm1097_vm2, %v4208_v48  ;;  %v3942_v57 = vadd.f32 %v3920_v37, %v3894_v60  ;;  %v3930_v22 = vpop.xlane.xlu1 %3929  ;;  %v4075_v48 = vmul.f32 %v9659_v31, %v3979_v54  ;;  %v6682_v31 = vmov (!%p5327_p0), 0   ;;  %6271 = vrcp.f32 (!%p5327_p0), %v4259_v16  ;;  %v4416_v54 = vld [vmem:[#allocation4 + $0xe8] sm:$0xff] (!%p5327_p0)  ;;  %v4549_v16 = vld [vmem:[#allocation4 + $0x110] sm:$0xff] (!%p5327_p0) }
 0xb9f   : > { %v3947_v32 = vadd.f32 %v3930_v22, %v3899_v45  ;;  %v5756_v4 = vpop.f32.mrb[84].mxu0  ;;  %6268 = vset.pattern.permute.xlu1 (!%p5327_p0), %v6682_v31  ;;  %6267 = vset.pattern.permute.xlu0 (!%p5327_p0), %v6682_v31  ;;  %6273 = vrcp.f32 (!%p5327_p0), %v4262_v20  ;;  %v4263_v22 = vld [vmem:[#allocation4 + $0x20] sm:$0xff] (!%p5327_p0)  ;;  %v4552_v31 = vld [vmem:[#allocation4 + $0x128] sm:$0xff] (!%p5327_p0) }
 0xba0   : > { %3958 = vst.msk [vmem:[#allocation4 + $0x1c8] sm:$0xff] %vm1563_vm3, %v3942_v57  ;;  %v4213_v12 = vadd.f32 %v5756_v4, %v4068_v3  ;;  %v4160_v35 = vpop.f32.mrb[85].mxu0  ;;  %v4260_v3 = vld [vmem:[#allocation4 + $0x8] sm:$0xff] (!%p5327_p0) }
 0xba1   : > { %3963 = vst.msk [vmem:[#allocation4 + $0x1f0] sm:$0xff] %vm1563_vm3, %v3947_v32  ;;  %v4211_v14 = vadd.f32 %v4160_v35, %v4066_v46  ;;  %v5757_v33 = vpop.f32.mrb[86].mxu0  ;;  %v3932_v63 = vpop.xlane.xlu0 %3931  ;;  %6275 = vrcp.f32 (!%p5327_p0), %v4260_v3  ;;  %v4264_v57 = vld [vmem:[#allocation4 + $0x28] sm:$0xff] (!%p5327_p0)  ;;  %v4265_v46 = vld [vmem:[#allocation4 + $0x30] sm:$0xff] (!%p5327_p0)  ;;  %v4267_v35 = vld [vmem:[#allocation4 + $0x40] sm:$0xff] (!%p5327_p0) }
 0xba2   : > { %4229 = vst.msk [vmem:[#allocation5 + $0x1b0] sm:$0xff] %vm1097_vm2, %v4213_v12  ;;  %v4214_v39 = vadd.f32 %v5757_v33, %v4069_v58  ;;  %v3948_v50 = vadd.f32 %v3932_v63, %v3900_v10  ;;  %v3926_v26 = vpop.xlane.xlu1 %3925  ;;  %v4163_v13 = vpop.f32.mrb[87].mxu0  ;;  %6277 = vrcp.f32 (!%p5327_p0), %v4264_v57  ;;  %v4268_v58 = vld [vmem:[#allocation4 + $0x48] sm:$0xff] (!%p5327_p0)  ;;  %v4269_v33 = vld [vmem:[#allocation4 + $0x50] sm:$0xff] (!%p5327_p0)  ;;  %v4551_v57 = vld [vmem:[#allocation4 + $0x120] sm:$0xff] (!%p5327_p0) }
 0xba3   : > { %4227 = vst.msk [vmem:[#allocation5 + $0x1a0] sm:$0xff] %vm1097_vm2, %v4211_v14  ;;  %v3945_v24 = vadd.f32 %v3926_v26, %v3897_v17  ;;  %v4212_v23 = vadd.f32 %v4163_v13, %v4067_v21  ;;  %6279 = vrcp.f32 (!%p5327_p0), %v4263_v22  ;;  %v4270_v21 = vld [vmem:[#allocation4 + $0x58] sm:$0xff] (!%p5327_p0)  ;;  %v4272_v17 = vld [vmem:[#allocation4 + $0x68] sm:$0xff] (!%p5327_p0) }
 0xba4   : > { %4230 = vst.msk [vmem:[#allocation5 + $0x1b8] sm:$0xff] %vm1097_vm2, %v4214_v39  ;;  %6281 = vrcp.f32 (!%p5327_p0), %v4266_v8  ;;  %v4271_v39 = vld [vmem:[#allocation4 + $0x60] sm:$0xff] (!%p5327_p0)  ;;  %v4274_v26 = vld [vmem:[#allocation4 + $0x78] sm:$0xff] (!%p5327_p0) }
 0xba5   : > { %3964 = vst.msk [vmem:[#allocation4 + $0x1f8] sm:$0xff] %vm1563_vm3, %v3948_v50  ;;  %3961 = vst.msk [vmem:[#allocation4 + $0x1e0] sm:$0xff] %vm1563_vm3, %v3945_v24  ;;  %v3928_v42 = vpop.xlane.xlu0 %3927  ;;  %6283 = vrcp.f32 (!%p5327_p0), %v4265_v46  ;;  %v4554_v8 = vld [vmem:[#allocation4 + $0x138] sm:$0xff] (!%p5327_p0) }
 0xba6   : > { %4228 = vst.msk [vmem:[#allocation5 + $0x1a8] sm:$0xff] %vm1097_vm2, %v4212_v23  ;;  %v3946_v19 = vadd.f32 %v3928_v42, %v3898_v47  ;;  %v4060_v52 = vpop.permute.xlu1 %4059  ;;  %6285 = vrcp.f32 (!%p5327_p0), %v4268_v58  ;;  %v4404_v23 = vld [vmem:[#allocation4 + $0x88] sm:$0xff] (!%p5327_p0)  ;;  %v4403_v47 = vld [vmem:[#allocation4 + $0x80] sm:$0xff] (!%p5327_p0)  ;;  %v4406_v42 = vld [vmem:[#allocation4 + $0x98] sm:$0xff] (!%p5327_p0) }
 0xba7   : > { %v5760_v43 = vpop.f32.mrb[88].mxu0  ;;  %v4077_v41 = vmul.f32 %v4060_v52, %v3981_v0  ;;  %v6270_v32 = vpop.eup (!%p5327_p0), %6269  ;;  %6287 = vrcp.f32 (!%p5327_p0), %v4267_v35  ;;  %v4413_v52 = vld [vmem:[#allocation4 + $0xd0] sm:$0xff] (!%p5327_p0)  ;;  %v4556_v58 = vld [vmem:[#allocation4 + $0x148] sm:$0xff] (!%p5327_p0)  ;;  %v4555_v35 = vld [vmem:[#allocation4 + $0x140] sm:$0xff] (!%p5327_p0) }
 0xba8   : > { %3962 = vst.msk [vmem:[#allocation4 + $0x1e8] sm:$0xff] %vm1563_vm3, %v3946_v19  ;;  %v4217_v29 = vadd.f32 %v5760_v43, %v4072_v28  ;;  %v4176_v62 = vpop.f32.mrb[89].mxu0  ;;  %v6272_v4 = vpop.eup (!%p5327_p0), %6271  ;;  %4319 = vperm.xlu1 (!%p5327_p0), %6268, %v6270_v32   ;;  %6289 = vrcp.f32 (!%p5327_p0), %v4270_v21  ;;  %v4553_v32 = vld [vmem:[#allocation4 + $0x130] sm:$0xff] (!%p5327_p0)  ;;  %v4558_v21 = vld [vmem:[#allocation4 + $0x158] sm:$0xff] (!%p5327_p0) }
 0xba9   : > { %v4215_v15 = vadd.f32 %v4176_v62, %v4070_v40  ;;  %v5761_v38 = vpop.f32.mrb[90].mxu0  ;;  %v6274_v12 = vpop.eup (!%p5327_p0), %6273  ;;  %4309 = vperm.xlu0 (!%p5327_p0), %6267, %v6272_v4   ;;  %6291 = vrcp.f32 (!%p5327_p0), %v4269_v33  ;;  %v4408_v40 = vld [vmem:[#allocation4 + $0xa8] sm:$0xff] (!%p5327_p0)  ;;  %v4410_v62 = vld [vmem:[#allocation4 + $0xb8] sm:$0xff] (!%p5327_p0)  ;;  %v4557_v33 = vld [vmem:[#allocation4 + $0x150] sm:$0xff] (!%p5327_p0) }
 0xbaa   : > { %4233 = vst.msk [vmem:[#allocation5 + $0x1d0] sm:$0xff] %vm1097_vm2, %v4217_v29  ;;  %v4218_v53 = vadd.f32 %v5761_v38, %v4073_v6  ;;  %v4179_v44 = vpop.f32.mrb[91].mxu0  ;;  %6293 = vrcp.f32 (!%p5327_p0), %v4272_v17  ;;  %v4407_v6 = vld [vmem:[#allocation4 + $0xa0] sm:$0xff] (!%p5327_p0)  ;;  %v4560_v17 = vld [vmem:[#allocation4 + $0x168] sm:$0xff] (!%p5327_p0) }
 0xbab   : > { %4231 = vst.msk [vmem:[#allocation5 + $0x1c0] sm:$0xff] %vm1097_vm2, %v4215_v15  ;;  %v4216_v49 = vadd.f32 %v4179_v44, %v4071_v34  ;;  %v6276_v10 = vpop.eup (!%p5327_p0), %6275  ;;  %6295 = vrcp.f32 (!%p5327_p0), %v4271_v39  ;;  %v4409_v15 = vld [vmem:[#allocation4 + $0xb0] sm:$0xff] (!%p5327_p0)  ;;  %v4559_v39 = vld [vmem:[#allocation4 + $0x160] sm:$0xff] (!%p5327_p0) }
 0xbac   : > { %4234 = vst.msk [vmem:[#allocation5 + $0x1d8] sm:$0xff] %vm1097_vm2, %v4218_v53  ;;  %4324 = vperm.xlu1 (!%p5327_p0), %6268, %v6274_v12   ;;  %v6278_v14 = vpop.eup (!%p5327_p0), %6277  ;;  %6297 = vrcp.f32 (!%p5327_p0), %v4274_v26  ;;  %v4412_v53 = vld [vmem:[#allocation4 + $0xc8] sm:$0xff] (!%p5327_p0)  ;;  %v4562_v26 = vld [vmem:[#allocation4 + $0x178] sm:$0xff] (!%p5327_p0) }
 0xbad   : > { %4232 = vst.msk [vmem:[#allocation5 + $0x1c8] sm:$0xff] %vm1097_vm2, %v4216_v49  ;;  %v4055_v1 = vpop.permute.xlu0 %4054  ;;  %4314 = vperm.xlu0 (!%p5327_p0), %6267, %v6276_v10   ;;  %v6280_v63 = vpop.eup (!%p5327_p0), %6279  ;;  %6299 = vrcp.f32 (!%p5327_p0), %v4273_v30  ;;  %v4411_v49 = vld [vmem:[#allocation4 + $0xc0] sm:$0xff] (!%p5327_p0)  ;;  %v4561_v30 = vld [vmem:[#allocation4 + $0x170] sm:$0xff] (!%p5327_p0) }
 0xbae   : > { %v4076_v11 = vmul.f32 %v4055_v1, %v3980_v59  ;;  %v6282_v61 = vpop.eup (!%p5327_p0), %6281  ;;  %6301 = vrcp.f32 (!%p5327_p0), %v4404_v23  ;;  %v4692_v23 = vld [vmem:[#allocation4 + $0x188] sm:$0xff] (!%p5327_p0) }
 0xbaf   : > { %v5764_v56 = vpop.f32.mrb[92].mxu0  ;;  %4258 = sbr.rel (%p5327_p0) target bundleno = 3356 (0xd1c), region = 60  ;;  %v6284_v50 = vpop.eup (!%p5327_p0), %6283  ;;  %6303 = vrcp.f32 (!%p5327_p0), %v4403_v47  ;;  %v4691_v47 = vld [vmem:[#allocation4 + $0x180] sm:$0xff] (!%p5327_p0) }
 0xbb0   : > { %v4221_v2 = vadd.f32 %v5764_v56, %v4076_v11  ;;  %v4192_v36 = vpop.f32.mrb[93].mxu0  ;;  %4334 = vperm.xlu1 (!%p5327_p0), %6268, %v6278_v14   ;;  %v6286_v13 = vpop.eup (!%p5327_p0), %6285  ;;  %6305 = vrcp.f32 (!%p5327_p0), %v4406_v42  ;;  %v4694_v42 = vld [vmem:[#allocation4 + $0x198] sm:$0xff] (!%p5327_p0) }
 0xbb1   : > { %v4219_v55 = vadd.f32 %v4192_v36, %v4074_v5  ;;  %v5765_v60 = vpop.f32.mrb[94].mxu0  ;;  %4329 = vperm.xlu0 (!%p5327_p0), %6267, %v6280_v63   ;;  %v6288_v24 = vpop.eup (!%p5327_p0), %6287  ;;  %6307 = vrcp.f32 (!%p5327_p0), %v4405_v27  ;;  %v4415_v5 = vld [vmem:[#allocation4 + $0xe0] sm:$0xff] (!%p5327_p0)  ;;  %v4417_v36 = vld [vmem:[#allocation4 + $0xf0] sm:$0xff] (!%p5327_p0) }
 0xbb2   : > { %4237 = vst.msk [vmem:[#allocation5 + $0x1f0] sm:$0xff] %vm1097_vm2, %v4221_v2  ;;  %v4222_v18 = vadd.f32 %v5765_v60, %v4077_v41  ;;  %v4195_v37 = vpop.f32.mrb[95].mxu0  ;;  %v6290_v7 = vpop.eup (!%p5327_p0), %6289  ;;  %6309 = vrcp.f32 (!%p5327_p0), %v4408_v40  ;;  %v4418_v41 = vld [vmem:[#allocation4 + $0xf8] sm:$0xff] (!%p5327_p0)  ;;  %v4693_v27 = vld [vmem:[#allocation4 + $0x190] sm:$0xff] (!%p5327_p0)  ;;  %v4696_v40 = vld [vmem:[#allocation4 + $0x1a8] sm:$0xff] (!%p5327_p0) }
 0xbb3   : > { %4235 = vst.msk [vmem:[#allocation5 + $0x1e0] sm:$0xff] %vm1097_vm2, %v4219_v55  ;;  %v4220_v45 = vadd.f32 %v4195_v37, %v4075_v48  ;;  %v6292_v9 = vpop.eup (!%p5327_p0), %6291  ;;  %6311 = vrcp.f32 (!%p5327_p0), %v4407_v6  ;;  %v4548_v55 = vld [vmem:[#allocation4 + $0x108] sm:$0xff] (!%p5327_p0)  ;;  %v4695_v6 = vld [vmem:[#allocation4 + $0x1a0] sm:$0xff] (!%p5327_p0) }
 0xbb4   : > { %4238 = vst.msk [vmem:[#allocation5 + $0x1f8] sm:$0xff] %vm1097_vm2, %v4222_v18  ;;  %4344 = vperm.xlu1 (!%p5327_p0), %6268, %v6282_v61   ;;  %v6294_v28 = vpop.eup (!%p5327_p0), %6293  ;;  %6313 = vrcp.f32 (!%p5327_p0), %v4410_v62  ;;  %v4547_v18 = vld [vmem:[#allocation4 + $0x100] sm:$0xff] (!%p5327_p0)  ;;  %v4698_v62 = vld [vmem:[#allocation4 + $0x1b8] sm:$0xff] (!%p5327_p0) }
 0xbb5   : > { %4236 = vst.msk [vmem:[#allocation5 + $0x1e8] sm:$0xff] %vm1097_vm2, %v4220_v45  ;;  %4339 = vperm.xlu0 (!%p5327_p0), %6267, %v6284_v50   ;;  %v6296_v19 = vpop.eup (!%p5327_p0), %6295  ;;  %6315 = vrcp.f32 (!%p5327_p0), %v4409_v15  ;;  %v4550_v45 = vld [vmem:[#allocation4 + $0x118] sm:$0xff] (!%p5327_p0)  ;;  %v4697_v15 = vld [vmem:[#allocation4 + $0x1b0] sm:$0xff] (!%p5327_p0) }
 0xbb6   : > { %v6298_v43 = vpop.eup %6297  ;;  %6317 = vrcp.f32 %v4412_v53  ;;  %v4700_v53 = vld [vmem:[#allocation4 + $0x1c8] sm:$0xff] }
 0xbb7   : > { %v6300_v29 = vpop.eup %6299  ;;  %6319 = vrcp.f32 %v4411_v49  ;;  %v4699_v49 = vld [vmem:[#allocation4 + $0x1c0] sm:$0xff] }
 0xbb8   : > { %4354 = vperm.xlu1 %6268, %v6286_v13   ;;  %v6302_v34 = vpop.eup %6301  ;;  %6321 = vrcp.f32 %v4414_v51  ;;  %v4702_v51 = vld [vmem:[#allocation4 + $0x1d8] sm:$0xff] }
 0xbb9   : > { %4349 = vperm.xlu0 %6267, %v6288_v24   ;;  %v6304_v38 = vpop.eup %6303  ;;  %6323 = vrcp.f32 %v4413_v52  ;;  %v4701_v52 = vld [vmem:[#allocation4 + $0x1d0] sm:$0xff] }
 0xbba   : > { %v6306_v44 = vpop.eup %6305  ;;  %6325 = vrcp.f32 %v4416_v54  ;;  %v4704_v54 = vld [vmem:[#allocation4 + $0x1e8] sm:$0xff] }
 0xbbb   : > { %v6308_v59 = vpop.eup %6307  ;;  %6327 = vrcp.f32 %v4415_v5  ;;  %v4703_v5 = vld [vmem:[#allocation4 + $0x1e0] sm:$0xff] }
 0xbbc   : > { %4364 = vperm.xlu1 %6268, %v6290_v7   ;;  %v6310_v0 = vpop.eup %6309  ;;  %6329 = vrcp.f32 %v4418_v41  ;;  %v4706_v41 = vld [vmem:[#allocation4 + $0x1f8] sm:$0xff] }
 0xbbd   : > { %4359 = vperm.xlu0 %6267, %v6292_v9   ;;  %v6312_v1 = vpop.eup %6311  ;;  %6331 = vrcp.f32 %v4417_v36  ;;  %v4705_v36 = vld [vmem:[#allocation4 + $0x1f0] sm:$0xff] }
 0xbbe   : > { %v6314_v11 = vpop.eup %6313  ;;  %6333 = vrcp.f32 %v4548_v55 }
 0xbbf   : > { %v6316_v56 = vpop.eup %6315  ;;  %6335 = vrcp.f32 %v4547_v18 }
 0xbc0   : > { %4374 = vperm.xlu1 %6268, %v6294_v28   ;;  %v6318_v2 = vpop.eup %6317  ;;  %6337 = vrcp.f32 %v4550_v45 }
 0xbc1   : > { %4369 = vperm.xlu0 %6267, %v6296_v19   ;;  %v6320_v48 = vpop.eup %6319  ;;  %6339 = vrcp.f32 %v4549_v16 }
 0xbc2   : > { %v6322_v60 = vpop.eup %6321  ;;  %6341 = vrcp.f32 %v4552_v31 }
 0xbc3   : > { %v6324_v37 = vpop.eup %6323  ;;  %6343 = vrcp.f32 %v4551_v57 }
 0xbc4   : > { %4384 = vperm.xlu1 %6268, %v6298_v43   ;;  %v6326_v25 = vpop.eup %6325  ;;  %6345 = vrcp.f32 %v4554_v8 }
 0xbc5   : > { %4379 = vperm.xlu0 %6267, %v6300_v29   ;;  %v6328_v20 = vpop.eup %6327  ;;  %6347 = vrcp.f32 %v4553_v32 }
 0xbc6   : > { %v6330_v3 = vpop.eup %6329  ;;  %6349 = vrcp.f32 %v4556_v58 }
 0xbc7   : > { %v6332_v22 = vpop.eup %6331  ;;  %6351 = vrcp.f32 %v4555_v35 }
 0xbc8   : > { %4458 = vperm.xlu1 %6268, %v6302_v34   ;;  %v6334_v46 = vpop.eup %6333  ;;  %6353 = vrcp.f32 %v4558_v21 }
 0xbc9   : > { %4453 = vperm.xlu0 %6267, %v6304_v38   ;;  %v6336_v4 = vpop.eup %6335  ;;  %6355 = vrcp.f32 %v4557_v33  ;;  %v4436_v33 = vld [vmem:[#allocation5 + $0x88] sm:$0xff] }
 0xbca   : > { %v6338_v12 = vpop.eup %6337  ;;  %6357 = vrcp.f32 %v4560_v17 }
 0xbcb   : > { %v6340_v10 = vpop.eup %6339  ;;  %6359 = vrcp.f32 %v4559_v39 }
 0xbcc   : > { %4468 = vperm.xlu1 %6268, %v6306_v44   ;;  %v6342_v14 = vpop.eup %6341  ;;  %6361 = vrcp.f32 %v4562_v26  ;;  %v4438_v26 = vld [vmem:[#allocation5 + $0x98] sm:$0xff] }
 0xbcd   : > { %4463 = vperm.xlu0 %6267, %v6308_v59   ;;  %v6344_v63 = vpop.eup %6343  ;;  %6363 = vrcp.f32 %v4561_v30 }
 0xbce   : > { %v6346_v61 = vpop.eup %6345  ;;  %6365 = vrcp.f32 %v4692_v23 }
 0xbcf   : > { %v6348_v50 = vpop.eup %6347  ;;  %6367 = vrcp.f32 %v4691_v47  ;;  %v4440_v47 = vld [vmem:[#allocation5 + $0xa8] sm:$0xff] }
 0xbd0   : > { %4478 = vperm.xlu1 %6268, %v6310_v0   ;;  %v6350_v13 = vpop.eup %6349  ;;  %6369 = vrcp.f32 %v4694_v42 }
 0xbd1   : > { %4473 = vperm.xlu0 %6267, %v6312_v1   ;;  %v6352_v24 = vpop.eup %6351  ;;  %6371 = vrcp.f32 %v4693_v27 }
 0xbd2   : > { %v6354_v7 = vpop.eup %6353  ;;  %6373 = vrcp.f32 %v4696_v40  ;;  %v4442_v40 = vld [vmem:[#allocation5 + $0xb8] sm:$0xff] }
 0xbd3   : > { %v6356_v9 = vpop.eup %6355  ;;  %6375 = vrcp.f32 %v4695_v6 }
 0xbd4   : > { %4488 = vperm.xlu1 %6268, %v6314_v11   ;;  %v6358_v28 = vpop.eup %6357  ;;  %6377 = vrcp.f32 %v4698_v62 }
 0xbd5   : > { %4483 = vperm.xlu0 %6267, %v6316_v56   ;;  %v6360_v19 = vpop.eup %6359  ;;  %6379 = vrcp.f32 %v4697_v15  ;;  %v4444_v15 = vld [vmem:[#allocation5 + $0xc8] sm:$0xff] }
 0xbd6   : > { %v6362_v43 = vpop.eup %6361  ;;  %6381 = vrcp.f32 %v4700_v53 }
 0xbd7   : > { %v6364_v29 = vpop.eup %6363  ;;  %6383 = vrcp.f32 %v4699_v49 }
 0xbd8   : > { %4498 = vperm.xlu1 %6268, %v6318_v2   ;;  %v6366_v34 = vpop.eup %6365  ;;  %6385 = vrcp.f32 %v4702_v51  ;;  %v4446_v51 = vld [vmem:[#allocation5 + $0xd8] sm:$0xff] }
 0xbd9   : > { %4493 = vperm.xlu0 %6267, %v6320_v48   ;;  %v6368_v38 = vpop.eup %6367  ;;  %6387 = vrcp.f32 %v4701_v52 }
 0xbda   : > { %v6370_v44 = vpop.eup %6369  ;;  %6389 = vrcp.f32 %v4704_v54 }
 0xbdb   : > { %v6372_v59 = vpop.eup %6371  ;;  %6391 = vrcp.f32 %v4703_v5  ;;  %v4448_v5 = vld [vmem:[#allocation5 + $0xe8] sm:$0xff] }
 0xbdc   : > { %4508 = vperm.xlu1 %6268, %v6322_v60   ;;  %v6374_v0 = vpop.eup %6373  ;;  %6393 = vrcp.f32 %v4706_v41 }
 0xbdd   : > { %4503 = vperm.xlu0 %6267, %v6324_v37   ;;  %v6376_v1 = vpop.eup %6375  ;;  %6395 = vrcp.f32 %v4705_v36 }
 0xbde   : > { %v6378_v11 = vpop.eup %6377 }
 0xbdf   : > { %v6380_v56 = vpop.eup %6379 }
 0xbe0   : > { %4518 = vperm.xlu1 %6268, %v6326_v25   ;;  %v6382_v2 = vpop.eup %6381 }
 0xbe1   : > { %4513 = vperm.xlu0 %6267, %v6328_v20   ;;  %v6384_v48 = vpop.eup %6383 }
 0xbe2   : > { %v6386_v55 = vpop.eup %6385 }
 0xbe3   : > { %v6388_v60 = vpop.eup %6387 }
 0xbe4   : > { %4528 = vperm.xlu1 %6268, %v6330_v3   ;;  %v6390_v18 = vpop.eup %6389 }
 0xbe5   : > { %4523 = vperm.xlu0 %6267, %v6332_v22   ;;  %v6392_v37 = vpop.eup %6391 }
 0xbe6   : > { %v6394_v45 = vpop.eup %6393 }
 0xbe7   : > { %v6396_v25 = vpop.eup %6395 }
 0xbe8   : > { %4602 = vperm.xlu1 %6268, %v6334_v46  }
 0xbe9   : > { %4597 = vperm.xlu0 %6267, %v6336_v4  }
 0xbec   : > { %4612 = vperm.xlu1 %6268, %v6338_v12  }
 0xbed   : > { %4607 = vperm.xlu0 %6267, %v6340_v10  }
 0xbf0   : > { %4622 = vperm.xlu1 %6268, %v6342_v14  }
 0xbf1   : > { %4617 = vperm.xlu0 %6267, %v6344_v63   ;;  %v4435_v63 = vld [vmem:[#allocation5 + $0x80] sm:$0xff] }
 0xbf4   : > { %4632 = vperm.xlu1 %6268, %v6346_v61  }
 0xbf5   : > { %4627 = vperm.xlu0 %6267, %v6348_v50  }
 0xbf8   : > { %4642 = vperm.xlu1 %6268, %v6350_v13   ;;  %v4437_v13 = vld [vmem:[#allocation5 + $0x90] sm:$0xff] }
 0xbf9   : > { %4637 = vperm.xlu0 %6267, %v6352_v24  }
 0xbfc   : > { %4652 = vperm.xlu1 %6268, %v6354_v7  }
 0xbfd   : > { %4647 = vperm.xlu0 %6267, %v6356_v9   ;;  %v4439_v9 = vld [vmem:[#allocation5 + $0xa0] sm:$0xff] }
 0xc00   : > { %4662 = vperm.xlu1 %6268, %v6358_v28  }
 0xc01   : > { %4657 = vperm.xlu0 %6267, %v6360_v19  }
 0xc04   : > { %4672 = vperm.xlu1 %6268, %v6362_v43   ;;  %v4441_v43 = vld [vmem:[#allocation5 + $0xb0] sm:$0xff] }
 0xc05   : > { %4667 = vperm.xlu0 %6267, %v6364_v29  }
 0xc08   : > { %4746 = vperm.xlu1 %6268, %v6366_v34  }
 0xc09   : > { %4741 = vperm.xlu0 %6267, %v6368_v38   ;;  %v4443_v38 = vld [vmem:[#allocation5 + $0xc0] sm:$0xff] }
 0xc0c   : > { %4756 = vperm.xlu1 %6268, %v6370_v44  }
 0xc0d   : > { %4751 = vperm.xlu0 %6267, %v6372_v59  }
 0xc10   : > { %4766 = vperm.xlu1 %6268, %v6374_v0   ;;  %v4445_v0 = vld [vmem:[#allocation5 + $0xd0] sm:$0xff] }
 0xc11   : > { %4761 = vperm.xlu0 %6267, %v6376_v1  }
 0xc14   : > { %4776 = vperm.xlu1 %6268, %v6378_v11  }
 0xc15   : > { %4771 = vperm.xlu0 %6267, %v6380_v56   ;;  %v4447_v56 = vld [vmem:[#allocation5 + $0xe0] sm:$0xff] }
 0xc18   : > { %4786 = vperm.xlu1 %6268, %v6382_v2  }
 0xc19   : > { %4781 = vperm.xlu0 %6267, %v6384_v48  }
 0xc1c   : > { %4796 = vperm.xlu1 %6268, %v6386_v55   ;;  %v4450_v55 = vld [vmem:[#allocation5 + $0xf8] sm:$0xff] }
 0xc1d   : > { %4791 = vperm.xlu0 %6267, %v6388_v60   ;;  %v4449_v60 = vld [vmem:[#allocation5 + $0xf0] sm:$0xff] }
 0xc20   : > { %4806 = vperm.xlu1 %6268, %v6390_v18  }
 0xc21   : > { %4801 = vperm.xlu0 %6267, %v6392_v37  }
 0xc24   : > { %4816 = vperm.xlu1 %6268, %v6394_v45  }
 0xc25   : > { %4811 = vperm.xlu0 %6267, %v6396_v25  }
 0xc27   : > { %v9722_v16 = vpop.permute.xlu1 %4319 }
 0xc28   : > { %v9724_v20 = vpop.permute.xlu0 %4309 }
 0xc2b   : > { %v9726_v31 = vpop.permute.xlu1 %4324 }
 0xc2c   : > { %v9728_v3 = vpop.permute.xlu0 %4314 }
 0xc2f   : > { %v9730_v57 = vpop.permute.xlu1 %4334 }
 0xc30   : > { %v9732_v22 = vpop.permute.xlu0 %4329 }
 0xc33   : > { %v9734_v8 = vpop.permute.xlu1 %4344 }
 0xc34   : > { %v9736_v46 = vpop.permute.xlu0 %4339 }
 0xc37   : > { %v9738_v32 = vpop.permute.xlu1 %4354 }
 0xc38   : > { %v9740_v4 = vpop.permute.xlu0 %4349 }
 0xc3b   : > { %v9742_v58 = vpop.permute.xlu1 %4364 }
 0xc3c   : > { %v9744_v12 = vpop.permute.xlu0 %4359 }
 0xc3f   : > { %v9746_v35 = vpop.permute.xlu1 %4374 }
 0xc40   : > { %v9748_v10 = vpop.permute.xlu0 %4369 }
 0xc43   : > { %v9750_v21 = vpop.permute.xlu1 %4384 }
 0xc44   : > { %v9752_v14 = vpop.permute.xlu0 %4379 }
 0xc47   : > { %v4459_v17 = vpop.permute.xlu1 %4458 }
 0xc48   : > { %v4532_v61 = vmul.f32 %v4459_v17, %v4436_v33  ;;  %v4454_v39 = vpop.permute.xlu0 %4453  ;;  %v4580_v33 = vld [vmem:[#allocation5 + $0x108] sm:$0xff] }
 0xc49   : > { %v4531_v50 = vmul.f32 %v4454_v39, %v4435_v63  ;;  %v4579_v63 = vld [vmem:[#allocation5 + $0x100] sm:$0xff] }
 0xc4a   : > { %4853 = vrot.lane.b32.xlu1 %v4532_v61, %s6683_s9 }
 0xc4b   : > { %4851 = vrot.lane.b32.xlu0 %v4531_v50, %s6683_s9  ;;  %v4469_v30 = vpop.permute.xlu1 %4468 }
 0xc4c   : > { %v4534_v24 = vmul.f32 %v4469_v30, %v4438_v26  ;;  %v4464_v23 = vpop.permute.xlu0 %4463  ;;  %v4582_v26 = vld [vmem:[#allocation5 + $0x118] sm:$0xff] }
 0xc4d   : > { %v4533_v7 = vmul.f32 %v4464_v23, %v4437_v13  ;;  %v4581_v13 = vld [vmem:[#allocation5 + $0x110] sm:$0xff] }
 0xc4e   : > { %4857 = vrot.lane.b32.xlu1 %v4534_v24, %s6683_s9 }
 0xc4f   : > { %4855 = vrot.lane.b32.xlu0 %v4533_v7, %s6683_s9  ;;  %v4479_v42 = vpop.permute.xlu1 %4478 }
 0xc50   : > { %v4536_v28 = vmul.f32 %v4479_v42, %v4440_v47  ;;  %v4474_v27 = vpop.permute.xlu0 %4473  ;;  %v4584_v47 = vld [vmem:[#allocation5 + $0x128] sm:$0xff] }
 0xc51   : > { %v4535_v19 = vmul.f32 %v4474_v27, %v4439_v9  ;;  %v4583_v9 = vld [vmem:[#allocation5 + $0x120] sm:$0xff] }
 0xc52   : > { %4861 = vrot.lane.b32.xlu1 %v4536_v28, %s6683_s9 }
 0xc53   : > { %4859 = vrot.lane.b32.xlu0 %v4535_v19, %s6683_s9  ;;  %v4489_v6 = vpop.permute.xlu1 %4488 }
 0xc54   : > { %v4538_v29 = vmul.f32 %v4489_v6, %v4442_v40  ;;  %v4484_v62 = vpop.permute.xlu0 %4483  ;;  %v4586_v40 = vld [vmem:[#allocation5 + $0x138] sm:$0xff] }
 0xc55   : > { %v4537_v34 = vmul.f32 %v4484_v62, %v4441_v43  ;;  %v4585_v43 = vld [vmem:[#allocation5 + $0x130] sm:$0xff] }
 0xc56   : > { %4865 = vrot.lane.b32.xlu1 %v4538_v29, %s6683_s9 }
 0xc57   : > { %4863 = vrot.lane.b32.xlu0 %v4537_v34, %s6683_s9  ;;  %v4499_v53 = vpop.permute.xlu1 %4498 }
 0xc58   : > { %v4540_v44 = vmul.f32 %v4499_v53, %v4444_v15  ;;  %v4494_v49 = vpop.permute.xlu0 %4493  ;;  %v4588_v15 = vld [vmem:[#allocation5 + $0x148] sm:$0xff] }
 0xc59   : > { %v4539_v59 = vmul.f32 %v4494_v49, %v4443_v38  ;;  %v4587_v38 = vld [vmem:[#allocation5 + $0x140] sm:$0xff] }
 0xc5a   : > { %4869 = vrot.lane.b32.xlu1 %v4540_v44, %s6683_s9 }
 0xc5b   : > { %4867 = vrot.lane.b32.xlu0 %v4539_v59, %s6683_s9  ;;  %v4509_v52 = vpop.permute.xlu1 %4508 }
 0xc5c   : > { %v4542_v1 = vmul.f32 %v4509_v52, %v4446_v51  ;;  %v4504_v54 = vpop.permute.xlu0 %4503  ;;  %v4590_v51 = vld [vmem:[#allocation5 + $0x158] sm:$0xff] }
 0xc5d   : > { %v4541_v11 = vmul.f32 %v4504_v54, %v4445_v0  ;;  %v4589_v0 = vld [vmem:[#allocation5 + $0x150] sm:$0xff] }
 0xc5e   : > { %4873 = vrot.lane.b32.xlu1 %v4542_v1, %s6683_s9 }
 0xc5f   : > { %4871 = vrot.lane.b32.xlu0 %v4541_v11, %s6683_s9  ;;  %v4519_v41 = vpop.permute.xlu1 %4518 }
 0xc60   : > { %v4544_v2 = vmul.f32 %v4519_v41, %v4448_v5  ;;  %v4514_v36 = vpop.permute.xlu0 %4513  ;;  %v4592_v5 = vld [vmem:[#allocation5 + $0x168] sm:$0xff] }
 0xc61   : > { %v4543_v48 = vmul.f32 %v4514_v36, %v4447_v56  ;;  %v4591_v56 = vld [vmem:[#allocation5 + $0x160] sm:$0xff] }
 0xc62   : > { %4877 = vrot.lane.b32.xlu1 %v4544_v2, %s6683_s9 }
 0xc63   : > { %4875 = vrot.lane.b32.xlu0 %v4543_v48, %s6683_s9  ;;  %v4529_v18 = vpop.permute.xlu1 %4528 }
 0xc64   : > { %v4546_v37 = vmul.f32 %v4529_v18, %v4450_v55  ;;  %v4524_v45 = vpop.permute.xlu0 %4523  ;;  %v4594_v55 = vld [vmem:[#allocation5 + $0x178] sm:$0xff] }
 0xc65   : > { %v4545_v25 = vmul.f32 %v4524_v45, %v4449_v60  ;;  %v4593_v60 = vld [vmem:[#allocation5 + $0x170] sm:$0xff] }
 0xc66   : > { %4881 = vrot.lane.b32.xlu1 %v4546_v37, %s6683_s9 }
 0xc67   : > { %4879 = vrot.lane.b32.xlu0 %v4545_v25, %s6683_s9  ;;  %v4603_v17 = vpop.permute.xlu1 %4602 }
 0xc68   : > { %v4676_v61 = vmul.f32 %v4603_v17, %v4580_v33  ;;  %v4598_v39 = vpop.permute.xlu0 %4597  ;;  %v4724_v33 = vld [vmem:[#allocation5 + $0x188] sm:$0xff] }
 0xc69   : > { %v4675_v50 = vmul.f32 %v4598_v39, %v4579_v63  ;;  %v4723_v63 = vld [vmem:[#allocation5 + $0x180] sm:$0xff] }
 0xc6a   : > { %4917 = vrot.lane.b32.xlu1 %v4676_v61, %s6684_s23 }
 0xc6b   : > { %4915 = vrot.lane.b32.xlu0 %v4675_v50, %s6684_s23  ;;  %v4613_v30 = vpop.permute.xlu1 %4612 }
 0xc6c   : > { %v4678_v24 = vmul.f32 %v4613_v30, %v4582_v26  ;;  %v4608_v23 = vpop.permute.xlu0 %4607  ;;  %v4726_v26 = vld [vmem:[#allocation5 + $0x198] sm:$0xff] }
 0xc6d   : > { %v4677_v7 = vmul.f32 %v4608_v23, %v4581_v13  ;;  %v4725_v13 = vld [vmem:[#allocation5 + $0x190] sm:$0xff] }
 0xc6e   : > { %4921 = vrot.lane.b32.xlu1 %v4678_v24, %s6684_s23 }
 0xc6f   : > { %4919 = vrot.lane.b32.xlu0 %v4677_v7, %s6684_s23  ;;  %v4623_v42 = vpop.permute.xlu1 %4622 }
 0xc70   : > { %v4680_v28 = vmul.f32 %v4623_v42, %v4584_v47  ;;  %v4618_v27 = vpop.permute.xlu0 %4617  ;;  %v4728_v47 = vld [vmem:[#allocation5 + $0x1a8] sm:$0xff] }
 0xc71   : > { %v4679_v19 = vmul.f32 %v4618_v27, %v4583_v9  ;;  %v4727_v9 = vld [vmem:[#allocation5 + $0x1a0] sm:$0xff] }
 0xc72   : > { %4925 = vrot.lane.b32.xlu1 %v4680_v28, %s6684_s23 }
 0xc73   : > { %4923 = vrot.lane.b32.xlu0 %v4679_v19, %s6684_s23  ;;  %v4633_v6 = vpop.permute.xlu1 %4632 }
 0xc74   : > { %v4682_v29 = vmul.f32 %v4633_v6, %v4586_v40  ;;  %v4628_v62 = vpop.permute.xlu0 %4627  ;;  %v4730_v40 = vld [vmem:[#allocation5 + $0x1b8] sm:$0xff] }
 0xc75   : > { %v4681_v34 = vmul.f32 %v4628_v62, %v4585_v43  ;;  %v4729_v43 = vld [vmem:[#allocation5 + $0x1b0] sm:$0xff] }
 0xc76   : > { %4929 = vrot.lane.b32.xlu1 %v4682_v29, %s6684_s23 }
 0xc77   : > { %4927 = vrot.lane.b32.xlu0 %v4681_v34, %s6684_s23  ;;  %v4643_v53 = vpop.permute.xlu1 %4642 }
 0xc78   : > { %v4684_v44 = vmul.f32 %v4643_v53, %v4588_v15  ;;  %v4638_v49 = vpop.permute.xlu0 %4637  ;;  %v4732_v15 = vld [vmem:[#allocation5 + $0x1c8] sm:$0xff] }
 0xc79   : > { %v4683_v59 = vmul.f32 %v4638_v49, %v4587_v38  ;;  %v4731_v38 = vld [vmem:[#allocation5 + $0x1c0] sm:$0xff] }
 0xc7a   : > { %4933 = vrot.lane.b32.xlu1 %v4684_v44, %s6684_s23 }
 0xc7b   : > { %4931 = vrot.lane.b32.xlu0 %v4683_v59, %s6684_s23  ;;  %v4653_v52 = vpop.permute.xlu1 %4652 }
 0xc7c   : > { %v4686_v1 = vmul.f32 %v4653_v52, %v4590_v51  ;;  %v4648_v54 = vpop.permute.xlu0 %4647  ;;  %v4734_v51 = vld [vmem:[#allocation5 + $0x1d8] sm:$0xff] }
 0xc7d   : > { %v4685_v11 = vmul.f32 %v4648_v54, %v4589_v0  ;;  %v4733_v0 = vld [vmem:[#allocation5 + $0x1d0] sm:$0xff] }
 0xc7e   : > { %4937 = vrot.lane.b32.xlu1 %v4686_v1, %s6684_s23 }
 0xc7f   : > { %4935 = vrot.lane.b32.xlu0 %v4685_v11, %s6684_s23  ;;  %v4663_v41 = vpop.permute.xlu1 %4662 }
 0xc80   : > { %v4688_v2 = vmul.f32 %v4663_v41, %v4592_v5  ;;  %v4658_v36 = vpop.permute.xlu0 %4657  ;;  %v4736_v5 = vld [vmem:[#allocation5 + $0x1e8] sm:$0xff] }
 0xc81   : > { %v4687_v48 = vmul.f32 %v4658_v36, %v4591_v56  ;;  %v4735_v56 = vld [vmem:[#allocation5 + $0x1e0] sm:$0xff] }
 0xc82   : > { %4941 = vrot.lane.b32.xlu1 %v4688_v2, %s6684_s23 }
 0xc83   : > { %4939 = vrot.lane.b32.xlu0 %v4687_v48, %s6684_s23  ;;  %v4673_v18 = vpop.permute.xlu1 %4672 }
 0xc84   : > { %v4690_v37 = vmul.f32 %v4673_v18, %v4594_v55  ;;  %v4668_v45 = vpop.permute.xlu0 %4667  ;;  %v4738_v55 = vld [vmem:[#allocation5 + $0x1f8] sm:$0xff] }
 0xc85   : > { %v4689_v25 = vmul.f32 %v4668_v45, %v4593_v60  ;;  %v4737_v60 = vld [vmem:[#allocation5 + $0x1f0] sm:$0xff] }
 0xc86   : > { %4945 = vrot.lane.b32.xlu1 %v4690_v37, %s6684_s23 }
 0xc87   : > { %4943 = vrot.lane.b32.xlu0 %v4689_v25, %s6684_s23  ;;  %v4747_v17 = vpop.permute.xlu1 %4746 }
 0xc88   : > { %v4820_v61 = vmul.f32 %v4747_v17, %v4724_v33  ;;  %v4742_v39 = vpop.permute.xlu0 %4741 }
 0xc89   : > { %v4819_v50 = vmul.f32 %v4742_v39, %v4723_v63 }
 0xc8a   : > { %4981 = vrot.lane.b32.xlu1 %v4820_v61, %s6685_s25 }
 0xc8b   : > { %4979 = vrot.lane.b32.xlu0 %v4819_v50, %s6685_s25  ;;  %v4757_v30 = vpop.permute.xlu1 %4756 }
 0xc8c   : > { %v4822_v24 = vmul.f32 %v4757_v30, %v4726_v26  ;;  %v4752_v23 = vpop.permute.xlu0 %4751 }
 0xc8d   : > { %v4821_v7 = vmul.f32 %v4752_v23, %v4725_v13 }
 0xc8e   : > { %4985 = vrot.lane.b32.xlu1 %v4822_v24, %s6685_s25 }
 0xc8f   : > { %4983 = vrot.lane.b32.xlu0 %v4821_v7, %s6685_s25  ;;  %v4767_v42 = vpop.permute.xlu1 %4766 }
 0xc90   : > { %v4824_v28 = vmul.f32 %v4767_v42, %v4728_v47  ;;  %v4762_v27 = vpop.permute.xlu0 %4761 }
 0xc91   : > { %v4823_v19 = vmul.f32 %v4762_v27, %v4727_v9 }
 0xc92   : > { %4989 = vrot.lane.b32.xlu1 %v4824_v28, %s6685_s25 }
 0xc93   : > { %4987 = vrot.lane.b32.xlu0 %v4823_v19, %s6685_s25  ;;  %v4777_v6 = vpop.permute.xlu1 %4776 }
 0xc94   : > { %v4826_v29 = vmul.f32 %v4777_v6, %v4730_v40  ;;  %v4772_v62 = vpop.permute.xlu0 %4771 }
 0xc95   : > { %v4825_v34 = vmul.f32 %v4772_v62, %v4729_v43 }
 0xc96   : > { %4993 = vrot.lane.b32.xlu1 %v4826_v29, %s6685_s25 }
 0xc97   : > { %4991 = vrot.lane.b32.xlu0 %v4825_v34, %s6685_s25  ;;  %v4787_v53 = vpop.permute.xlu1 %4786 }
 0xc98   : > { %v4828_v44 = vmul.f32 %v4787_v53, %v4732_v15  ;;  %v4782_v49 = vpop.permute.xlu0 %4781 }
 0xc99   : > { %v4827_v59 = vmul.f32 %v4782_v49, %v4731_v38 }
 0xc9a   : > { %4997 = vrot.lane.b32.xlu1 %v4828_v44, %s6685_s25 }
 0xc9b   : > { %4995 = vrot.lane.b32.xlu0 %v4827_v59, %s6685_s25  ;;  %v4797_v52 = vpop.permute.xlu1 %4796 }
 0xc9c   : > { %v4830_v1 = vmul.f32 %v4797_v52, %v4734_v51  ;;  %v4792_v54 = vpop.permute.xlu0 %4791  ;;  %v4292_v51 = vld [vmem:[#allocation5 + $0x8] sm:$0xff] }
 0xc9d   : > { %v4829_v11 = vmul.f32 %v4792_v54, %v4733_v0  ;;  %v4291_v0 = vld [vmem:[#allocation5] sm:$0xff] }
 0xc9e   : > { %5001 = vrot.lane.b32.xlu1 %v4830_v1, %s6685_s25  ;;  %v4388_v1 = vmul.f32 %v9728_v3, %v4292_v51 }
 0xc9f   : > { %4999 = vrot.lane.b32.xlu0 %v4829_v11, %s6685_s25  ;;  %v4807_v41 = vpop.permute.xlu1 %4806  ;;  %v4387_v11 = vmul.f32 %v9724_v20, %v4291_v0 }
 0xca0   : > { %v4832_v2 = vmul.f32 %v4807_v41, %v4736_v5  ;;  %v4802_v36 = vpop.permute.xlu0 %4801  ;;  %v4294_v5 = vld [vmem:[#allocation5 + $0x18] sm:$0xff] }
 0xca1   : > { %v4831_v48 = vmul.f32 %v4802_v36, %v4735_v56  ;;  %v4293_v56 = vld [vmem:[#allocation5 + $0x10] sm:$0xff] }
 0xca2   : > { %5005 = vrot.lane.b32.xlu1 %v4832_v2, %s6685_s25  ;;  %v4389_v20 = vmul.f32 %v9722_v16, %v4293_v56 }
 0xca3   : > { %5003 = vrot.lane.b32.xlu0 %v4831_v48, %s6685_s25  ;;  %v4817_v18 = vpop.permute.xlu1 %4816 }
 0xca4   : > { %v4834_v37 = vmul.f32 %v4817_v18, %v4738_v55  ;;  %v4812_v45 = vpop.permute.xlu0 %4811  ;;  %v4390_v55 = vmul.f32 %v9726_v31, %v4294_v5  ;;  %v4297_v5 = vld [vmem:[#allocation5 + $0x30] sm:$0xff] }
 0xca5   : > { %v4833_v25 = vmul.f32 %v4812_v45, %v4737_v60 }
 0xca6   : > { %5009 = vrot.lane.b32.xlu1 %v4834_v37, %s6685_s25  ;;  %v4296_v37 = vld [vmem:[#allocation5 + $0x28] sm:$0xff] }
 0xca7   : > { %5007 = vrot.lane.b32.xlu0 %v4833_v25, %s6685_s25  ;;  %v4295_v25 = vld [vmem:[#allocation5 + $0x20] sm:$0xff] }
 0xcbc   : > { %v4854_v33 = vpop.permute.xlu1 %4853 }
 0xcbd   : > { %v4852_v63 = vpop.permute.xlu0 %4851  ;;  %v5028_v41 = vsel %vm1097_vm2, %v4388_v1, %v4854_v33  ;;  %v4391_v1 = vmul.f32 %v9732_v22, %v4295_v25 }
 0xcbe   : > { %v5027_v2 = vsel %vm1097_vm2, %v4387_v11, %v4852_v63  ;;  %v4298_v11 = vld [vmem:[#allocation5 + $0x38] sm:$0xff] }
 0xcbf   : > { %v4394_v56 = vmul.f32 %v9734_v8, %v4298_v11  ;;  %v4305_v11 = vld [vmem:[#allocation5 + $0x70] sm:$0xff] }
 0xcc0   : > { %v4858_v17 = vpop.permute.xlu1 %4857 }
 0xcc1   : > { %v4856_v61 = vpop.permute.xlu0 %4855  ;;  %v5030_v33 = vsel %vm1097_vm2, %v4390_v55, %v4858_v17  ;;  %v4299_v55 = vld [vmem:[#allocation5 + $0x40] sm:$0xff] }
 0xcc2   : > { %v5029_v63 = vsel %vm1097_vm2, %v4389_v20, %v4856_v61  ;;  %v4395_v20 = vmul.f32 %v9740_v4, %v4299_v55 }
 0xcc4   : > { %v9802_v39 = vpop.permute.xlu1 %4861 }
 0xcc5   : > { %v9804_v50 = vpop.permute.xlu0 %4859 }
 0xcc8   : > { %v9806_v26 = vpop.permute.xlu1 %4865 }
 0xcc9   : > { %v9808_v13 = vpop.permute.xlu0 %4863 }
 0xccc   : > { %v9810_v30 = vpop.permute.xlu1 %4869 }
 0xccd   : > { %v9812_v24 = vpop.permute.xlu0 %4867 }
 0xcd0   : > { %v9814_v23 = vpop.permute.xlu1 %4873 }
 0xcd1   : > { %v9816_v7 = vpop.permute.xlu0 %4871 }
 0xcd4   : > { %v9818_v47 = vpop.permute.xlu1 %4877 }
 0xcd5   : > { %v9820_v9 = vpop.permute.xlu0 %4875 }
 0xcd8   : > { %v9822_v42 = vpop.permute.xlu1 %4881 }
 0xcd9   : > { %v9824_v28 = vpop.permute.xlu0 %4879 }
 0xcdc   : > { %v4918_v27 = vpop.permute.xlu1 %4917 }
 0xcdd   : > { %v4916_v19 = vpop.permute.xlu0 %4915  ;;  %v5045_v36 = vsel %vm5043_vm4, %v5028_v41, %v4918_v27 }
 0xcde   : > { %v5044_v3 = vsel %vm5043_vm4, %v5027_v2, %v4916_v19  ;;  %v4392_v19 = vmul.f32 %v9730_v57, %v4296_v37  ;;  %v5031_v57 = vsel %vm1097_vm2, %v4391_v1, %v9804_v50  ;;  %v5034_v50 = vsel %vm1097_vm2, %v4394_v56, %v9806_v26  ;;  %v4302_v26 = vld [vmem:[#allocation5 + $0x58] sm:$0xff] }
 0xcdf   : > { %v4398_v4 = vmul.f32 %v9742_v58, %v4302_v26 }
 0xce0   : > { %v4922_v40 = vpop.permute.xlu1 %4921  ;;  %v5032_v61 = vsel %vm1097_vm2, %v4392_v19, %v9802_v39 }
 0xce1   : > { %v4920_v43 = vpop.permute.xlu0 %4919  ;;  %v5047_v31 = vsel %vm5043_vm4, %v5030_v33, %v4922_v40 }
 0xce2   : > { %v5046_v51 = vsel %vm5043_vm4, %v5029_v63, %v4920_v43 }
 0xce4   : > { %v4926_v6 = vpop.permute.xlu1 %4925 }
 0xce5   : > { %v4924_v29 = vpop.permute.xlu0 %4923  ;;  %v5049_v40 = vsel %vm5043_vm4, %v5032_v61, %v4926_v6 }
 0xce6   : > { %v5048_v22 = vsel %vm5043_vm4, %v5031_v57, %v4924_v29 }
 0xce8   : > { %v9826_v62 = vpop.permute.xlu1 %4929 }
 0xce9   : > { %v9828_v34 = vpop.permute.xlu0 %4927  ;;  %v5051_v6 = vsel %vm5043_vm4, %v5034_v50, %v9826_v62 }
 0xcec   : > { %v9830_v15 = vpop.permute.xlu1 %4933 }
 0xced   : > { %v9832_v38 = vpop.permute.xlu0 %4931 }
 0xcf0   : > { %v9834_v53 = vpop.permute.xlu1 %4937 }
 0xcf1   : > { %v9836_v44 = vpop.permute.xlu0 %4935 }
 0xcf4   : > { %v9838_v49 = vpop.permute.xlu1 %4941 }
 0xcf5   : > { %v9840_v59 = vpop.permute.xlu0 %4939 }
 0xcf8   : > { %v9842_v52 = vpop.permute.xlu1 %4945 }
 0xcf9   : > { %v9845_v54 = vpop.permute.xlu0 %4943 }
 0xcfc   : > { %v4982_v48 = vpop.permute.xlu1 %4981 }
 0xcfd   : > { %v5062_v60 = vsel %vm5060_vm5, %v5045_v36, %v4982_v48  ;;  %v4980_v18 = vpop.permute.xlu0 %4979  ;;  %v4393_v36 = vmul.f32 %v9736_v46, %v4297_v5  ;;  %v4300_v48 = vld [vmem:[#allocation5 + $0x48] sm:$0xff] }
 0xcfe   : > { %5078 = vst [vmem:[%s7044_s30 + $0x8] sm:$0xff] %v5062_v60  ;;  %v5061_v45 = vsel %vm5060_vm5, %v5044_v3, %v4980_v18  ;;  %v4396_v46 = vmul.f32 %v9738_v32, %v4300_v48  ;;  %v5035_v32 = vsel %vm1097_vm2, %v4395_v20, %v9812_v24  ;;  %v4303_v24 = vld [vmem:[#allocation5 + $0x60] sm:$0xff] }
 0xcff   : > { %5077 = vst [vmem:[%s7044_s30] sm:$0xff] %v5061_v45  ;;  %v5033_v8 = vsel %vm1097_vm2, %v4393_v36, %v9808_v13  ;;  %v4301_v13 = vld [vmem:[#allocation5 + $0x50] sm:$0xff]  ;;  %v5052_v25 = vsel %vm5043_vm4, %v5035_v32, %v9832_v38  ;;  %v4399_v1 = vmul.f32 %v9748_v10, %v4303_v24 }
 0xd00   : > { %v4986_v27 = vpop.permute.xlu1 %4985  ;;  %v5050_v3 = vsel %vm5043_vm4, %v5033_v8, %v9828_v34  ;;  %v5036_v62 = vsel %vm1097_vm2, %v4396_v46, %v9810_v30  ;;  %v4304_v30 = vld [vmem:[#allocation5 + $0x68] sm:$0xff] }
 0xd01   : > { %v5064_v16 = vsel %vm5060_vm5, %v5047_v31, %v4986_v27  ;;  %v4984_v0 = vpop.permute.xlu0 %4983  ;;  %v5053_v34 = vsel %vm5043_vm4, %v5036_v62, %v9830_v15  ;;  %v4397_v31 = vmul.f32 %v9744_v12, %v4301_v13  ;;  %v5038_v15 = vsel %vm1097_vm2, %v4398_v4, %v9814_v23  ;;  %v4306_v23 = vld [vmem:[#allocation5 + $0x78] sm:$0xff] }
 0xd02   : > { %5080 = vst [vmem:[%s7044_s30 + $0x18] sm:$0xff] %v5064_v16  ;;  %v5063_v17 = vsel %vm5060_vm5, %v5046_v51, %v4984_v0  ;;  %v5055_v38 = vsel %vm5043_vm4, %v5038_v15, %v9834_v53  ;;  %v4400_v12 = vmul.f32 %v9746_v35, %v4304_v30  ;;  %v5039_v35 = vsel %vm1097_vm2, %v4399_v1, %v9820_v9 }
 0xd03   : > { %5079 = vst [vmem:[%s7044_s30 + $0x10] sm:$0xff] %v5063_v17  ;;  %v5037_v58 = vsel %vm1097_vm2, %v4397_v31, %v9816_v7  ;;  %v4402_v10 = vmul.f32 %v9750_v21, %v4306_v23  ;;  %v5056_v5 = vsel %vm5043_vm4, %v5039_v35, %v9840_v59 }
 0xd04   : > { %v4990_v43 = vpop.permute.xlu1 %4989  ;;  %v5054_v51 = vsel %vm5043_vm4, %v5037_v58, %v9836_v44  ;;  %v5040_v53 = vsel %vm1097_vm2, %v4400_v12, %v9818_v47  ;;  %v4401_v47 = vmul.f32 %v9752_v14, %v4305_v11 }
 0xd05   : > { %v5066_v41 = vsel %vm5060_vm5, %v5049_v40, %v4990_v43  ;;  %v4988_v2 = vpop.permute.xlu0 %4987  ;;  %v5057_v44 = vsel %vm5043_vm4, %v5040_v53, %v9838_v49  ;;  %v5042_v9 = vsel %vm1097_vm2, %v4402_v10, %v9822_v42 }
 0xd06   : > { %5082 = vst [vmem:[%s7044_s30 + $0x28] sm:$0xff] %v5066_v41  ;;  %v5065_v39 = vsel %vm5060_vm5, %v5048_v22, %v4988_v2  ;;  %v5041_v49 = vsel %vm1097_vm2, %v4401_v47, %v9824_v28  ;;  %v5059_v21 = vsel %vm5043_vm4, %v5042_v9, %v9842_v52 }
 0xd07   : > { %5081 = vst [vmem:[%s7044_s30 + $0x20] sm:$0xff] %v5065_v39  ;;  %v5058_v43 = vsel %vm5043_vm4, %v5041_v49, %v9845_v54 }
 0xd08   : > { %v4994_v29 = vpop.permute.xlu1 %4993 }
 0xd09   : > { %v5068_v60 = vsel %vm5060_vm5, %v5051_v6, %v4994_v29  ;;  %v4992_v18 = vpop.permute.xlu0 %4991 }
 0xd0a   : > { %5084 = vst [vmem:[%s7044_s30 + $0x38] sm:$0xff] %v5068_v60  ;;  %v5067_v37 = vsel %vm5060_vm5, %v5050_v3, %v4992_v18 }
 0xd0b   : > { %5083 = vst [vmem:[%s7044_s30 + $0x30] sm:$0xff] %v5067_v37 }
 0xd0c   : > { %v4998_v45 = vpop.permute.xlu1 %4997 }
 0xd0d   : > { %v5070_v33 = vsel %vm5060_vm5, %v5053_v34, %v4998_v45  ;;  %v4996_v63 = vpop.permute.xlu0 %4995 }
 0xd0e   : > { %5086 = vst [vmem:[%s7044_s30 + $0x48] sm:$0xff] %v5070_v33  ;;  %v5069_v27 = vsel %vm5060_vm5, %v5052_v25, %v4996_v63 }
 0xd0f   : > { %5085 = vst [vmem:[%s7044_s30 + $0x40] sm:$0xff] %v5069_v27 }
 0xd10   : > { %v5002_v19 = vpop.permute.xlu1 %5001 }
 0xd11   : > { %v5072_v16 = vsel %vm5060_vm5, %v5055_v38, %v5002_v19  ;;  %v5000_v0 = vpop.permute.xlu0 %4999 }
 0xd12   : > { %5088 = vst [vmem:[%s7044_s30 + $0x58] sm:$0xff] %v5072_v16  ;;  %v5071_v7 = vsel %vm5060_vm5, %v5054_v51, %v5000_v0 }
 0xd13   : > { %5087 = vst [vmem:[%s7044_s30 + $0x50] sm:$0xff] %v5071_v7 }
 0xd14   : > { %v5006_v17 = vpop.permute.xlu1 %5005 }
 0xd15   : > { %v5074_v61 = vsel %vm5060_vm5, %v5057_v44, %v5006_v17  ;;  %v5004_v57 = vpop.permute.xlu0 %5003 }
 0xd16   : > { %5090 = vst [vmem:[%s7044_s30 + $0x68] sm:$0xff] %v5074_v61  ;;  %v5073_v40 = vsel %vm5060_vm5, %v5056_v5, %v5004_v57 }
 0xd17   : > { %5089 = vst [vmem:[%s7044_s30 + $0x60] sm:$0xff] %v5073_v40 }
 0xd18   : > { %v5010_v59 = vpop.permute.xlu1 %5009 }
 0xd19   : > { %v5076_v56 = vsel %vm5060_vm5, %v5059_v21, %v5010_v59  ;;  %v5008_v14 = vpop.permute.xlu0 %5007 }
 0xd1a   : > { %5092 = vst [vmem:[%s7044_s30 + $0x78] sm:$0xff] %v5076_v56  ;;  %v5075_v22 = vsel %vm5060_vm5, %v5058_v43, %v5008_v14 }
 0xd1b   : > { %5091 = vst [vmem:[%s7044_s30 + $0x70] sm:$0xff] %v5075_v22 }
 0xd1c PF: > { %s10632_s13 = sld [smem:[#allocation22_spill]]  ;;  %s10633_s7 = sld [smem:[#allocation23_spill]] }
 0xd1d   : > { %s5109_s28 = sshll.u32 %s7044_s30, 4  ;;  %s10635_s15 = sld [smem:[#allocation167_spill]]  ;;  %s9951_s28 = int_to_ptr.vmem [resolvable:$true] %s5109_s28 }
 0xd1e   : > { %s5094_s11 = scalar_lea.sflag [#allocation8], %s7018_s3  ;;  %s6513_s9 = scalar_lea.vmem %s9951_s28, 2048 }
 0xd1f   : > { %p6514_p8 = scmp.ne.s32.totalorder %s9951_s28, %s6513_s9  ;;  %s6686_s23 = smov [#allocation14]  }
 0xd20   : > { %s6517_s30 = sshll.u32 %s6686_s23, 4  ;;  %s6518_s30 = int_to_ptr.vmem [resolvable:$false] %s6517_s30 }
 0xd21   : > { %p6515_p1 = pnand %p6514_p8, %p6878_p5  ;;  %s6519_s25 = scalar_lea.vmem %s6518_s30, 4096 }
 0xd22   : > { %s5329_s29 = sshll.u32 %s10632_s13, 4  ;;  %s5330_s22 = sshll.u32 %s10633_s7, 5 }
 0xd23   : > { %s5106_s5 = sadd.s32 %s5330_s22, %s5329_s29  ;;  %s10636_s8 = smov %s10635_s15 }
 0xd24   : > { %s5331_s14 = sshll.u32 %s5106_s5, 7  ;;  %p6516_p11 = pneg %p6515_p1 }
 0xd25   : > { %s9956_s21 = scalar_lea.hbm %s10635_s15, %s5331_s14  ;;  %p6520_p7 = scmp.lt.s32.totalorder %s9951_s28, %s6518_s30 }
 0xd26   : > { %p6521_p2 = scmp.lt.s32.totalorder %s6519_s25, %s6513_s9 }
 0xd28   : > { %p6522_p13 = por %p6521_p2, %p6520_p7 }
 0xd2a   : > { %p6523_p12 = pnand %p6522_p13, %p6516_p11 }
 0xd2c   : > { %6526 = shalt.err (!%p6523_p12)
}
 0xd2d   : > { %s6527_s13 = scalar_lea.hbm %s9956_s21, 2048  ;;  %s6531_s22 = scalar_lea.hbm %s10636_s8, 8192 }
 0xd2e   : > { %p6528_p3 = scmp.ne.s32.totalorder %s9956_s21, %s6527_s13  ;;  %p6532_p10 = scmp.lt.u32.totalorder %s9956_s21, %s10636_s8 }
 0xd2f   : > { %p6533_p4 = scmp.lt.u32.totalorder %s6531_s22, %s6527_s13  ;;  %p6535_p8 = scmp.lt.u32.totalorder %s6527_s13, %s9956_s21 }
 0xd30   : > { %p6529_p9 = pnand %p6528_p3, %p6878_p5 }
 0xd31   : > { %p6534_p0 = por %p6533_p4, %p6532_p10 }
 0xd32   : > { %p6530_p6 = pneg %p6529_p9 }
 0xd33   : > { %p6536_p1 = por %p6535_p8, %p6534_p0 }
 0xd35   : > { %p6537_p11 = pnand %p6536_p1, %p6530_p6 }
 0xd37   : > { %6540 = shalt.err (!%p6537_p11)
}
 0xd38   : > { %s6687_s12 = smov 128   ;;  %s6688_s10 = smov 8  }
 0xd39   : > { %5826 = dma.vmem_to_hbm [thread:$0]  (%p6878_p5), %s9951_s28, 2048, %s9956_s21, %s5094_s11, %s6687_s12, %s6687_s12, %s6688_s10  }
 0xd3a PF: > { %s10637_s15 = sld [smem:[#allocation20_spill]]  ;;  %s10638_s9 = sld [smem:[#allocation27_spill]] }
 0xd3b   : > { %p5851_p7 = scmp.ge.s32.totalorder %s6663_s27, 2 }
 0xd40   : > { %s5124_s23 = sand.u32 1, %s10637_s15   ;;  %p10639_p2 = scmp.ne.s32.totalorder %s10638_s9, 0 }
 0xd41   : > { %s5125_s30 = scalar_lea.sflag [#allocation8], %s5124_s23 }
 0xd42   : > { %p5843_p13 = pnand %p5851_p7, %p10639_p2 }
 0xd44   : > { %6610 = dma.done.wait (!%p5843_p13), %s5125_s30, 2048  }
 0xd45   : > { %6612 = vsyncadd (!%p5843_p13), %s5125_s30, 4294965248  ;;  %s24_s27 = sadd.s32 1, %s6663_s27   ;;  %s10641_s3 = smov %s6906_s18 }
 0xd46   : > { %p9987_p12 = scmp.ge.s32.totalorder %s24_s27, 10   ;;  %s10642_s22 = sld [smem:[#allocation24_spill]] }
 0xd47   : > { %s10643_s4 = sld [smem:[#allocation28_spill]]  ;;  %s10644_s28 = sld [smem:[#allocation30_spill]] }
 0xd48   : > { %s10646_s15 = smov %s6619_s16  ;;  %s10647_s16 = smov %s6623_s17 }
 0xd49   : > { %s10648_s17 = smov %s6965_s2  ;;  %s10649_s18 = smov %s6631_s19 }
 0xd4a   : > { %s10650_s19 = smov %s6635_s20  ;;  %s10651_s20 = smov %s10641_s3 }
 0xd4b   : > { %s10652_s21 = smov %s6651_s24  ;;  %s10653_s23 = smov %s6659_s26 }
 0xd4c   : > { %s10656_s26 = smov %s10666_s6  ;;  %23 = sbr.rel (!%p9987_p12) target bundleno = 17 (0x11), region = 125 }
 0xd4d   : > { %s10654_s24 = smov %s10643_s4  ;;  %s10655_s25 = smov %s10644_s28 }
 0xd53   :  { %5130 = vsyncpa [#allocation7], 1 }
 0xd54   :  { %5132 = vsyncpa [#allocation7 + $0x1], 1 }
 0xd55   :  { %5133 = vsyncpa [#allocation10], 1 }
 0xd56   :  { %5135 = vsyncpa [#allocation10 + $0x1], 1 }
 0xd57   :  { %5136 = vsyncpa [#allocation13], 1 }
 0xd58   :  { %5137 = vsyncpa [#allocation8], 1 }
 0xd59   :  { %5139 = vsyncpa [#allocation8 + $0x1], 1 }

</bundles_post_ra>
